<compile_context>
chip_gen: v5e
topology: v5e:2x2
jax: 0.10.0
libtpu: 0.0.40
codegen_flags: <defaults>
</compile_context>

<pallas_src>
import math

import jax
import jax.numpy as jnp
from jax import lax
from jax.experimental import pallas as pl
from jax.experimental.pallas import tpu as pltpu

_LN_EPS = 1e-5
_L2_EPS = 1e-12
_SQRT_2_OVER_PI = 0.7978845608028654


def _gelu_tanh(x):
    # tanh-approx GELU: transcendental lands on the EUP slot instead of a
    # ~12-op VALU erf polynomial.  ~1e-3-level delta vs torch's exact erf GELU.
    return 0.5 * x * (1.0 + jnp.tanh(_SQRT_2_OVER_PI * (x + 0.044715 * x * x * x)))


def _layer_norm(x, gamma, beta):
    # single-pass statistics: mean and E[x^2] from the same uncentered sweep.
    mu = jnp.mean(x, axis=-1, keepdims=True)
    m2 = jnp.mean(x * x, axis=-1, keepdims=True)
    var = m2 - mu * mu
    return (x - mu) * lax.rsqrt(var + _LN_EPS) * gamma + beta


def _bf16(x):
    return x.astype(jnp.bfloat16)


def _round_up(n, m):
    return ((n + m - 1) // m) * m


def tab_transformer_encoder(x, params, *, batch_tile=512, gelu_in_bf16=True):
    """Fused encoder forward.  `gelu_in_bf16=True` is right for v6e/v7x; pass
    False on v5e (no bf16 VPU/EUP)."""
    batch, input_dim = x.shape
    num_layers = params["wv"].shape[0]
    embed_dim = params["w_in"].shape[1]
    ff_dim = params["w1"].shape[2]

    # Lane-dense activations/stores require x128 feature dims (module defaults
    # 128 / 512 satisfy this).
    # TODO(synk): support sub-128 embed/ff dims via masked LayerNorm over padded lanes.
    assert embed_dim % 128 == 0 and ff_dim % 128 == 0, "embed/ff dims must be multiples of 128"

    # --- algebraic attention fusion (seq_len == 1):
    #   (h Wv + bv) Wo + bo == h (Wv Wo) + (bv Wo + bo)
    wvo = jnp.einsum("lij,ljk->lik", params["wv"], params["wo"])
    bvo = jnp.einsum("lij,ljk->lik", params["bv"], params["wo"]) + params["bo"]

    # --- balanced batch tiling: spread `batch` over cdiv(batch, batch_tile)
    # tiles instead of padding up to the next multiple of batch_tile.
    n_tiles = -(-batch // batch_tile)
    bt = max(16, _round_up(-(-batch // n_tiles), 16))   # 16: safe sublane mult for bf16 x
    b_pad = bt * n_tiles
    if b_pad != batch:
        x = jnp.pad(x, ((0, b_pad - batch), (0, 0)))
    x = _bf16(x)  # halve the only per-batch-tile input DMA

    # bf16 weights for the MXU; biases / LN params / pos stay f32.
    ordered = [
        _bf16(params["w_in"]), params["b_in"], params["pos"],
        _bf16(wvo), bvo,
        _bf16(params["w1"]), params["b1"], _bf16(params["w2"]), params["b2"],
        params["ln1_g"], params["ln1_b"], params["ln2_g"], params["ln2_b"],
        _bf16(params["wp1"]), params["bp1"], params["lng"], params["lnb"],
        _bf16(params["wp2"]), params["bp2"],
    ]

    weight_bytes = sum(int(p.size) * p.dtype.itemsize for p in ordered)
    # TODO(synk): fall back to streaming per-layer weights over an "arbitrary"
    # grid axis when the resident set no longer fits comfortably in VMEM.
    assert weight_bytes < 20 * 1024 * 1024, "weight set too large for the resident-weight path"

    def kernel(x_ref, w_in_ref, b_in_ref, pos_ref,
               wvo_ref, bvo_ref, w1_ref, b1_ref, w2_ref, b2_ref,
               g1_ref, be1_ref, g2_ref, be2_ref,
               wp1_ref, bp1_ref, lng_ref, lnb_ref, wp2_ref, bp2_ref,
               o_ref):
        # input projection + positional encoding (f32 accumulate)
        h = jnp.dot(x_ref[...], w_in_ref[...], preferred_element_type=jnp.float32)
        h = h + b_in_ref[...] + pos_ref[...]

        # statically unrolled layers; all weight slices are VMEM-resident and
        # indexed with static offsets (zero-cost ref views).
        for l in range(num_layers):
            # self-attention block (seq_len == 1 => one fused matmul)
            sa = jnp.dot(_bf16(h), wvo_ref[l],
                         preferred_element_type=jnp.float32) + bvo_ref[l]
            h = _layer_norm(h + sa, g1_ref[l], be1_ref[l])

            # feed-forward block: linear1 -> gelu -> linear2 (dropout: eval no-op)
            ff = jnp.dot(_bf16(h), w1_ref[l],
                         preferred_element_type=jnp.float32) + b1_ref[l]
            if gelu_in_bf16:
                ff = _gelu_tanh(_bf16(ff))        # bf16 VPU/EUP (v6e/v7x)
            else:
                ff = _bf16(_gelu_tanh(ff))        # f32 path for v5e
            ff = jnp.dot(ff, w2_ref[l],
                         preferred_element_type=jnp.float32) + b2_ref[l]
            h = _layer_norm(h + ff, g2_ref[l], be2_ref[l])

        # output projection head + L2 normalize
        y = jnp.dot(_bf16(h), wp1_ref[...],
                    preferred_element_type=jnp.float32) + bp1_ref[...]
        y = _layer_norm(y, lng_ref[...], lnb_ref[...])
        y = _gelu_tanh(y)
        y = jnp.dot(_bf16(y), wp2_ref[...],
                    preferred_element_type=jnp.float32) + bp2_ref[...]
        # F.normalize(p=2, dim=1): y / max(||y||, eps) == y * rsqrt(max(||y||^2, eps^2))
        ss = jnp.sum(y * y, axis=-1, keepdims=True)
        y = y * lax.rsqrt(jnp.maximum(ss, _L2_EPS * _L2_EPS))
        o_ref[...] = y.astype(o_ref.dtype)

    def global_spec(p):
        # grid-invariant: constant block index -> DMA'd once, kept resident
        nd = p.ndim
        return pl.BlockSpec(p.shape, lambda i, _nd=nd: (0,) * _nd)

    in_specs = [pl.BlockSpec((bt, input_dim), lambda i: (i, 0))]
    in_specs += [global_spec(p) for p in ordered]

    out = pl.pallas_call(
        kernel,
        out_shape=jax.ShapeDtypeStruct((b_pad, embed_dim), jnp.float32),
        grid=(b_pad // bt,),
        in_specs=in_specs,
        out_specs=pl.BlockSpec((bt, embed_dim), lambda i: (i, 0)),
        compiler_params=pltpu.CompilerParams(
            dimension_semantics=("parallel",),
        ),
    )(x, *ordered)
    return out[:batch]


def _xavier_uniform(key, fan_in, fan_out, shape):
    bound = math.sqrt(6.0 / (fan_in + fan_out))
    return jax.random.uniform(key, shape, jnp.float32, -bound, bound)


def init_params(key, input_dim, embed_dim, num_layers, ff_dim):
    """Deterministic synthetic parameters (f32 source of truth).  Linear
    weights are stored pre-transposed as (in, out) so the kernel computes
    x @ W directly; the wrapper fuses Wv@Wo and casts matmul weights to bf16."""
    keys = iter(jax.random.split(key, 256))
    nxt = lambda: next(keys)
    small = lambda s: jax.random.uniform(nxt(), s, jnp.float32, -0.1, 0.1)
    ones = lambda s: jnp.ones(s, jnp.float32)
    zeros = lambda s: jnp.zeros(s, jnp.float32)

    p = {
        "w_in": _xavier_uniform(nxt(), input_dim, embed_dim, (input_dim, embed_dim)),
        "b_in": small((1, embed_dim)),
        "pos": jax.random.normal(nxt(), (1, embed_dim), jnp.float32),
        "wp1": _xavier_uniform(nxt(), embed_dim, embed_dim, (embed_dim, embed_dim)),
        "bp1": small((1, embed_dim)),
        "lng": ones((1, embed_dim)),
        "lnb": zeros((1, embed_dim)),
        "wp2": _xavier_uniform(nxt(), embed_dim, embed_dim, (embed_dim, embed_dim)),
        "bp2": small((1, embed_dim)),
    }

    def per_layer(make):
        return jnp.stack([make() for _ in range(num_layers)], axis=0)

    # Only the V slice of in_proj matters (seq_len == 1 -> Q/K unused), plus out_proj.
    p["wv"] = per_layer(lambda: _xavier_uniform(nxt(), embed_dim, embed_dim, (embed_dim, embed_dim)))
    p["bv"] = per_layer(lambda: small((1, embed_dim)))
    p["wo"] = per_layer(lambda: _xavier_uniform(nxt(), embed_dim, embed_dim, (embed_dim, embed_dim)))
    p["bo"] = per_layer(lambda: small((1, embed_dim)))
    p["w1"] = per_layer(lambda: _xavier_uniform(nxt(), embed_dim, ff_dim, (embed_dim, ff_dim)))
    p["b1"] = per_layer(lambda: small((1, ff_dim)))
    p["w2"] = per_layer(lambda: _xavier_uniform(nxt(), ff_dim, embed_dim, (ff_dim, embed_dim)))
    p["b2"] = per_layer(lambda: small((1, embed_dim)))
    p["ln1_g"] = per_layer(lambda: ones((1, embed_dim)))
    p["ln1_b"] = per_layer(lambda: zeros((1, embed_dim)))
    p["ln2_g"] = per_layer(lambda: ones((1, embed_dim)))
    p["ln2_b"] = per_layer(lambda: zeros((1, embed_dim)))
    return p


if __name__ == "__main__":
    # Module-default feature dims (lane-dense: 128 / 512); small batch for the
    # smoke test.  num_heads is irrelevant to the math for seq_len == 1.
    input_dim, embed_dim, num_heads, num_layers, ff_dim = 32, 128, 8, 3, 512
    batch = 64
    assert embed_dim % num_heads == 0

    key = jax.random.PRNGKey(0)
    kp, kx = jax.random.split(key)
    params = init_params(kp, input_dim, embed_dim, num_layers, ff_dim)
    x = jax.random.normal(kx, (batch, input_dim), jnp.float32)

    out = tab_transformer_encoder(x, params, batch_tile=512)
    out = jax.block_until_ready(out)

    assert out.shape == (batch, embed_dim)
    assert bool(jnp.all(jnp.isfinite(out)))
    # rows are L2-normalized
    assert bool(jnp.allclose(jnp.linalg.norm(out, axis=1), 1.0, atol=2e-3))
    print("KERNEL_OK")
</pallas_src>

<mosaic_0001>
module attributes {stable_mosaic.version = 11 : i64} {
  func.func @kernel(%arg0: i32, %arg1: memref<64x32xbf16, #tpu.memory_space<vmem>>, %arg2: memref<32x128xbf16, #tpu.memory_space<vmem>>, %arg3: memref<1x128xf32, #tpu.memory_space<vmem>>, %arg4: memref<1x128xf32, #tpu.memory_space<vmem>>, %arg5: memref<3x128x128xbf16, #tpu.memory_space<vmem>>, %arg6: memref<3x1x128xf32, #tpu.memory_space<vmem>>, %arg7: memref<3x128x512xbf16, #tpu.memory_space<vmem>>, %arg8: memref<3x1x512xf32, #tpu.memory_space<vmem>>, %arg9: memref<3x512x128xbf16, #tpu.memory_space<vmem>>, %arg10: memref<3x1x128xf32, #tpu.memory_space<vmem>>, %arg11: memref<3x1x128xf32, #tpu.memory_space<vmem>>, %arg12: memref<3x1x128xf32, #tpu.memory_space<vmem>>, %arg13: memref<3x1x128xf32, #tpu.memory_space<vmem>>, %arg14: memref<3x1x128xf32, #tpu.memory_space<vmem>>, %arg15: memref<128x128xbf16, #tpu.memory_space<vmem>>, %arg16: memref<1x128xf32, #tpu.memory_space<vmem>>, %arg17: memref<1x128xf32, #tpu.memory_space<vmem>>, %arg18: memref<1x128xf32, #tpu.memory_space<vmem>>, %arg19: memref<128x128xbf16, #tpu.memory_space<vmem>>, %arg20: memref<1x128xf32, #tpu.memory_space<vmem>>, %arg21: memref<64x128xf32, #tpu.memory_space<vmem>>) attributes {dimension_semantics = [#tpu.dimension_semantics<parallel>], iteration_bounds = array<i64: 1>, scalar_prefetch = 0 : i64, scratch_operands = 0 : i64, tpu.core_type = #tpu.core_type<tc>, window_params = [{transform_indices = @transform_0, window_bounds = array<i64: 64, 32>}, {pipeline_mode = #tpu.pipeline_mode<synchronous>, transform_indices = @transform_1, window_bounds = array<i64: 32, 128>}, {pipeline_mode = #tpu.pipeline_mode<synchronous>, transform_indices = @transform_2, window_bounds = array<i64: 1, 128>}, {pipeline_mode = #tpu.pipeline_mode<synchronous>, transform_indices = @transform_3, window_bounds = array<i64: 1, 128>}, {pipeline_mode = #tpu.pipeline_mode<synchronous>, transform_indices = @transform_4, window_bounds = array<i64: 3, 128, 128>}, {pipeline_mode = #tpu.pipeline_mode<synchronous>, transform_indices = @transform_5, window_bounds = array<i64: 3, 1, 128>}, {pipeline_mode = #tpu.pipeline_mode<synchronous>, transform_indices = @transform_6, window_bounds = array<i64: 3, 128, 512>}, {pipeline_mode = #tpu.pipeline_mode<synchronous>, transform_indices = @transform_7, window_bounds = array<i64: 3, 1, 512>}, {pipeline_mode = #tpu.pipeline_mode<synchronous>, transform_indices = @transform_8, window_bounds = array<i64: 3, 512, 128>}, {pipeline_mode = #tpu.pipeline_mode<synchronous>, transform_indices = @transform_9, window_bounds = array<i64: 3, 1, 128>}, {pipeline_mode = #tpu.pipeline_mode<synchronous>, transform_indices = @transform_10, window_bounds = array<i64: 3, 1, 128>}, {pipeline_mode = #tpu.pipeline_mode<synchronous>, transform_indices = @transform_11, window_bounds = array<i64: 3, 1, 128>}, {pipeline_mode = #tpu.pipeline_mode<synchronous>, transform_indices = @transform_12, window_bounds = array<i64: 3, 1, 128>}, {pipeline_mode = #tpu.pipeline_mode<synchronous>, transform_indices = @transform_13, window_bounds = array<i64: 3, 1, 128>}, {pipeline_mode = #tpu.pipeline_mode<synchronous>, transform_indices = @transform_14, window_bounds = array<i64: 128, 128>}, {pipeline_mode = #tpu.pipeline_mode<synchronous>, transform_indices = @transform_15, window_bounds = array<i64: 1, 128>}, {pipeline_mode = #tpu.pipeline_mode<synchronous>, transform_indices = @transform_16, window_bounds = array<i64: 1, 128>}, {pipeline_mode = #tpu.pipeline_mode<synchronous>, transform_indices = @transform_17, window_bounds = array<i64: 1, 128>}, {pipeline_mode = #tpu.pipeline_mode<synchronous>, transform_indices = @transform_18, window_bounds = array<i64: 128, 128>}, {pipeline_mode = #tpu.pipeline_mode<synchronous>, transform_indices = @transform_19, window_bounds = array<i64: 1, 128>}, {transform_indices = @transform_20, window_bounds = array<i64: 64, 128>}]} {
    %c0 = arith.constant 0 : index
    %c0_0 = arith.constant 0 : index
    %0 = vector.load %arg1[%c0, %c0_0] : memref<64x32xbf16, #tpu.memory_space<vmem>>, vector<64x32xbf16>
    %c0_1 = arith.constant 0 : index
    %c0_2 = arith.constant 0 : index
    %1 = vector.load %arg2[%c0_1, %c0_2] : memref<32x128xbf16, #tpu.memory_space<vmem>>, vector<32x128xbf16>
    %cst = arith.constant dense<0.000000e+00> : vector<64x128xf32>
    %2 = tpu.matmul %0, %1, %cst {dimension_numbers = #tpu.dot_dimension_numbers<[1], [0], [0], [1], [0, 0, 1, 1], [], []>} : vector<64x32xbf16>, vector<32x128xbf16>, vector<64x128xf32> -> vector<64x128xf32>
    %c0_3 = arith.constant 0 : index
    %c0_4 = arith.constant 0 : index
    %3 = vector.load %arg3[%c0_3, %c0_4] : memref<1x128xf32, #tpu.memory_space<vmem>>, vector<1x128xf32>
    %4 = vector.broadcast %3 : vector<1x128xf32> to vector<64x128xf32>
    %5 = arith.addf %2, %4 : vector<64x128xf32>
    %c0_5 = arith.constant 0 : index
    %c0_6 = arith.constant 0 : index
    %6 = vector.load %arg4[%c0_5, %c0_6] : memref<1x128xf32, #tpu.memory_space<vmem>>, vector<1x128xf32>
    %7 = vector.broadcast %6 : vector<1x128xf32> to vector<64x128xf32>
    %8 = arith.addf %5, %7 : vector<64x128xf32>
    %9 = arith.truncf %8 : vector<64x128xf32> to vector<64x128xbf16>
    %c0_7 = arith.constant 0 : index
    %c0_8 = arith.constant 0 : index
    %c0_9 = arith.constant 0 : index
    %10 = vector.load %arg5[%c0_7, %c0_8, %c0_9] : memref<3x128x128xbf16, #tpu.memory_space<vmem>>, vector<1x128x128xbf16>
    %11 = vector.shape_cast %10 : vector<1x128x128xbf16> to vector<128x128xbf16>
    %cst_10 = arith.constant dense<0.000000e+00> : vector<64x128xf32>
    %12 = tpu.matmul %9, %11, %cst_10 {dimension_numbers = #tpu.dot_dimension_numbers<[1], [0], [0], [1], [0, 0, 1, 1], [], []>} : vector<64x128xbf16>, vector<128x128xbf16>, vector<64x128xf32> -> vector<64x128xf32>
    %c0_11 = arith.constant 0 : index
    %c0_12 = arith.constant 0 : index
    %c0_13 = arith.constant 0 : index
    %13 = vector.load %arg6[%c0_11, %c0_12, %c0_13] : memref<3x1x128xf32, #tpu.memory_space<vmem>>, vector<1x1x128xf32>
    %14 = vector.shape_cast %13 : vector<1x1x128xf32> to vector<1x128xf32>
    %15 = vector.broadcast %14 : vector<1x128xf32> to vector<64x128xf32>
    %16 = arith.addf %12, %15 : vector<64x128xf32>
    %17 = arith.addf %8, %16 : vector<64x128xf32>
    %c0_14 = arith.constant 0 : index
    %c0_15 = arith.constant 0 : index
    %c0_16 = arith.constant 0 : index
    %18 = vector.load %arg11[%c0_14, %c0_15, %c0_16] : memref<3x1x128xf32, #tpu.memory_space<vmem>>, vector<1x1x128xf32>
    %19 = vector.shape_cast %18 : vector<1x1x128xf32> to vector<1x128xf32>
    %c0_17 = arith.constant 0 : index
    %c0_18 = arith.constant 0 : index
    %c0_19 = arith.constant 0 : index
    %20 = vector.load %arg12[%c0_17, %c0_18, %c0_19] : memref<3x1x128xf32, #tpu.memory_space<vmem>>, vector<1x1x128xf32>
    %21 = vector.shape_cast %20 : vector<1x1x128xf32> to vector<1x128xf32>
    %cst_20 = arith.constant dense<0.000000e+00> : vector<64xf32>
    %22 = vector.multi_reduction <add>, %17, %cst_20 [1] : vector<64x128xf32> to vector<64xf32>
    %23 = vector.shape_cast %22 : vector<64xf32> to vector<64x1xf32>
    %cst_21 = arith.constant 1.280000e+02 : f32
    %24 = vector.broadcast %cst_21 : f32 to vector<64x1xf32>
    %25 = arith.divf %23, %24 : vector<64x1xf32>
    %26 = arith.mulf %17, %17 : vector<64x128xf32>
    %cst_22 = arith.constant dense<0.000000e+00> : vector<64xf32>
    %27 = vector.multi_reduction <add>, %26, %cst_22 [1] : vector<64x128xf32> to vector<64xf32>
    %28 = vector.shape_cast %27 : vector<64xf32> to vector<64x1xf32>
    %cst_23 = arith.constant 1.280000e+02 : f32
    %29 = vector.broadcast %cst_23 : f32 to vector<64x1xf32>
    %30 = arith.divf %28, %29 : vector<64x1xf32>
    %31 = arith.mulf %25, %25 : vector<64x1xf32>
    %32 = arith.subf %30, %31 : vector<64x1xf32>
    %33 = vector.broadcast %25 : vector<64x1xf32> to vector<64x128xf32>
    %34 = arith.subf %17, %33 : vector<64x128xf32>
    %cst_24 = arith.constant 9.99999974E-6 : f32
    %35 = vector.broadcast %cst_24 : f32 to vector<64x1xf32>
    %36 = arith.addf %32, %35 : vector<64x1xf32>
    %37 = math.rsqrt %36 : vector<64x1xf32>
    %38 = vector.broadcast %37 : vector<64x1xf32> to vector<64x128xf32>
    %39 = arith.mulf %34, %38 : vector<64x128xf32>
    %40 = vector.broadcast %19 : vector<1x128xf32> to vector<64x128xf32>
    %41 = arith.mulf %39, %40 : vector<64x128xf32>
    %42 = vector.broadcast %21 : vector<1x128xf32> to vector<64x128xf32>
    %43 = arith.addf %41, %42 : vector<64x128xf32>
    %44 = arith.truncf %43 : vector<64x128xf32> to vector<64x128xbf16>
    %c0_25 = arith.constant 0 : index
    %c0_26 = arith.constant 0 : index
    %c0_27 = arith.constant 0 : index
    %45 = vector.load %arg7[%c0_25, %c0_26, %c0_27] : memref<3x128x512xbf16, #tpu.memory_space<vmem>>, vector<1x128x512xbf16>
    %46 = vector.shape_cast %45 : vector<1x128x512xbf16> to vector<128x512xbf16>
    %cst_28 = arith.constant dense<0.000000e+00> : vector<64x512xf32>
    %47 = tpu.matmul %44, %46, %cst_28 {dimension_numbers = #tpu.dot_dimension_numbers<[1], [0], [0], [1], [0, 0, 1, 1], [], []>} : vector<64x128xbf16>, vector<128x512xbf16>, vector<64x512xf32> -> vector<64x512xf32>
    %c0_29 = arith.constant 0 : index
    %c0_30 = arith.constant 0 : index
    %c0_31 = arith.constant 0 : index
    %48 = vector.load %arg8[%c0_29, %c0_30, %c0_31] : memref<3x1x512xf32, #tpu.memory_space<vmem>>, vector<1x1x512xf32>
    %49 = vector.shape_cast %48 : vector<1x1x512xf32> to vector<1x512xf32>
    %50 = vector.broadcast %49 : vector<1x512xf32> to vector<64x512xf32>
    %51 = arith.addf %47, %50 : vector<64x512xf32>
    %52 = arith.truncf %51 : vector<64x512xf32> to vector<64x512xbf16>
    %cst_32 = arith.constant 5.000000e-01 : bf16
    %53 = vector.broadcast %cst_32 : bf16 to vector<64x512xbf16>
    %54 = arith.mulf %53, %52 : vector<64x512xbf16>
    %cst_33 = arith.constant 4.467770e-02 : bf16
    %55 = vector.broadcast %cst_33 : bf16 to vector<64x512xbf16>
    %56 = arith.mulf %55, %52 : vector<64x512xbf16>
    %57 = arith.mulf %56, %52 : vector<64x512xbf16>
    %58 = arith.mulf %57, %52 : vector<64x512xbf16>
    %59 = arith.addf %52, %58 : vector<64x512xbf16>
    %cst_34 = arith.constant 7.968750e-01 : bf16
    %60 = vector.broadcast %cst_34 : bf16 to vector<64x512xbf16>
    %61 = arith.mulf %60, %59 : vector<64x512xbf16>
    %62 = math.tanh %61 : vector<64x512xbf16>
    %cst_35 = arith.constant 1.000000e+00 : bf16
    %63 = vector.broadcast %cst_35 : bf16 to vector<64x512xbf16>
    %64 = arith.addf %63, %62 : vector<64x512xbf16>
    %65 = arith.mulf %54, %64 : vector<64x512xbf16>
    %c0_36 = arith.constant 0 : index
    %c0_37 = arith.constant 0 : index
    %c0_38 = arith.constant 0 : index
    %66 = vector.load %arg9[%c0_36, %c0_37, %c0_38] : memref<3x512x128xbf16, #tpu.memory_space<vmem>>, vector<1x512x128xbf16>
    %67 = vector.shape_cast %66 : vector<1x512x128xbf16> to vector<512x128xbf16>
    %cst_39 = arith.constant dense<0.000000e+00> : vector<64x128xf32>
    %68 = tpu.matmul %65, %67, %cst_39 {dimension_numbers = #tpu.dot_dimension_numbers<[1], [0], [0], [1], [0, 0, 1, 1], [], []>} : vector<64x512xbf16>, vector<512x128xbf16>, vector<64x128xf32> -> vector<64x128xf32>
    %c0_40 = arith.constant 0 : index
    %c0_41 = arith.constant 0 : index
    %c0_42 = arith.constant 0 : index
    %69 = vector.load %arg10[%c0_40, %c0_41, %c0_42] : memref<3x1x128xf32, #tpu.memory_space<vmem>>, vector<1x1x128xf32>
    %70 = vector.shape_cast %69 : vector<1x1x128xf32> to vector<1x128xf32>
    %71 = vector.broadcast %70 : vector<1x128xf32> to vector<64x128xf32>
    %72 = arith.addf %68, %71 : vector<64x128xf32>
    %73 = arith.addf %43, %72 : vector<64x128xf32>
    %c0_43 = arith.constant 0 : index
    %c0_44 = arith.constant 0 : index
    %c0_45 = arith.constant 0 : index
    %74 = vector.load %arg13[%c0_43, %c0_44, %c0_45] : memref<3x1x128xf32, #tpu.memory_space<vmem>>, vector<1x1x128xf32>
    %75 = vector.shape_cast %74 : vector<1x1x128xf32> to vector<1x128xf32>
    %c0_46 = arith.constant 0 : index
    %c0_47 = arith.constant 0 : index
    %c0_48 = arith.constant 0 : index
    %76 = vector.load %arg14[%c0_46, %c0_47, %c0_48] : memref<3x1x128xf32, #tpu.memory_space<vmem>>, vector<1x1x128xf32>
    %77 = vector.shape_cast %76 : vector<1x1x128xf32> to vector<1x128xf32>
    %cst_49 = arith.constant dense<0.000000e+00> : vector<64xf32>
    %78 = vector.multi_reduction <add>, %73, %cst_49 [1] : vector<64x128xf32> to vector<64xf32>
    %79 = vector.shape_cast %78 : vector<64xf32> to vector<64x1xf32>
    %cst_50 = arith.constant 1.280000e+02 : f32
    %80 = vector.broadcast %cst_50 : f32 to vector<64x1xf32>
    %81 = arith.divf %79, %80 : vector<64x1xf32>
    %82 = arith.mulf %73, %73 : vector<64x128xf32>
    %cst_51 = arith.constant dense<0.000000e+00> : vector<64xf32>
    %83 = vector.multi_reduction <add>, %82, %cst_51 [1] : vector<64x128xf32> to vector<64xf32>
    %84 = vector.shape_cast %83 : vector<64xf32> to vector<64x1xf32>
    %cst_52 = arith.constant 1.280000e+02 : f32
    %85 = vector.broadcast %cst_52 : f32 to vector<64x1xf32>
    %86 = arith.divf %84, %85 : vector<64x1xf32>
    %87 = arith.mulf %81, %81 : vector<64x1xf32>
    %88 = arith.subf %86, %87 : vector<64x1xf32>
    %89 = vector.broadcast %81 : vector<64x1xf32> to vector<64x128xf32>
    %90 = arith.subf %73, %89 : vector<64x128xf32>
    %cst_53 = arith.constant 9.99999974E-6 : f32
    %91 = vector.broadcast %cst_53 : f32 to vector<64x1xf32>
    %92 = arith.addf %88, %91 : vector<64x1xf32>
    %93 = math.rsqrt %92 : vector<64x1xf32>
    %94 = vector.broadcast %93 : vector<64x1xf32> to vector<64x128xf32>
    %95 = arith.mulf %90, %94 : vector<64x128xf32>
    %96 = vector.broadcast %75 : vector<1x128xf32> to vector<64x128xf32>
    %97 = arith.mulf %95, %96 : vector<64x128xf32>
    %98 = vector.broadcast %77 : vector<1x128xf32> to vector<64x128xf32>
    %99 = arith.addf %97, %98 : vector<64x128xf32>
    %100 = arith.truncf %99 : vector<64x128xf32> to vector<64x128xbf16>
    %c1 = arith.constant 1 : index
    %c0_54 = arith.constant 0 : index
    %c0_55 = arith.constant 0 : index
    %101 = vector.load %arg5[%c1, %c0_54, %c0_55] : memref<3x128x128xbf16, #tpu.memory_space<vmem>>, vector<1x128x128xbf16>
    %102 = vector.shape_cast %101 : vector<1x128x128xbf16> to vector<128x128xbf16>
    %cst_56 = arith.constant dense<0.000000e+00> : vector<64x128xf32>
    %103 = tpu.matmul %100, %102, %cst_56 {dimension_numbers = #tpu.dot_dimension_numbers<[1], [0], [0], [1], [0, 0, 1, 1], [], []>} : vector<64x128xbf16>, vector<128x128xbf16>, vector<64x128xf32> -> vector<64x128xf32>
    %c1_57 = arith.constant 1 : index
    %c0_58 = arith.constant 0 : index
    %c0_59 = arith.constant 0 : index
    %104 = vector.load %arg6[%c1_57, %c0_58, %c0_59] : memref<3x1x128xf32, #tpu.memory_space<vmem>>, vector<1x1x128xf32>
    %105 = vector.shape_cast %104 : vector<1x1x128xf32> to vector<1x128xf32>
    %106 = vector.broadcast %105 : vector<1x128xf32> to vector<64x128xf32>
    %107 = arith.addf %103, %106 : vector<64x128xf32>
    %108 = arith.addf %99, %107 : vector<64x128xf32>
    %c1_60 = arith.constant 1 : index
    %c0_61 = arith.constant 0 : index
    %c0_62 = arith.constant 0 : index
    %109 = vector.load %arg11[%c1_60, %c0_61, %c0_62] : memref<3x1x128xf32, #tpu.memory_space<vmem>>, vector<1x1x128xf32>
    %110 = vector.shape_cast %109 : vector<1x1x128xf32> to vector<1x128xf32>
    %c1_63 = arith.constant 1 : index
    %c0_64 = arith.constant 0 : index
    %c0_65 = arith.constant 0 : index
    %111 = vector.load %arg12[%c1_63, %c0_64, %c0_65] : memref<3x1x128xf32, #tpu.memory_space<vmem>>, vector<1x1x128xf32>
    %112 = vector.shape_cast %111 : vector<1x1x128xf32> to vector<1x128xf32>
    %cst_66 = arith.constant dense<0.000000e+00> : vector<64xf32>
    %113 = vector.multi_reduction <add>, %108, %cst_66 [1] : vector<64x128xf32> to vector<64xf32>
    %114 = vector.shape_cast %113 : vector<64xf32> to vector<64x1xf32>
    %cst_67 = arith.constant 1.280000e+02 : f32
    %115 = vector.broadcast %cst_67 : f32 to vector<64x1xf32>
    %116 = arith.divf %114, %115 : vector<64x1xf32>
    %117 = arith.mulf %108, %108 : vector<64x128xf32>
    %cst_68 = arith.constant dense<0.000000e+00> : vector<64xf32>
    %118 = vector.multi_reduction <add>, %117, %cst_68 [1] : vector<64x128xf32> to vector<64xf32>
    %119 = vector.shape_cast %118 : vector<64xf32> to vector<64x1xf32>
    %cst_69 = arith.constant 1.280000e+02 : f32
    %120 = vector.broadcast %cst_69 : f32 to vector<64x1xf32>
    %121 = arith.divf %119, %120 : vector<64x1xf32>
    %122 = arith.mulf %116, %116 : vector<64x1xf32>
    %123 = arith.subf %121, %122 : vector<64x1xf32>
    %124 = vector.broadcast %116 : vector<64x1xf32> to vector<64x128xf32>
    %125 = arith.subf %108, %124 : vector<64x128xf32>
    %cst_70 = arith.constant 9.99999974E-6 : f32
    %126 = vector.broadcast %cst_70 : f32 to vector<64x1xf32>
    %127 = arith.addf %123, %126 : vector<64x1xf32>
    %128 = math.rsqrt %127 : vector<64x1xf32>
    %129 = vector.broadcast %128 : vector<64x1xf32> to vector<64x128xf32>
    %130 = arith.mulf %125, %129 : vector<64x128xf32>
    %131 = vector.broadcast %110 : vector<1x128xf32> to vector<64x128xf32>
    %132 = arith.mulf %130, %131 : vector<64x128xf32>
    %133 = vector.broadcast %112 : vector<1x128xf32> to vector<64x128xf32>
    %134 = arith.addf %132, %133 : vector<64x128xf32>
    %135 = arith.truncf %134 : vector<64x128xf32> to vector<64x128xbf16>
    %c1_71 = arith.constant 1 : index
    %c0_72 = arith.constant 0 : index
    %c0_73 = arith.constant 0 : index
    %136 = vector.load %arg7[%c1_71, %c0_72, %c0_73] : memref<3x128x512xbf16, #tpu.memory_space<vmem>>, vector<1x128x512xbf16>
    %137 = vector.shape_cast %136 : vector<1x128x512xbf16> to vector<128x512xbf16>
    %cst_74 = arith.constant dense<0.000000e+00> : vector<64x512xf32>
    %138 = tpu.matmul %135, %137, %cst_74 {dimension_numbers = #tpu.dot_dimension_numbers<[1], [0], [0], [1], [0, 0, 1, 1], [], []>} : vector<64x128xbf16>, vector<128x512xbf16>, vector<64x512xf32> -> vector<64x512xf32>
    %c1_75 = arith.constant 1 : index
    %c0_76 = arith.constant 0 : index
    %c0_77 = arith.constant 0 : index
    %139 = vector.load %arg8[%c1_75, %c0_76, %c0_77] : memref<3x1x512xf32, #tpu.memory_space<vmem>>, vector<1x1x512xf32>
    %140 = vector.shape_cast %139 : vector<1x1x512xf32> to vector<1x512xf32>
    %141 = vector.broadcast %140 : vector<1x512xf32> to vector<64x512xf32>
    %142 = arith.addf %138, %141 : vector<64x512xf32>
    %143 = arith.truncf %142 : vector<64x512xf32> to vector<64x512xbf16>
    %cst_78 = arith.constant 5.000000e-01 : bf16
    %144 = vector.broadcast %cst_78 : bf16 to vector<64x512xbf16>
    %145 = arith.mulf %144, %143 : vector<64x512xbf16>
    %cst_79 = arith.constant 4.467770e-02 : bf16
    %146 = vector.broadcast %cst_79 : bf16 to vector<64x512xbf16>
    %147 = arith.mulf %146, %143 : vector<64x512xbf16>
    %148 = arith.mulf %147, %143 : vector<64x512xbf16>
    %149 = arith.mulf %148, %143 : vector<64x512xbf16>
    %150 = arith.addf %143, %149 : vector<64x512xbf16>
    %cst_80 = arith.constant 7.968750e-01 : bf16
    %151 = vector.broadcast %cst_80 : bf16 to vector<64x512xbf16>
    %152 = arith.mulf %151, %150 : vector<64x512xbf16>
    %153 = math.tanh %152 : vector<64x512xbf16>
    %cst_81 = arith.constant 1.000000e+00 : bf16
    %154 = vector.broadcast %cst_81 : bf16 to vector<64x512xbf16>
    %155 = arith.addf %154, %153 : vector<64x512xbf16>
    %156 = arith.mulf %145, %155 : vector<64x512xbf16>
    %c1_82 = arith.constant 1 : index
    %c0_83 = arith.constant 0 : index
    %c0_84 = arith.constant 0 : index
    %157 = vector.load %arg9[%c1_82, %c0_83, %c0_84] : memref<3x512x128xbf16, #tpu.memory_space<vmem>>, vector<1x512x128xbf16>
    %158 = vector.shape_cast %157 : vector<1x512x128xbf16> to vector<512x128xbf16>
    %cst_85 = arith.constant dense<0.000000e+00> : vector<64x128xf32>
    %159 = tpu.matmul %156, %158, %cst_85 {dimension_numbers = #tpu.dot_dimension_numbers<[1], [0], [0], [1], [0, 0, 1, 1], [], []>} : vector<64x512xbf16>, vector<512x128xbf16>, vector<64x128xf32> -> vector<64x128xf32>
    %c1_86 = arith.constant 1 : index
    %c0_87 = arith.constant 0 : index
    %c0_88 = arith.constant 0 : index
    %160 = vector.load %arg10[%c1_86, %c0_87, %c0_88] : memref<3x1x128xf32, #tpu.memory_space<vmem>>, vector<1x1x128xf32>
    %161 = vector.shape_cast %160 : vector<1x1x128xf32> to vector<1x128xf32>
    %162 = vector.broadcast %161 : vector<1x128xf32> to vector<64x128xf32>
    %163 = arith.addf %159, %162 : vector<64x128xf32>
    %164 = arith.addf %134, %163 : vector<64x128xf32>
    %c1_89 = arith.constant 1 : index
    %c0_90 = arith.constant 0 : index
    %c0_91 = arith.constant 0 : index
    %165 = vector.load %arg13[%c1_89, %c0_90, %c0_91] : memref<3x1x128xf32, #tpu.memory_space<vmem>>, vector<1x1x128xf32>
    %166 = vector.shape_cast %165 : vector<1x1x128xf32> to vector<1x128xf32>
    %c1_92 = arith.constant 1 : index
    %c0_93 = arith.constant 0 : index
    %c0_94 = arith.constant 0 : index
    %167 = vector.load %arg14[%c1_92, %c0_93, %c0_94] : memref<3x1x128xf32, #tpu.memory_space<vmem>>, vector<1x1x128xf32>
    %168 = vector.shape_cast %167 : vector<1x1x128xf32> to vector<1x128xf32>
    %cst_95 = arith.constant dense<0.000000e+00> : vector<64xf32>
    %169 = vector.multi_reduction <add>, %164, %cst_95 [1] : vector<64x128xf32> to vector<64xf32>
    %170 = vector.shape_cast %169 : vector<64xf32> to vector<64x1xf32>
    %cst_96 = arith.constant 1.280000e+02 : f32
    %171 = vector.broadcast %cst_96 : f32 to vector<64x1xf32>
    %172 = arith.divf %170, %171 : vector<64x1xf32>
    %173 = arith.mulf %164, %164 : vector<64x128xf32>
    %cst_97 = arith.constant dense<0.000000e+00> : vector<64xf32>
    %174 = vector.multi_reduction <add>, %173, %cst_97 [1] : vector<64x128xf32> to vector<64xf32>
    %175 = vector.shape_cast %174 : vector<64xf32> to vector<64x1xf32>
    %cst_98 = arith.constant 1.280000e+02 : f32
    %176 = vector.broadcast %cst_98 : f32 to vector<64x1xf32>
    %177 = arith.divf %175, %176 : vector<64x1xf32>
    %178 = arith.mulf %172, %172 : vector<64x1xf32>
    %179 = arith.subf %177, %178 : vector<64x1xf32>
    %180 = vector.broadcast %172 : vector<64x1xf32> to vector<64x128xf32>
    %181 = arith.subf %164, %180 : vector<64x128xf32>
    %cst_99 = arith.constant 9.99999974E-6 : f32
    %182 = vector.broadcast %cst_99 : f32 to vector<64x1xf32>
    %183 = arith.addf %179, %182 : vector<64x1xf32>
    %184 = math.rsqrt %183 : vector<64x1xf32>
    %185 = vector.broadcast %184 : vector<64x1xf32> to vector<64x128xf32>
    %186 = arith.mulf %181, %185 : vector<64x128xf32>
    %187 = vector.broadcast %166 : vector<1x128xf32> to vector<64x128xf32>
    %188 = arith.mulf %186, %187 : vector<64x128xf32>
    %189 = vector.broadcast %168 : vector<1x128xf32> to vector<64x128xf32>
    %190 = arith.addf %188, %189 : vector<64x128xf32>
    %191 = arith.truncf %190 : vector<64x128xf32> to vector<64x128xbf16>
    %c2 = arith.constant 2 : index
    %c0_100 = arith.constant 0 : index
    %c0_101 = arith.constant 0 : index
    %192 = vector.load %arg5[%c2, %c0_100, %c0_101] : memref<3x128x128xbf16, #tpu.memory_space<vmem>>, vector<1x128x128xbf16>
    %193 = vector.shape_cast %192 : vector<1x128x128xbf16> to vector<128x128xbf16>
    %cst_102 = arith.constant dense<0.000000e+00> : vector<64x128xf32>
    %194 = tpu.matmul %191, %193, %cst_102 {dimension_numbers = #tpu.dot_dimension_numbers<[1], [0], [0], [1], [0, 0, 1, 1], [], []>} : vector<64x128xbf16>, vector<128x128xbf16>, vector<64x128xf32> -> vector<64x128xf32>
    %c2_103 = arith.constant 2 : index
    %c0_104 = arith.constant 0 : index
    %c0_105 = arith.constant 0 : index
    %195 = vector.load %arg6[%c2_103, %c0_104, %c0_105] : memref<3x1x128xf32, #tpu.memory_space<vmem>>, vector<1x1x128xf32>
    %196 = vector.shape_cast %195 : vector<1x1x128xf32> to vector<1x128xf32>
    %197 = vector.broadcast %196 : vector<1x128xf32> to vector<64x128xf32>
    %198 = arith.addf %194, %197 : vector<64x128xf32>
    %199 = arith.addf %190, %198 : vector<64x128xf32>
    %c2_106 = arith.constant 2 : index
    %c0_107 = arith.constant 0 : index
    %c0_108 = arith.constant 0 : index
    %200 = vector.load %arg11[%c2_106, %c0_107, %c0_108] : memref<3x1x128xf32, #tpu.memory_space<vmem>>, vector<1x1x128xf32>
    %201 = vector.shape_cast %200 : vector<1x1x128xf32> to vector<1x128xf32>
    %c2_109 = arith.constant 2 : index
    %c0_110 = arith.constant 0 : index
    %c0_111 = arith.constant 0 : index
    %202 = vector.load %arg12[%c2_109, %c0_110, %c0_111] : memref<3x1x128xf32, #tpu.memory_space<vmem>>, vector<1x1x128xf32>
    %203 = vector.shape_cast %202 : vector<1x1x128xf32> to vector<1x128xf32>
    %cst_112 = arith.constant dense<0.000000e+00> : vector<64xf32>
    %204 = vector.multi_reduction <add>, %199, %cst_112 [1] : vector<64x128xf32> to vector<64xf32>
    %205 = vector.shape_cast %204 : vector<64xf32> to vector<64x1xf32>
    %cst_113 = arith.constant 1.280000e+02 : f32
    %206 = vector.broadcast %cst_113 : f32 to vector<64x1xf32>
    %207 = arith.divf %205, %206 : vector<64x1xf32>
    %208 = arith.mulf %199, %199 : vector<64x128xf32>
    %cst_114 = arith.constant dense<0.000000e+00> : vector<64xf32>
    %209 = vector.multi_reduction <add>, %208, %cst_114 [1] : vector<64x128xf32> to vector<64xf32>
    %210 = vector.shape_cast %209 : vector<64xf32> to vector<64x1xf32>
    %cst_115 = arith.constant 1.280000e+02 : f32
    %211 = vector.broadcast %cst_115 : f32 to vector<64x1xf32>
    %212 = arith.divf %210, %211 : vector<64x1xf32>
    %213 = arith.mulf %207, %207 : vector<64x1xf32>
    %214 = arith.subf %212, %213 : vector<64x1xf32>
    %215 = vector.broadcast %207 : vector<64x1xf32> to vector<64x128xf32>
    %216 = arith.subf %199, %215 : vector<64x128xf32>
    %cst_116 = arith.constant 9.99999974E-6 : f32
    %217 = vector.broadcast %cst_116 : f32 to vector<64x1xf32>
    %218 = arith.addf %214, %217 : vector<64x1xf32>
    %219 = math.rsqrt %218 : vector<64x1xf32>
    %220 = vector.broadcast %219 : vector<64x1xf32> to vector<64x128xf32>
    %221 = arith.mulf %216, %220 : vector<64x128xf32>
    %222 = vector.broadcast %201 : vector<1x128xf32> to vector<64x128xf32>
    %223 = arith.mulf %221, %222 : vector<64x128xf32>
    %224 = vector.broadcast %203 : vector<1x128xf32> to vector<64x128xf32>
    %225 = arith.addf %223, %224 : vector<64x128xf32>
    %226 = arith.truncf %225 : vector<64x128xf32> to vector<64x128xbf16>
    %c2_117 = arith.constant 2 : index
    %c0_118 = arith.constant 0 : index
    %c0_119 = arith.constant 0 : index
    %227 = vector.load %arg7[%c2_117, %c0_118, %c0_119] : memref<3x128x512xbf16, #tpu.memory_space<vmem>>, vector<1x128x512xbf16>
    %228 = vector.shape_cast %227 : vector<1x128x512xbf16> to vector<128x512xbf16>
    %cst_120 = arith.constant dense<0.000000e+00> : vector<64x512xf32>
    %229 = tpu.matmul %226, %228, %cst_120 {dimension_numbers = #tpu.dot_dimension_numbers<[1], [0], [0], [1], [0, 0, 1, 1], [], []>} : vector<64x128xbf16>, vector<128x512xbf16>, vector<64x512xf32> -> vector<64x512xf32>
    %c2_121 = arith.constant 2 : index
    %c0_122 = arith.constant 0 : index
    %c0_123 = arith.constant 0 : index
    %230 = vector.load %arg8[%c2_121, %c0_122, %c0_123] : memref<3x1x512xf32, #tpu.memory_space<vmem>>, vector<1x1x512xf32>
    %231 = vector.shape_cast %230 : vector<1x1x512xf32> to vector<1x512xf32>
    %232 = vector.broadcast %231 : vector<1x512xf32> to vector<64x512xf32>
    %233 = arith.addf %229, %232 : vector<64x512xf32>
    %234 = arith.truncf %233 : vector<64x512xf32> to vector<64x512xbf16>
    %cst_124 = arith.constant 5.000000e-01 : bf16
    %235 = vector.broadcast %cst_124 : bf16 to vector<64x512xbf16>
    %236 = arith.mulf %235, %234 : vector<64x512xbf16>
    %cst_125 = arith.constant 4.467770e-02 : bf16
    %237 = vector.broadcast %cst_125 : bf16 to vector<64x512xbf16>
    %238 = arith.mulf %237, %234 : vector<64x512xbf16>
    %239 = arith.mulf %238, %234 : vector<64x512xbf16>
    %240 = arith.mulf %239, %234 : vector<64x512xbf16>
    %241 = arith.addf %234, %240 : vector<64x512xbf16>
    %cst_126 = arith.constant 7.968750e-01 : bf16
    %242 = vector.broadcast %cst_126 : bf16 to vector<64x512xbf16>
    %243 = arith.mulf %242, %241 : vector<64x512xbf16>
    %244 = math.tanh %243 : vector<64x512xbf16>
    %cst_127 = arith.constant 1.000000e+00 : bf16
    %245 = vector.broadcast %cst_127 : bf16 to vector<64x512xbf16>
    %246 = arith.addf %245, %244 : vector<64x512xbf16>
    %247 = arith.mulf %236, %246 : vector<64x512xbf16>
    %c2_128 = arith.constant 2 : index
    %c0_129 = arith.constant 0 : index
    %c0_130 = arith.constant 0 : index
    %248 = vector.load %arg9[%c2_128, %c0_129, %c0_130] : memref<3x512x128xbf16, #tpu.memory_space<vmem>>, vector<1x512x128xbf16>
    %249 = vector.shape_cast %248 : vector<1x512x128xbf16> to vector<512x128xbf16>
    %cst_131 = arith.constant dense<0.000000e+00> : vector<64x128xf32>
    %250 = tpu.matmul %247, %249, %cst_131 {dimension_numbers = #tpu.dot_dimension_numbers<[1], [0], [0], [1], [0, 0, 1, 1], [], []>} : vector<64x512xbf16>, vector<512x128xbf16>, vector<64x128xf32> -> vector<64x128xf32>
    %c2_132 = arith.constant 2 : index
    %c0_133 = arith.constant 0 : index
    %c0_134 = arith.constant 0 : index
    %251 = vector.load %arg10[%c2_132, %c0_133, %c0_134] : memref<3x1x128xf32, #tpu.memory_space<vmem>>, vector<1x1x128xf32>
    %252 = vector.shape_cast %251 : vector<1x1x128xf32> to vector<1x128xf32>
    %253 = vector.broadcast %252 : vector<1x128xf32> to vector<64x128xf32>
    %254 = arith.addf %250, %253 : vector<64x128xf32>
    %255 = arith.addf %225, %254 : vector<64x128xf32>
    %c2_135 = arith.constant 2 : index
    %c0_136 = arith.constant 0 : index
    %c0_137 = arith.constant 0 : index
    %256 = vector.load %arg13[%c2_135, %c0_136, %c0_137] : memref<3x1x128xf32, #tpu.memory_space<vmem>>, vector<1x1x128xf32>
    %257 = vector.shape_cast %256 : vector<1x1x128xf32> to vector<1x128xf32>
    %c2_138 = arith.constant 2 : index
    %c0_139 = arith.constant 0 : index
    %c0_140 = arith.constant 0 : index
    %258 = vector.load %arg14[%c2_138, %c0_139, %c0_140] : memref<3x1x128xf32, #tpu.memory_space<vmem>>, vector<1x1x128xf32>
    %259 = vector.shape_cast %258 : vector<1x1x128xf32> to vector<1x128xf32>
    %cst_141 = arith.constant dense<0.000000e+00> : vector<64xf32>
    %260 = vector.multi_reduction <add>, %255, %cst_141 [1] : vector<64x128xf32> to vector<64xf32>
    %261 = vector.shape_cast %260 : vector<64xf32> to vector<64x1xf32>
    %cst_142 = arith.constant 1.280000e+02 : f32
    %262 = vector.broadcast %cst_142 : f32 to vector<64x1xf32>
    %263 = arith.divf %261, %262 : vector<64x1xf32>
    %264 = arith.mulf %255, %255 : vector<64x128xf32>
    %cst_143 = arith.constant dense<0.000000e+00> : vector<64xf32>
    %265 = vector.multi_reduction <add>, %264, %cst_143 [1] : vector<64x128xf32> to vector<64xf32>
    %266 = vector.shape_cast %265 : vector<64xf32> to vector<64x1xf32>
    %cst_144 = arith.constant 1.280000e+02 : f32
    %267 = vector.broadcast %cst_144 : f32 to vector<64x1xf32>
    %268 = arith.divf %266, %267 : vector<64x1xf32>
    %269 = arith.mulf %263, %263 : vector<64x1xf32>
    %270 = arith.subf %268, %269 : vector<64x1xf32>
    %271 = vector.broadcast %263 : vector<64x1xf32> to vector<64x128xf32>
    %272 = arith.subf %255, %271 : vector<64x128xf32>
    %cst_145 = arith.constant 9.99999974E-6 : f32
    %273 = vector.broadcast %cst_145 : f32 to vector<64x1xf32>
    %274 = arith.addf %270, %273 : vector<64x1xf32>
    %275 = math.rsqrt %274 : vector<64x1xf32>
    %276 = vector.broadcast %275 : vector<64x1xf32> to vector<64x128xf32>
    %277 = arith.mulf %272, %276 : vector<64x128xf32>
    %278 = vector.broadcast %257 : vector<1x128xf32> to vector<64x128xf32>
    %279 = arith.mulf %277, %278 : vector<64x128xf32>
    %280 = vector.broadcast %259 : vector<1x128xf32> to vector<64x128xf32>
    %281 = arith.addf %279, %280 : vector<64x128xf32>
    %282 = arith.truncf %281 : vector<64x128xf32> to vector<64x128xbf16>
    %c0_146 = arith.constant 0 : index
    %c0_147 = arith.constant 0 : index
    %283 = vector.load %arg15[%c0_146, %c0_147] : memref<128x128xbf16, #tpu.memory_space<vmem>>, vector<128x128xbf16>
    %cst_148 = arith.constant dense<0.000000e+00> : vector<64x128xf32>
    %284 = tpu.matmul %282, %283, %cst_148 {dimension_numbers = #tpu.dot_dimension_numbers<[1], [0], [0], [1], [0, 0, 1, 1], [], []>} : vector<64x128xbf16>, vector<128x128xbf16>, vector<64x128xf32> -> vector<64x128xf32>
    %c0_149 = arith.constant 0 : index
    %c0_150 = arith.constant 0 : index
    %285 = vector.load %arg16[%c0_149, %c0_150] : memref<1x128xf32, #tpu.memory_space<vmem>>, vector<1x128xf32>
    %286 = vector.broadcast %285 : vector<1x128xf32> to vector<64x128xf32>
    %287 = arith.addf %284, %286 : vector<64x128xf32>
    %c0_151 = arith.constant 0 : index
    %c0_152 = arith.constant 0 : index
    %288 = vector.load %arg17[%c0_151, %c0_152] : memref<1x128xf32, #tpu.memory_space<vmem>>, vector<1x128xf32>
    %c0_153 = arith.constant 0 : index
    %c0_154 = arith.constant 0 : index
    %289 = vector.load %arg18[%c0_153, %c0_154] : memref<1x128xf32, #tpu.memory_space<vmem>>, vector<1x128xf32>
    %cst_155 = arith.constant dense<0.000000e+00> : vector<64xf32>
    %290 = vector.multi_reduction <add>, %287, %cst_155 [1] : vector<64x128xf32> to vector<64xf32>
    %291 = vector.shape_cast %290 : vector<64xf32> to vector<64x1xf32>
    %cst_156 = arith.constant 1.280000e+02 : f32
    %292 = vector.broadcast %cst_156 : f32 to vector<64x1xf32>
    %293 = arith.divf %291, %292 : vector<64x1xf32>
    %294 = arith.mulf %287, %287 : vector<64x128xf32>
    %cst_157 = arith.constant dense<0.000000e+00> : vector<64xf32>
    %295 = vector.multi_reduction <add>, %294, %cst_157 [1] : vector<64x128xf32> to vector<64xf32>
    %296 = vector.shape_cast %295 : vector<64xf32> to vector<64x1xf32>
    %cst_158 = arith.constant 1.280000e+02 : f32
    %297 = vector.broadcast %cst_158 : f32 to vector<64x1xf32>
    %298 = arith.divf %296, %297 : vector<64x1xf32>
    %299 = arith.mulf %293, %293 : vector<64x1xf32>
    %300 = arith.subf %298, %299 : vector<64x1xf32>
    %301 = vector.broadcast %293 : vector<64x1xf32> to vector<64x128xf32>
    %302 = arith.subf %287, %301 : vector<64x128xf32>
    %cst_159 = arith.constant 9.99999974E-6 : f32
    %303 = vector.broadcast %cst_159 : f32 to vector<64x1xf32>
    %304 = arith.addf %300, %303 : vector<64x1xf32>
    %305 = math.rsqrt %304 : vector<64x1xf32>
    %306 = vector.broadcast %305 : vector<64x1xf32> to vector<64x128xf32>
    %307 = arith.mulf %302, %306 : vector<64x128xf32>
    %308 = vector.broadcast %288 : vector<1x128xf32> to vector<64x128xf32>
    %309 = arith.mulf %307, %308 : vector<64x128xf32>
    %310 = vector.broadcast %289 : vector<1x128xf32> to vector<64x128xf32>
    %311 = arith.addf %309, %310 : vector<64x128xf32>
    %cst_160 = arith.constant 5.000000e-01 : f32
    %312 = vector.broadcast %cst_160 : f32 to vector<64x128xf32>
    %313 = arith.mulf %312, %311 : vector<64x128xf32>
    %cst_161 = arith.constant 4.471500e-02 : f32
    %314 = vector.broadcast %cst_161 : f32 to vector<64x128xf32>
    %315 = arith.mulf %314, %311 : vector<64x128xf32>
    %316 = arith.mulf %315, %311 : vector<64x128xf32>
    %317 = arith.mulf %316, %311 : vector<64x128xf32>
    %318 = arith.addf %311, %317 : vector<64x128xf32>
    %cst_162 = arith.constant 0.797884583 : f32
    %319 = vector.broadcast %cst_162 : f32 to vector<64x128xf32>
    %320 = arith.mulf %319, %318 : vector<64x128xf32>
    %321 = math.tanh %320 : vector<64x128xf32>
    %cst_163 = arith.constant 1.000000e+00 : f32
    %322 = vector.broadcast %cst_163 : f32 to vector<64x128xf32>
    %323 = arith.addf %322, %321 : vector<64x128xf32>
    %324 = arith.mulf %313, %323 : vector<64x128xf32>
    %325 = arith.truncf %324 : vector<64x128xf32> to vector<64x128xbf16>
    %c0_164 = arith.constant 0 : index
    %c0_165 = arith.constant 0 : index
    %326 = vector.load %arg19[%c0_164, %c0_165] : memref<128x128xbf16, #tpu.memory_space<vmem>>, vector<128x128xbf16>
    %cst_166 = arith.constant dense<0.000000e+00> : vector<64x128xf32>
    %327 = tpu.matmul %325, %326, %cst_166 {dimension_numbers = #tpu.dot_dimension_numbers<[1], [0], [0], [1], [0, 0, 1, 1], [], []>} : vector<64x128xbf16>, vector<128x128xbf16>, vector<64x128xf32> -> vector<64x128xf32>
    %c0_167 = arith.constant 0 : index
    %c0_168 = arith.constant 0 : index
    %328 = vector.load %arg20[%c0_167, %c0_168] : memref<1x128xf32, #tpu.memory_space<vmem>>, vector<1x128xf32>
    %329 = vector.broadcast %328 : vector<1x128xf32> to vector<64x128xf32>
    %330 = arith.addf %327, %329 : vector<64x128xf32>
    %331 = arith.mulf %330, %330 : vector<64x128xf32>
    %cst_169 = arith.constant dense<0.000000e+00> : vector<64xf32>
    %332 = vector.multi_reduction <add>, %331, %cst_169 [1] : vector<64x128xf32> to vector<64xf32>
    %333 = vector.shape_cast %332 : vector<64xf32> to vector<64x1xf32>
    %cst_170 = arith.constant 1.000000e-24 : f32
    %334 = vector.broadcast %cst_170 : f32 to vector<64x1xf32>
    %335 = arith.maximumf %333, %334 : vector<64x1xf32>
    %336 = math.rsqrt %335 : vector<64x1xf32>
    %337 = vector.broadcast %336 : vector<64x1xf32> to vector<64x128xf32>
    %338 = arith.mulf %330, %337 : vector<64x128xf32>
    %c0_171 = arith.constant 0 : index
    %c0_172 = arith.constant 0 : index
    %339 = vector.load %arg21[%c0_171, %c0_172] : memref<64x128xf32, #tpu.memory_space<vmem>>, vector<64x128xf32>
    tpu.vector_store %arg21[%c0_171, %c0_172], %338 {strides = array<i32>} : memref<64x128xf32, #tpu.memory_space<vmem>>, vector<64x128xf32>,
    return
  }
  func.func @transform_0(%arg0: i32) -> (i32, i32) {
    %c0_i32 = arith.constant 0 : i32
    %c0_i32_0 = arith.constant 0 : i32
    return %arg0, %c0_i32 : i32, i32
  }
  func.func @transform_1(%arg0: i32) -> (i32, i32) {
    %c0_i32 = arith.constant 0 : i32
    %c0_i32_0 = arith.constant 0 : i32
    %c0_i32_1 = arith.constant 0 : i32
    return %c0_i32, %c0_i32_0 : i32, i32
  }
  func.func @transform_2(%arg0: i32) -> (i32, i32) {
    %c0_i32 = arith.constant 0 : i32
    %c0_i32_0 = arith.constant 0 : i32
    %c0_i32_1 = arith.constant 0 : i32
    return %c0_i32, %c0_i32_0 : i32, i32
  }
  func.func @transform_3(%arg0: i32) -> (i32, i32) {
    %c0_i32 = arith.constant 0 : i32
    %c0_i32_0 = arith.constant 0 : i32
    %c0_i32_1 = arith.constant 0 : i32
    return %c0_i32, %c0_i32_0 : i32, i32
  }
  func.func @transform_4(%arg0: i32) -> (i32, i32, i32) {
    %c0_i32 = arith.constant 0 : i32
    %c0_i32_0 = arith.constant 0 : i32
    %c0_i32_1 = arith.constant 0 : i32
    %c0_i32_2 = arith.constant 0 : i32
    return %c0_i32, %c0_i32_0, %c0_i32_1 : i32, i32, i32
  }
  func.func @transform_5(%arg0: i32) -> (i32, i32, i32) {
    %c0_i32 = arith.constant 0 : i32
    %c0_i32_0 = arith.constant 0 : i32
    %c0_i32_1 = arith.constant 0 : i32
    %c0_i32_2 = arith.constant 0 : i32
    return %c0_i32, %c0_i32_0, %c0_i32_1 : i32, i32, i32
  }
  func.func @transform_6(%arg0: i32) -> (i32, i32, i32) {
    %c0_i32 = arith.constant 0 : i32
    %c0_i32_0 = arith.constant 0 : i32
    %c0_i32_1 = arith.constant 0 : i32
    %c0_i32_2 = arith.constant 0 : i32
    return %c0_i32, %c0_i32_0, %c0_i32_1 : i32, i32, i32
  }
  func.func @transform_7(%arg0: i32) -> (i32, i32, i32) {
    %c0_i32 = arith.constant 0 : i32
    %c0_i32_0 = arith.constant 0 : i32
    %c0_i32_1 = arith.constant 0 : i32
    %c0_i32_2 = arith.constant 0 : i32
    return %c0_i32, %c0_i32_0, %c0_i32_1 : i32, i32, i32
  }
  func.func @transform_8(%arg0: i32) -> (i32, i32, i32) {
    %c0_i32 = arith.constant 0 : i32
    %c0_i32_0 = arith.constant 0 : i32
    %c0_i32_1 = arith.constant 0 : i32
    %c0_i32_2 = arith.constant 0 : i32
    return %c0_i32, %c0_i32_0, %c0_i32_1 : i32, i32, i32
  }
  func.func @transform_9(%arg0: i32) -> (i32, i32, i32) {
    %c0_i32 = arith.constant 0 : i32
    %c0_i32_0 = arith.constant 0 : i32
    %c0_i32_1 = arith.constant 0 : i32
    %c0_i32_2 = arith.constant 0 : i32
    return %c0_i32, %c0_i32_0, %c0_i32_1 : i32, i32, i32
  }
  func.func @transform_10(%arg0: i32) -> (i32, i32, i32) {
    %c0_i32 = arith.constant 0 : i32
    %c0_i32_0 = arith.constant 0 : i32
    %c0_i32_1 = arith.constant 0 : i32
    %c0_i32_2 = arith.constant 0 : i32
    return %c0_i32, %c0_i32_0, %c0_i32_1 : i32, i32, i32
  }
  func.func @transform_11(%arg0: i32) -> (i32, i32, i32) {
    %c0_i32 = arith.constant 0 : i32
    %c0_i32_0 = arith.constant 0 : i32
    %c0_i32_1 = arith.constant 0 : i32
    %c0_i32_2 = arith.constant 0 : i32
    return %c0_i32, %c0_i32_0, %c0_i32_1 : i32, i32, i32
  }
  func.func @transform_12(%arg0: i32) -> (i32, i32, i32) {
    %c0_i32 = arith.constant 0 : i32
    %c0_i32_0 = arith.constant 0 : i32
    %c0_i32_1 = arith.constant 0 : i32
    %c0_i32_2 = arith.constant 0 : i32
    return %c0_i32, %c0_i32_0, %c0_i32_1 : i32, i32, i32
  }
  func.func @transform_13(%arg0: i32) -> (i32, i32, i32) {
    %c0_i32 = arith.constant 0 : i32
    %c0_i32_0 = arith.constant 0 : i32
    %c0_i32_1 = arith.constant 0 : i32
    %c0_i32_2 = arith.constant 0 : i32
    return %c0_i32, %c0_i32_0, %c0_i32_1 : i32, i32, i32
  }
  func.func @transform_14(%arg0: i32) -> (i32, i32) {
    %c0_i32 = arith.constant 0 : i32
    %c0_i32_0 = arith.constant 0 : i32
    %c0_i32_1 = arith.constant 0 : i32
    return %c0_i32, %c0_i32_0 : i32, i32
  }
  func.func @transform_15(%arg0: i32) -> (i32, i32) {
    %c0_i32 = arith.constant 0 : i32
    %c0_i32_0 = arith.constant 0 : i32
    %c0_i32_1 = arith.constant 0 : i32
    return %c0_i32, %c0_i32_0 : i32, i32
  }
  func.func @transform_16(%arg0: i32) -> (i32, i32) {
    %c0_i32 = arith.constant 0 : i32
    %c0_i32_0 = arith.constant 0 : i32
    %c0_i32_1 = arith.constant 0 : i32
    return %c0_i32, %c0_i32_0 : i32, i32
  }
  func.func @transform_17(%arg0: i32) -> (i32, i32) {
    %c0_i32 = arith.constant 0 : i32
    %c0_i32_0 = arith.constant 0 : i32
    %c0_i32_1 = arith.constant 0 : i32
    return %c0_i32, %c0_i32_0 : i32, i32
  }
  func.func @transform_18(%arg0: i32) -> (i32, i32) {
    %c0_i32 = arith.constant 0 : i32
    %c0_i32_0 = arith.constant 0 : i32
    %c0_i32_1 = arith.constant 0 : i32
    return %c0_i32, %c0_i32_0 : i32, i32
  }
  func.func @transform_19(%arg0: i32) -> (i32, i32) {
    %c0_i32 = arith.constant 0 : i32
    %c0_i32_0 = arith.constant 0 : i32
    %c0_i32_1 = arith.constant 0 : i32
    return %c0_i32, %c0_i32_0 : i32, i32
  }
  func.func @transform_20(%arg0: i32) -> (i32, i32) {
    %c0_i32 = arith.constant 0 : i32
    %c0_i32_0 = arith.constant 0 : i32
    return %arg0, %c0_i32 : i32, i32
  }
}

</mosaic_0001>

<bundles_post_ra>
// kernel: tpu_custom_call.1
= control target key start
LH: loop header
LB: loop body
LE: loop exit
PB: predicated region body
PF: predicated region fallthrough
CT: control target
= control target key end

     0   :  { %s11704_s0 = inlined_call_operand.vmem [shape: bf16[64,32], index: 0, kind: input, shape index: {}]   ;;  %s11705_s1 = inlined_call_operand.hbm [shape: bf16[32,128], index: 1, kind: input, shape index: {}]   ;;  %s11706_s2 = inlined_call_operand.vmem [shape: f32[1,128], index: 2, kind: input, shape index: {}]   ;;  %s11707_s3 = inlined_call_operand.hbm [shape: f32[1,128], index: 3, kind: input, shape index: {}]   ;;  %s11708_s4 = inlined_call_operand.hbm [shape: bf16[3,128,128], index: 4, kind: input, shape index: {}]   ;;  %s11709_s5 = inlined_call_operand.hbm [shape: f32[3,1,128], index: 5, kind: input, shape index: {}]   ;;  %s11710_s6 = inlined_call_operand.hbm [shape: bf16[3,128,512], index: 6, kind: input, shape index: {}]   ;;  %s11711_s7 = inlined_call_operand.hbm [shape: f32[3,1,512], index: 7, kind: input, shape index: {}]   ;;  %s11712_s8 = inlined_call_operand.hbm [shape: bf16[3,512,128], index: 8, kind: input, shape index: {}]   ;;  %s11713_s9 = inlined_call_operand.hbm [shape: f32[3,1,128], index: 9, kind: input, shape index: {}]   ;;  %s11714_s10 = inlined_call_operand.hbm [shape: f32[3,1,128], index: 10, kind: input, shape index: {}]   ;;  %s11715_s11 = inlined_call_operand.hbm [shape: f32[3,1,128], index: 11, kind: input, shape index: {}]   ;;  %s11716_s12 = inlined_call_operand.hbm [shape: f32[3,1,128], index: 12, kind: input, shape index: {}]   ;;  %s11717_s13 = inlined_call_operand.hbm [shape: f32[3,1,128], index: 13, kind: input, shape index: {}]   ;;  %s11718_s14 = inlined_call_operand.hbm [shape: bf16[128,128], index: 14, kind: input, shape index: {}]   ;;  %s11719_s15 = inlined_call_operand.hbm [shape: f32[1,128], index: 15, kind: input, shape index: {}]   ;;  %s11720_s16 = inlined_call_operand.hbm [shape: f32[1,128], index: 16, kind: input, shape index: {}]   ;;  %s11721_s17 = inlined_call_operand.hbm [shape: f32[1,128], index: 17, kind: input, shape index: {}]   ;;  %s11722_s18 = inlined_call_operand.vmem [shape: bf16[128,128], index: 18, kind: input, shape index: {}]   ;;  %s11723_s19 = inlined_call_operand.vmem [shape: f32[1,128], index: 19, kind: input, shape index: {}]   ;;  %s11724_s20 = inlined_call_operand.hbm [shape: f32[64,128], index: 20, kind: output, shape index: {}]  }
   0x1   :  { %11786 = sst [smem:[#allocation62_spill]] %s11704_s0 }
   0x2   :  { %11787 = sst [smem:[#allocation63_spill]] %s11705_s1 }
   0x3   :  { %11788 = sst [smem:[#allocation64_spill]] %s11706_s2 }
   0x4   :  { %11789 = sst [smem:[#allocation65_spill]] %s11707_s3 }
   0x5   :  { %11790 = sst [smem:[#allocation66_spill]] %s11708_s4 }
   0x6   :  { %25 = vsyncpa [#allocation3], 0 }
   0x7   :  { %26 = vsyncpa [#allocation6], 0 }
   0x8   :  { %27 = vsyncpa [#allocation9], 0 }
   0x9   :  { %28 = vsyncpa [#allocation12], 0 }
   0xa   :  { %29 = vsyncpa [#allocation15], 0 }
   0xb   :  { %30 = vsyncpa [#allocation18], 0 }
   0xc   :  { %31 = vsyncpa [#allocation21], 0 }
   0xd   :  { %32 = vsyncpa [#allocation24], 0 }
   0xe   :  { %33 = vsyncpa [#allocation27], 0  ;;  %s11791_s23 = sld [smem:[#allocation65_spill]] }
  0x14   :  { %s57_s24 = sshll.u32 %s11791_s23, 4  ;;  %s58_s24 = int_to_ptr.hbm [resolvable:$true] %s57_s24 }
  0x15   :  { %34 = vsyncpa [#allocation4], 0  ;;  %s8938_s2 = smov [#allocation5]   ;;  %s80_s27 = sshll.u32 %s11709_s5, 4  ;;  %s81_s27 = int_to_ptr.hbm [resolvable:$true] %s80_s27 }
  0x16   :  { %s59_s25 = sshll.u32 %s8938_s2, 4  ;;  %s8939_s28 = smov [#allocation8]   ;;  %s60_s25 = int_to_ptr.vmem [resolvable:$true] %s59_s25 }
  0x17   :  { %62 = dma.hbm_to_vmem [thread:$0]  %s58_s24, 16, %s60_s25, [#allocation6]  }
  0x18   :  { %s82_s4 = sshll.u32 %s8939_s28, 4  ;;  %s8940_s29 = smov 16   ;;  %s83_s4 = int_to_ptr.vmem [resolvable:$true] %s82_s4 }
  0x19   :  { %s8941_s30 = smov 1   ;;  %s106_s1 = sshll.u32 %s11711_s7, 4  ;;  %s107_s1 = int_to_ptr.hbm [resolvable:$true] %s106_s1 }
  0x1a   :  { %88 = dma.hbm_to_vmem [thread:$0]  %s81_s27, 48, %s83_s4, [#allocation9], %s8940_s29, %s8940_s29, %s8941_s30  }
  0x1b   :  { %s8942_s22 = smov [#allocation11]   ;;  %s132_s2 = sshll.u32 %s11713_s9, 4  ;;  %s133_s2 = int_to_ptr.hbm [resolvable:$true] %s132_s2 }
  0x1c   :  { %s108_s23 = sshll.u32 %s8942_s22, 4  ;;  %s8943_s25 = smov 64   ;;  %s109_s23 = int_to_ptr.vmem [resolvable:$true] %s108_s23 }
  0x1d   :  { %s8944_s3 = smov 4   ;;  %s8945_s26 = smov [#allocation14]  }
  0x1e   :  { %114 = dma.hbm_to_vmem [thread:$0]  %s107_s1, 192, %s109_s23, [#allocation12], %s8943_s25, %s8943_s25, %s8944_s3  }
  0x1f   :  { %s134_s27 = sshll.u32 %s8945_s26, 4  ;;  %s158_s7 = sshll.u32 %s11715_s11, 4  ;;  %s135_s27 = int_to_ptr.vmem [resolvable:$true] %s134_s27  ;;  %s159_s7 = int_to_ptr.hbm [resolvable:$true] %s158_s7 }
  0x20   :  { %140 = dma.hbm_to_vmem [thread:$0]  %s133_s2, 48, %s135_s27, [#allocation15], %s8940_s29, %s8940_s29, %s8941_s30  }
  0x21   :  { %s184_s21 = sshll.u32 %s11717_s13, 4  ;;  %s8946_s22 = smov [#allocation17]   ;;  %s185_s21 = int_to_ptr.hbm [resolvable:$true] %s184_s21 }
  0x22   :  { %s160_s5 = sshll.u32 %s8946_s22, 4  ;;  %s8947_s1 = smov [#allocation20]   ;;  %s161_s5 = int_to_ptr.vmem [resolvable:$true] %s160_s5 }
  0x23   :  { %166 = dma.hbm_to_vmem [thread:$0]  %s159_s7, 48, %s161_s5, [#allocation18], %s8940_s29, %s8940_s29, %s8941_s30  }
  0x24   :  { %s186_s11 = sshll.u32 %s8947_s1, 4  ;;  %s211_s26 = sshll.u32 %s11719_s15, 4  ;;  %s187_s11 = int_to_ptr.vmem [resolvable:$true] %s186_s11  ;;  %s212_s26 = int_to_ptr.hbm [resolvable:$true] %s211_s26 }
  0x25   :  { %192 = dma.hbm_to_vmem [thread:$0]  %s185_s21, 48, %s187_s11, [#allocation21], %s8940_s29, %s8940_s29, %s8941_s30  }
  0x26   :  { %s11792_s27 = sld [smem:[#allocation63_spill]]  ;;  %s8948_s4 = smov [#allocation23]  }
  0x27   :  { %s213_s9 = sshll.u32 %s8948_s4, 4  ;;  %s8949_s7 = smov [#allocation2]   ;;  %s214_s9 = int_to_ptr.vmem [resolvable:$true] %s213_s9 }
  0x28   :  { %216 = dma.hbm_to_vmem [thread:$0]  %s212_s26, 16, %s214_s9, [#allocation24]  }
  0x29   :  { %s43_s0 = sshll.u32 %s8949_s7, 4  ;;  %s11793_s15 = sld [smem:[#allocation66_spill]]  ;;  %s44_s0 = int_to_ptr.vmem [resolvable:$true] %s43_s0 }
  0x2a   :  { %s93_s23 = sshll.u32 %s11710_s6, 4  ;;  %s8950_s24 = smov [#allocation7]   ;;  %s94_s23 = int_to_ptr.hbm [resolvable:$true] %s93_s23 }
  0x2b   :  { %s69_s13 = sshll.u32 %s8950_s24, 4  ;;  %s8951_s26 = smov [#allocation10]   ;;  %s70_s13 = int_to_ptr.vmem [resolvable:$true] %s69_s13 }
  0x2c   :  { %s41_s28 = sshll.u32 %s11792_s27, 4  ;;  %s95_s2 = sshll.u32 %s8951_s26, 4  ;;  %s42_s28 = int_to_ptr.hbm [resolvable:$true] %s41_s28  ;;  %s96_s2 = int_to_ptr.vmem [resolvable:$true] %s95_s2 }
  0x2d   :  { %49 = dma.hbm_to_vmem [thread:$0]  %s42_s28, 256, %s44_s0, [#allocation3], %s8943_s25, %s8943_s25, %s8944_s3  }
  0x2e   :  { %s119_s9 = sshll.u32 %s11712_s8, 4  ;;  %s8952_s28 = smov 256   ;;  %s120_s9 = int_to_ptr.hbm [resolvable:$true] %s119_s9 }
  0x2f   :  { %s67_s1 = sshll.u32 %s11793_s15, 4  ;;  %s8953_s6 = smov [#allocation13]   ;;  %s68_s1 = int_to_ptr.hbm [resolvable:$true] %s67_s1 }
  0x30   :  { %75 = dma.hbm_to_vmem [thread:$0]  %s68_s1, 3072, %s70_s13, [#allocation6], %s8943_s25, %s8943_s25, %s8944_s3  }
  0x31   :  { %101 = dma.hbm_to_vmem [thread:$0]  %s94_s23, 12288, %s96_s2, [#allocation9], %s8952_s28, %s8952_s28, %s8940_s29  }
  0x32   :  { %s121_s7 = sshll.u32 %s8953_s6, 4  ;;  %s145_s5 = sshll.u32 %s11714_s10, 4  ;;  %s122_s7 = int_to_ptr.vmem [resolvable:$true] %s121_s7  ;;  %s146_s5 = int_to_ptr.hbm [resolvable:$true] %s145_s5 }
  0x33   :  { %127 = dma.hbm_to_vmem [thread:$0]  %s120_s9, 12288, %s122_s7, [#allocation12], %s8943_s25, %s8943_s25, %s8944_s3  }
  0x34   :  { %s171_s8 = sshll.u32 %s11716_s12, 4  ;;  %s8954_s21 = smov [#allocation16]   ;;  %s172_s8 = int_to_ptr.hbm [resolvable:$true] %s171_s8 }
  0x35   :  { %s147_s11 = sshll.u32 %s8954_s21, 4  ;;  %s8955_s23 = smov [#allocation19]   ;;  %s148_s11 = int_to_ptr.vmem [resolvable:$true] %s147_s11 }
  0x36   :  { %153 = dma.hbm_to_vmem [thread:$0]  %s146_s5, 48, %s148_s11, [#allocation15], %s8940_s29, %s8940_s29, %s8941_s30  }
  0x37   :  { %s173_s10 = sshll.u32 %s8955_s23, 4  ;;  %s197_s26 = sshll.u32 %s11718_s14, 4  ;;  %s174_s10 = int_to_ptr.vmem [resolvable:$true] %s173_s10  ;;  %s198_s26 = int_to_ptr.hbm [resolvable:$true] %s197_s26 }
  0x38   :  { %179 = dma.hbm_to_vmem [thread:$0]  %s172_s8, 48, %s174_s10, [#allocation18], %s8940_s29, %s8940_s29, %s8941_s30  }
  0x39   :  { %s222_s27 = sshll.u32 %s11720_s16, 4  ;;  %s8956_s4 = smov [#allocation22]   ;;  %s223_s27 = int_to_ptr.hbm [resolvable:$true] %s222_s27 }
  0x3a   :  { %s199_s9 = sshll.u32 %s8956_s4, 4  ;;  %s8957_s28 = smov [#allocation25]   ;;  %s200_s9 = int_to_ptr.vmem [resolvable:$true] %s199_s9 }
  0x3b   :  { %205 = dma.hbm_to_vmem [thread:$0]  %s198_s26, 1024, %s200_s9, [#allocation21], %s8943_s25, %s8943_s25, %s8944_s3  }
  0x3c   :  { %s224_s14 = sshll.u32 %s8957_s28, 4  ;;  %s233_s0 = sshll.u32 %s11721_s17, 4  ;;  %s225_s14 = int_to_ptr.vmem [resolvable:$true] %s224_s14  ;;  %s234_s0 = int_to_ptr.hbm [resolvable:$true] %s233_s0 }
  0x3d   :  { %227 = dma.hbm_to_vmem [thread:$0]  %s223_s27, 16, %s225_s14, [#allocation24]  }
  0x3e   :  { %s8958_s29 = smov [#allocation26]  }
  0x3f   :  { %s235_s30 = sshll.u32 %s8958_s29, 4  ;;  %s236_s30 = int_to_ptr.vmem [resolvable:$true] %s235_s30 }
  0x40   :  { %238 = dma.hbm_to_vmem [thread:$0]  %s234_s0, 16, %s236_s30, [#allocation27]  }
  0x41   :  { %8918 = dma.done.wait [#allocation3], 256  }
  0x42   :  { %8919 = vsyncadd [#allocation3], 4294967040 }
  0x43   :  { %8920 = dma.done.wait [#allocation6], 3088  }
  0x44   :  { %8921 = vsyncadd [#allocation6], 4294964208 }
  0x45   :  { %8922 = dma.done.wait [#allocation9], 12336  }
  0x46   :  { %8923 = vsyncadd [#allocation9], 4294954960 }
  0x47   :  { %8924 = dma.done.wait [#allocation12], 12480  }
  0x48   :  { %8925 = vsyncadd [#allocation12], 4294954816 }
  0x49   :  { %8926 = dma.done.wait [#allocation15], 96  }
  0x4a   :  { %8927 = vsyncadd [#allocation15], 4294967200 }
  0x4b   :  { %8928 = dma.done.wait [#allocation18], 96  }
  0x4c   :  { %8929 = vsyncadd [#allocation18], 4294967200 }
  0x4d   :  { %8930 = dma.done.wait [#allocation21], 1072  }
  0x4e   :  { %8931 = vsyncadd [#allocation21], 4294966224 }
  0x4f   :  { %8932 = dma.done.wait [#allocation24], 32  }
  0x50   :  { %8933 = vsyncadd [#allocation24], 4294967264 }
  0x51   :  { %8934 = dma.done.wait [#allocation27], 16  }
  0x52   :  { %8935 = vsyncadd [#allocation27], 4294967280  ;;  %v7880_v0 = vld [vmem:[#allocation2 + $0x8] sm:$0xff]  ;;  %v7879_v1 = vld [vmem:[#allocation2] sm:$0xff]  ;;  %s11794_s25 = sld [smem:[#allocation62_spill]]  ;;  %vm356_vm0 = vcmask 261120  }
  0x53   :  { %375 = vmatpush.bf16.msra.mxu0 %v7880_v0  ;;  %8113 = vmatpush.bf16.msra.mxu3 %v7880_v0  ;;  %v7888_v2 = vld [vmem:[#allocation7 + $0x38] sm:$0xff]  ;;  %v7887_v5 = vld [vmem:[#allocation7 + $0x30] sm:$0xff]  ;;  %v7886_v6 = vld [vmem:[#allocation7 + $0x28] sm:$0xff]  ;;  %s11795_s23 = sld [smem:[#allocation64_spill]]  ;;  %s6898_s22 = sshll.u32 %s11724_s20, 4  ;;  %s6899_s22 = int_to_ptr.hbm [resolvable:$true] %s6898_s22 }
  0x54   :  { %482 = vmatpush.bf16.msra.mxu1 %v7888_v2  ;;  %8115 = vmatpush.bf16.msra.mxu2 %v7888_v2  ;;  %v7885_v7 = vld [vmem:[#allocation7 + $0x20] sm:$0xff]  ;;  %v7884_v10 = vld [vmem:[#allocation7 + $0x18] sm:$0xff]  ;;  %v7883_v11 = vld [vmem:[#allocation7 + $0x10] sm:$0xff]  ;;  %s8961_s5 = smov 128   ;;  %s8962_s15 = smov 8  }
  0x55   :  { %v7882_v12 = vld [vmem:[#allocation7 + $0x8] sm:$0xff]  ;;  %v7881_v13 = vld [vmem:[#allocation7] sm:$0xff]  ;;  %v8149_v18 = vld [vmem:[#allocation5] ss:$0 sm:$0xff] }
  0x56   :  { %v8150_v44 = vld [vmem:[#allocation8] ss:$0 sm:$0xff] }
  0x57   :  { %376 = vmatpush.bf16.msra.mxu0 %v7879_v1  ;;  %8114 = vmatpush.bf16.msra.mxu3 %v7879_v1 }
  0x58   :  { %v7875_v3 = vld [vmem:[%s11794_s25] sm:$0xff]  ;;  %v7877_v4 = vld [vmem:[%s11794_s25 + $0x10] sm:$0xff]  ;;  %483 = vmatpush.bf16.msra.mxu1 %v7887_v5  ;;  %8116 = vmatpush.bf16.msra.mxu2 %v7887_v5  ;;  %v7876_v8 = vld [vmem:[%s11794_s25 + $0x8] sm:$0xff] }
  0x59   :  { %v7878_v9 = vld [vmem:[%s11794_s25 + $0x18] sm:$0xff]  ;;  %v8148_v15 = vld [vmem:[%s11795_s23] ss:$0 sm:$0xff] }
  0x5a   :  { %6943 = vmatmul.msk.bf16.vlgmr.msra.gmra.mxu0 %vm356_vm0, %v7875_v3  ;;  %6945 = vmatmul.msk.bf16.vlgmr.msra.gmra.mxu3 %vm356_vm0, %v7877_v4 }
  0x5c   :  { %484 = vmatpush.bf16.msra.mxu1 %v7886_v6  ;;  %8117 = vmatpush.bf16.msra.mxu2 %v7886_v6 }
  0x60   :  { %485 = vmatpush.bf16.msra.mxu1 %v7885_v7  ;;  %8118 = vmatpush.bf16.msra.mxu2 %v7885_v7 }
  0x64   :  { %486 = vmatpush.bf16.msra.mxu1 %v7884_v10  ;;  %8119 = vmatpush.bf16.msra.mxu2 %v7884_v10 }
  0x68   :  { %487 = vmatpush.bf16.msra.mxu1 %v7883_v11  ;;  %8120 = vmatpush.bf16.msra.mxu2 %v7883_v11 }
  0x6a   :  { %6944 = vmatmul.msk.bf16.gmra.mxu0 %vm356_vm0, %v7876_v8  ;;  %6946 = vmatmul.msk.bf16.gmra.mxu3 %vm356_vm0, %v7878_v9 }
  0x6c   :  { %488 = vmatpush.bf16.msra.mxu1 %v7882_v12  ;;  %8121 = vmatpush.bf16.msra.mxu2 %v7882_v12 }
  0x70   :  { %489 = vmatpush.bf16.msra.mxu1 %v7881_v13  ;;  %8122 = vmatpush.bf16.msra.mxu2 %v7881_v13  ;;  %v8959_v13 = vmov 128.0  }
  0x71   :  { %8172 = vrcp.f32 %v8959_v13  ;;  %v7901_v13 = vld [vmem:[#allocation10 + $0x64] sm:$0xf] }
  0xd7   :  { %v378_v14 = vpop.f32.mrf.mxu0 }
  0xd8   :  { %v379_v17 = vadd.f32 %v8148_v15, %v378_v14  ;;  %v9209_v14 = vpop.eup %8172 }
  0xd9   :  { %vm542_vm1 = vweird.f32 %v9209_v14 }
  0xda   :  { %v402_v21 = vadd.f32 %v8149_v18, %v379_v17  ;;  %v7917_v17 = vld [vmem:[#allocation10 + $0xe4] sm:$0xf] }
  0xdd   :  { %v388_v16 = vpop.f32.mrf.mxu3 }
  0xde   :  { %v389_v22 = vadd.f32 %v8148_v15, %v388_v16  ;;  %v7919_v16 = vld [vmem:[#allocation10 + $0xec] sm:$0xf0] }
  0xdf   :  { %v380_v19 = vpop.f32.mrf.mxu0 }
  0xe0   :  { %v381_v20 = vadd.f32 %v8148_v15, %v380_v19  ;;  %v406_v26 = vadd.f32 %v8149_v18, %v389_v22  ;;  %v7095_v19 = vld [vmem:[#allocation10 + $0xf0] sm:$0xf0] }
  0xe1   :  { %v7098_v22 = vor.u32 %v7917_v17, %v7095_v19  ;;  %v7037_v17 = vld [vmem:[#allocation10 + $0x68] sm:$0xf] }
  0xe2   :  { %v403_v23 = vadd.f32 %v8149_v18, %v381_v20  ;;  %v7101_v20 = vld [vmem:[#allocation10 + $0xe8] sm:$0xf] }
  0xe3   :  { %961 = vmatpush.bf16.msrb.mxu3 %v7098_v22  ;;  %v7039_v22 = vld [vmem:[#allocation10 + $0x78] sm:$0xf0] }
  0xe4   :  { %v410_v24 = vpack.c.bf16 %v403_v23, %v402_v21 }
  0xe5   :  { %v390_v25 = vpop.f32.mrf.mxu3 }
  0xe6   :  { %v391_v27 = vadd.f32 %v8148_v15, %v390_v25  ;;  %490 = vmatmul.bf16.vlgmr.msra.gmra.mxu1 %v410_v24  ;;  %v7918_v24 = vld [vmem:[#allocation10 + $0xec] sm:$0xf]  ;;  %v7103_v25 = vld [vmem:[#allocation10 + $0xf8] sm:$0xf0] }
  0xe7   :  { %v383_v28 = vpop.f32.mrf.mxu0 }
  0xe8   :  { %v407_v29 = vadd.f32 %v8149_v18, %v391_v27  ;;  %v384_v32 = vadd.f32 %v8148_v15, %v383_v28  ;;  %v7106_v27 = vor.u32 %v7918_v24, %v7103_v25  ;;  %v7077_v28 = vld [vmem:[#allocation10 + $0xc0] sm:$0xf] }
  0xe9   :  { %v7013_v25 = vld [vmem:[#allocation10 + $0x40] sm:$0xf] }
  0xea   :  { %v412_v30 = vpack.c.bf16 %v407_v29, %v406_v26  ;;  %v404_v35 = vadd.f32 %v8149_v18, %v384_v32  ;;  %1019 = vmatpush.bf16.msrb.mxu1 %v7106_v27  ;;  %v7079_v32 = vld [vmem:[#allocation10 + $0xd0] sm:$0xf0]  ;;  %v7897_v27 = vld [vmem:[#allocation10 + $0x44] sm:$0xf] }
  0xec   :  { %500 = vmatmul.bf16.vlgmr.msra.gmra.mxu2 %v412_v30  ;;  %v7913_v30 = vld [vmem:[#allocation10 + $0xc4] sm:$0xf] }
  0xed   :  { %v393_v31 = vpop.f32.mrf.mxu3 }
  0xee   :  { %v394_v36 = vadd.f32 %v8148_v15, %v393_v31 }
  0xef   :  { %v385_v33 = vpop.f32.mrf.mxu0 }
  0xf0   :  { %v386_v34 = vadd.f32 %v8148_v15, %v385_v33  ;;  %v408_v40 = vadd.f32 %v8149_v18, %v394_v36  ;;  %v7085_v33 = vld [vmem:[#allocation10 + $0xc8] sm:$0xf] }
  0xf2   :  { %v405_v37 = vadd.f32 %v8149_v18, %v386_v34  ;;  %v7916_v34 = vld [vmem:[#allocation10 + $0xd4] sm:$0xf0] }
  0xf3   :  { %v7086_v36 = vor.u32 %v7916_v34, %v7085_v33 }
  0xf4   :  { %v411_v38 = vpack.c.bf16 %v405_v37, %v404_v35 }
  0xf5   :  { %v395_v39 = vpop.f32.mrf.mxu3 }
  0xf6   :  { %v396_v41 = vadd.f32 %v8148_v15, %v395_v39  ;;  %495 = vmatmul.bf16.gmra.mxu1 %v411_v38  ;;  %v7093_v15 = vld [vmem:[#allocation10 + $0xe0] sm:$0xf]  ;;  %v7087_v38 = vld [vmem:[#allocation10 + $0xd8] sm:$0xf0] }
  0xf8   :  { %v409_v42 = vadd.f32 %v8149_v18, %v396_v41  ;;  %v7094_v18 = vor.u32 %v7919_v16, %v7093_v15  ;;  %v7061_v41 = vld [vmem:[#allocation10 + $0xa0] sm:$0xf]  ;;  %v7031_v16 = vld [vmem:[#allocation10 + $0x70] sm:$0xf0] }
  0xf9   :  { %v7034_v19 = vor.u32 %v7901_v13, %v7031_v16 }
  0xfa   :  { %v413_v43 = vpack.c.bf16 %v409_v42, %v408_v40  ;;  %932 = vmatpush.bf16.msrb.mxu2 %v7094_v18  ;;  %v7904_v18 = vld [vmem:[#allocation10 + $0x74] sm:$0xf0] }
  0xfc   :  { %505 = vmatmul.bf16.gmra.mxu2 %v413_v43  ;;  %v7909_v43 = vld [vmem:[#allocation10 + $0xa4] sm:$0xf] }
 0x163   :  { %v491_v45 = vpop.f32.mrf.mxu1 }
 0x164   :  { %v492_v46 = vadd.f32 %v8150_v44, %v491_v45  ;;  %v7063_v45 = vld [vmem:[#allocation10 + $0xb0] sm:$0xf0] }
 0x166   :  { %v9169_v47 = vadd.f32 %v492_v46, %v402_v21  ;;  %v7920_v21 = vld [vmem:[#allocation10 + $0xf4] sm:$0xf0]  ;;  %v7069_v46 = vld [vmem:[#allocation10 + $0xa8] sm:$0xf] }
 0x168   :  { %521 = vadd.xlane.f32.xlu0 %v9169_v47  ;;  %v552_v48 = vmul.f32 %v9169_v47, %v9169_v47 }
 0x16a   :  { %560 = vadd.xlane.f32.xlu1 %v552_v48  ;;  %v7912_v48 = vld [vmem:[#allocation10 + $0xb4] sm:$0xf0] }
 0x16b   :  { %v493_v49 = vpop.f32.mrf.mxu1 }
 0x16c   :  { %v494_v50 = vadd.f32 %v8150_v44, %v493_v49  ;;  %v7066_v49 = vor.u32 %v7909_v43, %v7063_v45  ;;  %v6999_v45 = vld [vmem:[#allocation10 + $0x30] sm:$0xf0] }
 0x16e   :  { %v9174_v51 = vadd.f32 %v494_v50, %v403_v23  ;;  %v7102_v23 = vor.u32 %v7920_v21, %v7101_v20  ;;  %v7070_v50 = vor.u32 %v7912_v48, %v7069_v46  ;;  %v7038_v20 = vor.u32 %v7904_v18, %v7037_v17  ;;  %v7902_v21 = vld [vmem:[#allocation10 + $0x6c] sm:$0xf]  ;;  %v7005_v46 = vld [vmem:[#allocation10 + $0x28] sm:$0xf]  ;;  %v7896_v48 = vld [vmem:[#allocation10 + $0x34] sm:$0xf0] }
 0x16f   :  { %v501_v52 = vpop.f32.mrf.mxu2 }
 0x170   :  { %523 = vadd.xlane.f32.xlu0 %v9174_v51  ;;  %v553_v53 = vmul.f32 %v9174_v51, %v9174_v51  ;;  %v502_v0 = vadd.f32 %v8150_v44, %v501_v52  ;;  %990 = vmatpush.bf16.msrb.mxu0 %v7102_v23  ;;  %v7910_v52 = vld [vmem:[#allocation10 + $0xac] sm:$0xf]  ;;  %v7042_v23 = vor.u32 %v7902_v21, %v7039_v22 }
 0x172   :  { %562 = vadd.xlane.f32.xlu1 %v553_v53  ;;  %v9192_v3 = vadd.f32 %v502_v0, %v406_v26  ;;  %v538_v26 = vmul.f32 128.0, %v9209_v14  ;;  %v7071_v53 = vld [vmem:[#allocation10 + $0xb8] sm:$0xf0]  ;;  %v7908_v0 = vld [vmem:[#allocation10 + $0x94] sm:$0xf0] }
 0x173   :  { %v496_v54 = vpop.f32.mrf.mxu1 }
 0x174   :  { %v497_v55 = vadd.f32 %v8150_v44, %v496_v54  ;;  %v556_v8 = vmul.f32 %v9192_v3, %v9192_v3  ;;  %v539_v39 = vsub.f32 1.0, %v538_v26  ;;  %991 = vmatpush.bf16.msrb.mxu0 %v7086_v36  ;;  %v7074_v54 = vor.u32 %v7910_v52, %v7071_v53  ;;  %v7899_v26 = vld [vmem:[#allocation10 + $0x4c] sm:$0xf0]  ;;  %v7023_v36 = vld [vmem:[#allocation10 + $0x58] sm:$0xf0] }
 0x175   :  { %v7894_v52 = vld [vmem:[#allocation10 + $0x2c] sm:$0xf]  ;;  %v7007_v53 = vld [vmem:[#allocation10 + $0x38] sm:$0xf0] }
 0x176   :  { %v9179_v56 = vadd.f32 %v497_v55, %v404_v35  ;;  %v7082_v35 = vor.u32 %v7913_v30, %v7079_v32  ;;  %v7045_v55 = vld [vmem:[#allocation10 + $0x80] sm:$0xf]  ;;  %v7021_v30 = vld [vmem:[#allocation10 + $0x48] sm:$0xf] }
 0x177   :  { %v503_v57 = vpop.f32.mrf.mxu2 }
 0x178   :  { %525 = vadd.xlane.f32.xlu2 %v9179_v56  ;;  %v554_v58 = vmul.f32 %v9179_v56, %v9179_v56  ;;  %v504_v60 = vadd.f32 %v8150_v44, %v503_v57  ;;  %962 = vmatpush.bf16.msrb.mxu3 %v7082_v35  ;;  %v7907_v57 = vld [vmem:[#allocation10 + $0x8c] sm:$0xf0]  ;;  %v7898_v35 = vld [vmem:[#allocation10 + $0x4c] sm:$0xf] }
 0x179   :  { %992 = vmatpush.bf16.msrb.mxu0 %v7070_v50  ;;  %v7006_v50 = vor.u32 %v7896_v48, %v7005_v46 }
 0x17a   :  { %564 = vadd.xlane.f32.xlu0 %v554_v58  ;;  %v9186_v1 = vadd.f32 %v504_v60, %v407_v29  ;;  %v7915_v29 = vld [vmem:[#allocation10 + $0xcc] sm:$0xf0]  ;;  %v7905_v58 = vld [vmem:[#allocation10 + $0x84] sm:$0xf]  ;;  %v7046_v60 = vor.u32 %v7907_v57, %v7045_v55  ;;  %v7010_v55 = vor.u32 %v7894_v52, %v7007_v53  ;;  %v6981_v57 = vld [vmem:[#allocation10] sm:$0xf] }
 0x17b   :  { %v498_v59 = vpop.f32.mrf.mxu1  ;;  %v7078_v31 = vor.u32 %v7915_v29, %v7077_v28  ;;  %v7014_v28 = vor.u32 %v7899_v26, %v7013_v25  ;;  %v7015_v29 = vld [vmem:[#allocation10 + $0x50] sm:$0xf0] }
 0x17c   :  { %v499_v61 = vadd.f32 %v8150_v44, %v498_v59  ;;  %v557_v10 = vmul.f32 %v9186_v1, %v9186_v1  ;;  %963 = vmatpush.bf16.msrb.mxu3 %v7066_v49  ;;  %v540_v59 = vmul.f32 %v9209_v14, %v539_v39  ;;  %v7018_v33 = vor.u32 %v7897_v27, %v7015_v29  ;;  %v6997_v39 = vld [vmem:[#allocation10 + $0x20] sm:$0xf] }
 0x17d   :  { %933 = vmatpush.bf16.msrb.mxu2 %v7078_v31  ;;  %v7900_v31 = vld [vmem:[#allocation10 + $0x54] sm:$0xf0] }
 0x17e   :  { %v9184_v62 = vadd.f32 %v499_v61, %v405_v37  ;;  %v7914_v37 = vld [vmem:[#allocation10 + $0xcc] sm:$0xf]  ;;  %v7047_v61 = vld [vmem:[#allocation10 + $0x90] sm:$0xf0]  ;;  %v7022_v34 = vor.u32 %v7900_v31, %v7021_v30 }
 0x17f   :  { %v506_v63 = vpop.f32.mrf.mxu2 }
 0x180   :  { %527 = vadd.xlane.f32.xlu2 %v9184_v62  ;;  %v555_v2 = vmul.f32 %v9184_v62, %v9184_v62  ;;  %v507_v4 = vadd.f32 %v8150_v44, %v506_v63  ;;  %v7053_v63 = vld [vmem:[#allocation10 + $0x88] sm:$0xf] }
 0x182   :  { %531 = vadd.xlane.f32.xlu0 %v9186_v1  ;;  %566 = vadd.xlane.f32.xlu1 %v555_v2  ;;  %v9194_v6 = vadd.f32 %v507_v4, %v408_v40  ;;  %v7090_v40 = vor.u32 %v7914_v37, %v7087_v38  ;;  %v7050_v2 = vor.u32 %v7905_v58, %v7047_v61  ;;  %v7891_v58 = vld [vmem:[#allocation10 + $0xc] sm:$0xf0] }
 0x183   :  { %v7054_v4 = vor.u32 %v7908_v0, %v7053_v63  ;;  %v6982_v61 = vor.u32 %v7891_v58, %v6981_v57  ;;  %v6983_v63 = vld [vmem:[#allocation10 + $0x10] sm:$0xf0]  ;;  %v6989_v0 = vld [vmem:[#allocation10 + $0x8] sm:$0xf] }
 0x184   :  { %v558_v12 = vmul.f32 %v9194_v6, %v9194_v6  ;;  %1020 = vmatpush.bf16.msrb.mxu1 %v7090_v40  ;;  %964 = vmatpush.bf16.msrb.mxu3 %v7050_v2  ;;  %v7895_v40 = vld [vmem:[#allocation10 + $0x2c] sm:$0xf0] }
 0x185   :  { %993 = vmatpush.bf16.msrb.mxu0 %v7054_v4 }
 0x187   :  { %v508_v5 = vpop.f32.mrf.mxu2 }
 0x188   :  { %v509_v7 = vadd.f32 %v8150_v44, %v508_v5  ;;  %529 = vadd.xlane.f32.xlu2 %v9192_v3  ;;  %1021 = vmatpush.bf16.msrb.mxu1 %v7074_v54  ;;  %v7906_v5 = vld [vmem:[#allocation10 + $0x8c] sm:$0xf] }
 0x189   :  { %965 = vmatpush.bf16.msrb.mxu3 %v7034_v19  ;;  %994 = vmatpush.bf16.msrb.mxu0 %v7038_v20 }
 0x18a   :  { %533 = vadd.xlane.f32.xlu0 %v9194_v6  ;;  %568 = vadd.xlane.f32.xlu1 %v556_v8  ;;  %v9200_v9 = vadd.f32 %v509_v7, %v409_v42  ;;  %v7911_v42 = vld [vmem:[#allocation10 + $0xac] sm:$0xf0]  ;;  %v7055_v7 = vld [vmem:[#allocation10 + $0x98] sm:$0xf0] }
 0x18b   :  { %v7062_v44 = vor.u32 %v7911_v42, %v7061_v41  ;;  %v7058_v8 = vor.u32 %v7906_v5, %v7055_v7  ;;  %v7893_v41 = vld [vmem:[#allocation10 + $0x24] sm:$0xf]  ;;  %v7892_v5 = vld [vmem:[#allocation10 + $0x14] sm:$0xf0]  ;;  %v7890_v7 = vld [vmem:[#allocation10 + $0xc] sm:$0xf] }
 0x18c   :  { %v559_v11 = vmul.f32 %v9200_v9, %v9200_v9  ;;  %v7002_v49 = vor.u32 %v7893_v41, %v6999_v45 }
 0x18d   :  { %934 = vmatpush.bf16.msrb.mxu2 %v7062_v44  ;;  %1022 = vmatpush.bf16.msrb.mxu1 %v7058_v8  ;;  %v6998_v44 = vor.u32 %v7895_v40, %v6997_v39  ;;  %v6991_v8 = vld [vmem:[#allocation10 + $0x18] sm:$0xf0] }
 0x18e   :  { %966 = vmatpush.bf16.msrb.mxu3 %v7018_v33  ;;  %995 = vmatpush.bf16.msrb.mxu0 %v7022_v34  ;;  %v6994_v13 = vor.u32 %v7890_v7, %v6991_v8 }
 0x190   :  { %570 = vadd.xlane.f32.xlu2 %v557_v10  ;;  %v541_v10 = vadd.f32 %v9209_v14, %v540_v59  ;;  %v7889_v59 = vld [vmem:[#allocation10 + $0x4] sm:$0xf] }
 0x191   :  { %935 = vmatpush.bf16.msrb.mxu2 %v7046_v60  ;;  %1023 = vmatpush.bf16.msrb.mxu1 %v7042_v23  ;;  %v6986_v4 = vor.u32 %v7889_v59, %v6983_v63 }
 0x192   :  { %574 = vadd.xlane.f32.xlu0 %v559_v11  ;;  %535 = vadd.xlane.f32.xlu1 %v9200_v9  ;;  %v7029_v11 = vld [vmem:[#allocation10 + $0x60] sm:$0xf]  ;;  %v9216_v24 = vsel %vm542_vm1, %v9209_v14, %v541_v10  ;;  %v7026_v14 = vor.u32 %v7898_v35, %v7023_v36 }
 0x193   :  { %11796 = vst [vmem:[#allocation39_spill] sm:$0xff] %v9216_v24  ;;  %967 = vmatpush.bf16.msrb.mxu3 %v7002_v49  ;;  %996 = vmatpush.bf16.msrb.mxu0 %v7006_v50  ;;  %v9243_v50 = vld [vmem:[#allocation16] ss:$0 sm:$0xff] }
 0x195   :  { %1024 = vmatpush.bf16.msrb.mxu1 %v7026_v14 }
 0x197   :  { %968 = vmatpush.bf16.msrb.mxu3 %v6986_v4 }
 0x198   :  { %572 = vadd.xlane.f32.xlu2 %v558_v12  ;;  %v7903_v12 = vld [vmem:[#allocation10 + $0x6c] sm:$0xf0] }
 0x199   :  { %v7030_v15 = vor.u32 %v7903_v12, %v7029_v11  ;;  %1025 = vmatpush.bf16.msrb.mxu1 %v7010_v55  ;;  %v6990_v11 = vor.u32 %v7892_v5, %v6989_v0  ;;  %v9255_v0 = vld [vmem:[#allocation17] ss:$0 sm:$0xff] }
 0x19b   :  { %936 = vmatpush.bf16.msrb.mxu2 %v7030_v15  ;;  %997 = vmatpush.bf16.msrb.mxu0 %v6990_v11 }
 0x19d   :  { %1026 = vmatpush.bf16.msrb.mxu1 %v6994_v13 }
 0x19f   :  { %937 = vmatpush.bf16.msrb.mxu2 %v7014_v28 }
 0x1a3   :  { %938 = vmatpush.bf16.msrb.mxu2 %v6998_v44 }
 0x1a7   :  { %939 = vmatpush.bf16.msrb.mxu2 %v6982_v61 }
 0x1db   :  { %v522_v32 = vpop.xlane.xlu0 %521 }
 0x1dc   :  { %v9219_v37 = vmul.f32 %v9216_v24, %v522_v32 }
 0x1dd   :  { %v561_v38 = vpop.xlane.xlu1 %560 }
 0x1de   :  { %v584_v42 = vmul.f32 %v9219_v37, %v9219_v37  ;;  %v576_v43 = vmul.f32 %v561_v38, %v9216_v24  ;;  %v600_v44 = vsub.f32 %v9169_v47, %v9219_v37 }
 0x1e0   :  { %v592_v54 = vsub.f32 %v576_v43, %v584_v42 }
 0x1e2   :  { %v608_v60 = vadd.f32 1e-05, %v592_v54 }
 0x1e3   :  { %v524_v2 = vpop.xlane.xlu0 %523 }
 0x1e4   :  { %8174 = vrsqrt.f32 %v608_v60  ;;  %v545_v10 = vmul.f32 %v9216_v24, %v524_v2  ;;  %vm622_vm3 = vweird.f32 %v608_v60 }
 0x1e5   :  { %v563_v12 = vpop.xlane.xlu1 %562 }
 0x1e6   :  { %v585_v15 = vmul.f32 %v545_v10, %v545_v10  ;;  %v577_v16 = vmul.f32 %v563_v12, %v9216_v24  ;;  %v601_v57 = vsub.f32 %v9174_v51, %v545_v10 }
 0x1e8   :  { %v593_v17 = vsub.f32 %v577_v16, %v585_v15 }
 0x1ea   :  { %v8175_v18 = vpop.eup %8174  ;;  %v609_v19 = vadd.f32 1e-05, %v593_v17 }
 0x1eb   :  { %v617_v20 = vmul.f32 %v8175_v18, %v608_v60  ;;  %v526_v21 = vpop.xlane.xlu2 %525  ;;  %vm623_vm2 = vweird.f32 %v8175_v18 }
 0x1ec   :  { %8176 = vrsqrt.f32 %v609_v19  ;;  %v9227_v22 = vmul.f32 %v9216_v24, %v526_v21  ;;  %vm624_vm4 = vmor %vm622_vm3, %vm623_vm2  ;;  %vm632_vm6 = vweird.f32 %v609_v19 }
 0x1ed   :  { %v618_v23 = vmul.f32 %v8175_v18, %v617_v20  ;;  %v565_v25 = vpop.xlane.xlu0 %564 }
 0x1ee   :  { %v586_v26 = vmul.f32 %v9227_v22, %v9227_v22  ;;  %v578_v27 = vmul.f32 %v565_v25, %v9216_v24 }
 0x1ef   :  { %v619_v28 = vmul.f32 0.5, %v618_v23 }
 0x1f0   :  { %v594_v29 = vsub.f32 %v578_v27, %v586_v26 }
 0x1f1   :  { %v620_v30 = vsub.f32 1.5, %v619_v28 }
 0x1f2   :  { %v8177_v31 = vpop.eup %8176  ;;  %v9232_v32 = vadd.f32 1e-05, %v594_v29 }
 0x1f3   :  { %v621_v33 = vmul.f32 %v8175_v18, %v620_v30  ;;  %v627_v34 = vmul.f32 %v8177_v31, %v609_v19  ;;  %v528_v35 = vpop.xlane.xlu2 %527  ;;  %vm633_vm5 = vweird.f32 %v8177_v31 }
 0x1f4   :  { %8178 = vrsqrt.f32 %v9232_v32  ;;  %v9236_v36 = vmul.f32 %v9216_v24, %v528_v35  ;;  %vm634_vm7 = vmor %vm632_vm6, %vm633_vm5  ;;  %vm642_vm9 = vweird.f32 %v9232_v32 }
 0x1f5   :  { %v628_v14 = vmul.f32 %v8177_v31, %v627_v34  ;;  %v532_v38 = vpop.xlane.xlu0 %531  ;;  %v567_v39 = vpop.xlane.xlu1 %566  ;;  %v625_v41 = vsel %vm624_vm4, %v8175_v18, %v621_v33  ;;  %v602_v34 = vsub.f32 %v9179_v56, %v9227_v22 }
 0x1f6   :  { %v587_v40 = vmul.f32 %v9236_v36, %v9236_v36  ;;  %v579_v43 = vmul.f32 %v567_v39, %v9216_v24  ;;  %v696_v49 = vmul.f32 %v625_v41, %v600_v44  ;;  %v9259_v51 = vmul.f32 %v9216_v24, %v532_v38 }
 0x1f7   :  { %v629_v42 = vmul.f32 0.5, %v628_v14 }
 0x1f8   :  { %v595_v46 = vsub.f32 %v579_v43, %v587_v40  ;;  %v707_v2 = vmul.f32 %v9243_v50, %v696_v49  ;;  %v589_v15 = vmul.f32 %v9259_v51, %v9259_v51 }
 0x1f9   :  { %v630_v45 = vsub.f32 1.5, %v629_v42 }
 0x1fa   :  { %v8179_v48 = vpop.eup %8178  ;;  %v9246_v54 = vadd.f32 1e-05, %v595_v46  ;;  %v9264_v11 = vadd.f32 %v9255_v0, %v707_v2 }
 0x1fb   :  { %v631_v52 = vmul.f32 %v8177_v31, %v630_v45  ;;  %v637_v53 = vmul.f32 %v8179_v48, %v9232_v32  ;;  %v530_v55 = vpop.xlane.xlu2 %529  ;;  %vm643_vm8 = vweird.f32 %v8179_v48  ;;  %v603_v45 = vsub.f32 %v9184_v62, %v9236_v36 }
 0x1fc   :  { %v9250_v58 = vmul.f32 %v9216_v24, %v530_v55  ;;  %8180 = vrsqrt.f32 %v9246_v54  ;;  %11797 = vst [vmem:[#allocation40_spill] sm:$0xff] %v9264_v11  ;;  %vm9280_vm10 = vmor %vm642_vm9, %vm643_vm8  ;;  %vm652_vm12 = vweird.f32 %v9246_v54 }
 0x1fd   :  { %v635_v47 = vsel %vm634_vm7, %v8177_v31, %v631_v52  ;;  %v638_v37 = vmul.f32 %v8179_v48, %v637_v53  ;;  %v534_v59 = vpop.xlane.xlu0 %533  ;;  %v569_v60 = vpop.xlane.xlu1 %568 }
 0x1fe   :  { %v697_v61 = vmul.f32 %v635_v47, %v601_v57  ;;  %v588_v63 = vmul.f32 %v9250_v58, %v9250_v58  ;;  %v580_v5 = vmul.f32 %v569_v60, %v9216_v24  ;;  %v9290_v32 = vmul.f32 %v9216_v24, %v534_v59 }
 0x1ff   :  { %v639_v4 = vmul.f32 0.5, %v638_v37 }
 0x200   :  { %v708_v7 = vmul.f32 %v9243_v50, %v697_v61  ;;  %v596_v10 = vsub.f32 %v580_v5, %v588_v63  ;;  %v590_v44 = vmul.f32 %v9290_v32, %v9290_v32 }
 0x201   :  { %v640_v8 = vsub.f32 1.5, %v639_v4 }
 0x202   :  { %v9267_v12 = vadd.f32 %v9255_v0, %v708_v7  ;;  %v8181_v13 = vpop.eup %8180  ;;  %v9271_v16 = vadd.f32 1e-05, %v596_v10 }
 0x203   :  { %v571_v17 = vpop.xlane.xlu2 %570  ;;  %v641_v18 = vmul.f32 %v8179_v48, %v640_v8  ;;  %v647_v19 = vmul.f32 %v8181_v13, %v9246_v54  ;;  %vm653_vm11 = vweird.f32 %v8181_v13 }
 0x204   :  { %11798 = vst [vmem:[#allocation41_spill] sm:$0xff] %v9267_v12  ;;  %v581_v20 = vmul.f32 %v571_v17, %v9216_v24  ;;  %v726_v21 = vpack.c.bf16 %v9267_v12, %v9264_v11  ;;  %8182 = vrsqrt.f32 %v9271_v16  ;;  %vm654_vm13 = vmor %vm652_vm12, %vm653_vm11  ;;  %vm662_vm15 = vweird.f32 %v9271_v16 }
 0x205   :  { %v536_v23 = vpop.xlane.xlu1 %535  ;;  %v648_v25 = vmul.f32 %v8181_v13, %v647_v19  ;;  %v575_v27 = vpop.xlane.xlu0 %574  ;;  %v645_v30 = vsel %vm9280_vm10, %v8179_v48, %v641_v18  ;;  %v604_v18 = vsub.f32 %v9192_v3, %v9250_v58 }
 0x206   :  { %v597_v26 = vsub.f32 %v581_v20, %v589_v15  ;;  %940 = vmatmul.bf16.vlgmr.msrb.gmra.mxu2 %v726_v21  ;;  %v9285_v29 = vmul.f32 %v9216_v24, %v536_v23  ;;  %969 = vmatmul.bf16.vlgmr.msrb.gmra.mxu3 %v726_v21  ;;  %v583_v35 = vmul.f32 %v575_v27, %v9216_v24 }
 0x207   :  { %998 = vmatmul.bf16.vlgmr.msrb.gmra.mxu0 %v726_v21  ;;  %v649_v31 = vmul.f32 0.5, %v648_v25  ;;  %1027 = vmatmul.bf16.vlgmr.msrb.gmra.mxu1 %v726_v21  ;;  %v698_v40 = vmul.f32 %v645_v30, %v602_v34  ;;  %v605_v20 = vsub.f32 %v9186_v1, %v9259_v51 }
 0x208   :  { %v613_v33 = vadd.f32 1e-05, %v597_v26  ;;  %v591_v14 = vmul.f32 %v9285_v29, %v9285_v29 }
 0x209   :  { %v650_v38 = vsub.f32 1.5, %v649_v31  ;;  %v709_v54 = vmul.f32 %v9243_v50, %v698_v40  ;;  %v607_v40 = vsub.f32 %v9200_v9, %v9285_v29  ;;  %v762_v9 = vld [vmem:[#allocation11] sm:$0xf] }
 0x20a   :  { %8184 = vrsqrt.f32 %v613_v33  ;;  %v8183_v39 = vpop.eup %8182  ;;  %v599_v41 = vsub.f32 %v583_v35, %v591_v14  ;;  %vm672_vm2 = vweird.f32 %v613_v33  ;;  %v9349_v29 = vperm.slane %v762_v9, 2 }
 0x20b   :  { %v573_v42 = vpop.xlane.xlu2 %572  ;;  %v651_v43 = vmul.f32 %v8181_v13, %v650_v38  ;;  %v657_v56 = vmul.f32 %v8183_v39, %v9271_v16  ;;  %v9307_v62 = vadd.f32 %v9255_v0, %v709_v54  ;;  %vm663_vm14 = vweird.f32 %v8183_v39 }
 0x20c   :  { %v582_v22 = vmul.f32 %v573_v42, %v9216_v24  ;;  %v615_v46 = vadd.f32 1e-05, %v599_v41  ;;  %vm9315_vm0 = vmor %vm662_vm15, %vm663_vm14  ;;  %v606_v38 = vsub.f32 %v9194_v6, %v9290_v32 }
 0x20d   :  { %v655_v48 = vsel %vm654_vm13, %v8181_v13, %v651_v43  ;;  %v658_v49 = vmul.f32 %v8183_v39, %v657_v56  ;;  %11801 = vst [vmem:[#allocation42_spill] sm:$0xff] %v9307_v62 }
 0x20e   :  { %v598_v52 = vsub.f32 %v582_v22, %v590_v44  ;;  %v699_v53 = vmul.f32 %v655_v48, %v603_v45  ;;  %8186 = vrsqrt.f32 %v615_v46  ;;  %vm692_vm8 = vweird.f32 %v615_v46 }
 0x20f   :  { %v659_v57 = vmul.f32 0.5, %v658_v49  ;;  %v9351_v22 = vperm.slane %v762_v9, 3  ;;  %v9357_v49 = vperm.slane %v762_v9, 1 }
 0x210   :  { %v8185_v55 = vpop.eup %8184  ;;  %v614_v47 = vadd.f32 1e-05, %v598_v52  ;;  %v710_v59 = vmul.f32 %v9243_v50, %v699_v53 }
 0x211   :  { %v667_v37 = vmul.f32 %v8185_v55, %v613_v33  ;;  %v660_v60 = vsub.f32 1.5, %v659_v57  ;;  %vm673_vm1 = vweird.f32 %v8185_v55 }
 0x212   :  { %8188 = vrsqrt.f32 %v614_v47  ;;  %v9310_v36 = vadd.f32 %v9255_v0, %v710_v59  ;;  %vm674_vm3 = vmor %vm672_vm2, %vm673_vm1  ;;  %vm682_vm6 = vweird.f32 %v614_v47 }
 0x213   :  { %v668_v61 = vmul.f32 %v8185_v55, %v667_v37  ;;  %v661_v63 = vmul.f32 %v8183_v39, %v660_v60 }
 0x214   :  { %11802 = vst [vmem:[#allocation43_spill] sm:$0xff] %v9310_v36  ;;  %v8187_v2 = vpop.eup %8186  ;;  %v727_v5 = vpack.c.bf16 %v9310_v36, %v9307_v62 }
 0x215   :  { %v669_v4 = vmul.f32 0.5, %v668_v61  ;;  %v687_v7 = vmul.f32 %v8187_v2, %v615_v46  ;;  %v665_v15 = vsel %vm9315_vm0, %v8183_v39, %v661_v63  ;;  %vm693_vm5 = vweird.f32 %v8187_v2  ;;  %v7928_v63 = vld [vmem:[#allocation13 + $0x38] sm:$0xff] }
 0x216   :  { %945 = vmatmul.bf16.gmra.mxu2 %v727_v5  ;;  %974 = vmatmul.bf16.gmra.mxu3 %v727_v5  ;;  %v700_v21 = vmul.f32 %v665_v15, %v604_v18  ;;  %vm694_vm9 = vmor %vm692_vm8, %vm693_vm5  ;;  %v7952_v15 = vld [vmem:[#allocation13 + $0xf8] sm:$0xff] }
 0x217   :  { %v670_v10 = vsub.f32 1.5, %v669_v4  ;;  %v688_v17 = vmul.f32 %v8187_v2, %v687_v7  ;;  %1003 = vmatmul.bf16.gmra.mxu0 %v727_v5  ;;  %1032 = vmatmul.bf16.gmra.mxu1 %v727_v5 }
 0x218   :  { %v8189_v13 = vpop.eup %8188  ;;  %v711_v34 = vmul.f32 %v9243_v50, %v700_v21  ;;  %2044 = vmatpush.bf16.msra.mxu2 %v7928_v63  ;;  %2131 = vmatpush.bf16.msra.mxu1 %v7952_v15 }
 0x219   :  { %v671_v16 = vmul.f32 %v8185_v55, %v670_v10  ;;  %v677_v19 = vmul.f32 %v8189_v13, %v614_v47  ;;  %v689_v27 = vmul.f32 0.5, %v688_v17  ;;  %vm683_vm4 = vweird.f32 %v8189_v13 }
 0x21a   :  { %v9331_v1 = vadd.f32 %v9255_v0, %v711_v34  ;;  %vm684_vm7 = vmor %vm682_vm6, %vm683_vm4 }
 0x21b   :  { %v675_v23 = vsel %vm674_vm3, %v8185_v55, %v671_v16  ;;  %v678_v25 = vmul.f32 %v8189_v13, %v677_v19  ;;  %v690_v35 = vsub.f32 1.5, %v689_v27 }
 0x21c   :  { %v701_v26 = vmul.f32 %v675_v23, %v605_v20  ;;  %11806 = vst [vmem:[#allocation45_spill] sm:$0xff] %v9331_v1 }
 0x21d   :  { %v679_v28 = vmul.f32 0.5, %v678_v25  ;;  %v691_v51 = vmul.f32 %v8187_v2, %v690_v35 }
 0x21e   :  { %v712_v30 = vmul.f32 %v9243_v50, %v701_v26 }
 0x21f   :  { %v680_v31 = vsub.f32 1.5, %v679_v28  ;;  %v695_v39 = vsel %vm694_vm9, %v8187_v2, %v691_v51  ;;  %v7936_v2 = vld [vmem:[#allocation13 + $0x78] sm:$0xff] }
 0x220   :  { %v9328_v3 = vadd.f32 %v9255_v0, %v712_v30  ;;  %v703_v42 = vmul.f32 %v695_v39, %v607_v40  ;;  %2073 = vmatpush.bf16.msra.mxu3 %v7936_v2 }
 0x221   :  { %v681_v58 = vmul.f32 %v8189_v13, %v680_v31 }
 0x222   :  { %11805 = vst [vmem:[#allocation44_spill] sm:$0xff] %v9328_v3  ;;  %v728_v33 = vpack.c.bf16 %v9328_v3, %v9331_v1  ;;  %v714_v44 = vmul.f32 %v9243_v50, %v703_v42  ;;  %v7929_v3 = vld [vmem:[#allocation13 + $0x40] sm:$0xff] }
 0x223   :  { %v685_v14 = vsel %vm684_vm7, %v8189_v13, %v681_v58  ;;  %v7944_v13 = vld [vmem:[#allocation13 + $0xb8] sm:$0xff] }
 0x224   :  { %v702_v41 = vmul.f32 %v685_v14, %v606_v38  ;;  %v9345_v6 = vadd.f32 %v9255_v0, %v714_v44  ;;  %2102 = vmatpush.bf16.msra.mxu0 %v7944_v13 }
 0x226   :  { %950 = vmatmul.bf16.gmra.mxu2 %v728_v33  ;;  %979 = vmatmul.bf16.gmra.mxu3 %v728_v33  ;;  %v713_v43 = vmul.f32 %v9243_v50, %v702_v41  ;;  %11808 = vst [vmem:[#allocation47_spill] sm:$0xff] %v9345_v6 }
 0x227   :  { %1008 = vmatmul.bf16.gmra.mxu0 %v728_v33  ;;  %1037 = vmatmul.bf16.gmra.mxu1 %v728_v33 }
 0x228   :  { %v9342_v56 = vadd.f32 %v9255_v0, %v713_v43  ;;  %v9355_v0 = vperm.slane %v762_v9, 0 }
 0x22a   :  { %11807 = vst [vmem:[#allocation46_spill] sm:$0xff] %v9342_v56  ;;  %v729_v32 = vpack.c.bf16 %v9345_v6, %v9342_v56  ;;  %v7921_v56 = vld [vmem:[#allocation13] sm:$0xff] }
 0x236   :  { %955 = vmatmul.bf16.gmra.mxu2 %v729_v32  ;;  %984 = vmatmul.bf16.gmra.mxu3 %v729_v32 }
 0x237   :  { %1013 = vmatmul.bf16.gmra.mxu0 %v729_v32  ;;  %1042 = vmatmul.bf16.gmra.mxu1 %v729_v32 }
 0x284   :  { %v999_v45 = vpop.f32.mrf.mxu0  ;;  %v1028_v46 = vpop.f32.mrf.mxu1 }
 0x285   :  { %v1000_v50 = vadd.f32 %v999_v45, %v9349_v29  ;;  %v1029_v48 = vadd.f32 %v1028_v46, %v9351_v22 }
 0x287   :  { %v1049_v52 = vpack.c.bf16 %v1029_v48, %v1000_v50 }
 0x289   :  { %v941_v53 = vpop.f32.mrf.mxu2  ;;  %v9359_v54 = vunpack.c.l.bf16 %v1049_v52  ;;  %v9361_v55 = vunpack.c.h.bf16 %v1049_v52  ;;  %v970_v47 = vpop.f32.mrf.mxu3 }
 0x28a   :  { %v942_v57 = vadd.f32 %v941_v53, %v9355_v0  ;;  %v971_v37 = vadd.f32 %v970_v47, %v9357_v49 }
 0x28b   :  { %v1146_v59 = vmul.f32 0.044677734, %v9359_v54  ;;  %v1147_v60 = vmul.f32 0.044677734, %v9361_v55 }
 0x28c   :  { %v1001_v61 = vpop.f32.mrf.mxu0  ;;  %v1048_v4 = vpack.c.bf16 %v971_v37, %v942_v57  ;;  %v1030_v7 = vpop.f32.mrf.mxu1  ;;  %v7927_v37 = vld [vmem:[#allocation13 + $0x30] sm:$0xff] }
 0x28d   :  { %v1002_v5 = vadd.f32 %v1001_v61, %v9349_v29  ;;  %v1177_v8 = vpack.c.bf16 %v1147_v60, %v1146_v59  ;;  %v1031_v10 = vadd.f32 %v1030_v7, %v9351_v22  ;;  %v7935_v59 = vld [vmem:[#allocation13 + $0x70] sm:$0xff]  ;;  %2045 = vmatpush.bf16.msra.mxu2 %v7927_v37 }
 0x28e   :  { %v9369_v17 = vunpack.c.l.bf16 %v1048_v4  ;;  %v9371_v18 = vunpack.c.h.bf16 %v1048_v4  ;;  %v7943_v4 = vld [vmem:[#allocation13 + $0xb0] sm:$0xff]  ;;  %2074 = vmatpush.bf16.msra.mxu3 %v7935_v59 }
 0x28f   :  { %v1194_v16 = vunpack.c.l.bf16 %v1177_v8  ;;  %v1195_v19 = vunpack.c.h.bf16 %v1177_v8  ;;  %v1051_v20 = vpack.c.bf16 %v1031_v10, %v1002_v5  ;;  %v7951_v5 = vld [vmem:[#allocation13 + $0xf0] sm:$0xff]  ;;  %2103 = vmatpush.bf16.msra.mxu0 %v7943_v4 }
 0x290   :  { %v1144_v21 = vmul.f32 0.044677734, %v9369_v17  ;;  %v1145_v23 = vmul.f32 0.044677734, %v9371_v18  ;;  %2132 = vmatpush.bf16.msra.mxu1 %v7951_v5  ;;  %v7926_v5 = vld [vmem:[#allocation13 + $0x28] sm:$0xff] }
 0x291   :  { %v943_v25 = vpop.f32.mrf.mxu2  ;;  %v1226_v26 = vmul.f32 %v1194_v16, %v9359_v54  ;;  %v1227_v27 = vmul.f32 %v1195_v19, %v9361_v55  ;;  %v9377_v28 = vunpack.c.l.bf16 %v1051_v20  ;;  %v9379_v30 = vunpack.c.h.bf16 %v1051_v20  ;;  %v972_v31 = vpop.f32.mrf.mxu3  ;;  %2046 = vmatpush.bf16.msra.mxu2 %v7926_v5 }
 0x292   :  { %v1176_v34 = vpack.c.bf16 %v1145_v23, %v1144_v21  ;;  %v944_v35 = vadd.f32 %v943_v25, %v9355_v0  ;;  %v973_v58 = vadd.f32 %v972_v31, %v9357_v49 }
 0x293   :  { %v1257_v51 = vpack.c.bf16 %v1227_v27, %v1226_v26  ;;  %v1150_v33 = vmul.f32 0.044677734, %v9377_v28  ;;  %v1151_v14 = vmul.f32 0.044677734, %v9379_v30 }
 0x294   :  { %v1192_v38 = vunpack.c.l.bf16 %v1176_v34  ;;  %v1193_v39 = vunpack.c.h.bf16 %v1176_v34  ;;  %v1050_v40 = vpack.c.bf16 %v973_v58, %v944_v35  ;;  %v1004_v41 = vpop.f32.mrf.mxu0  ;;  %v1033_v9 = vpop.f32.mrf.mxu1 }
 0x295   :  { %v1274_v42 = vunpack.c.l.bf16 %v1257_v51  ;;  %v1275_v43 = vunpack.c.h.bf16 %v1257_v51  ;;  %v1179_v44 = vpack.c.bf16 %v1151_v14, %v1150_v33  ;;  %v1005_v32 = vadd.f32 %v1004_v41, %v9349_v29  ;;  %v7942_v33 = vld [vmem:[#allocation13 + $0xa8] sm:$0xff] }
 0x296   :  { %v1224_v45 = vmul.f32 %v1192_v38, %v9369_v17  ;;  %v1225_v50 = vmul.f32 %v1193_v39, %v9371_v18  ;;  %v9388_v46 = vunpack.c.l.bf16 %v1050_v40  ;;  %v9390_v48 = vunpack.c.h.bf16 %v1050_v40  ;;  %v7950_v14 = vld [vmem:[#allocation13 + $0xe8] sm:$0xff]  ;;  %2104 = vmatpush.bf16.msra.mxu0 %v7942_v33  ;;  %v7925_v33 = vld [vmem:[#allocation13 + $0x20] sm:$0xff] }
 0x297   :  { %v1306_v52 = vmul.f32 %v1274_v42, %v9359_v54  ;;  %v1307_v53 = vmul.f32 %v1275_v43, %v9361_v55  ;;  %v1198_v57 = vunpack.c.l.bf16 %v1179_v44  ;;  %v1199_v47 = vunpack.c.h.bf16 %v1179_v44  ;;  %2133 = vmatpush.bf16.msra.mxu1 %v7950_v14  ;;  %v7933_v14 = vld [vmem:[#allocation13 + $0x60] sm:$0xff]  ;;  %2047 = vmatpush.bf16.msra.mxu2 %v7925_v33 }
 0x298   :  { %v1256_v60 = vpack.c.bf16 %v1225_v50, %v1224_v45  ;;  %v1148_v61 = vmul.f32 0.044677734, %v9388_v46  ;;  %v1149_v63 = vmul.f32 0.044677734, %v9390_v48  ;;  %v1034_v2 = vadd.f32 %v1033_v9, %v9351_v22 }
 0x299   :  { %v1337_v7 = vpack.c.bf16 %v1307_v53, %v1306_v52  ;;  %v1230_v8 = vmul.f32 %v1198_v57, %v9377_v28  ;;  %v1231_v10 = vmul.f32 %v1199_v47, %v9379_v30  ;;  %v946_v53 = vpop.f32.mrf.mxu2 }
 0x29a   :  { %v1272_v13 = vunpack.c.l.bf16 %v1256_v60  ;;  %v1273_v15 = vunpack.c.h.bf16 %v1256_v60  ;;  %v1178_v16 = vpack.c.bf16 %v1149_v63, %v1148_v61  ;;  %v1053_v19 = vpack.c.bf16 %v1034_v2, %v1005_v32  ;;  %v975_v60 = vpop.f32.mrf.mxu3 }
 0x29b   :  { %v1354_v20 = vunpack.c.l.bf16 %v1337_v7  ;;  %v1355_v21 = vunpack.c.h.bf16 %v1337_v7  ;;  %v1259_v23 = vpack.c.bf16 %v1231_v10, %v1230_v8  ;;  %v7934_v7 = vld [vmem:[#allocation13 + $0x68] sm:$0xff] }
 0x29c   :  { %v1304_v25 = vmul.f32 %v1272_v13, %v9369_v17  ;;  %v1305_v26 = vmul.f32 %v1273_v15, %v9371_v18  ;;  %v1196_v27 = vunpack.c.l.bf16 %v1178_v16  ;;  %v1197_v31 = vunpack.c.h.bf16 %v1178_v16  ;;  %v1006_v15 = vpop.f32.mrf.mxu0  ;;  %2075 = vmatpush.bf16.msra.mxu3 %v7934_v7 }
 0x29d   :  { %v1386_v34 = vadd.f32 %v1354_v20, %v9359_v54  ;;  %v1387_v35 = vadd.f32 %v1355_v21, %v9361_v55  ;;  %v1278_v58 = vunpack.c.l.bf16 %v1259_v23  ;;  %v1279_v51 = vunpack.c.h.bf16 %v1259_v23  ;;  %v1035_v23 = vpop.f32.mrf.mxu1 }
 0x29e   :  { %v1336_v38 = vpack.c.bf16 %v1305_v26, %v1304_v25  ;;  %v1228_v39 = vmul.f32 %v1196_v27, %v9388_v46  ;;  %v1229_v40 = vmul.f32 %v1197_v31, %v9390_v48  ;;  %v9405_v41 = vunpack.c.l.bf16 %v1053_v19 }
 0x29f   :  { %v1417_v42 = vpack.c.bf16 %v1387_v35, %v1386_v34  ;;  %v1310_v43 = vmul.f32 %v1278_v58, %v9377_v28  ;;  %v1311_v44 = vmul.f32 %v1279_v51, %v9379_v30  ;;  %v9409_v32 = vunpack.c.h.bf16 %v1053_v19 }
 0x2a0   :  { %v1352_v9 = vunpack.c.l.bf16 %v1336_v38  ;;  %v1353_v45 = vunpack.c.h.bf16 %v1336_v38  ;;  %v1258_v50 = vpack.c.bf16 %v1229_v40, %v1228_v39  ;;  %v1154_v52 = vmul.f32 0.044677734, %v9405_v41  ;;  %2076 = vmatpush.bf16.msra.mxu3 %v7933_v14 }
 0x2a1   :  { %v1434_v57 = vunpack.c.l.bf16 %v1417_v42  ;;  %v1435_v47 = vunpack.c.h.bf16 %v1417_v42  ;;  %v1339_v37 = vpack.c.bf16 %v1311_v44, %v1310_v43  ;;  %v1155_v59 = vmul.f32 0.044677734, %v9409_v32 }
 0x2a2   :  { %v1384_v61 = vadd.f32 %v1352_v9, %v9369_v17  ;;  %v1385_v63 = vadd.f32 %v1353_v45, %v9371_v18  ;;  %v1276_v2 = vunpack.c.l.bf16 %v1258_v50  ;;  %v1277_v4 = vunpack.c.h.bf16 %v1258_v50  ;;  %v948_v45 = vpop.f32.mrf.mxu2  ;;  %v7941_v50 = vld [vmem:[#allocation13 + $0xa0] sm:$0xff] }
 0x2a3   :  { %v1358_v8 = vunpack.c.l.bf16 %v1339_v37  ;;  %v1359_v10 = vunpack.c.h.bf16 %v1339_v37  ;;  %v947_v13 = vadd.f32 %v946_v53, %v9355_v0  ;;  %v1181_v19 = vpack.c.bf16 %v1155_v59, %v1154_v52  ;;  %v7949_v52 = vld [vmem:[#allocation13 + $0xe0] sm:$0xff]  ;;  %2105 = vmatpush.bf16.msra.mxu0 %v7941_v50 }
 0x2a4   :  { %v9416_v16 = vpack.c.bf16 %v1385_v63, %v1384_v61  ;;  %v1466_v20 = vmul.f32 0.796875, %v1434_v57  ;;  %v976_v21 = vadd.f32 %v975_v60, %v9357_v49  ;;  %v1467_v25 = vmul.f32 0.796875, %v1435_v47  ;;  %v977_v60 = vpop.f32.mrf.mxu3  ;;  %2134 = vmatpush.bf16.msra.mxu1 %v7949_v52  ;;  %v7940_v52 = vld [vmem:[#allocation13 + $0x98] sm:$0xff] }
 0x2a5   :  { %v1308_v26 = vmul.f32 %v1276_v2, %v9388_v46  ;;  %v1309_v27 = vmul.f32 %v1277_v4, %v9390_v48  ;;  %v1202_v31 = vunpack.c.l.bf16 %v1181_v19  ;;  %v1390_v34 = vadd.f32 %v1358_v8, %v9377_v28  ;;  %v1009_v8 = vpop.f32.mrf.mxu0 }
 0x2a6   :  { %v1391_v35 = vadd.f32 %v1359_v10, %v9379_v30  ;;  %v1203_v58 = vunpack.c.h.bf16 %v1181_v19  ;;  %v1052_v51 = vpack.c.bf16 %v976_v21, %v947_v13  ;;  %v1432_v38 = vunpack.c.l.bf16 %v9416_v16 }
 0x2a7   :  { %v1234_v39 = vmul.f32 %v1202_v31, %v9405_v41  ;;  %v9427_v42 = vmul.f32 0.5, %v9359_v54  ;;  %v1338_v43 = vpack.c.bf16 %v1309_v27, %v1308_v26  ;;  %v1007_v9 = vadd.f32 %v1006_v15, %v9349_v29  ;;  %2106 = vmatpush.bf16.msra.mxu0 %v7940_v52 }
 0x2a8   :  { %v1235_v40 = vmul.f32 %v1203_v58, %v9409_v32  ;;  %v9429_v44 = vunpack.c.l.bf16 %v1052_v51  ;;  %v9433_v53 = vmul.f32 0.5, %v9361_v55  ;;  %v9435_v57 = vpack.c.bf16 %v1467_v25, %v1466_v20  ;;  %v1038_v25 = vpop.f32.mrf.mxu1 }
 0x2a9   :  { %v1419_v47 = vpack.c.bf16 %v1391_v35, %v1390_v34  ;;  %v9437_v59 = vunpack.c.h.bf16 %v1052_v51  ;;  %v1433_v54 = vunpack.c.h.bf16 %v9416_v16  ;;  %v9440_v61 = vmul.f32 0.796875, %v1432_v38 }
 0x2aa   :  { %11809 = vst [vmem:[#allocation48_spill] sm:$0xff] %v9429_v44  ;;  %v1261_v37 = vpack.c.bf16 %v1235_v40, %v1234_v39  ;;  %v1152_v63 = vmul.f32 0.044677734, %v9429_v44  ;;  %v1036_v2 = vadd.f32 %v1035_v23, %v9351_v22  ;;  %v949_v7 = vadd.f32 %v948_v45, %v9355_v0 }
 0x2ab   :  { %11810 = vst [vmem:[#allocation49_spill] sm:$0xff] %v9437_v59  ;;  %v1153_v5 = vmul.f32 0.044677734, %v9437_v59  ;;  %v1356_v10 = vunpack.c.l.bf16 %v1338_v43  ;;  %v1357_v13 = vunpack.c.h.bf16 %v1338_v43  ;;  %v978_v16 = vadd.f32 %v977_v60, %v9357_v49 }
 0x2ac   :  { %v1282_v4 = vunpack.c.l.bf16 %v1261_v37  ;;  %v1283_v55 = vunpack.c.h.bf16 %v1261_v37  ;;  %v1055_v15 = vpack.c.bf16 %v1036_v2, %v1007_v9  ;;  %v1438_v19 = vunpack.c.l.bf16 %v1419_v47  ;;  %v7924_v2 = vld [vmem:[#allocation13 + $0x18] sm:$0xff] }
 0x2ad   :  { %v1180_v23 = vpack.c.bf16 %v1153_v5, %v1152_v63  ;;  %v1439_v26 = vunpack.c.h.bf16 %v1419_v47  ;;  %v1010_v34 = vadd.f32 %v1009_v8, %v9349_v29  ;;  %v1054_v33 = vpack.c.bf16 %v978_v16, %v949_v7  ;;  %v7948_v47 = vld [vmem:[#allocation13 + $0xd8] sm:$0xff]  ;;  %2048 = vmatpush.bf16.msra.mxu2 %v7924_v2  ;;  %v980_v2 = vpop.f32.mrf.mxu3  ;;  %v1011_v24 = vpop.f32.mrf.mxu0 }
 0x2ae   :  { %v1314_v20 = vmul.f32 %v1282_v4, %v9405_v41  ;;  %v1315_v21 = vmul.f32 %v1283_v55, %v9409_v32  ;;  %v9449_v27 = vunpack.c.l.bf16 %v1055_v15  ;;  %v9451_v31 = vunpack.c.h.bf16 %v1055_v15  ;;  %v7932_v4 = vld [vmem:[#allocation13 + $0x58] sm:$0xff]  ;;  %2135 = vmatpush.bf16.msra.mxu1 %v7948_v47 }
 0x2af   :  { %v1200_v58 = vunpack.c.l.bf16 %v1180_v23  ;;  %v1201_v51 = vunpack.c.h.bf16 %v1180_v23  ;;  %v9454_v14 = vmul.f32 0.796875, %v1433_v54  ;;  %v1039_v40 = vadd.f32 %v1038_v25, %v9351_v22  ;;  %2077 = vmatpush.bf16.msra.mxu3 %v7932_v4 }
 0x2b0   :  { %v1341_v35 = vpack.c.bf16 %v1315_v21, %v1314_v20  ;;  %v1158_v38 = vmul.f32 0.044677734, %v9449_v27  ;;  %v1159_v39 = vmul.f32 0.044677734, %v9451_v31  ;;  %v1388_v43 = vadd.f32 %v1356_v10, %v9388_v46  ;;  %v1040_v6 = vpop.f32.mrf.mxu1 }
 0x2b1   :  { %v1389_v9 = vadd.f32 %v1357_v13, %v9390_v48  ;;  %v1232_v45 = vmul.f32 %v1200_v58, %v9429_v44  ;;  %v1233_v50 = vmul.f32 %v1201_v51, %v9437_v59  ;;  %v9463_v60 = vunpack.c.l.bf16 %v1054_v33  ;;  %v951_v51 = vpop.f32.mrf.mxu2 }
 0x2b2   :  { %v1183_v37 = vpack.c.bf16 %v1159_v39, %v1158_v38  ;;  %v9465_v54 = vunpack.c.h.bf16 %v1054_v33  ;;  %v1057_v63 = vpack.c.bf16 %v1039_v40, %v1010_v34  ;;  %v9467_v55 = vmul.f32 0.796875, %v1438_v19  ;;  %v7939_v40 = vld [vmem:[#allocation13 + $0x90] sm:$0xff] }
 0x2b3   :  { %11811 = vst [vmem:[#allocation50_spill] sm:$0xff] %v9463_v60  ;;  %v9469_v5 = vmul.f32 0.796875, %v1439_v26  ;;  %v1362_v7 = vunpack.c.l.bf16 %v1341_v35  ;;  %v1260_v8 = vpack.c.bf16 %v1233_v50, %v1232_v45  ;;  %v1156_v15 = vmul.f32 0.044677734, %v9463_v60  ;;  %v7947_v45 = vld [vmem:[#allocation13 + $0xd0] sm:$0xff]  ;;  %2107 = vmatpush.bf16.msra.mxu0 %v7939_v40  ;;  %v7946_v40 = vld [vmem:[#allocation13 + $0xc8] sm:$0xff] }
 0x2b4   :  { %11812 = vst [vmem:[#allocation51_spill] sm:$0xff] %v9465_v54  ;;  %v1206_v10 = vunpack.c.l.bf16 %v1183_v37  ;;  %v1207_v13 = vunpack.c.h.bf16 %v1183_v37  ;;  %v1157_v16 = vmul.f32 0.044677734, %v9465_v54  ;;  %v1363_v20 = vunpack.c.h.bf16 %v1341_v35  ;;  %2136 = vmatpush.bf16.msra.mxu1 %v7947_v45 }
 0x2b5   :  { %v1280_v21 = vunpack.c.l.bf16 %v1260_v8  ;;  %v1281_v23 = vunpack.c.h.bf16 %v1260_v8  ;;  %v9473_v25 = vunpack.c.l.bf16 %v1057_v63  ;;  %v9477_v58 = vunpack.c.h.bf16 %v1057_v63 }
 0x2b6   :  { %v1238_v19 = vmul.f32 %v1206_v10, %v9449_v27  ;;  %v1239_v26 = vmul.f32 %v1207_v13, %v9451_v31  ;;  %v1182_v34 = vpack.c.bf16 %v1157_v16, %v1156_v15  ;;  %v9479_v33 = vpack.c.bf16 %v1389_v9, %v1388_v43 }
 0x2b7   :  { %11813 = vst [vmem:[#allocation52_spill] sm:$0xff] %v9473_v25  ;;  %v1394_v38 = vadd.f32 %v1362_v7, %v9405_v41  ;;  %v1312_v39 = vmul.f32 %v1280_v21, %v9429_v44  ;;  %v1313_v35 = vmul.f32 %v1281_v23, %v9437_v59  ;;  %v1162_v37 = vmul.f32 0.044677734, %v9473_v25 }
 0x2b8   :  { %11814 = vst [vmem:[#allocation53_spill] sm:$0xff] %v9477_v58  ;;  %v1263_v50 = vpack.c.bf16 %v1239_v26, %v1238_v19  ;;  %v1204_v52 = vunpack.c.l.bf16 %v1182_v34  ;;  %v1205_v47 = vunpack.c.h.bf16 %v1182_v34  ;;  %v1395_v63 = vadd.f32 %v1363_v20, %v9409_v32  ;;  %v7923_v19 = vld [vmem:[#allocation13 + $0x10] sm:$0xff]  ;;  %2137 = vmatpush.bf16.msra.mxu1 %v7946_v40 }
 0x2b9   :  { %v1340_v4 = vpack.c.bf16 %v1313_v35, %v1312_v39  ;;  %v1163_v43 = vmul.f32 0.044677734, %v9477_v58  ;;  %v952_v9 = vadd.f32 %v951_v51, %v9355_v0  ;;  %v981_v23 = vadd.f32 %v980_v2, %v9357_v49  ;;  %v7931_v20 = vld [vmem:[#allocation13 + $0x50] sm:$0xff]  ;;  %v7938_v35 = vld [vmem:[#allocation13 + $0x88] sm:$0xff]  ;;  %2049 = vmatpush.bf16.msra.mxu2 %v7923_v19 }
 0x2ba   :  { %v1286_v7 = vunpack.c.l.bf16 %v1263_v50  ;;  %v1287_v8 = vunpack.c.h.bf16 %v1263_v50  ;;  %v1236_v10 = vmul.f32 %v1204_v52, %v9463_v60  ;;  %v1237_v13 = vmul.f32 %v1205_v47, %v9465_v54  ;;  %2078 = vmatpush.bf16.msra.mxu3 %v7931_v20  ;;  %2108 = vmatpush.bf16.msra.mxu0 %v7938_v35  ;;  %v7930_v35 = vld [vmem:[#allocation13 + $0x48] sm:$0xff] }
 0x2bb   :  { %v1360_v15 = vunpack.c.l.bf16 %v1340_v4  ;;  %v1361_v16 = vunpack.c.h.bf16 %v1340_v4  ;;  %v1185_v21 = vpack.c.bf16 %v1163_v43, %v1162_v37  ;;  %v1436_v26 = vunpack.c.l.bf16 %v9479_v33 }
 0x2bc   :  { %v1318_v34 = vmul.f32 %v1286_v7, %v9449_v27  ;;  %v1319_v51 = vmul.f32 %v1287_v8, %v9451_v31  ;;  %v1262_v39 = vpack.c.bf16 %v1237_v13, %v1236_v10  ;;  %v1056_v43 = vpack.c.bf16 %v981_v23, %v952_v9 }
 0x2bd   :  { %v1392_v45 = vadd.f32 %v1360_v15, %v9429_v44  ;;  %v1393_v50 = vadd.f32 %v1361_v16, %v9437_v59  ;;  %v1210_v52 = vunpack.c.l.bf16 %v1185_v21  ;;  %v1211_v47 = vunpack.c.h.bf16 %v1185_v21 }
 0x2be   :  { %v1343_v37 = vpack.c.bf16 %v1319_v51, %v1318_v34  ;;  %v1284_v2 = vunpack.c.l.bf16 %v1262_v39  ;;  %v1285_v4 = vunpack.c.h.bf16 %v1262_v39  ;;  %v1437_v7 = vunpack.c.h.bf16 %v9479_v33  ;;  %v7922_v39 = vld [vmem:[#allocation13 + $0x8] sm:$0xff]  ;;  %2079 = vmatpush.bf16.msra.mxu3 %v7930_v35 }
 0x2bf   :  { %v1421_v8 = vpack.c.bf16 %v1395_v63, %v1394_v38  ;;  %v1242_v10 = vmul.f32 %v1210_v52, %v9473_v25  ;;  %v1243_v13 = vmul.f32 %v1211_v47, %v9477_v58  ;;  %v9501_v34 = vunpack.c.l.bf16 %v1056_v43  ;;  %2050 = vmatpush.bf16.msra.mxu2 %v7922_v39 }
 0x2c0   :  { %v1366_v15 = vunpack.c.l.bf16 %v1343_v37  ;;  %v1367_v16 = vunpack.c.h.bf16 %v1343_v37  ;;  %v1316_v21 = vmul.f32 %v1284_v2, %v9463_v60  ;;  %v1317_v19 = vmul.f32 %v1285_v4, %v9465_v54 }
 0x2c1   :  { %v1265_v20 = vpack.c.bf16 %v1243_v13, %v1242_v10  ;;  %11815 = vst [vmem:[#allocation54_spill] sm:$0xff] %v9501_v34  ;;  %v1012_v9 = vadd.f32 %v1011_v24, %v9349_v29  ;;  %v1041_v23 = vadd.f32 %v1040_v6, %v9351_v22  ;;  %v1420_v51 = vpack.c.bf16 %v1393_v50, %v1392_v45  ;;  %v953_v13 = vpop.f32.mrf.mxu2 }
 0x2c2   :  { %v1398_v33 = vadd.f32 %v1366_v15, %v9449_v27  ;;  %v1399_v38 = vadd.f32 %v1367_v16, %v9451_v31  ;;  %v9507_v63 = vunpack.c.h.bf16 %v1056_v43  ;;  %v1468_v40 = vmul.f32 0.796875, %v1436_v26  ;;  %v982_v16 = vpop.f32.mrf.mxu3  ;;  %2080 = vmatpush.bf16.msra.mxu3 %v7929_v3 }
 0x2c3   :  { %v1469_v52 = vmul.f32 0.796875, %v1437_v7  ;;  %v1290_v47 = vunpack.c.l.bf16 %v1265_v20  ;;  %v1291_v37 = vunpack.c.h.bf16 %v1265_v20  ;;  %v1442_v2 = vunpack.c.l.bf16 %v1421_v8  ;;  %2051 = vmatpush.bf16.msra.mxu2 %v7921_v56 }
 0x2c4   :  { %11816 = vst [vmem:[#allocation55_spill] sm:$0xff] %v9507_v63  ;;  %v1443_v4 = vunpack.c.h.bf16 %v1421_v8  ;;  %v1342_v10 = vpack.c.bf16 %v1317_v19, %v1316_v21  ;;  %v1160_v24 = vmul.f32 0.044677734, %v9501_v34  ;;  %v9512_v6 = vpack.c.bf16 %v9454_v14, %v9440_v61  ;;  %v7937_v21 = vld [vmem:[#allocation13 + $0x80] sm:$0xff] }
 0x2c5   :  { %v9514_v45 = vpack.c.bf16 %v1399_v38, %v1398_v33  ;;  %v1161_v50 = vmul.f32 0.044677734, %v9507_v63  ;;  %v1059_v26 = vpack.c.bf16 %v1041_v23, %v1012_v9  ;;  %v9519_v43 = vpack.c.bf16 %v9469_v5, %v9467_v55  ;;  %v7945_v19 = vld [vmem:[#allocation13 + $0xc0] sm:$0xff]  ;;  %v1014_v23 = vpop.f32.mrf.mxu0  ;;  %2109 = vmatpush.bf16.msra.mxu0 %v7937_v21 }
 0x2c6   :  { %v1440_v7 = vunpack.c.l.bf16 %v1420_v51  ;;  %v1441_v8 = vunpack.c.h.bf16 %v1420_v51  ;;  %v1322_v15 = vmul.f32 %v1290_v47, %v9473_v25  ;;  %v1323_v20 = vmul.f32 %v1291_v37, %v9477_v58  ;;  %v1043_v51 = vpop.f32.mrf.mxu1  ;;  %2138 = vmatpush.bf16.msra.mxu1 %v7945_v19 }
 0x2c7   :  { %v1184_v61 = vpack.c.bf16 %v1161_v50, %v1160_v24  ;;  %v9523_v14 = vunpack.c.l.bf16 %v1059_v26  ;;  %v9525_v33 = vunpack.c.h.bf16 %v1059_v26  ;;  %v9527_v38 = vpack.c.bf16 %v1469_v52, %v1468_v40 }
 0x2c8   :  { %v9529_v9 = vmul.f32 0.796875, %v1442_v2  ;;  %v9531_v55 = vmul.f32 0.796875, %v1443_v4  ;;  %v1364_v5 = vunpack.c.l.bf16 %v1342_v10  ;;  %v1446_v39 = vunpack.c.l.bf16 %v9514_v45 }
 0x2c9   :  { %11817 = vst [vmem:[#allocation56_spill] sm:$0xff] %v9523_v14  ;;  %v1365_v35 = vunpack.c.h.bf16 %v1342_v10  ;;  %v1208_v47 = vunpack.c.l.bf16 %v1184_v61  ;;  %v1209_v37 = vunpack.c.h.bf16 %v1184_v61  ;;  %v9534_v24 = vmul.f32 0.796875, %v1440_v7  ;;  %v956_v19 = vpop.f32.mrf.mxu2 }
 0x2ca   :  { %v1166_v50 = vmul.f32 0.044677734, %v9523_v14  ;;  %v1167_v40 = vmul.f32 0.044677734, %v9525_v33  ;;  %v954_v52 = vadd.f32 %v953_v13, %v9355_v0  ;;  %v9539_v2 = vmul.f32 0.796875, %v1441_v8 }
 0x2cb   :  { %v1345_v4 = vpack.c.bf16 %v1323_v20, %v1322_v15  ;;  %v1240_v26 = vmul.f32 %v1208_v47, %v9501_v34  ;;  %v1241_v21 = vmul.f32 %v1209_v37, %v9507_v63  ;;  %v1396_v10 = vadd.f32 %v1364_v5, %v9463_v60 }
 0x2cc   :  { %v1187_v61 = vpack.c.bf16 %v1167_v40, %v1166_v50  ;;  %v983_v7 = vadd.f32 %v982_v16, %v9357_v49  ;;  %v9546_v1 = vmul.f32 0.796875, %v1446_v39  ;;  %v1397_v13 = vadd.f32 %v1365_v35, %v9465_v54 }
 0x2cd   :  { %v1264_v8 = vpack.c.bf16 %v1241_v21, %v1240_v26  ;;  %v1015_v15 = vadd.f32 %v1014_v23, %v9349_v29  ;;  %v1044_v37 = vadd.f32 %v1043_v51, %v9351_v22  ;;  %v1370_v5 = vunpack.c.l.bf16 %v1345_v4  ;;  %v985_v23 = vpop.f32.mrf.mxu3 }
 0x2ce   :  { %v1214_v20 = vunpack.c.l.bf16 %v1187_v61  ;;  %v1215_v47 = vunpack.c.h.bf16 %v1187_v61  ;;  %v1058_v36 = vpack.c.bf16 %v983_v7, %v954_v52  ;;  %v1371_v50 = vunpack.c.h.bf16 %v1345_v4 }
 0x2cf   :  { %v1288_v16 = vunpack.c.l.bf16 %v1264_v8  ;;  %v1289_v40 = vunpack.c.h.bf16 %v1264_v8  ;;  %v1422_v21 = vpack.c.bf16 %v1397_v13, %v1396_v10  ;;  %v957_v3 = vadd.f32 %v956_v19, %v9355_v0  ;;  %v1016_v8 = vpop.f32.mrf.mxu0 }
 0x2d0   :  { %v1246_v39 = vmul.f32 %v1214_v20, %v9523_v14  ;;  %v1247_v62 = vmul.f32 %v1215_v47, %v9525_v33  ;;  %v9553_v35 = vunpack.c.l.bf16 %v1058_v36  ;;  %v9555_v26 = vunpack.c.h.bf16 %v1058_v36  ;;  %v1045_v20 = vpop.f32.mrf.mxu1 }
 0x2d1   :  { %v1320_v52 = vmul.f32 %v1288_v16, %v9501_v34  ;;  %v1321_v51 = vmul.f32 %v1289_v40, %v9507_v63  ;;  %v1061_v7 = vpack.c.bf16 %v1044_v37, %v1015_v15  ;;  %v1402_v47 = vadd.f32 %v1370_v5, %v9473_v25 }
 0x2d2   :  { %v1267_v56 = vpack.c.bf16 %v1247_v62, %v1246_v39  ;;  %v1164_v4 = vmul.f32 0.044677734, %v9553_v35  ;;  %v1165_v61 = vmul.f32 0.044677734, %v9555_v26  ;;  %v1403_v36 = vadd.f32 %v1371_v50, %v9477_v58 }
 0x2d3   :  { %v1344_v12 = vpack.c.bf16 %v1321_v51, %v1320_v52  ;;  %v986_v10 = vadd.f32 %v985_v23, %v9357_v49  ;;  %v9565_v11 = vunpack.c.l.bf16 %v1061_v7  ;;  %v9567_v62 = vunpack.c.h.bf16 %v1061_v7 }
 0x2d4   :  { %v1294_v13 = vunpack.c.l.bf16 %v1267_v56  ;;  %v1295_v16 = vunpack.c.h.bf16 %v1267_v56  ;;  %v1186_v40 = vpack.c.bf16 %v1165_v61, %v1164_v4  ;;  %v1017_v39 = vadd.f32 %v1016_v8, %v9349_v29 }
 0x2d5   :  { %11818 = vst [vmem:[#allocation57_spill] sm:$0xff] %v9567_v62  ;;  %v1060_v19 = vpack.c.bf16 %v986_v10, %v957_v3  ;;  %v1046_v15 = vadd.f32 %v1045_v20, %v9351_v22  ;;  %v1368_v37 = vunpack.c.l.bf16 %v1344_v12  ;;  %v1369_v54 = vunpack.c.h.bf16 %v1344_v12 }
 0x2d6   :  { %v1212_v5 = vunpack.c.l.bf16 %v1186_v40  ;;  %v1213_v25 = vunpack.c.h.bf16 %v1186_v40  ;;  %v1444_v50 = vunpack.c.l.bf16 %v1422_v21  ;;  %v1326_v52 = vmul.f32 %v1294_v13, %v9523_v14 }
 0x2d7   :  { %v1170_v23 = vmul.f32 0.044677734, %v9565_v11  ;;  %v1171_v51 = vmul.f32 0.044677734, %v9567_v62  ;;  %v1327_v56 = vmul.f32 %v1295_v16, %v9525_v33  ;;  %v9577_v29 = vunpack.c.l.bf16 %v1060_v19 }
 0x2d8   :  { %v1244_v4 = vmul.f32 %v1212_v5, %v9553_v35  ;;  %v1245_v3 = vmul.f32 %v1213_v25, %v9555_v26  ;;  %v1445_v22 = vunpack.c.h.bf16 %v1422_v21  ;;  %v1425_v61 = vpack.c.bf16 %v1403_v36, %v1402_v47 }
 0x2d9   :  { %11819 = vst [vmem:[#allocation58_spill] sm:$0xff] %v9577_v29  ;;  %v1189_v12 = vpack.c.bf16 %v1171_v51, %v1170_v23  ;;  %v1063_v7 = vpack.c.bf16 %v1046_v15, %v1017_v39  ;;  %v1400_v8 = vadd.f32 %v1368_v37, %v9501_v34  ;;  %v1401_v20 = vadd.f32 %v1369_v54, %v9507_v63 }
 0x2da   :  { %v1266_v10 = vpack.c.bf16 %v1245_v3, %v1244_v4  ;;  %v9581_v13 = vunpack.c.h.bf16 %v1060_v19  ;;  %v11821_v40 = vunpack.c.h.bf16 %v9514_v45  ;;  %v9587_v5 = vmul.f32 0.796875, %v1444_v50  ;;  %v958_v3 = vpop.f32.mrf.mxu2 }
 0x2db   :  { %v1218_v25 = vunpack.c.l.bf16 %v1189_v12  ;;  %v1219_v58 = vunpack.c.h.bf16 %v1189_v12  ;;  %v1347_v60 = vpack.c.bf16 %v1327_v56, %v1326_v52  ;;  %v1168_v36 = vmul.f32 0.044677734, %v9577_v29 }
 0x2dc   :  { %11820 = vst [vmem:[#allocation59_spill] sm:$0xff] %v9581_v13  ;;  %v9585_v16 = vmul.f32 0.796875, %v11821_v40  ;;  %v1292_v21 = vunpack.c.l.bf16 %v1266_v10  ;;  %v1293_v47 = vunpack.c.h.bf16 %v1266_v10  ;;  %v9590_v39 = vmul.f32 0.796875, %v1445_v22 }
 0x2dd   :  { %v1450_v15 = vunpack.c.l.bf16 %v1425_v61  ;;  %v1250_v54 = vmul.f32 %v1218_v25, %v9565_v11  ;;  %v1251_v19 = vmul.f32 %v1219_v58, %v9567_v62  ;;  %v9594_v37 = vpack.c.bf16 %v1401_v20, %v1400_v8 }
 0x2de   :  { %v1324_v45 = vmul.f32 %v1292_v21, %v9553_v35  ;;  %v1325_v50 = vmul.f32 %v1293_v47, %v9555_v26  ;;  %v1169_v23 = vmul.f32 0.044677734, %v9581_v13  ;;  %v1451_v52 = vunpack.c.h.bf16 %v1425_v61  ;;  %v987_v21 = vpop.f32.mrf.mxu3 }
 0x2df   :  { %v1269_v51 = vpack.c.bf16 %v1251_v19, %v1250_v54  ;;  %v9599_v56 = vunpack.c.l.bf16 %v1063_v7  ;;  %v9601_v4 = vunpack.c.h.bf16 %v1063_v7  ;;  %v1374_v22 = vunpack.c.l.bf16 %v1347_v60 }
 0x2e0   :  { %v1375_v12 = vunpack.c.h.bf16 %v1347_v60  ;;  %v1346_v10 = vpack.c.bf16 %v1325_v50, %v1324_v45  ;;  %v1188_v40 = vpack.c.bf16 %v1169_v23, %v1168_v36  ;;  %v1448_v47 = vunpack.c.l.bf16 %v9594_v37 }
 0x2e1   :  { %v1298_v58 = vunpack.c.l.bf16 %v1269_v51  ;;  %v1299_v8 = vunpack.c.h.bf16 %v1269_v51  ;;  %v1174_v20 = vmul.f32 0.044677734, %v9599_v56  ;;  %v1175_v25 = vmul.f32 0.044677734, %v9601_v4 }
 0x2e2   :  { %v1372_v61 = vunpack.c.l.bf16 %v1346_v10  ;;  %v1373_v54 = vunpack.c.h.bf16 %v1346_v10  ;;  %v959_v19 = vadd.f32 %v958_v3, %v9355_v0  ;;  %v1216_v60 = vunpack.c.l.bf16 %v1188_v40 }
 0x2e3   :  { %v1330_v7 = vmul.f32 %v1298_v58, %v9565_v11  ;;  %v1331_v63 = vmul.f32 %v1299_v8, %v9567_v62  ;;  %v1217_v45 = vunpack.c.h.bf16 %v1188_v40  ;;  %v1406_v36 = vadd.f32 %v1374_v22, %v9523_v14 }
 0x2e4   :  { %v1407_v50 = vadd.f32 %v1375_v12, %v9525_v33  ;;  %v1191_v23 = vpack.c.bf16 %v1175_v25, %v1174_v20  ;;  %v988_v51 = vadd.f32 %v987_v21, %v9357_v49  ;;  %v1404_v34 = vadd.f32 %v1372_v61, %v9553_v35 }
 0x2e5   :  { %v1349_v59 = vpack.c.bf16 %v1331_v63, %v1330_v7  ;;  %v1248_v10 = vmul.f32 %v1216_v60, %v9577_v29  ;;  %v1249_v0 = vmul.f32 %v1217_v45, %v9581_v13  ;;  %v1405_v3 = vadd.f32 %v1373_v54, %v9555_v26 }
 0x2e6   :  { %v1222_v58 = vunpack.c.l.bf16 %v1191_v23  ;;  %v1223_v8 = vunpack.c.h.bf16 %v1191_v23  ;;  %v1062_v44 = vpack.c.bf16 %v988_v51, %v959_v19  ;;  %v9616_v40 = vmul.f32 0.796875, %v1450_v15 }
 0x2e7   :  { %v1378_v22 = vunpack.c.l.bf16 %v1349_v59  ;;  %v1379_v14 = vunpack.c.h.bf16 %v1349_v59  ;;  %v1268_v12 = vpack.c.bf16 %v1249_v0, %v1248_v10  ;;  %v9618_v20 = vmul.f32 0.796875, %v1451_v52 }
 0x2e8   :  { %v1427_v49 = vpack.c.bf16 %v1407_v50, %v1406_v36  ;;  %v1254_v25 = vmul.f32 %v1222_v58, %v9599_v56  ;;  %v1255_v63 = vmul.f32 %v1223_v8, %v9601_v4  ;;  %v1449_v21 = vunpack.c.h.bf16 %v9594_v37 }
 0x2e9   :  { %v9623_v61 = vmul.f32 0.796875, %v1448_v47  ;;  %v1296_v54 = vunpack.c.l.bf16 %v1268_v12  ;;  %v1297_v7 = vunpack.c.h.bf16 %v1268_v12  ;;  %v1426_v60 = vpack.c.bf16 %v1405_v3, %v1404_v34 }
 0x2ea   :  { %v1410_v15 = vadd.f32 %v1378_v22, %v9565_v11  ;;  %v1271_v19 = vpack.c.bf16 %v1255_v63, %v1254_v25  ;;  %v9626_v45 = vunpack.c.l.bf16 %v1062_v44  ;;  %v1411_v59 = vadd.f32 %v1379_v14, %v9567_v62 }
 0x2eb   :  { %v1328_v52 = vmul.f32 %v1296_v54, %v9577_v29  ;;  %v1329_v36 = vmul.f32 %v1297_v7, %v9581_v13  ;;  %v9631_v50 = vunpack.c.h.bf16 %v1062_v44  ;;  %v1454_v23 = vunpack.c.l.bf16 %v1427_v49 }
 0x2ec   :  { %11822 = vst [vmem:[#allocation60_spill] sm:$0xff] %v9626_v45  ;;  %v1302_v37 = vunpack.c.l.bf16 %v1271_v19  ;;  %v1303_v47 = vunpack.c.h.bf16 %v1271_v19  ;;  %v1172_v51 = vmul.f32 0.044677734, %v9626_v45  ;;  %v1455_v10 = vunpack.c.h.bf16 %v1427_v49 }
 0x2ed   :  { %11823 = vst [vmem:[#allocation61_spill] sm:$0xff] %v9631_v50  ;;  %v1348_v34 = vpack.c.bf16 %v1329_v36, %v1328_v52  ;;  %v1173_v0 = vmul.f32 0.044677734, %v9631_v50  ;;  %v1102_v3 = vmul.f32 0.5, %v9377_v28  ;;  %v1103_v8 = vmul.f32 0.5, %v9379_v30 }
 0x2ee   :  { %v1334_v58 = vmul.f32 %v1302_v37, %v9599_v56  ;;  %v1335_v14 = vmul.f32 %v1303_v47, %v9601_v4  ;;  %v1514_v44 = vunpack.c.l.bf16 %v9435_v57  ;;  %v1452_v22 = vunpack.c.l.bf16 %v1426_v60 }
 0x2ef   :  { %v1429_v12 = vpack.c.bf16 %v1411_v59, %v1410_v15  ;;  %v1376_v25 = vunpack.c.l.bf16 %v1348_v34  ;;  %v1377_v63 = vunpack.c.h.bf16 %v1348_v34  ;;  %v1190_v7 = vpack.c.bf16 %v1173_v0, %v1172_v51 }
 0x2f0   :  { %v1351_v54 = vpack.c.bf16 %v1335_v14, %v1334_v58  ;;  %v1515_v49 = vunpack.c.h.bf16 %v9435_v57  ;;  %v1518_v19 = vunpack.c.l.bf16 %v9519_v43  ;;  %v1519_v36 = vunpack.c.h.bf16 %v9519_v43 }
 0x2f1   :  { %v1408_v28 = vadd.f32 %v1376_v25, %v9577_v29  ;;  %v1409_v52 = vadd.f32 %v1377_v63, %v9581_v13  ;;  %8190 = vtanh.f32 %v1514_v44  ;;  %v1220_v47 = vunpack.c.l.bf16 %v1190_v7 }
 0x2f2   :  { %v1382_v30 = vunpack.c.l.bf16 %v1351_v54  ;;  %v1383_v37 = vunpack.c.h.bf16 %v1351_v54  ;;  %v1221_v62 = vunpack.c.h.bf16 %v1190_v7  ;;  %v1453_v15 = vunpack.c.h.bf16 %v1426_v60 }
 0x2f3   :  { %v1458_v59 = vunpack.c.l.bf16 %v1429_v12  ;;  %v1459_v34 = vunpack.c.h.bf16 %v1429_v12  ;;  %8192 = vtanh.f32 %v1515_v49  ;;  %v1252_v0 = vmul.f32 %v1220_v47, %v9626_v45 }
 0x2f4   :  { %v1414_v51 = vadd.f32 %v1382_v30, %v9599_v56  ;;  %v1415_v57 = vadd.f32 %v1383_v37, %v9601_v4  ;;  %v1253_v58 = vmul.f32 %v1221_v62, %v9631_v50  ;;  %v9649_v14 = vmul.f32 0.796875, %v1449_v21 }
 0x2f5   :  { %v1428_v43 = vpack.c.bf16 %v1409_v52, %v1408_v28  ;;  %v9653_v44 = vpack.c.bf16 %v9433_v53, %v9427_v42  ;;  %8194 = vtanh.f32 %v1518_v19  ;;  %v9655_v60 = vmul.f32 0.796875, %v1454_v23 }
 0x2f6   :  { %v9657_v12 = vmul.f32 0.796875, %v1455_v10  ;;  %v1270_v25 = vpack.c.bf16 %v1253_v58, %v1252_v0  ;;  %8196 = vtanh.f32 %v1519_v36  ;;  %v9659_v54 = vmul.f32 0.796875, %v1452_v22 }
 0x2f7   :  { %v8191_v63 = vpop.eup %8190  ;;  %v9661_v7 = vmul.f32 0.796875, %v1453_v15  ;;  %v1431_v62 = vpack.c.bf16 %v1415_v57, %v1414_v51  ;;  %v9663_v21 = vpack.c.bf16 %v1103_v8, %v1102_v3  ;;  %v9665_v49 = vmul.f32 0.796875, %v1458_v59 }
 0x2f8   :  { %v9667_v28 = vmul.f32 0.796875, %v1459_v34  ;;  %v1300_v42 = vunpack.c.l.bf16 %v1270_v25  ;;  %v1301_v53 = vunpack.c.h.bf16 %v1270_v25  ;;  %v1456_v19 = vunpack.c.l.bf16 %v1428_v43 }
 0x2f9   :  { %v8193_v23 = vpop.eup %8192  ;;  %v1457_v10 = vunpack.c.h.bf16 %v1428_v43  ;;  %v1674_v52 = vunpack.c.l.bf16 %v9653_v44  ;;  %v1512_v36 = vunpack.c.l.bf16 %v9512_v6  ;;  %v1096_v3 = vmul.f32 0.5, %v9369_v17 }
 0x2fa   :  { %v1332_v22 = vmul.f32 %v1300_v42, %v9626_v45  ;;  %v1333_v30 = vmul.f32 %v1301_v53, %v9631_v50  ;;  %v1097_v8 = vmul.f32 0.5, %v9371_v18  ;;  %v1462_v47 = vunpack.c.l.bf16 %v1431_v62 }
 0x2fb   :  { %v8195_v37 = vpop.eup %8194  ;;  %v1577_v15 = vpack.c.bf16 %v8193_v23, %v8191_v63  ;;  %v1513_v59 = vunpack.c.h.bf16 %v9512_v6  ;;  %v1516_v34 = vunpack.c.l.bf16 %v9527_v38  ;;  %v1463_v57 = vunpack.c.h.bf16 %v1431_v62 }
 0x2fc   :  { %v8197_v51 = vpop.eup %8196  ;;  %v1350_v0 = vpack.c.bf16 %v1333_v30, %v1332_v22  ;;  %v1517_v58 = vunpack.c.h.bf16 %v9527_v38  ;;  %8198 = vtanh.f32 %v1512_v36  ;;  %v1100_v18 = vmul.f32 0.5, %v9388_v46 }
 0x2fd   :  { %v1579_v43 = vpack.c.bf16 %v8197_v51, %v8195_v37  ;;  %v1594_v25 = vunpack.c.l.bf16 %v1577_v15  ;;  %v1595_v42 = vunpack.c.h.bf16 %v1577_v15  ;;  %8200 = vtanh.f32 %v1513_v59 }
 0x2fe   :  { %v1380_v17 = vunpack.c.l.bf16 %v1350_v0  ;;  %v1381_v53 = vunpack.c.h.bf16 %v1350_v0  ;;  %8202 = vtanh.f32 %v1516_v34  ;;  %v1101_v62 = vmul.f32 0.5, %v9390_v48 }
 0x2ff   :  { %v1598_v63 = vunpack.c.l.bf16 %v1579_v43  ;;  %v1599_v23 = vunpack.c.h.bf16 %v1579_v43  ;;  %v1626_v6 = vadd.f32 1.0, %v1594_v25  ;;  %v1627_v13 = vadd.f32 1.0, %v1595_v42 }
 0x300   :  { %v1412_v29 = vadd.f32 %v1380_v17, %v9626_v45  ;;  %v9681_v22 = vpack.c.bf16 %v1097_v8, %v1096_v3  ;;  %8204 = vtanh.f32 %v1517_v58  ;;  %v1413_v38 = vadd.f32 %v1381_v53, %v9631_v50 }
 0x301   :  { %v1630_v36 = vadd.f32 1.0, %v1598_v63  ;;  %v1631_v30 = vadd.f32 1.0, %v1599_v23  ;;  %v1657_v37 = vpack.c.bf16 %v1627_v13, %v1626_v6  ;;  %v9684_v59 = vmul.f32 0.796875, %v1456_v19 }
 0x302   :  { %v8199_v15 = vpop.eup %8198  ;;  %v1678_v46 = vunpack.c.l.bf16 %v9663_v21  ;;  %v1675_v34 = vunpack.c.h.bf16 %v9653_v44  ;;  %v1679_v51 = vunpack.c.h.bf16 %v9663_v21  ;;  %v9689_v43 = vmul.f32 0.796875, %v1457_v10 }
 0x303   :  { %v8201_v0 = vpop.eup %8200  ;;  %v1659_v48 = vpack.c.bf16 %v1631_v30, %v1630_v36  ;;  %v1706_v3 = vunpack.c.l.bf16 %v1657_v37  ;;  %v1707_v8 = vunpack.c.h.bf16 %v1657_v37  ;;  %v9691_v25 = vmul.f32 0.796875, %v1462_v47 }
 0x304   :  { %v8203_v58 = vpop.eup %8202  ;;  %v9693_v42 = vmul.f32 0.796875, %v1463_v57  ;;  %v1130_v13 = vpack.c.bf16 %v1101_v62, %v1100_v18  ;;  %v1576_v19 = vpack.c.bf16 %v8201_v0, %v8199_v15  ;;  %v9695_v17 = vpack.c.bf16 %v1413_v38, %v1412_v29 }
 0x305   :  { %v1710_v53 = vunpack.c.l.bf16 %v1659_v48  ;;  %v1711_v63 = vunpack.c.h.bf16 %v1659_v48  ;;  %v1672_v44 = vunpack.c.l.bf16 %v9681_v22  ;;  %v1738_v23 = vmul.f32 %v1706_v3, %v1674_v52 }
 0x306   :  { %v8205_v21 = vpop.eup %8204  ;;  %v1592_v10 = vunpack.c.l.bf16 %v1576_v19  ;;  %v1593_v6 = vunpack.c.h.bf16 %v1576_v19  ;;  %v1106_v36 = vmul.f32 0.5, %v9405_v41  ;;  %v1739_v37 = vmul.f32 %v1707_v8, %v1675_v34 }
 0x307   :  { %v1742_v30 = vmul.f32 %v1710_v53, %v1678_v46  ;;  %v1743_v47 = vmul.f32 %v1711_v63, %v1679_v51  ;;  %v1578_v50 = vpack.c.bf16 %v8205_v21, %v8203_v58  ;;  %v1501_v29 = vpack.c.bf16 %v9531_v55, %v9529_v9 }
 0x308   :  { %v1624_v57 = vadd.f32 1.0, %v1592_v10  ;;  %v1625_v45 = vadd.f32 1.0, %v1593_v6  ;;  %v1503_v18 = vpack.c.bf16 %v9585_v16, %v9546_v1  ;;  %v1107_v51 = vmul.f32 0.5, %v9409_v32 }
 0x309   :  { %v1770_v62 = vpack.c.bf16 %v1742_v30, %v1738_v23  ;;  %v1771_v38 = vpack.c.bf16 %v1743_v47, %v1739_v37  ;;  %v1596_v15 = vunpack.c.l.bf16 %v1578_v50  ;;  %v1597_v52 = vunpack.c.h.bf16 %v1578_v50 }
 0x30a   :  { %v1656_v0 = vpack.c.bf16 %v1625_v45, %v1624_v57  ;;  %v1522_v48 = vunpack.c.l.bf16 %v1501_v29  ;;  %v1523_v3 = vunpack.c.h.bf16 %v1501_v29  ;;  %v1526_v41 = vunpack.c.l.bf16 %v1503_v18 }
 0x30b   :  { %2110 = vmatmul.bf16.vlgmr.msra.gmra.mxu0 %v1770_v62  ;;  %2139 = vmatmul.bf16.vlgmr.msra.gmra.mxu1 %v1771_v38  ;;  %v1628_v46 = vadd.f32 1.0, %v1596_v15  ;;  %v1629_v34 = vadd.f32 1.0, %v1597_v52  ;;  %v1527_v8 = vunpack.c.h.bf16 %v1503_v18  ;;  %v1676_v58 = vunpack.c.l.bf16 %v1130_v13 }
 0x30c   :  { %v1110_v9 = vmul.f32 0.5, %v9449_v27  ;;  %v1111_v1 = vmul.f32 0.5, %v9451_v31  ;;  %8206 = vtanh.f32 %v1522_v48  ;;  %v1704_v16 = vunpack.c.l.bf16 %v1656_v0  ;;  %v11824_v48 = vld [vmem:[#allocation48_spill] sm:$0xff] }
 0x30d   :  { %v1658_v55 = vpack.c.bf16 %v1629_v34, %v1628_v46  ;;  %v1705_v50 = vunpack.c.h.bf16 %v1656_v0  ;;  %8208 = vtanh.f32 %v1523_v3  ;;  %v1460_v45 = vunpack.c.l.bf16 %v9695_v17 }
 0x30e   :  { %v1673_v19 = vunpack.c.h.bf16 %v9681_v22  ;;  %v1677_v53 = vunpack.c.h.bf16 %v1130_v13  ;;  %8210 = vtanh.f32 %v1526_v41  ;;  %v9708_v32 = vpack.c.bf16 %v1107_v51, %v1106_v36  ;;  %v11825_v41 = vld [vmem:[#allocation49_spill] sm:$0xff] }
 0x30f   :  { %v1708_v63 = vunpack.c.l.bf16 %v1658_v55  ;;  %v1709_v21 = vunpack.c.h.bf16 %v1658_v55  ;;  %8212 = vtanh.f32 %v1527_v8  ;;  %v1461_v27 = vunpack.c.h.bf16 %v9695_v17 }
 0x310   :  { %v9711_v23 = vpack.c.bf16 %v1111_v1, %v1110_v9  ;;  %v1500_v31 = vpack.c.bf16 %v9539_v2, %v9534_v24  ;;  %v1502_v10 = vpack.c.bf16 %v9590_v39, %v9587_v5  ;;  %v1736_v6 = vmul.f32 %v1704_v16, %v1672_v44  ;;  %v11827_v1 = vld [vmem:[#allocation51_spill] sm:$0xff] }
 0x311   :  { %v1740_v30 = vmul.f32 %v1708_v63, %v1676_v58  ;;  %v1737_v22 = vmul.f32 %v1705_v50, %v1673_v19  ;;  %v1741_v13 = vmul.f32 %v1709_v21, %v1677_v53  ;;  %v9717_v47 = vmul.f32 0.796875, %v1460_v45  ;;  %v11826_v58 = vld [vmem:[#allocation50_spill] sm:$0xff] }
 0x312   :  { %v8207_v37 = vpop.eup %8206  ;;  %v1520_v36 = vunpack.c.l.bf16 %v1500_v31  ;;  %v1521_v57 = vunpack.c.h.bf16 %v1500_v31  ;;  %v1524_v29 = vunpack.c.l.bf16 %v1502_v10  ;;  %v1682_v15 = vunpack.c.l.bf16 %v9708_v32 }
 0x313   :  { %v8209_v18 = vpop.eup %8208  ;;  %v1768_v62 = vpack.c.bf16 %v1740_v30, %v1736_v6  ;;  %v1769_v38 = vpack.c.bf16 %v1741_v13, %v1737_v22  ;;  %v1525_v52 = vunpack.c.h.bf16 %v1502_v10  ;;  %v1686_v5 = vunpack.c.l.bf16 %v9711_v23  ;;  %v11828_v22 = vld [vmem:[#allocation52_spill] sm:$0xff] }
 0x314   :  { %v8211_v24 = vpop.eup %8210  ;;  %v1581_v2 = vpack.c.bf16 %v8209_v18, %v8207_v37  ;;  %v1683_v39 = vunpack.c.h.bf16 %v9708_v32  ;;  %8214 = vtanh.f32 %v1520_v36  ;;  %v1687_v0 = vunpack.c.h.bf16 %v9711_v23 }
 0x315   :  { %v8213_v44 = vpop.eup %8212  ;;  %2052 = vmatmul.bf16.vlgmr.msra.gmra.mxu2 %v1768_v62  ;;  %2081 = vmatmul.bf16.vlgmr.msra.gmra.mxu3 %v1769_v38  ;;  %v1104_v3 = vmul.f32 0.5, %v11824_v48  ;;  %v1105_v46 = vmul.f32 0.5, %v11825_v41  ;;  %8216 = vtanh.f32 %v1521_v57  ;;  %v1108_v9 = vmul.f32 0.5, %v11826_v58 }
 0x316   :  { %v1583_v34 = vpack.c.bf16 %v8213_v44, %v8211_v24  ;;  %v1602_v51 = vunpack.c.l.bf16 %v1581_v2  ;;  %v1603_v8 = vunpack.c.h.bf16 %v1581_v2  ;;  %8218 = vtanh.f32 %v1524_v29  ;;  %v11830_v2 = vld [vmem:[#allocation56_spill] sm:$0xff] }
 0x317   :  { %v1109_v55 = vmul.f32 0.5, %v11827_v1  ;;  %8220 = vtanh.f32 %v1525_v52  ;;  %v1505_v16 = vpack.c.bf16 %v9618_v20, %v9616_v40  ;;  %v9729_v63 = vpack.c.bf16 %v1105_v46, %v1104_v3  ;;  %v11829_v52 = vld [vmem:[#allocation53_spill] sm:$0xff] }
 0x318   :  { %v1606_v50 = vunpack.c.l.bf16 %v1583_v34  ;;  %v1607_v45 = vunpack.c.h.bf16 %v1583_v34  ;;  %v1634_v19 = vadd.f32 1.0, %v1602_v51  ;;  %v1635_v53 = vadd.f32 1.0, %v1603_v8 }
 0x319   :  { %v1507_v21 = vpack.c.bf16 %v9657_v12, %v9655_v60  ;;  %v1530_v32 = vunpack.c.l.bf16 %v1505_v16  ;;  %v1531_v23 = vunpack.c.h.bf16 %v1505_v16  ;;  %v1114_v13 = vmul.f32 0.5, %v11828_v22 }
 0x31a   :  { %v8215_v31 = vpop.eup %8214  ;;  %v1638_v10 = vadd.f32 1.0, %v1606_v50  ;;  %v1639_v6 = vadd.f32 1.0, %v1607_v45  ;;  %v1661_v30 = vpack.c.bf16 %v1635_v53, %v1634_v19  ;;  %v9734_v36 = vpack.c.bf16 %v1109_v55, %v1108_v9 }
 0x31b   :  { %v8217_v37 = vpop.eup %8216  ;;  %v1534_v40 = vunpack.c.l.bf16 %v1507_v21  ;;  %v1535_v20 = vunpack.c.h.bf16 %v1507_v21  ;;  %8222 = vtanh.f32 %v1530_v32  ;;  %v1680_v12 = vunpack.c.l.bf16 %v9729_v63 }
 0x31c   :  { %v8219_v57 = vpop.eup %8218  ;;  %v1663_v29 = vpack.c.bf16 %v1639_v6, %v1638_v10  ;;  %v1714_v18 = vunpack.c.l.bf16 %v1661_v30  ;;  %v1715_v62 = vunpack.c.h.bf16 %v1661_v30  ;;  %v1580_v38 = vpack.c.bf16 %v8217_v37, %v8215_v31 }
 0x31d   :  { %v8221_v60 = vpop.eup %8220  ;;  %v1115_v24 = vmul.f32 0.5, %v11829_v52  ;;  %v1118_v44 = vmul.f32 0.5, %v11830_v2  ;;  %8224 = vtanh.f32 %v1531_v23  ;;  %v1119_v46 = vmul.f32 0.5, %v9525_v33 }
 0x31e   :  { %v1718_v48 = vunpack.c.l.bf16 %v1663_v29  ;;  %v1746_v3 = vmul.f32 %v1714_v18, %v1682_v15  ;;  %v1719_v41 = vunpack.c.h.bf16 %v1663_v29  ;;  %v1582_v34 = vpack.c.bf16 %v8221_v60, %v8219_v57 }
 0x31f   :  { %v1600_v51 = vunpack.c.l.bf16 %v1580_v38  ;;  %v1601_v8 = vunpack.c.h.bf16 %v1580_v38  ;;  %8226 = vtanh.f32 %v1534_v40  ;;  %v1747_v9 = vmul.f32 %v1715_v62, %v1683_v39 }
 0x320   :  { %v1750_v58 = vmul.f32 %v1718_v48, %v1686_v5  ;;  %v1751_v1 = vmul.f32 %v1719_v41, %v1687_v0  ;;  %8228 = vtanh.f32 %v1535_v20  ;;  %v1604_v16 = vunpack.c.l.bf16 %v1582_v34 }
 0x321   :  { %v8223_v55 = vpop.eup %8222  ;;  %v1605_v50 = vunpack.c.h.bf16 %v1582_v34  ;;  %v1632_v45 = vadd.f32 1.0, %v1600_v51  ;;  %v1633_v19 = vadd.f32 1.0, %v1601_v8  ;;  %v1684_v15 = vunpack.c.l.bf16 %v9734_v36  ;;  %v11831_v51 = vld [vmem:[#allocation54_spill] sm:$0xff] }
 0x322   :  { %v1774_v53 = vpack.c.bf16 %v1750_v58, %v1746_v3  ;;  %v1775_v21 = vpack.c.bf16 %v1751_v1, %v1747_v9  ;;  %v1681_v32 = vunpack.c.h.bf16 %v9729_v63  ;;  %v1636_v23 = vadd.f32 1.0, %v1604_v16  ;;  %v11832_v1 = vld [vmem:[#allocation55_spill] sm:$0xff] }
 0x323   :  { %v8225_v33 = vpop.eup %8224  ;;  %v1637_v31 = vadd.f32 1.0, %v1605_v50  ;;  %v1660_v10 = vpack.c.bf16 %v1633_v19, %v1632_v45  ;;  %v9742_v6 = vpack.c.bf16 %v1115_v24, %v1114_v13  ;;  %v1685_v5 = vunpack.c.h.bf16 %v9734_v36 }
 0x324   :  { %2115 = vmatmul.bf16.gmra.mxu0 %v1774_v53  ;;  %2144 = vmatmul.bf16.gmra.mxu1 %v1775_v21  ;;  %v9745_v39 = vpack.c.bf16 %v1119_v46, %v1118_v44  ;;  %v1585_v0 = vpack.c.bf16 %v8225_v33, %v8223_v55  ;;  %v1504_v30 = vpack.c.bf16 %v9649_v14, %v9623_v61  ;;  %v1112_v8 = vmul.f32 0.5, %v11831_v51 }
 0x325   :  { %v8227_v22 = vpop.eup %8226  ;;  %v1662_v37 = vpack.c.bf16 %v1637_v31, %v1636_v23  ;;  %v1712_v40 = vunpack.c.l.bf16 %v1660_v10  ;;  %v1713_v63 = vunpack.c.h.bf16 %v1660_v10  ;;  %v1506_v20 = vpack.c.bf16 %v9661_v7, %v9659_v54 }
 0x326   :  { %v8229_v57 = vpop.eup %8228  ;;  %v1610_v13 = vunpack.c.l.bf16 %v1585_v0  ;;  %v1611_v29 = vunpack.c.h.bf16 %v1585_v0  ;;  %v1528_v18 = vunpack.c.l.bf16 %v1504_v30  ;;  %v1529_v62 = vunpack.c.h.bf16 %v1504_v30 }
 0x327   :  { %v1716_v38 = vunpack.c.l.bf16 %v1662_v37  ;;  %v1744_v36 = vmul.f32 %v1712_v40, %v1680_v12  ;;  %v1717_v60 = vunpack.c.h.bf16 %v1662_v37  ;;  %v1745_v52 = vmul.f32 %v1713_v63, %v1681_v32 }
 0x328   :  { %v1587_v24 = vpack.c.bf16 %v8229_v57, %v8227_v22  ;;  %v1642_v2 = vadd.f32 1.0, %v1610_v13  ;;  %v1643_v44 = vadd.f32 1.0, %v1611_v29  ;;  %v1532_v61 = vunpack.c.l.bf16 %v1506_v20 }
 0x329   :  { %v1748_v14 = vmul.f32 %v1716_v38, %v1684_v15  ;;  %v1749_v48 = vmul.f32 %v1717_v60, %v1685_v5  ;;  %v1533_v3 = vunpack.c.h.bf16 %v1506_v20  ;;  %8230 = vtanh.f32 %v1528_v18 }
 0x32a   :  { %v1614_v41 = vunpack.c.l.bf16 %v1587_v24  ;;  %v1615_v46 = vunpack.c.h.bf16 %v1587_v24  ;;  %v1665_v54 = vpack.c.bf16 %v1643_v44, %v1642_v2  ;;  %8232 = vtanh.f32 %v1529_v62 }
 0x32b   :  { %v1772_v7 = vpack.c.bf16 %v1748_v14, %v1744_v36  ;;  %v1773_v34 = vpack.c.bf16 %v1749_v48, %v1745_v52  ;;  %8234 = vtanh.f32 %v1532_v61  ;;  %v1113_v55 = vmul.f32 0.5, %v11832_v1  ;;  %v11833_v61 = vld [vmem:[#allocation57_spill] sm:$0xff] }
 0x32c   :  { %v1646_v12 = vadd.f32 1.0, %v1614_v41  ;;  %v1647_v58 = vadd.f32 1.0, %v1615_v46  ;;  %v1722_v9 = vunpack.c.l.bf16 %v1665_v54  ;;  %v1493_v16 = vmul.f32 0.796875, %v1461_v27 }
 0x32d   :  { %2057 = vmatmul.bf16.gmra.mxu2 %v1772_v7  ;;  %2086 = vmatmul.bf16.gmra.mxu3 %v1773_v34  ;;  %v1690_v50 = vunpack.c.l.bf16 %v9742_v6  ;;  %v1723_v45 = vunpack.c.h.bf16 %v1665_v54  ;;  %8236 = vtanh.f32 %v1533_v3  ;;  %v1694_v53 = vunpack.c.l.bf16 %v9745_v39 }
 0x32e   :  { %v1667_v19 = vpack.c.bf16 %v1647_v58, %v1646_v12  ;;  %v1691_v21 = vunpack.c.h.bf16 %v9742_v6  ;;  %v1695_v15 = vunpack.c.h.bf16 %v9745_v39  ;;  %v1116_v33 = vmul.f32 0.5, %v9553_v35 }
 0x32f   :  { %v8231_v32 = vpop.eup %8230  ;;  %v1117_v23 = vmul.f32 0.5, %v9555_v26  ;;  %v1509_v17 = vpack.c.bf16 %v9667_v28, %v9665_v49  ;;  %v1511_v27 = vpack.c.bf16 %v9693_v42, %v9691_v25  ;;  %v1754_v5 = vmul.f32 %v1722_v9, %v1690_v50 }
 0x330   :  { %v8233_v31 = vpop.eup %8232  ;;  %v1726_v10 = vunpack.c.l.bf16 %v1667_v19  ;;  %v1727_v0 = vunpack.c.h.bf16 %v1667_v19  ;;  %v9765_v30 = vpack.c.bf16 %v1113_v55, %v1112_v8  ;;  %v1755_v22 = vmul.f32 %v1723_v45, %v1691_v21 }
 0x331   :  { %v8235_v6 = vpop.eup %8234  ;;  %v1584_v39 = vpack.c.bf16 %v8233_v31, %v8231_v32  ;;  %v1538_v37 = vunpack.c.l.bf16 %v1509_v17  ;;  %v1539_v40 = vunpack.c.h.bf16 %v1509_v17  ;;  %v1542_v26 = vunpack.c.l.bf16 %v1511_v27 }
 0x332   :  { %v1758_v35 = vmul.f32 %v1726_v10, %v1694_v53  ;;  %v1759_v63 = vmul.f32 %v1727_v0, %v1695_v15  ;;  %v1543_v20 = vunpack.c.h.bf16 %v1511_v27  ;;  %v1138_v49 = vpack.c.bf16 %v1117_v23, %v1116_v33 }
 0x333   :  { %v8237_v57 = vpop.eup %8236  ;;  %v1608_v28 = vunpack.c.l.bf16 %v1584_v39  ;;  %v1609_v13 = vunpack.c.h.bf16 %v1584_v39  ;;  %8238 = vtanh.f32 %v1538_v37  ;;  %v1122_v38 = vmul.f32 0.5, %v9565_v11  ;;  %v11834_v37 = vld [vmem:[#allocation58_spill] sm:$0xff] }
 0x334   :  { %v1778_v25 = vpack.c.bf16 %v1758_v35, %v1754_v5  ;;  %v1779_v42 = vpack.c.bf16 %v1759_v63, %v1755_v22  ;;  %v1586_v29 = vpack.c.bf16 %v8237_v57, %v8235_v6  ;;  %8240 = vtanh.f32 %v1539_v40 }
 0x335   :  { %v1640_v18 = vadd.f32 1.0, %v1608_v28  ;;  %v1641_v62 = vadd.f32 1.0, %v1609_v13  ;;  %8242 = vtanh.f32 %v1542_v26  ;;  %v1688_v52 = vunpack.c.l.bf16 %v9765_v30 }
 0x336   :  { %2120 = vmatmul.bf16.gmra.mxu0 %v1778_v25  ;;  %2149 = vmatmul.bf16.gmra.mxu1 %v1779_v42  ;;  %v1612_v36 = vunpack.c.l.bf16 %v1586_v29  ;;  %v1613_v60 = vunpack.c.h.bf16 %v1586_v29  ;;  %8244 = vtanh.f32 %v1543_v20  ;;  %v1692_v2 = vunpack.c.l.bf16 %v1138_v49 }
 0x337   :  { %v1664_v24 = vpack.c.bf16 %v1641_v62, %v1640_v18  ;;  %v1689_v44 = vunpack.c.h.bf16 %v9765_v30  ;;  %v1123_v14 = vmul.f32 0.5, %v11833_v61  ;;  %v1693_v41 = vunpack.c.h.bf16 %v1138_v49  ;;  %v11835_v62 = vld [vmem:[#allocation59_spill] sm:$0xff] }
 0x338   :  { %v1644_v48 = vadd.f32 1.0, %v1612_v36  ;;  %v1645_v3 = vadd.f32 1.0, %v1613_v60  ;;  %v1508_v11 = vpack.c.bf16 %v9689_v43, %v9684_v59  ;;  %v1126_v7 = vmul.f32 0.5, %v9599_v56  ;;  %v11836_v36 = vld [vmem:[#allocation60_spill] sm:$0xff] }
 0x339   :  { %v8239_v46 = vpop.eup %8238  ;;  %v1720_v54 = vunpack.c.l.bf16 %v1664_v24  ;;  %v1127_v34 = vmul.f32 0.5, %v9601_v4  ;;  %v1510_v51 = vpack.c.bf16 %v1493_v16, %v9717_v47  ;;  %v1721_v58 = vunpack.c.h.bf16 %v1664_v24 }
 0x33a   :  { %v8241_v8 = vpop.eup %8240  ;;  %v1666_v12 = vpack.c.bf16 %v1645_v3, %v1644_v48  ;;  %v1536_v9 = vunpack.c.l.bf16 %v1508_v11  ;;  %v1537_v1 = vunpack.c.h.bf16 %v1508_v11  ;;  %v1141_v45 = vpack.c.bf16 %v1123_v14, %v1122_v38 }
 0x33b   :  { %v8243_v55 = vpop.eup %8242  ;;  %v1752_v50 = vmul.f32 %v1720_v54, %v1688_v52  ;;  %v1589_v19 = vpack.c.bf16 %v8241_v8, %v8239_v46  ;;  %v1540_v53 = vunpack.c.l.bf16 %v1510_v51  ;;  %v1541_v15 = vunpack.c.h.bf16 %v1510_v51 }
 0x33c   :  { %v8245_v21 = vpop.eup %8244  ;;  %v1724_v59 = vunpack.c.l.bf16 %v1666_v12  ;;  %v1725_v43 = vunpack.c.h.bf16 %v1666_v12  ;;  %8246 = vtanh.f32 %v1536_v9  ;;  %v1753_v16 = vmul.f32 %v1721_v58, %v1689_v44 }
 0x33d   :  { %v1591_v56 = vpack.c.bf16 %v8245_v21, %v8243_v55  ;;  %v1618_v32 = vunpack.c.l.bf16 %v1589_v19  ;;  %v1619_v4 = vunpack.c.h.bf16 %v1589_v19  ;;  %8248 = vtanh.f32 %v1537_v1 }
 0x33e   :  { %v1756_v47 = vmul.f32 %v1724_v59, %v1692_v2  ;;  %v1757_v33 = vmul.f32 %v1725_v43, %v1693_v41  ;;  %8250 = vtanh.f32 %v1540_v53  ;;  %v1143_v0 = vpack.c.bf16 %v1127_v34, %v1126_v7  ;;  %v11837_v2 = vld [vmem:[#allocation61_spill] sm:$0xff] }
 0x33f   :  { %v1622_v23 = vunpack.c.l.bf16 %v1591_v56  ;;  %v1623_v17 = vunpack.c.h.bf16 %v1591_v56  ;;  %v1650_v27 = vadd.f32 1.0, %v1618_v32  ;;  %v1651_v31 = vadd.f32 1.0, %v1619_v4 }
 0x340   :  { %v1776_v10 = vpack.c.bf16 %v1756_v47, %v1752_v50  ;;  %v1777_v5 = vpack.c.bf16 %v1757_v33, %v1753_v16  ;;  %8252 = vtanh.f32 %v1541_v15  ;;  %v1120_v40 = vmul.f32 0.5, %v11834_v37 }
 0x341   :  { %v1654_v30 = vadd.f32 1.0, %v1622_v23  ;;  %v1655_v6 = vadd.f32 1.0, %v1623_v17  ;;  %v1669_v22 = vpack.c.bf16 %v1651_v31, %v1650_v27  ;;  %v1698_v26 = vunpack.c.l.bf16 %v1141_v45  ;;  %v9780_v17 = vld [vmem:[#allocation14] ss:$0 sm:$0xff] }
 0x342   :  { %v8247_v39 = vpop.eup %8246  ;;  %2062 = vmatmul.bf16.gmra.mxu2 %v1776_v10  ;;  %2091 = vmatmul.bf16.gmra.mxu3 %v1777_v5  ;;  %v1702_v28 = vunpack.c.l.bf16 %v1143_v0  ;;  %v1699_v13 = vunpack.c.h.bf16 %v1141_v45  ;;  %v1703_v25 = vunpack.c.h.bf16 %v1143_v0  ;;  %v1121_v38 = vmul.f32 0.5, %v11835_v62 }
 0x343   :  { %v8249_v35 = vpop.eup %8248  ;;  %v1671_v63 = vpack.c.bf16 %v1655_v6, %v1654_v30  ;;  %v1730_v20 = vunpack.c.l.bf16 %v1669_v22  ;;  %v1731_v57 = vunpack.c.h.bf16 %v1669_v22  ;;  %v1124_v60 = vmul.f32 0.5, %v11836_v36 }
 0x344   :  { %v8251_v49 = vpop.eup %8250  ;;  %v1588_v42 = vpack.c.bf16 %v8249_v35, %v8247_v39  ;;  %v1125_v44 = vmul.f32 0.5, %v11837_v2  ;;  %v1140_v12 = vpack.c.bf16 %v1121_v38, %v1120_v40  ;;  %v11838_v40 = vld [vmem:[#allocation40_spill] sm:$0xff] }
 0x345   :  { %v1734_v29 = vunpack.c.l.bf16 %v1671_v63  ;;  %v1735_v18 = vunpack.c.h.bf16 %v1671_v63  ;;  %v1762_v24 = vmul.f32 %v1730_v20, %v1698_v26  ;;  %v1763_v3 = vmul.f32 %v1731_v57, %v1699_v13 }
 0x346   :  { %v8253_v52 = vpop.eup %8252  ;;  %v1616_v61 = vunpack.c.l.bf16 %v1588_v42  ;;  %v1617_v14 = vunpack.c.h.bf16 %v1588_v42  ;;  %v1142_v58 = vpack.c.bf16 %v1125_v44, %v1124_v60  ;;  %v1696_v53 = vunpack.c.l.bf16 %v1140_v12 }
 0x347   :  { %v1766_v48 = vmul.f32 %v1734_v29, %v1702_v28  ;;  %v1767_v41 = vmul.f32 %v1735_v18, %v1703_v25  ;;  %v1590_v11 = vpack.c.bf16 %v8253_v52, %v8251_v49  ;;  %v1697_v43 = vunpack.c.h.bf16 %v1140_v12  ;;  %v11839_v25 = vld [vmem:[#allocation41_spill] sm:$0xff] }
 0x348   :  { %v1648_v46 = vadd.f32 1.0, %v1616_v61  ;;  %v1649_v54 = vadd.f32 1.0, %v1617_v14  ;;  %v1700_v21 = vunpack.c.l.bf16 %v1142_v58  ;;  %v1701_v15 = vunpack.c.h.bf16 %v1142_v58  ;;  %v11840_v14 = vld [vmem:[#allocation42_spill] sm:$0xff] }
 0x349   :  { %v1782_v7 = vpack.c.bf16 %v1766_v48, %v1762_v24  ;;  %v1783_v34 = vpack.c.bf16 %v1767_v41, %v1763_v3  ;;  %v1620_v51 = vunpack.c.l.bf16 %v1590_v11  ;;  %v1621_v8 = vunpack.c.h.bf16 %v1590_v11 }
 0x34a   :  { %v1668_v9 = vpack.c.bf16 %v1649_v54, %v1648_v46 }
 0x34b   :  { %2125 = vmatmul.bf16.gmra.mxu0 %v1782_v7  ;;  %2154 = vmatmul.bf16.gmra.mxu1 %v1783_v34  ;;  %v1652_v1 = vadd.f32 1.0, %v1620_v51  ;;  %v1653_v55 = vadd.f32 1.0, %v1621_v8  ;;  %v11841_v51 = vld [vmem:[#allocation43_spill] sm:$0xff] }
 0x34c   :  { %v1728_v45 = vunpack.c.l.bf16 %v1668_v9  ;;  %v1729_v19 = vunpack.c.h.bf16 %v1668_v9 }
 0x34d   :  { %v1670_v50 = vpack.c.bf16 %v1653_v55, %v1652_v1 }
 0x34e   :  { %v1760_v32 = vmul.f32 %v1728_v45, %v1696_v53  ;;  %v1761_v47 = vmul.f32 %v1729_v19, %v1697_v43 }
 0x34f   :  { %v1732_v59 = vunpack.c.l.bf16 %v1670_v50  ;;  %v1733_v56 = vunpack.c.h.bf16 %v1670_v50 }
 0x351   :  { %v1764_v4 = vmul.f32 %v1732_v59, %v1700_v21  ;;  %v1765_v16 = vmul.f32 %v1733_v56, %v1701_v15  ;;  %v7960_v59 = vld [vmem:[#allocation7 + $0x78] sm:$0xff] }
 0x352   :  { %v11842_v56 = vld [vmem:[#allocation45_spill] sm:$0xff]  ;;  %2442 = vmatpush.bf16.msrb.mxu2 %v7960_v59 }
 0x353   :  { %v1780_v33 = vpack.c.bf16 %v1764_v4, %v1760_v32  ;;  %v1781_v23 = vpack.c.bf16 %v1765_v16, %v1761_v47  ;;  %v7959_v4 = vld [vmem:[#allocation7 + $0x70] sm:$0xff] }
 0x355   :  { %2067 = vmatmul.bf16.gmra.mxu2 %v1780_v33  ;;  %2096 = vmatmul.bf16.gmra.mxu3 %v1781_v23 }
 0x356   :  { %2443 = vmatpush.bf16.msrb.mxu2 %v7959_v4 }
 0x388   :  { %v2111_v5 = vpop.f32.mrf.mxu0  ;;  %v2140_v30 = vpop.f32.mrf.mxu1 }
 0x390   :  { %v2113_v57 = vpop.f32.mrf.mxu0  ;;  %v2142_v28 = vpop.f32.mrf.mxu1 }
 0x398   :  { %v2053_v27 = vpop.f32.mrf.mxu2  ;;  %v2082_v31 = vpop.f32.mrf.mxu3 }
 0x399   :  { %v2054_v10 = vadd.f32 %v9780_v17, %v2053_v27 }
 0x39b   :  { %v2083_v0 = vadd.f32 %v2082_v31, %v2054_v10  ;;  %v7958_v31 = vld [vmem:[#allocation7 + $0x68] sm:$0xff] }
 0x39c   :  { %2444 = vmatpush.bf16.msrb.mxu2 %v7958_v31 }
 0x39d   :  { %v2112_v6 = vadd.f32 %v2111_v5, %v2083_v0  ;;  %v11843_v5 = vld [vmem:[#allocation44_spill] sm:$0xff] }
 0x39f   :  { %v2141_v22 = vadd.f32 %v2140_v30, %v2112_v6 }
 0x3a0   :  { %v2055_v39 = vpop.f32.mrf.mxu2  ;;  %v2084_v63 = vpop.f32.mrf.mxu3 }
 0x3a1   :  { %v2056_v37 = vadd.f32 %v9780_v17, %v2055_v39  ;;  %v9785_v35 = vadd.f32 %v2141_v22, %v11838_v40  ;;  %v2116_v36 = vpop.f32.mrf.mxu0  ;;  %v2145_v52 = vpop.f32.mrf.mxu1 }
 0x3a3   :  { %v2085_v26 = vadd.f32 %v2084_v63, %v2056_v37  ;;  %2170 = vadd.xlane.f32.xlu1 %v9785_v35  ;;  %v2194_v20 = vmul.f32 %v9785_v35, %v9785_v35 }
 0x3a5   :  { %v2114_v49 = vadd.f32 %v2113_v57, %v2085_v26  ;;  %2202 = vadd.xlane.f32.xlu0 %v2194_v20 }
 0x3a7   :  { %v2143_v13 = vadd.f32 %v2142_v28, %v2114_v49  ;;  %v11844_v28 = vld [vmem:[#allocation46_spill] sm:$0xff] }
 0x3a9   :  { %v9791_v42 = vadd.f32 %v2143_v13, %v11839_v25  ;;  %v2118_v46 = vpop.f32.mrf.mxu0  ;;  %v2147_v7 = vpop.f32.mrf.mxu1 }
 0x3ab   :  { %2172 = vadd.xlane.f32.xlu2 %v9791_v42  ;;  %v2195_v29 = vmul.f32 %v9791_v42, %v9791_v42 }
 0x3ad   :  { %2204 = vadd.xlane.f32.xlu1 %v2195_v29 }
 0x3b0   :  { %v2058_v18 = vpop.f32.mrf.mxu2  ;;  %v2087_v62 = vpop.f32.mrf.mxu3 }
 0x3b1   :  { %v2059_v38 = vadd.f32 %v9780_v17, %v2058_v18 }
 0x3b3   :  { %v2088_v60 = vadd.f32 %v2087_v62, %v2059_v38  ;;  %v2121_v1 = vpop.f32.mrf.mxu0  ;;  %v2150_v50 = vpop.f32.mrf.mxu1 }
 0x3b5   :  { %v2117_v24 = vadd.f32 %v2116_v36, %v2088_v60 }
 0x3b7   :  { %v2146_v2 = vadd.f32 %v2145_v52, %v2117_v24  ;;  %v11845_v52 = vld [vmem:[#allocation47_spill] sm:$0xff] }
 0x3b8   :  { %v2060_v44 = vpop.f32.mrf.mxu2  ;;  %v2089_v3 = vpop.f32.mrf.mxu3 }
 0x3b9   :  { %v2061_v61 = vadd.f32 %v9780_v17, %v2060_v44  ;;  %v9799_v48 = vadd.f32 %v2146_v2, %v11840_v14  ;;  %v7957_v2 = vld [vmem:[#allocation7 + $0x60] sm:$0xff] }
 0x3ba   :  { %2445 = vmatpush.bf16.msrb.mxu2 %v7957_v2 }
 0x3bb   :  { %v2090_v41 = vadd.f32 %v2089_v3, %v2061_v61  ;;  %2174 = vadd.xlane.f32.xlu2 %v9799_v48  ;;  %v2196_v11 = vmul.f32 %v9799_v48, %v9799_v48  ;;  %v2123_v47 = vpop.f32.mrf.mxu0  ;;  %v2152_v23 = vpop.f32.mrf.mxu1  ;;  %v11846_v61 = vld [vmem:[#allocation39_spill] sm:$0xff] }
 0x3bd   :  { %v2119_v54 = vadd.f32 %v2118_v46, %v2090_v41  ;;  %2206 = vadd.xlane.f32.xlu1 %v2196_v11  ;;  %v7956_v46 = vld [vmem:[#allocation7 + $0x58] sm:$0xff] }
 0x3be   :  { %2446 = vmatpush.bf16.msrb.mxu2 %v7956_v46 }
 0x3bf   :  { %v2148_v34 = vadd.f32 %v2147_v7, %v2119_v54 }
 0x3c1   :  { %v9805_v8 = vadd.f32 %v2148_v34, %v11841_v51 }
 0x3c3   :  { %2176 = vadd.xlane.f32.xlu0 %v9805_v8  ;;  %v2197_v12 = vmul.f32 %v9805_v8, %v9805_v8 }
 0x3c5   :  { %v2063_v58 = vpop.f32.mrf.mxu2  ;;  %v2092_v9 = vpop.f32.mrf.mxu3  ;;  %2208 = vadd.xlane.f32.xlu2 %v2197_v12 }
 0x3c6   :  { %v2064_v55 = vadd.f32 %v9780_v17, %v2063_v58 }
 0x3c8   :  { %v2093_v45 = vadd.f32 %v2092_v9, %v2064_v55  ;;  %v2126_v37 = vpop.f32.mrf.mxu0  ;;  %v2155_v63 = vpop.f32.mrf.mxu1 }
 0x3ca   :  { %v2122_v19 = vadd.f32 %v2121_v1, %v2093_v45 }
 0x3cc   :  { %v2151_v53 = vadd.f32 %v2150_v50, %v2122_v19  ;;  %v7955_v50 = vld [vmem:[#allocation7 + $0x50] sm:$0xff] }
 0x3cd   :  { %v2065_v21 = vpop.f32.mrf.mxu2  ;;  %v2094_v15 = vpop.f32.mrf.mxu3  ;;  %2447 = vmatpush.bf16.msrb.mxu2 %v7955_v50 }
 0x3ce   :  { %v2066_v43 = vadd.f32 %v9780_v17, %v2065_v21  ;;  %v9813_v32 = vadd.f32 %v2151_v53, %v11842_v56 }
 0x3d0   :  { %v2095_v16 = vadd.f32 %v2094_v15, %v2066_v43  ;;  %2178 = vadd.xlane.f32.xlu0 %v9813_v32  ;;  %v2198_v33 = vmul.f32 %v9813_v32, %v9813_v32  ;;  %v2128_v62 = vpop.f32.mrf.mxu0  ;;  %v2157_v36 = vpop.f32.mrf.mxu1  ;;  %v7954_v43 = vld [vmem:[#allocation7 + $0x48] sm:$0xff] }
 0x3d1   :  { %2448 = vmatpush.bf16.msrb.mxu2 %v7954_v43 }
 0x3d2   :  { %v2124_v27 = vadd.f32 %v2123_v47, %v2095_v16  ;;  %2210 = vadd.xlane.f32.xlu2 %v2198_v33 }
 0x3d4   :  { %v2153_v10 = vadd.f32 %v2152_v23, %v2124_v27 }
 0x3d6   :  { %v9819_v0 = vadd.f32 %v2153_v10, %v11843_v5 }
 0x3d8   :  { %v2068_v30 = vpop.f32.mrf.mxu2  ;;  %v2097_v6 = vpop.f32.mrf.mxu3  ;;  %2180 = vadd.xlane.f32.xlu1 %v9819_v0  ;;  %v2199_v22 = vmul.f32 %v9819_v0, %v9819_v0 }
 0x3d9   :  { %v2069_v39 = vadd.f32 %v9780_v17, %v2068_v30 }
 0x3da   :  { %2212 = vadd.xlane.f32.xlu0 %v2199_v22 }
 0x3db   :  { %v2098_v40 = vadd.f32 %v2097_v6, %v2069_v39 }
 0x3dd   :  { %v2127_v26 = vadd.f32 %v2126_v37, %v2098_v40 }
 0x3df   :  { %v2156_v20 = vadd.f32 %v2155_v63, %v2127_v26 }
 0x3e0   :  { %v2070_v57 = vpop.f32.mrf.mxu2  ;;  %v2099_v25 = vpop.f32.mrf.mxu3 }
 0x3e1   :  { %v2071_v49 = vadd.f32 %v9780_v17, %v2070_v57  ;;  %v9827_v13 = vadd.f32 %v2156_v20, %v11844_v28  ;;  %v7953_v28 = vld [vmem:[#allocation7 + $0x40] sm:$0xff] }
 0x3e2   :  { %2449 = vmatpush.bf16.msrb.mxu2 %v7953_v28 }
 0x3e3   :  { %v2100_v29 = vadd.f32 %v2099_v25, %v2071_v49  ;;  %2182 = vadd.xlane.f32.xlu1 %v9827_v13  ;;  %v2200_v18 = vmul.f32 %v9827_v13, %v9827_v13 }
 0x3e5   :  { %v2129_v38 = vadd.f32 %v2128_v62, %v2100_v29  ;;  %2214 = vadd.xlane.f32.xlu0 %v2200_v18 }
 0x3e7   :  { %v2158_v60 = vadd.f32 %v2157_v36, %v2129_v38 }
 0x3e9   :  { %v9833_v24 = vadd.f32 %v2158_v60, %v11845_v52 }
 0x3eb   :  { %2184 = vadd.xlane.f32.xlu2 %v9833_v24  ;;  %v2201_v17 = vmul.f32 %v9833_v24, %v9833_v24 }
 0x3ed   :  { %2216 = vadd.xlane.f32.xlu1 %v2201_v17 }
 0x416   :  { %v2171_v44 = vpop.xlane.xlu1 %2170 }
 0x417   :  { %v9839_v14 = vmul.f32 %v2171_v44, %v11846_v61  ;;  %v9868_v44 = vld [vmem:[#allocation19] ss:$0 sm:$0xff] }
 0x418   :  { %v2203_v3 = vpop.xlane.xlu0 %2202 }
 0x419   :  { %v2226_v41 = vmul.f32 %v9839_v14, %v9839_v14  ;;  %v2218_v11 = vmul.f32 %v2203_v3, %v11846_v61  ;;  %v2242_v62 = vsub.f32 %v9785_v35, %v9839_v14 }
 0x41b   :  { %v2234_v54 = vsub.f32 %v2218_v11, %v2226_v41  ;;  %v9870_v11 = vld [vmem:[#allocation20] ss:$0 sm:$0xff] }
 0x41d   :  { %v2250_v34 = vadd.f32 1e-05, %v2234_v54 }
 0x41e   :  { %v2173_v7 = vpop.xlane.xlu2 %2172 }
 0x41f   :  { %v2187_v51 = vmul.f32 %v2173_v7, %v11846_v61  ;;  %8254 = vrsqrt.f32 %v2250_v34  ;;  %vm2264_vm12 = vweird.f32 %v2250_v34 }
 0x420   :  { %v2205_v12 = vpop.xlane.xlu1 %2204 }
 0x421   :  { %v2227_v58 = vmul.f32 %v2187_v51, %v2187_v51  ;;  %v2219_v9 = vmul.f32 %v2205_v12, %v11846_v61  ;;  %v2243_v38 = vsub.f32 %v9791_v42, %v2187_v51 }
 0x423   :  { %v2235_v1 = vsub.f32 %v2219_v9, %v2227_v58 }
 0x425   :  { %v2251_v55 = vadd.f32 1e-05, %v2235_v1  ;;  %v8255_v45 = vpop.eup %8254 }
 0x426   :  { %v2259_v19 = vmul.f32 %v8255_v45, %v2250_v34  ;;  %vm2265_vm10 = vweird.f32 %v8255_v45 }
 0x427   :  { %8256 = vrsqrt.f32 %v2251_v55  ;;  %vm2266_vm13 = vmor %vm2264_vm12, %vm2265_vm10  ;;  %vm2274_vm14 = vweird.f32 %v2251_v55 }
 0x428   :  { %v2260_v56 = vmul.f32 %v8255_v45, %v2259_v19 }
 0x42a   :  { %v2261_v27 = vmul.f32 0.5, %v2260_v56 }
 0x42c   :  { %v2262_v6 = vsub.f32 1.5, %v2261_v27 }
 0x42d   :  { %v8257_v53 = vpop.eup %8256 }
 0x42e   :  { %v2269_v21 = vmul.f32 %v8257_v53, %v2251_v55  ;;  %v2175_v59 = vpop.xlane.xlu2 %2174  ;;  %v2263_v26 = vmul.f32 %v8255_v45, %v2262_v6  ;;  %vm2275_vm11 = vweird.f32 %v8257_v53 }
 0x42f   :  { %v9847_v15 = vmul.f32 %v2175_v59, %v11846_v61  ;;  %vm2276_vm15 = vmor %vm2274_vm14, %vm2275_vm11 }
 0x430   :  { %v2270_v4 = vmul.f32 %v8257_v53, %v2269_v21  ;;  %v2207_v47 = vpop.xlane.xlu1 %2206  ;;  %v2267_v29 = vsel %vm2266_vm13, %v8255_v45, %v2263_v26 }
 0x431   :  { %v2228_v16 = vmul.f32 %v9847_v15, %v9847_v15  ;;  %v2220_v33 = vmul.f32 %v2207_v47, %v11846_v61  ;;  %v2338_v36 = vmul.f32 %v2267_v29, %v2242_v62 }
 0x432   :  { %v2271_v31 = vmul.f32 0.5, %v2270_v4 }
 0x433   :  { %v2236_v23 = vsub.f32 %v2220_v33, %v2228_v16  ;;  %v2349_v14 = vmul.f32 %v9868_v44, %v2338_v36  ;;  %v2244_v33 = vsub.f32 %v9799_v48, %v9847_v15 }
 0x434   :  { %v2272_v22 = vsub.f32 1.5, %v2271_v31 }
 0x435   :  { %v9852_v10 = vadd.f32 1e-05, %v2236_v23  ;;  %v9878_v12 = vadd.f32 %v9870_v11, %v2349_v14 }
 0x436   :  { %v2177_v5 = vpop.xlane.xlu0 %2176  ;;  %v2273_v20 = vmul.f32 %v8257_v53, %v2272_v22 }
 0x437   :  { %8258 = vrsqrt.f32 %v9852_v10  ;;  %v9856_v30 = vmul.f32 %v2177_v5, %v11846_v61  ;;  %vm2284_vm1 = vweird.f32 %v9852_v10 }
 0x438   :  { %v2209_v39 = vpop.xlane.xlu2 %2208  ;;  %v2277_v18 = vsel %vm2276_vm15, %v8257_v53, %v2273_v20 }
 0x439   :  { %v2229_v37 = vmul.f32 %v9856_v30, %v9856_v30  ;;  %v2221_v40 = vmul.f32 %v2209_v39, %v11846_v61  ;;  %v2339_v60 = vmul.f32 %v2277_v18, %v2243_v38  ;;  %v2245_v39 = vsub.f32 %v9805_v8, %v9856_v30 }
 0x43b   :  { %v2237_v63 = vsub.f32 %v2221_v40, %v2229_v37  ;;  %v2350_v7 = vmul.f32 %v9868_v44, %v2339_v60 }
 0x43d   :  { %v8259_v57 = vpop.eup %8258  ;;  %v2253_v49 = vadd.f32 1e-05, %v2237_v63  ;;  %v9881_v58 = vadd.f32 %v9870_v11, %v2350_v7 }
 0x43e   :  { %v2279_v25 = vmul.f32 %v8259_v57, %v9852_v10  ;;  %vm2285_vm0 = vweird.f32 %v8259_v57 }
 0x43f   :  { %8260 = vrsqrt.f32 %v2253_v49  ;;  %v2368_v50 = vpack.c.bf16 %v9881_v58, %v9878_v12  ;;  %vm2286_vm2 = vmor %vm2284_vm1, %vm2285_vm0  ;;  %vm2294_vm4 = vweird.f32 %v2253_v49 }
 0x440   :  { %v2280_v52 = vmul.f32 %v8259_v57, %v2279_v25 }
 0x441   :  { %2450 = vmatmul.bf16.vlgmr.msrb.gmra.mxu2 %v2368_v50 }
 0x442   :  { %v2281_v35 = vmul.f32 0.5, %v2280_v52 }
 0x443   :  { %v2179_v17 = vpop.xlane.xlu0 %2178 }
 0x444   :  { %v9866_v2 = vmul.f32 %v2179_v17, %v11846_v61  ;;  %v2282_v9 = vsub.f32 1.5, %v2281_v35  ;;  %v7989_v17 = vld [vmem:[#allocation10 + $0x1e4] sm:$0xf] }
 0x445   :  { %v8261_v3 = vpop.eup %8260  ;;  %v2211_v41 = vpop.xlane.xlu2 %2210 }
 0x446   :  { %v2289_v46 = vmul.f32 %v8261_v3, %v2253_v49  ;;  %v2230_v54 = vmul.f32 %v9866_v2, %v9866_v2  ;;  %v2222_v42 = vmul.f32 %v2211_v41, %v11846_v61  ;;  %v2283_v43 = vmul.f32 %v8259_v57, %v2282_v9 }
 0x447   :  { %vm2295_vm3 = vweird.f32 %v8261_v3  ;;  %v2246_v14 = vsub.f32 %v9813_v32, %v9866_v2 }
 0x448   :  { %v2290_v34 = vmul.f32 %v8261_v3, %v2289_v46  ;;  %v2238_v51 = vsub.f32 %v2222_v42, %v2230_v54  ;;  %v2287_v23 = vsel %vm2286_vm2, %v8259_v57, %v2283_v43  ;;  %vm2296_vm5 = vmor %vm2294_vm4, %vm2295_vm3 }
 0x449   :  { %v2340_v22 = vmul.f32 %v2287_v23, %v2244_v33 }
 0x44a   :  { %v2254_v1 = vadd.f32 1e-05, %v2238_v51  ;;  %v2291_v45 = vmul.f32 0.5, %v2290_v34 }
 0x44b   :  { %v2181_v55 = vpop.xlane.xlu1 %2180  ;;  %v2351_v49 = vmul.f32 %v9868_v44, %v2340_v22 }
 0x44c   :  { %v9886_v19 = vmul.f32 %v2181_v55, %v11846_v61  ;;  %8262 = vrsqrt.f32 %v2254_v1  ;;  %v2292_v56 = vsub.f32 1.5, %v2291_v45  ;;  %vm2304_vm7 = vweird.f32 %v2254_v1 }
 0x44d   :  { %v2213_v53 = vpop.xlane.xlu0 %2212  ;;  %v9908_v36 = vadd.f32 %v9870_v11, %v2351_v49 }
 0x44e   :  { %v2231_v21 = vmul.f32 %v9886_v19, %v9886_v19  ;;  %v2223_v59 = vmul.f32 %v2213_v53, %v11846_v61  ;;  %v2293_v27 = vmul.f32 %v8261_v3, %v2292_v56  ;;  %v2247_v51 = vsub.f32 %v9819_v0, %v9886_v19 }
 0x450   :  { %v2239_v4 = vsub.f32 %v2223_v59, %v2231_v21  ;;  %v2297_v63 = vsel %vm2296_vm5, %v8261_v3, %v2293_v27 }
 0x451   :  { %v2341_v26 = vmul.f32 %v2297_v63, %v2245_v39 }
 0x452   :  { %v2255_v47 = vadd.f32 1e-05, %v2239_v4  ;;  %v8263_v16 = vpop.eup %8262 }
 0x453   :  { %v2299_v31 = vmul.f32 %v8263_v16, %v2254_v1  ;;  %v2352_v8 = vmul.f32 %v9868_v44, %v2341_v26  ;;  %vm2305_vm6 = vweird.f32 %v8263_v16 }
 0x454   :  { %8264 = vrsqrt.f32 %v2255_v47  ;;  %vm9911_vm8 = vmor %vm2304_vm7, %vm2305_vm6  ;;  %vm2314_vm10 = vweird.f32 %v2255_v47 }
 0x455   :  { %v2300_v5 = vmul.f32 %v8263_v16, %v2299_v31  ;;  %v9905_v62 = vadd.f32 %v9870_v11, %v2352_v8 }
 0x456   :  { %v2183_v6 = vpop.xlane.xlu1 %2182 }
 0x457   :  { %v9897_v10 = vmul.f32 %v2183_v6, %v11846_v61  ;;  %v2301_v37 = vmul.f32 0.5, %v2300_v5  ;;  %v2369_v41 = vpack.c.bf16 %v9905_v62, %v9908_v36 }
 0x458   :  { %v2215_v40 = vpop.xlane.xlu0 %2214 }
 0x459   :  { %v2232_v48 = vmul.f32 %v9897_v10, %v9897_v10  ;;  %v2224_v15 = vmul.f32 %v2215_v40, %v11846_v61  ;;  %v2302_v57 = vsub.f32 1.5, %v2301_v37  ;;  %2455 = vmatmul.bf16.gmra.mxu2 %v2369_v41  ;;  %v2248_v31 = vsub.f32 %v9827_v13, %v9897_v10  ;;  %v9947_v10 = vld [vmem:[#allocation8 + $0x1] ss:$0 sm:$0xff] }
 0x45a   :  { %v8265_v20 = vpop.eup %8264 }
 0x45b   :  { %v2309_v28 = vmul.f32 %v8265_v20, %v2255_v47  ;;  %v2240_v25 = vsub.f32 %v2224_v15, %v2232_v48  ;;  %v2303_v30 = vmul.f32 %v8263_v16, %v2302_v57  ;;  %vm2315_vm9 = vweird.f32 %v8265_v20 }
 0x45c   :  { %vm2316_vm11 = vmor %vm2314_vm10, %vm2315_vm9 }
 0x45d   :  { %v2310_v29 = vmul.f32 %v8265_v20, %v2309_v28  ;;  %v2256_v18 = vadd.f32 1e-05, %v2240_v25  ;;  %v2307_v46 = vsel %vm9911_vm8, %v8263_v16, %v2303_v30 }
 0x45e   :  { %v2185_v38 = vpop.xlane.xlu2 %2184  ;;  %v2342_v9 = vmul.f32 %v2307_v46, %v2246_v14  ;;  %v7383_v46 = vld [vmem:[#allocation10 + $0x1f0] sm:$0xf0] }
 0x45f   :  { %v2311_v60 = vmul.f32 0.5, %v2310_v29  ;;  %8266 = vrsqrt.f32 %v2256_v18  ;;  %v2193_v52 = vmul.f32 %v2185_v38, %v11846_v61  ;;  %vm2324_vm13 = vweird.f32 %v2256_v18 }
 0x460   :  { %v2217_v3 = vpop.xlane.xlu1 %2216  ;;  %v2353_v59 = vmul.f32 %v9868_v44, %v2342_v9  ;;  %v7386_v14 = vor.u32 %v7989_v17, %v7383_v46 }
 0x461   :  { %v2312_v54 = vsub.f32 1.5, %v2311_v60  ;;  %v2233_v35 = vmul.f32 %v2193_v52, %v2193_v52  ;;  %v2225_v42 = vmul.f32 %v2217_v3, %v11846_v61  ;;  %v2249_v39 = vsub.f32 %v9833_v24, %v2193_v52  ;;  %v7991_v52 = vld [vmem:[#allocation10 + $0x1ec] sm:$0xf0] }
 0x462   :  { %v9930_v0 = vadd.f32 %v9870_v11, %v2353_v59  ;;  %2918 = vmatpush.bf16.msrb.mxu0 %v7386_v14  ;;  %v7986_v59 = vld [vmem:[#allocation10 + $0x1cc] sm:$0xf]  ;;  %v7341_v14 = vld [vmem:[#allocation10 + $0x188] sm:$0xf] }
 0x463   :  { %v2313_v7 = vmul.f32 %v8265_v20, %v2312_v54  ;;  %v2241_v34 = vsub.f32 %v2225_v42, %v2233_v35  ;;  %v7990_v54 = vld [vmem:[#allocation10 + $0x1ec] sm:$0xf]  ;;  %v7391_v35 = vld [vmem:[#allocation10 + $0x1f8] sm:$0xf0] }
 0x465   :  { %v8267_v1 = vpop.eup %8266  ;;  %v2317_v55 = vsel %vm2316_vm11, %v8265_v20, %v2313_v7  ;;  %v2257_v50 = vadd.f32 1e-05, %v2241_v34  ;;  %v7394_v7 = vor.u32 %v7990_v54, %v7391_v35  ;;  %v7987_v34 = vld [vmem:[#allocation10 + $0x1cc] sm:$0xf0]  ;;  %v7317_v35 = vld [vmem:[#allocation10 + $0x160] sm:$0xf] }
 0x466   :  { %v2319_v45 = vmul.f32 %v8267_v1, %v2256_v18  ;;  %v2343_v53 = vmul.f32 %v2317_v55, %v2247_v51  ;;  %vm2325_vm12 = vweird.f32 %v8267_v1  ;;  %v7389_v51 = vld [vmem:[#allocation10 + $0x1e8] sm:$0xf]  ;;  %v7985_v55 = vld [vmem:[#allocation10 + $0x1c4] sm:$0xf] }
 0x467   :  { %8268 = vrsqrt.f32 %v2257_v50  ;;  %vm2326_vm14 = vmor %vm2324_vm13, %vm2325_vm12  ;;  %vm2334_vm0 = vweird.f32 %v2257_v50  ;;  %2976 = vmatpush.bf16.msra.mxu2 %v7394_v7 }
 0x468   :  { %v2320_v21 = vmul.f32 %v8267_v1, %v2319_v45  ;;  %v2354_v32 = vmul.f32 %v9868_v44, %v2343_v53 }
 0x46a   :  { %v2321_v2 = vmul.f32 0.5, %v2320_v21  ;;  %v9927_v43 = vadd.f32 %v9870_v11, %v2354_v32  ;;  %v7375_v32 = vld [vmem:[#allocation10 + $0x1d8] sm:$0xf0] }
 0x46c   :  { %v2322_v56 = vsub.f32 1.5, %v2321_v2  ;;  %v2370_v16 = vpack.c.bf16 %v9927_v43, %v9930_v0  ;;  %v7349_v2 = vld [vmem:[#allocation10 + $0x1a0] sm:$0xf] }
 0x46d   :  { %v8269_v19 = vpop.eup %8268 }
 0x46e   :  { %v2323_v4 = vmul.f32 %v8267_v1, %v2322_v56  ;;  %v2329_v47 = vmul.f32 %v8269_v19, %v2257_v50  ;;  %2460 = vmatmul.bf16.gmra.mxu2 %v2370_v16  ;;  %vm2335_vm15 = vweird.f32 %v8269_v19  ;;  %v7367_v50 = vld [vmem:[#allocation10 + $0x1d0] sm:$0xf0]  ;;  %v7378_v56 = vor.u32 %v7986_v59, %v7375_v32 }
 0x46f   :  { %vm2336_vm1 = vmor %vm2334_vm0, %vm2335_vm15  ;;  %v7370_v21 = vor.u32 %v7985_v55, %v7367_v50  ;;  %v7974_v50 = vld [vmem:[#allocation10 + $0x16c] sm:$0xf] }
 0x470   :  { %v2330_v33 = vmul.f32 %v8269_v19, %v2329_v47  ;;  %v2327_v23 = vsel %vm2326_vm14, %v8267_v1, %v2323_v4  ;;  %v7992_v1 = vld [vmem:[#allocation10 + $0x1f4] sm:$0xf0]  ;;  %v7373_v4 = vld [vmem:[#allocation10 + $0x1c8] sm:$0xf]  ;;  %2977 = vmatpush.bf16.msra.mxu2 %v7378_v56 }
 0x471   :  { %v2344_v6 = vmul.f32 %v2327_v23, %v2248_v31  ;;  %v7390_v53 = vor.u32 %v7992_v1, %v7389_v51  ;;  %v7988_v47 = vld [vmem:[#allocation10 + $0x1d4] sm:$0xf0]  ;;  %2919 = vmatpush.bf16.msrb.mxu0 %v7370_v21  ;;  %v7319_v51 = vld [vmem:[#allocation10 + $0x170] sm:$0xf0] }
 0x472   :  { %v2331_v27 = vmul.f32 0.5, %v2330_v33  ;;  %v7374_v33 = vor.u32 %v7988_v47, %v7373_v4 }
 0x473   :  { %v2355_v63 = vmul.f32 %v9868_v44, %v2344_v6  ;;  %2947 = vmatpush.bf16.msrb.mxu1 %v7390_v53  ;;  %v7327_v53 = vld [vmem:[#allocation10 + $0x178] sm:$0xf0] }
 0x474   :  { %v2332_v5 = vsub.f32 1.5, %v2331_v27  ;;  %v7330_v21 = vor.u32 %v7974_v50, %v7327_v53 }
 0x475   :  { %v9940_v15 = vadd.f32 %v9870_v11, %v2355_v63 }
 0x476   :  { %v2333_v22 = vmul.f32 %v8269_v19, %v2332_v5 }
 0x477   :  { %2948 = vmatpush.bf16.msrb.mxu1 %v7374_v33 }
 0x478   :  { %v2337_v37 = vsel %vm2336_vm1, %v8269_v19, %v2333_v22  ;;  %v7983_v19 = vld [vmem:[#allocation10 + $0x1ac] sm:$0xf0] }
 0x479   :  { %v2345_v40 = vmul.f32 %v2337_v37, %v2249_v39 }
 0x47b   :  { %v2356_v48 = vmul.f32 %v9868_v44, %v2345_v40 }
 0x47d   :  { %v9943_v26 = vadd.f32 %v9870_v11, %v2356_v48 }
 0x47f   :  { %v2371_v13 = vpack.c.bf16 %v9943_v26, %v9940_v15 }
 0x481   :  { %2465 = vmatmul.bf16.gmra.mxu2 %v2371_v13  ;;  %v7351_v13 = vld [vmem:[#allocation10 + $0x1b0] sm:$0xf0] }
 0x4c4   :  { %v2451_v24 = vpop.f32.mrf.mxu2 }
 0x4c5   :  { %v2452_v20 = vadd.f32 %v9947_v10, %v2451_v24  ;;  %v7982_v24 = vld [vmem:[#allocation10 + $0x1ac] sm:$0xf] }
 0x4c7   :  { %v9951_v57 = vadd.f32 %v2452_v20, %v9878_v12 }
 0x4c9   :  { %2483 = vadd.xlane.f32.xlu2 %v9951_v57  ;;  %v2507_v44 = vmul.f32 %v9951_v57, %v9951_v57 }
 0x4cb   :  { %2515 = vadd.xlane.f32.xlu1 %v2507_v44  ;;  %v7359_v44 = vld [vmem:[#allocation10 + $0x1b8] sm:$0xf0] }
 0x4cc   :  { %v2453_v11 = vpop.f32.mrf.mxu2 }
 0x4cd   :  { %v2454_v49 = vadd.f32 %v9947_v10, %v2453_v11  ;;  %v7362_v11 = vor.u32 %v7982_v24, %v7359_v44 }
 0x4cf   :  { %v9958_v28 = vadd.f32 %v2454_v49, %v9881_v58  ;;  %2978 = vmatpush.bf16.msra.mxu2 %v7362_v11  ;;  %v7333_v49 = vld [vmem:[#allocation10 + $0x180] sm:$0xf] }
 0x4d1   :  { %2485 = vadd.xlane.f32.xlu0 %v9958_v28  ;;  %v2508_v25 = vmul.f32 %v9958_v28, %v9958_v28 }
 0x4d3   :  { %2517 = vadd.xlane.f32.xlu2 %v2508_v25  ;;  %v7979_v25 = vld [vmem:[#allocation10 + $0x18c] sm:$0xf0] }
 0x4dc   :  { %v2456_v12 = vpop.f32.mrf.mxu2 }
 0x4dd   :  { %v2457_v8 = vadd.f32 %v9947_v10, %v2456_v12  ;;  %v7334_v12 = vor.u32 %v7979_v25, %v7333_v49 }
 0x4df   :  { %v9965_v30 = vadd.f32 %v2457_v8, %v9908_v36  ;;  %v7381_v36 = vld [vmem:[#allocation10 + $0x1e0] sm:$0xf]  ;;  %v7977_v8 = vld [vmem:[#allocation10 + $0x184] sm:$0xf] }
 0x4e0   :  { %v7382_v41 = vor.u32 %v7991_v52, %v7381_v36  ;;  %v7343_v36 = vld [vmem:[#allocation10 + $0x198] sm:$0xf0] }
 0x4e1   :  { %2487 = vadd.xlane.f32.xlu0 %v9965_v30  ;;  %v2509_v29 = vmul.f32 %v9965_v30, %v9965_v30 }
 0x4e2   :  { %2889 = vmatpush.bf16.msrb.mxu3 %v7382_v41 }
 0x4e3   :  { %2519 = vadd.xlane.f32.xlu2 %v2509_v29  ;;  %v7335_v29 = vld [vmem:[#allocation10 + $0x190] sm:$0xf0] }
 0x4e4   :  { %v2458_v58 = vpop.f32.mrf.mxu2 }
 0x4e5   :  { %v2459_v18 = vadd.f32 %v9947_v10, %v2458_v58 }
 0x4e7   :  { %v9972_v38 = vadd.f32 %v2459_v18, %v9905_v62  ;;  %v7365_v62 = vld [vmem:[#allocation10 + $0x1c0] sm:$0xf]  ;;  %v7338_v18 = vor.u32 %v7977_v8, %v7335_v29 }
 0x4e8   :  { %v7366_v9 = vor.u32 %v7987_v34, %v7365_v62  ;;  %v7980_v62 = vld [vmem:[#allocation10 + $0x194] sm:$0xf0]  ;;  %v7973_v34 = vld [vmem:[#allocation10 + $0x164] sm:$0xf]  ;;  %v7285_v29 = vld [vmem:[#allocation10 + $0x120] sm:$0xf] }
 0x4e9   :  { %2489 = vadd.xlane.f32.xlu1 %v9972_v38  ;;  %v2510_v60 = vmul.f32 %v9972_v38, %v9972_v38  ;;  %v7342_v1 = vor.u32 %v7980_v62, %v7341_v14  ;;  %v7322_v55 = vor.u32 %v7973_v34, %v7319_v51 }
 0x4ea   :  { %2890 = vmatpush.bf16.msrb.mxu3 %v7366_v9 }
 0x4eb   :  { %2521 = vadd.xlane.f32.xlu0 %v2510_v60  ;;  %v7978_v60 = vld [vmem:[#allocation10 + $0x18c] sm:$0xf] }
 0x4ec   :  { %v7346_v52 = vor.u32 %v7978_v60, %v7343_v36 }
 0x4ee   :  { %2979 = vmatpush.bf16.msra.mxu2 %v7346_v52  ;;  %v7972_v52 = vld [vmem:[#allocation10 + $0x154] sm:$0xf0] }
 0x4f1   :  { %v2461_v3 = vpop.f32.mrf.mxu2 }
 0x4f2   :  { %v2462_v42 = vadd.f32 %v9947_v10, %v2461_v3  ;;  %2980 = vmatpush.bf16.msra.mxu2 %v7330_v21 }
 0x4f4   :  { %v9979_v45 = vadd.f32 %v2462_v42, %v9930_v0  ;;  %v7350_v0 = vor.u32 %v7983_v19, %v7349_v2  ;;  %v7975_v42 = vld [vmem:[#allocation10 + $0x16c] sm:$0xf0] }
 0x4f5   :  { %v7318_v7 = vor.u32 %v7975_v42, %v7317_v35  ;;  %v7966_v35 = vld [vmem:[#allocation10 + $0x12c] sm:$0xf]  ;;  %v7295_v42 = vld [vmem:[#allocation10 + $0x138] sm:$0xf0] }
 0x4f6   :  { %2491 = vadd.xlane.f32.xlu1 %v9979_v45  ;;  %v2511_v16 = vmul.f32 %v9979_v45, %v9979_v45  ;;  %2891 = vmatpush.bf16.msrb.mxu3 %v7350_v0  ;;  %v7298_v62 = vor.u32 %v7966_v35, %v7295_v42 }
 0x4f8   :  { %2523 = vadd.xlane.f32.xlu0 %v2511_v16 }
 0x4f9   :  { %v2463_v23 = vpop.f32.mrf.mxu2 }
 0x4fa   :  { %v2464_v27 = vadd.f32 %v9947_v10, %v2463_v23  ;;  %2892 = vmatpush.bf16.msrb.mxu3 %v7334_v12  ;;  %v7301_v23 = vld [vmem:[#allocation10 + $0x140] sm:$0xf] }
 0x4fc   :  { %v9986_v31 = vadd.f32 %v2464_v27, %v9927_v43  ;;  %v7971_v27 = vld [vmem:[#allocation10 + $0x14c] sm:$0xf0] }
 0x4fe   :  { %2493 = vadd.xlane.f32.xlu2 %v9986_v31  ;;  %v2512_v5 = vmul.f32 %v9986_v31, %v9986_v31  ;;  %2893 = vmatpush.bf16.msrb.mxu3 %v7318_v7 }
 0x500   :  { %2525 = vadd.xlane.f32.xlu1 %v2512_v5 }
 0x504   :  { %v2466_v6 = vpop.f32.mrf.mxu2 }
 0x505   :  { %v2467_v22 = vadd.f32 %v9947_v10, %v2466_v6  ;;  %v7302_v6 = vor.u32 %v7971_v27, %v7301_v23  ;;  %v7293_v23 = vld [vmem:[#allocation10 + $0x128] sm:$0xf] }
 0x507   :  { %v9993_v39 = vadd.f32 %v2467_v22, %v9940_v15  ;;  %v7981_v15 = vld [vmem:[#allocation10 + $0x1a4] sm:$0xf]  ;;  %v7325_v22 = vld [vmem:[#allocation10 + $0x168] sm:$0xf]  ;;  %2894 = vmatpush.bf16.msrb.mxu3 %v7302_v6 }
 0x508   :  { %v7354_v20 = vor.u32 %v7981_v15, %v7351_v13  ;;  %v7970_v15 = vld [vmem:[#allocation10 + $0x14c] sm:$0xf]  ;;  %v7311_v13 = vld [vmem:[#allocation10 + $0x158] sm:$0xf0] }
 0x509   :  { %2495 = vadd.xlane.f32.xlu2 %v9993_v39  ;;  %v2513_v37 = vmul.f32 %v9993_v39, %v9993_v39  ;;  %v7314_v44 = vor.u32 %v7970_v15, %v7311_v13  ;;  %v7277_v13 = vld [vmem:[#allocation10 + $0x108] sm:$0xf] }
 0x50a   :  { %2920 = vmatpush.bf16.msrb.mxu0 %v7354_v20 }
 0x50b   :  { %2527 = vadd.xlane.f32.xlu1 %v2513_v37  ;;  %v7976_v37 = vld [vmem:[#allocation10 + $0x174] sm:$0xf0]  ;;  %2981 = vmatpush.bf16.msra.mxu2 %v7314_v44  ;;  %v7279_v44 = vld [vmem:[#allocation10 + $0x118] sm:$0xf0] }
 0x50c   :  { %v2468_v43 = vpop.f32.mrf.mxu2 }
 0x50d   :  { %v2469_v40 = vadd.f32 %v9947_v10, %v2468_v43  ;;  %v7357_v10 = vld [vmem:[#allocation10 + $0x1a8] sm:$0xf]  ;;  %v7969_v43 = vld [vmem:[#allocation10 + $0x144] sm:$0xf] }
 0x50e   :  { %2921 = vmatpush.bf16.msrb.mxu0 %v7338_v18  ;;  %v7309_v18 = vld [vmem:[#allocation10 + $0x148] sm:$0xf] }
 0x50f   :  { %v10000_v63 = vadd.f32 %v2469_v40, %v9943_v26  ;;  %v7984_v26 = vld [vmem:[#allocation10 + $0x1b4] sm:$0xf0]  ;;  %v7326_v40 = vor.u32 %v7976_v37, %v7325_v22  ;;  %2982 = vmatpush.bf16.msra.mxu2 %v7298_v62  ;;  %v7961_v37 = vld [vmem:[#allocation10 + $0x104] sm:$0xf] }
 0x510   :  { %v7358_v58 = vor.u32 %v7984_v26, %v7357_v10  ;;  %v7968_v22 = vld [vmem:[#allocation10 + $0x134] sm:$0xf0] }
 0x511   :  { %2497 = vadd.xlane.f32.xlu0 %v10000_v63  ;;  %v2514_v48 = vmul.f32 %v10000_v63, %v10000_v63 }
 0x512   :  { %2949 = vmatpush.bf16.msrb.mxu1 %v7358_v58  ;;  %2922 = vmatpush.bf16.msrb.mxu0 %v7322_v55  ;;  %v7967_v58 = vld [vmem:[#allocation10 + $0x12c] sm:$0xf0] }
 0x513   :  { %2529 = vadd.xlane.f32.xlu2 %v2514_v48  ;;  %v7303_v48 = vld [vmem:[#allocation10 + $0x150] sm:$0xf0]  ;;  %v7286_v36 = vor.u32 %v7967_v58, %v7285_v29 }
 0x514   :  { %v7306_v20 = vor.u32 %v7969_v43, %v7303_v48  ;;  %v7271_v43 = vld [vmem:[#allocation10 + $0x110] sm:$0xf0]  ;;  %v7294_v48 = vor.u32 %v7968_v22, %v7293_v23 }
 0x515   :  { %2895 = vmatpush.bf16.msrb.mxu3 %v7286_v36  ;;  %v7274_v15 = vor.u32 %v7961_v37, %v7271_v43 }
 0x516   :  { %2950 = vmatpush.bf16.msrb.mxu1 %v7342_v1  ;;  %2923 = vmatpush.bf16.msrb.mxu0 %v7306_v20 }
 0x51a   :  { %2951 = vmatpush.bf16.msrb.mxu1 %v7326_v40 }
 0x53c   :  { %v2484_v17 = vpop.xlane.xlu2 %2483 }
 0x53d   :  { %v10006_v3 = vmul.f32 %v2484_v17, %v11846_v61  ;;  %v7965_v17 = vld [vmem:[#allocation10 + $0x124] sm:$0xf] }
 0x53e   :  { %v2516_v41 = vpop.xlane.xlu1 %2515 }
 0x53f   :  { %v2539_v46 = vmul.f32 %v10006_v3, %v10006_v3  ;;  %v2531_v54 = vmul.f32 %v2516_v41, %v11846_v61 }
 0x541   :  { %v2547_v9 = vsub.f32 %v2531_v54, %v2539_v46  ;;  %v7310_v46 = vor.u32 %v7972_v52, %v7309_v18  ;;  %v7287_v54 = vld [vmem:[#allocation10 + $0x130] sm:$0xf0] }
 0x542   :  { %v7290_v7 = vor.u32 %v7965_v17, %v7287_v54 }
 0x543   :  { %v10011_v59 = vadd.f32 1e-05, %v2547_v9  ;;  %2952 = vmatpush.bf16.msrb.mxu1 %v7310_v46 }
 0x544   :  { %v2486_v32 = vpop.xlane.xlu0 %2485  ;;  %2924 = vmatpush.bf16.msrb.mxu0 %v7290_v7 }
 0x545   :  { %8270 = vrsqrt.f32 %v10011_v59  ;;  %v10015_v2 = vmul.f32 %v2486_v32, %v11846_v61  ;;  %vm2577_vm4 = vweird.f32 %v10011_v59 }
 0x546   :  { %v2518_v56 = vpop.xlane.xlu2 %2517 }
 0x547   :  { %v2540_v19 = vmul.f32 %v10015_v2, %v10015_v2  ;;  %v2532_v4 = vmul.f32 %v2518_v56, %v11846_v61  ;;  %v2556_v27 = vsub.f32 %v9958_v28, %v10015_v2  ;;  %2953 = vmatpush.bf16.msrb.mxu1 %v7294_v48 }
 0x548   :  { %2925 = vmatpush.bf16.msrb.mxu0 %v7274_v15 }
 0x549   :  { %v2548_v47 = vsub.f32 %v2532_v4, %v2540_v19 }
 0x54b   :  { %v10020_v16 = vpop.eup %8270  ;;  %v2564_v33 = vadd.f32 1e-05, %v2548_v47  ;;  %v2555_v47 = vsub.f32 %v9951_v57, %v10006_v3  ;;  %v7962_v57 = vld [vmem:[#allocation10 + $0x10c] sm:$0xf] }
 0x54c   :  { %v2572_v0 = vmul.f32 %v10020_v16, %v10011_v59  ;;  %vm2578_vm2 = vweird.f32 %v10020_v16 }
 0x54d   :  { %8272 = vrsqrt.f32 %v2564_v33  ;;  %vm10039_vm5 = vmor %vm2577_vm4, %vm2578_vm2  ;;  %vm2587_vm6 = vweird.f32 %v2564_v33 }
 0x54e   :  { %v2573_v5 = vmul.f32 %v10020_v16, %v2572_v0  ;;  %v7963_v0 = vld [vmem:[#allocation10 + $0x10c] sm:$0xf0] }
 0x550   :  { %v2574_v24 = vmul.f32 0.5, %v2573_v5 }
 0x552   :  { %v2575_v10 = vsub.f32 1.5, %v2574_v24  ;;  %v7964_v24 = vld [vmem:[#allocation10 + $0x114] sm:$0xf0] }
 0x553   :  { %v8273_v25 = vpop.eup %8272 }
 0x554   :  { %v2488_v11 = vpop.xlane.xlu0 %2487  ;;  %v2582_v26 = vmul.f32 %v8273_v25, %v2564_v33  ;;  %v2576_v34 = vmul.f32 %v10020_v16, %v2575_v10  ;;  %vm2588_vm3 = vweird.f32 %v8273_v25  ;;  %v7269_v33 = vld [vmem:[#allocation10 + $0x100] sm:$0xf]  ;;  %v7282_v10 = vor.u32 %v7962_v57, %v7279_v44 }
 0x555   :  { %v10026_v49 = vmul.f32 %v2488_v11, %v11846_v61  ;;  %vm10047_vm7 = vmor %vm2587_vm6, %vm2588_vm3  ;;  %v7270_v6 = vor.u32 %v7963_v0, %v7269_v33  ;;  %v10060_v11 = vld [vmem:[#allocation16 + $0x1] ss:$0 sm:$0xff] }
 0x556   :  { %v2520_v12 = vpop.xlane.xlu2 %2519  ;;  %v2583_v41 = vmul.f32 %v8273_v25, %v2582_v26  ;;  %v2580_v32 = vsel %vm10039_vm5, %v10020_v16, %v2576_v34  ;;  %v10063_v26 = vld [vmem:[#allocation17 + $0x1] ss:$0 sm:$0xff]  ;;  %2983 = vmatpush.bf16.msra.mxu2 %v7282_v10 }
 0x557   :  { %v2541_v8 = vmul.f32 %v10026_v49, %v10026_v49  ;;  %v2533_v60 = vmul.f32 %v2520_v12, %v11846_v61  ;;  %v2651_v40 = vmul.f32 %v2580_v32, %v2555_v47  ;;  %2896 = vmatpush.bf16.msrb.mxu3 %v7270_v6 }
 0x558   :  { %v2584_v51 = vmul.f32 0.5, %v2583_v41 }
 0x559   :  { %v2549_v14 = vsub.f32 %v2533_v60, %v2541_v8  ;;  %v2662_v58 = vmul.f32 %v10060_v11, %v2651_v40 }
 0x55a   :  { %v2585_v55 = vsub.f32 1.5, %v2584_v51 }
 0x55b   :  { %v10033_v9 = vadd.f32 1e-05, %v2549_v14  ;;  %v10074_v41 = vadd.f32 %v10063_v26, %v2662_v58 }
 0x55c   :  { %v2490_v1 = vpop.xlane.xlu1 %2489  ;;  %v2586_v56 = vmul.f32 %v8273_v25, %v2585_v55 }
 0x55d   :  { %v10037_v50 = vmul.f32 %v2490_v1, %v11846_v61  ;;  %8274 = vrsqrt.f32 %v10033_v9  ;;  %11853 = vst [vmem:[#allocation48_spill] sm:$0xff] %v10074_v41  ;;  %vm2597_vm9 = vweird.f32 %v10033_v9 }
 0x55e   :  { %v2522_v21 = vpop.xlane.xlu0 %2521  ;;  %v2590_v16 = vsel %vm10047_vm7, %v8273_v25, %v2586_v56  ;;  %v7278_v25 = vor.u32 %v7964_v24, %v7277_v13 }
 0x55f   :  { %v2542_v59 = vmul.f32 %v10037_v50, %v10037_v50  ;;  %v2534_v4 = vmul.f32 %v2522_v21, %v11846_v61  ;;  %v2652_v3 = vmul.f32 %v2590_v16, %v2556_v27  ;;  %v2558_v16 = vsub.f32 %v9972_v38, %v10037_v50 }
 0x560   :  { %2954 = vmatpush.bf16.msrb.mxu1 %v7278_v25 }
 0x561   :  { %v2550_v5 = vsub.f32 %v2534_v4, %v2542_v59  ;;  %v2663_v36 = vmul.f32 %v10060_v11, %v2652_v3  ;;  %v2557_v59 = vsub.f32 %v9965_v30, %v10026_v49 }
 0x563   :  { %v2566_v20 = vadd.f32 1e-05, %v2550_v5  ;;  %v8275_v28 = vpop.eup %8274  ;;  %v10077_v46 = vadd.f32 %v10063_v26, %v2663_v36 }
 0x564   :  { %v2592_v12 = vmul.f32 %v8275_v28, %v10033_v9  ;;  %vm2598_vm8 = vweird.f32 %v8275_v28 }
 0x565   :  { %8276 = vrsqrt.f32 %v2566_v20  ;;  %11854 = vst [vmem:[#allocation49_spill] sm:$0xff] %v10077_v46  ;;  %v2681_v14 = vpack.c.bf16 %v10077_v46, %v10074_v41  ;;  %vm2599_vm10 = vmor %vm2597_vm9, %vm2598_vm8  ;;  %vm2607_vm12 = vweird.f32 %v2566_v20 }
 0x566   :  { %v2593_v18 = vmul.f32 %v8275_v28, %v2592_v12 }
 0x567   :  { %2897 = vmatmul.bf16.vlgmr.msrb.gmra.mxu3 %v2681_v14  ;;  %2926 = vmatmul.bf16.vlgmr.msrb.gmra.mxu0 %v2681_v14 }
 0x568   :  { %v2594_v17 = vmul.f32 0.5, %v2593_v18  ;;  %2955 = vmatmul.bf16.vlgmr.msrb.gmra.mxu1 %v2681_v14  ;;  %2984 = vmatmul.bf16.vlgmr.msra.gmra.mxu2 %v2681_v14 }
 0x569   :  { %v2492_v2 = vpop.xlane.xlu1 %2491 }
 0x56a   :  { %v10066_v8 = vmul.f32 %v2492_v2, %v11846_v61  ;;  %v2595_v42 = vsub.f32 1.5, %v2594_v17 }
 0x56b   :  { %v2524_v29 = vpop.xlane.xlu0 %2523  ;;  %v8277_v35 = vpop.eup %8276 }
 0x56c   :  { %v2535_v60 = vmul.f32 %v2524_v29, %v11846_v61  ;;  %v2543_v52 = vmul.f32 %v10066_v8, %v10066_v8  ;;  %v2602_v7 = vmul.f32 %v8277_v35, %v2566_v20  ;;  %v2596_v51 = vmul.f32 %v8275_v28, %v2595_v42 }
 0x56d   :  { %vm2608_vm11 = vweird.f32 %v8277_v35 }
 0x56e   :  { %v2551_v54 = vsub.f32 %v2535_v60, %v2543_v52  ;;  %v2603_v55 = vmul.f32 %v8277_v35, %v2602_v7  ;;  %v2600_v56 = vsel %vm2599_vm10, %v8275_v28, %v2596_v51  ;;  %vm2609_vm13 = vmor %vm2607_vm12, %vm2608_vm11  ;;  %v2559_v52 = vsub.f32 %v9979_v45, %v10066_v8 }
 0x56f   :  { %v2653_v9 = vmul.f32 %v2600_v56, %v2557_v59 }
 0x570   :  { %v2567_v62 = vadd.f32 1e-05, %v2551_v54  ;;  %v2604_v19 = vmul.f32 0.5, %v2603_v55 }
 0x571   :  { %v2494_v34 = vpop.xlane.xlu2 %2493  ;;  %v2664_v40 = vmul.f32 %v10060_v11, %v2653_v9 }
 0x572   :  { %v10082_v1 = vmul.f32 %v2494_v34, %v11846_v61  ;;  %8278 = vrsqrt.f32 %v2567_v62  ;;  %v2605_v47 = vsub.f32 1.5, %v2604_v19  ;;  %vm2617_vm15 = vweird.f32 %v2567_v62 }
 0x573   :  { %v2526_v53 = vpop.xlane.xlu1 %2525  ;;  %v10101_v57 = vadd.f32 %v10063_v26, %v2664_v40 }
 0x574   :  { %v2544_v21 = vmul.f32 %v10082_v1, %v10082_v1  ;;  %v2536_v32 = vmul.f32 %v2526_v53, %v11846_v61  ;;  %v2606_v23 = vmul.f32 %v8277_v35, %v2605_v47 }
 0x575   :  { %11855 = vst [vmem:[#allocation50_spill] sm:$0xff] %v10101_v57 }
 0x576   :  { %v2552_v4 = vsub.f32 %v2536_v32, %v2544_v21  ;;  %v2610_v6 = vsel %vm2609_vm13, %v8277_v35, %v2606_v23 }
 0x577   :  { %v2654_v49 = vmul.f32 %v2610_v6, %v2558_v16 }
 0x578   :  { %v2568_v33 = vadd.f32 1e-05, %v2552_v4  ;;  %v8279_v0 = vpop.eup %8278 }
 0x579   :  { %v2612_v5 = vmul.f32 %v8279_v0, %v2567_v62  ;;  %v2665_v38 = vmul.f32 %v10060_v11, %v2654_v49  ;;  %vm2618_vm14 = vweird.f32 %v8279_v0  ;;  %v2560_v62 = vsub.f32 %v9986_v31, %v10082_v1 }
 0x57a   :  { %8280 = vrsqrt.f32 %v2568_v33  ;;  %vm2619_vm0 = vmor %vm2617_vm15, %vm2618_vm14  ;;  %vm2627_vm2 = vweird.f32 %v2568_v33 }
 0x57b   :  { %v2613_v37 = vmul.f32 %v8279_v0, %v2612_v5  ;;  %v10104_v3 = vadd.f32 %v10063_v26, %v2665_v38 }
 0x57c   :  { %v2496_v27 = vpop.xlane.xlu2 %2495 }
 0x57d   :  { %v10093_v22 = vmul.f32 %v2496_v27, %v11846_v61  ;;  %v2614_v15 = vmul.f32 0.5, %v2613_v37  ;;  %11856 = vst [vmem:[#allocation51_spill] sm:$0xff] %v10104_v3  ;;  %v2682_v10 = vpack.c.bf16 %v10104_v3, %v10101_v57 }
 0x57e   :  { %v2528_v30 = vpop.xlane.xlu1 %2527 }
 0x57f   :  { %v2537_v43 = vmul.f32 %v2528_v30, %v11846_v61  ;;  %v2545_v48 = vmul.f32 %v10093_v22, %v10093_v22  ;;  %v2615_v24 = vsub.f32 1.5, %v2614_v15  ;;  %2902 = vmatmul.bf16.gmra.mxu3 %v2682_v10  ;;  %2931 = vmatmul.bf16.gmra.mxu0 %v2682_v10 }
 0x580   :  { %v8281_v13 = vpop.eup %8280  ;;  %2960 = vmatmul.bf16.gmra.mxu1 %v2682_v10  ;;  %2989 = vmatmul.bf16.gmra.mxu2 %v2682_v10 }
 0x581   :  { %v2553_v50 = vsub.f32 %v2537_v43, %v2545_v48  ;;  %v2622_v20 = vmul.f32 %v8281_v13, %v2568_v33  ;;  %v2616_v2 = vmul.f32 %v8279_v0, %v2615_v24  ;;  %vm2628_vm1 = vweird.f32 %v8281_v13 }
 0x582   :  { %vm2629_vm3 = vmor %vm2627_vm2, %vm2628_vm1 }
 0x583   :  { %v2569_v44 = vadd.f32 1e-05, %v2553_v50  ;;  %v2623_v12 = vmul.f32 %v8281_v13, %v2622_v20  ;;  %v2620_v60 = vsel %vm2619_vm0, %v8279_v0, %v2616_v2  ;;  %v2561_v0 = vsub.f32 %v9993_v39, %v10093_v22 }
 0x584   :  { %v2498_v28 = vpop.xlane.xlu0 %2497  ;;  %v2655_v35 = vmul.f32 %v2620_v60, %v2559_v52 }
 0x585   :  { %v2506_v25 = vmul.f32 %v2498_v28, %v11846_v61  ;;  %8282 = vrsqrt.f32 %v2569_v44  ;;  %v2624_v36 = vmul.f32 0.5, %v2623_v12  ;;  %vm2637_vm5 = vweird.f32 %v2569_v44 }
 0x586   :  { %v2530_v29 = vpop.xlane.xlu2 %2529  ;;  %v2666_v45 = vmul.f32 %v10060_v11, %v2655_v35 }
 0x587   :  { %v2546_v58 = vmul.f32 %v2506_v25, %v2506_v25  ;;  %v2538_v18 = vmul.f32 %v2530_v29, %v11846_v61  ;;  %v2625_v54 = vsub.f32 1.5, %v2624_v36  ;;  %v2562_v5 = vsub.f32 %v10000_v63, %v2506_v25  ;;  %v2719_v63 = vld [vmem:[#allocation11 + $0x4] sm:$0xf] }
 0x588   :  { %v10117_v19 = vadd.f32 %v10063_v26, %v2666_v45  ;;  %v10137_v40 = vperm.slane %v2719_v63, 1  ;;  %v10139_v48 = vperm.slane %v2719_v63, 0  ;;  %v10145_v20 = vperm.slane %v2719_v63, 3 }
 0x589   :  { %v2554_v17 = vsub.f32 %v2538_v18, %v2546_v58  ;;  %v2626_v7 = vmul.f32 %v8281_v13, %v2625_v54 }
 0x58a   :  { %11857 = vst [vmem:[#allocation52_spill] sm:$0xff] %v10117_v19 }
 0x58b   :  { %v2570_v42 = vadd.f32 1e-05, %v2554_v17  ;;  %v8283_v14 = vpop.eup %8282  ;;  %v2630_v51 = vsel %vm2629_vm3, %v8281_v13, %v2626_v7  ;;  %v10143_v13 = vperm.slane %v2719_v63, 2 }
 0x58c   :  { %v2632_v34 = vmul.f32 %v8283_v14, %v2569_v44  ;;  %v2656_v55 = vmul.f32 %v2630_v51, %v2560_v62  ;;  %vm2638_vm4 = vweird.f32 %v8283_v14 }
 0x58d   :  { %8284 = vrsqrt.f32 %v2570_v42  ;;  %vm2639_vm6 = vmor %vm2637_vm5, %vm2638_vm4  ;;  %vm2647_vm8 = vweird.f32 %v2570_v42 }
 0x58e   :  { %v2633_v53 = vmul.f32 %v8283_v14, %v2632_v34  ;;  %v2667_v21 = vmul.f32 %v10060_v11, %v2656_v55 }
 0x590   :  { %v2634_v8 = vmul.f32 0.5, %v2633_v53  ;;  %v10120_v59 = vadd.f32 %v10063_v26, %v2667_v21 }
 0x592   :  { %v2635_v56 = vsub.f32 1.5, %v2634_v8  ;;  %11858 = vst [vmem:[#allocation53_spill] sm:$0xff] %v10120_v59  ;;  %v2683_v4 = vpack.c.bf16 %v10120_v59, %v10117_v19 }
 0x593   :  { %v8285_v32 = vpop.eup %8284 }
 0x594   :  { %v2642_v31 = vmul.f32 %v8285_v32, %v2570_v42  ;;  %v2636_v1 = vmul.f32 %v8283_v14, %v2635_v56  ;;  %2907 = vmatmul.bf16.gmra.mxu3 %v2683_v4  ;;  %2936 = vmatmul.bf16.gmra.mxu0 %v2683_v4  ;;  %vm2648_vm7 = vweird.f32 %v8285_v32  ;;  %v8000_v42 = vld [vmem:[#allocation13 + $0x138] sm:$0xff] }
 0x595   :  { %2965 = vmatmul.bf16.gmra.mxu1 %v2683_v4  ;;  %2994 = vmatmul.bf16.gmra.mxu2 %v2683_v4  ;;  %vm2649_vm9 = vmor %vm2647_vm8, %vm2648_vm7 }
 0x596   :  { %v2643_v47 = vmul.f32 %v8285_v32, %v2642_v31  ;;  %v2640_v9 = vsel %vm2639_vm6, %v8283_v14, %v2636_v1  ;;  %4003 = vmatpush.bf16.msra.mxu3 %v8000_v42 }
 0x597   :  { %v2657_v27 = vmul.f32 %v2640_v9, %v2561_v0 }
 0x598   :  { %v2644_v33 = vmul.f32 0.5, %v2643_v47 }
 0x599   :  { %v2668_v49 = vmul.f32 %v10060_v11, %v2657_v27 }
 0x59a   :  { %v2645_v23 = vsub.f32 1.5, %v2644_v33 }
 0x59b   :  { %v10130_v43 = vadd.f32 %v10063_v26, %v2668_v49 }
 0x59c   :  { %v2646_v16 = vmul.f32 %v8285_v32, %v2645_v23 }
 0x59d   :  { %11859 = vst [vmem:[#allocation56_spill] sm:$0xff] %v10130_v43 }
 0x59e   :  { %v2650_v6 = vsel %vm2649_vm9, %v8285_v32, %v2646_v16 }
 0x59f   :  { %v2658_v30 = vmul.f32 %v2650_v6, %v2562_v5 }
 0x5a1   :  { %v2669_v37 = vmul.f32 %v10060_v11, %v2658_v30 }
 0x5a3   :  { %v10133_v39 = vadd.f32 %v10063_v26, %v2669_v37 }
 0x5a5   :  { %11860 = vst [vmem:[#allocation54_spill] sm:$0xff] %v10133_v39  ;;  %v2684_v22 = vpack.c.bf16 %v10133_v39, %v10130_v43  ;;  %v8018_v39 = vld [vmem:[#allocation13 + $0x1c8] sm:$0xff] }
 0x5a6   :  { %v8010_v43 = vld [vmem:[#allocation13 + $0x188] sm:$0xff] }
 0x5a7   :  { %2912 = vmatmul.bf16.gmra.mxu3 %v2684_v22  ;;  %2941 = vmatmul.bf16.gmra.mxu0 %v2684_v22 }
 0x5a8   :  { %2970 = vmatmul.bf16.gmra.mxu1 %v2684_v22  ;;  %2999 = vmatmul.bf16.gmra.mxu2 %v2684_v22 }
 0x5e4   :  { %v2927_v15 = vpop.f32.mrf.mxu0 }
 0x5e5   :  { %v2956_v11 = vpop.f32.mrf.mxu1  ;;  %v2928_v50 = vadd.f32 %v2927_v15, %v10137_v40 }
 0x5e6   :  { %v2957_v10 = vadd.f32 %v2956_v11, %v10143_v13 }
 0x5ea   :  { %v2898_v38 = vpop.f32.mrf.mxu3 }
 0x5eb   :  { %v2899_v26 = vadd.f32 %v2898_v38, %v10139_v48  ;;  %v2985_v44 = vpop.f32.mrf.mxu2 }
 0x5ec   :  { %v2986_v25 = vadd.f32 %v2985_v44, %v10145_v20  ;;  %v2929_v18 = vpop.f32.mrf.mxu0  ;;  %v8024_v44 = vld [vmem:[#allocation13 + $0x1f8] sm:$0xff] }
 0x5ed   :  { %v3005_v24 = vpack.c.bf16 %v2928_v50, %v2899_v26  ;;  %v2958_v36 = vpop.f32.mrf.mxu1  ;;  %v2930_v34 = vadd.f32 %v2929_v18, %v10137_v40  ;;  %4090 = vmatpush.bf16.msrb.mxu2 %v8024_v44 }
 0x5ee   :  { %v3006_v58 = vpack.c.bf16 %v2986_v25, %v2957_v10  ;;  %v2959_v51 = vadd.f32 %v2958_v36, %v10143_v13  ;;  %v7999_v10 = vld [vmem:[#allocation13 + $0x130] sm:$0xff] }
 0x5ef   :  { %v10147_v28 = vunpack.c.l.bf16 %v3005_v24  ;;  %v10149_v2 = vunpack.c.h.bf16 %v3005_v24  ;;  %4004 = vmatpush.bf16.msra.mxu3 %v7999_v10 }
 0x5f0   :  { %v10155_v52 = vunpack.c.l.bf16 %v3006_v58  ;;  %v10157_v17 = vunpack.c.h.bf16 %v3006_v58 }
 0x5f1   :  { %v3101_v12 = vmul.f32 0.044677734, %v10147_v28  ;;  %v3102_v29 = vmul.f32 0.044677734, %v10149_v2 }
 0x5f2   :  { %v2900_v14 = vpop.f32.mrf.mxu3  ;;  %v3103_v7 = vmul.f32 0.044677734, %v10155_v52  ;;  %v3104_v62 = vmul.f32 0.044677734, %v10157_v17 }
 0x5f3   :  { %v3133_v60 = vpack.c.bf16 %v3102_v29, %v3101_v12  ;;  %v2987_v55 = vpop.f32.mrf.mxu2  ;;  %v2901_v8 = vadd.f32 %v2900_v14, %v10139_v48  ;;  %v8008_v12 = vld [vmem:[#allocation13 + $0x178] sm:$0xff] }
 0x5f4   :  { %v2988_v21 = vadd.f32 %v2987_v55, %v10145_v20  ;;  %v3134_v32 = vpack.c.bf16 %v3104_v62, %v3103_v7  ;;  %4032 = vmatpush.bf16.msra.mxu0 %v8008_v12 }
 0x5f5   :  { %v3149_v54 = vunpack.c.l.bf16 %v3133_v60  ;;  %v3150_v35 = vunpack.c.h.bf16 %v3133_v60  ;;  %v3007_v31 = vpack.c.bf16 %v2930_v34, %v2901_v8  ;;  %v8016_v60 = vld [vmem:[#allocation13 + $0x1b8] sm:$0xff] }
 0x5f6   :  { %v3008_v1 = vpack.c.bf16 %v2988_v21, %v2959_v51  ;;  %v3151_v4 = vunpack.c.l.bf16 %v3134_v32  ;;  %v3152_v47 = vunpack.c.h.bf16 %v3134_v32  ;;  %4061 = vmatpush.bf16.msra.mxu1 %v8016_v60 }
 0x5f7   :  { %v3181_v53 = vmul.f32 %v3149_v54, %v10147_v28  ;;  %v3182_v45 = vmul.f32 %v3150_v35, %v10149_v2  ;;  %v10167_v0 = vunpack.c.l.bf16 %v3007_v31  ;;  %v10169_v23 = vunpack.c.h.bf16 %v3007_v31 }
 0x5f8   :  { %v3183_v27 = vmul.f32 %v3151_v4, %v10155_v52  ;;  %v3184_v16 = vmul.f32 %v3152_v47, %v10157_v17  ;;  %v10173_v5 = vunpack.c.l.bf16 %v3008_v1  ;;  %v10175_v6 = vunpack.c.h.bf16 %v3008_v1 }
 0x5f9   :  { %v3213_v56 = vpack.c.bf16 %v3182_v45, %v3181_v53  ;;  %v3105_v63 = vmul.f32 0.044677734, %v10167_v0  ;;  %v3106_v15 = vmul.f32 0.044677734, %v10169_v23 }
 0x5fa   :  { %v3214_v22 = vpack.c.bf16 %v3184_v16, %v3183_v27  ;;  %v3107_v26 = vmul.f32 0.044677734, %v10173_v5  ;;  %v3108_v24 = vmul.f32 0.044677734, %v10175_v6 }
 0x5fb   :  { %v3229_v9 = vunpack.c.l.bf16 %v3213_v56  ;;  %v3230_v33 = vunpack.c.h.bf16 %v3213_v56  ;;  %v3135_v18 = vpack.c.bf16 %v3106_v15, %v3105_v63 }
 0x5fc   :  { %v2932_v30 = vpop.f32.mrf.mxu0  ;;  %v3231_v29 = vunpack.c.l.bf16 %v3214_v22  ;;  %v3232_v58 = vunpack.c.h.bf16 %v3214_v22  ;;  %v3136_v42 = vpack.c.bf16 %v3108_v24, %v3107_v26 }
 0x5fd   :  { %v3261_v49 = vmul.f32 %v3229_v9, %v10147_v28  ;;  %v3262_v37 = vmul.f32 %v3230_v33, %v10149_v2  ;;  %v2961_v11 = vpop.f32.mrf.mxu1  ;;  %v2933_v25 = vadd.f32 %v2932_v30, %v10137_v40  ;;  %v3153_v34 = vunpack.c.l.bf16 %v3135_v18 }
 0x5fe   :  { %v2962_v14 = vadd.f32 %v2961_v11, %v10143_v13  ;;  %v3263_v7 = vmul.f32 %v3231_v29, %v10155_v52  ;;  %v3264_v62 = vmul.f32 %v3232_v58, %v10157_v17  ;;  %v3154_v51 = vunpack.c.h.bf16 %v3135_v18 }
 0x5ff   :  { %v3293_v50 = vpack.c.bf16 %v3262_v37, %v3261_v49  ;;  %v3155_v8 = vunpack.c.l.bf16 %v3136_v42  ;;  %v3156_v21 = vunpack.c.h.bf16 %v3136_v42  ;;  %v3185_v56 = vmul.f32 %v3153_v34, %v10167_v0 }
 0x600   :  { %v3294_v32 = vpack.c.bf16 %v3264_v62, %v3263_v7  ;;  %v3186_v31 = vmul.f32 %v3154_v51, %v10169_v23 }
 0x601   :  { %v3309_v54 = vunpack.c.l.bf16 %v3293_v50  ;;  %v3310_v35 = vunpack.c.h.bf16 %v3293_v50  ;;  %v3187_v47 = vmul.f32 %v3155_v8, %v10173_v5  ;;  %v3188_v9 = vmul.f32 %v3156_v21, %v10175_v6 }
 0x602   :  { %v2903_v38 = vpop.f32.mrf.mxu3  ;;  %v3311_v27 = vunpack.c.l.bf16 %v3294_v32  ;;  %v3312_v16 = vunpack.c.h.bf16 %v3294_v32  ;;  %v3215_v30 = vpack.c.bf16 %v3186_v31, %v3185_v56  ;;  %v8023_v32 = vld [vmem:[#allocation13 + $0x1f0] sm:$0xff]  ;;  %v7998_v56 = vld [vmem:[#allocation13 + $0x128] sm:$0xff] }
 0x603   :  { %v2904_v36 = vadd.f32 %v2903_v38, %v10139_v48  ;;  %v2990_v55 = vpop.f32.mrf.mxu2  ;;  %v3341_v53 = vadd.f32 %v3309_v54, %v10147_v28  ;;  %v3342_v45 = vadd.f32 %v3310_v35, %v10149_v2  ;;  %v3216_v63 = vpack.c.bf16 %v3188_v9, %v3187_v47  ;;  %v8007_v31 = vld [vmem:[#allocation13 + $0x170] sm:$0xff]  ;;  %4091 = vmatpush.bf16.msrb.mxu2 %v8023_v32 }
 0x604   :  { %v2991_v33 = vadd.f32 %v2990_v55, %v10145_v20  ;;  %v3343_v11 = vadd.f32 %v3311_v27, %v10155_v52  ;;  %v3344_v38 = vadd.f32 %v3312_v16, %v10157_v17  ;;  %v3233_v50 = vunpack.c.l.bf16 %v3215_v30  ;;  %4005 = vmatpush.bf16.msra.mxu3 %v7998_v56  ;;  %4033 = vmatpush.bf16.msra.mxu0 %v8007_v31 }
 0x605   :  { %v3009_v1 = vpack.c.bf16 %v2933_v25, %v2904_v36  ;;  %v3373_v4 = vpack.c.bf16 %v3342_v45, %v3341_v53  ;;  %v3234_v26 = vunpack.c.h.bf16 %v3215_v30  ;;  %v3235_v25 = vunpack.c.l.bf16 %v3216_v63 }
 0x606   :  { %v3236_v10 = vunpack.c.h.bf16 %v3216_v63  ;;  %v3374_v12 = vpack.c.bf16 %v3344_v38, %v3343_v11  ;;  %v3265_v29 = vmul.f32 %v3233_v50, %v10167_v0  ;;  %v3010_v35 = vpack.c.bf16 %v2991_v33, %v2962_v14  ;;  %v8015_v14 = vld [vmem:[#allocation13 + $0x1b0] sm:$0xff] }
 0x607   :  { %v10195_v49 = vunpack.c.l.bf16 %v3009_v1  ;;  %v3389_v37 = vunpack.c.l.bf16 %v3373_v4  ;;  %v3390_v22 = vunpack.c.h.bf16 %v3373_v4  ;;  %v10197_v15 = vunpack.c.h.bf16 %v3009_v1  ;;  %4062 = vmatpush.bf16.msra.mxu1 %v8015_v14 }
 0x608   :  { %v3266_v58 = vmul.f32 %v3234_v26, %v10169_v23  ;;  %v3267_v60 = vmul.f32 %v3235_v25, %v10173_v5  ;;  %v3268_v36 = vmul.f32 %v3236_v10, %v10175_v6  ;;  %v3391_v42 = vunpack.c.l.bf16 %v3374_v12 }
 0x609   :  { %v3421_v24 = vmul.f32 0.796875, %v3389_v37  ;;  %v3422_v44 = vmul.f32 0.796875, %v3390_v22  ;;  %v3109_v18 = vmul.f32 0.044677734, %v10195_v49  ;;  %v3110_v54 = vmul.f32 0.044677734, %v10197_v15 }
 0x60a   :  { %v3392_v7 = vunpack.c.h.bf16 %v3374_v12  ;;  %v3295_v62 = vpack.c.bf16 %v3266_v58, %v3265_v29  ;;  %v3296_v51 = vpack.c.bf16 %v3268_v36, %v3267_v60  ;;  %v3423_v53 = vmul.f32 0.796875, %v3391_v42  ;;  %v2905_v60 = vpop.f32.mrf.mxu3 }
 0x60b   :  { %v10207_v34 = vpack.c.bf16 %v3422_v44, %v3421_v24  ;;  %v3137_v55 = vpack.c.bf16 %v3110_v54, %v3109_v18  ;;  %v10209_v9 = vunpack.c.l.bf16 %v3010_v35  ;;  %v10219_v50 = vunpack.c.h.bf16 %v3010_v35  ;;  %v2934_v18 = vpop.f32.mrf.mxu0 }
 0x60c   :  { %v3424_v45 = vmul.f32 0.796875, %v3392_v7  ;;  %v3313_v8 = vunpack.c.l.bf16 %v3295_v62  ;;  %v3314_v21 = vunpack.c.h.bf16 %v3295_v62  ;;  %v3315_v1 = vunpack.c.l.bf16 %v3296_v51  ;;  %v2992_v7 = vpop.f32.mrf.mxu2 }
 0x60d   :  { %v3316_v4 = vunpack.c.h.bf16 %v3296_v51  ;;  %v3157_v47 = vunpack.c.l.bf16 %v3137_v55  ;;  %11861 = vst [vmem:[#allocation55_spill] sm:$0xff] %v10209_v9  ;;  %v3158_v37 = vunpack.c.h.bf16 %v3137_v55  ;;  %v3469_v63 = vunpack.c.l.bf16 %v10207_v34 }
 0x60e   :  { %v3345_v33 = vadd.f32 %v3313_v8, %v10167_v0  ;;  %v3346_v27 = vadd.f32 %v3314_v21, %v10169_v23  ;;  %v3347_v16 = vadd.f32 %v3315_v1, %v10173_v5  ;;  %v10217_v11 = vpack.c.bf16 %v3424_v45, %v3423_v53  ;;  %11862 = vst [vmem:[#allocation57_spill] sm:$0xff] %v10219_v50  ;;  %v2963_v53 = vpop.f32.mrf.mxu1  ;;  %v8022_v45 = vld [vmem:[#allocation13 + $0x1e8] sm:$0xff] }
 0x60f   :  { %v3348_v30 = vadd.f32 %v3316_v4, %v10175_v6  ;;  %v3189_v22 = vmul.f32 %v3157_v47, %v10195_v49  ;;  %v10222_v26 = vmul.f32 0.5, %v10147_v28  ;;  %v3190_v44 = vmul.f32 %v3158_v37, %v10197_v15  ;;  %v8006_v8 = vld [vmem:[#allocation13 + $0x168] sm:$0xff]  ;;  %4092 = vmatpush.bf16.msrb.mxu2 %v8022_v45 }
 0x610   :  { %v3375_v38 = vpack.c.bf16 %v3346_v27, %v3345_v33  ;;  %v3111_v25 = vmul.f32 0.044677734, %v10209_v9  ;;  %v10227_v10 = vmul.f32 0.5, %v10149_v2  ;;  %v10230_v12 = vmul.f32 0.5, %v10155_v52  ;;  %v8014_v21 = vld [vmem:[#allocation13 + $0x1a8] sm:$0xff]  ;;  %4034 = vmatpush.bf16.msra.mxu0 %v8006_v8 }
 0x611   :  { %v3376_v24 = vpack.c.bf16 %v3348_v30, %v3347_v16  ;;  %v10233_v29 = vmul.f32 0.5, %v10157_v17  ;;  %v3112_v58 = vmul.f32 0.044677734, %v10219_v50  ;;  %v3470_v28 = vunpack.c.h.bf16 %v10207_v34  ;;  %4063 = vmatpush.bf16.msra.mxu1 %v8014_v21 }
 0x612   :  { %v10238_v36 = vmul.f32 0.5, %v10167_v0  ;;  %v3393_v54 = vunpack.c.l.bf16 %v3375_v38  ;;  %v3217_v35 = vpack.c.bf16 %v3190_v44, %v3189_v22  ;;  %8286 = vtanh.f32 %v3469_v63  ;;  %v8005_v44 = vld [vmem:[#allocation13 + $0x160] sm:$0xff] }
 0x613   :  { %v3471_v2 = vunpack.c.l.bf16 %v10217_v11  ;;  %v3394_v42 = vunpack.c.h.bf16 %v3375_v38  ;;  %v3138_v52 = vpack.c.bf16 %v3112_v58, %v3111_v25  ;;  %v3395_v62 = vunpack.c.l.bf16 %v3376_v24  ;;  %v7997_v38 = vld [vmem:[#allocation13 + $0x120] sm:$0xff] }
 0x614   :  { %v3396_v17 = vunpack.c.h.bf16 %v3376_v24  ;;  %v3237_v51 = vunpack.c.l.bf16 %v3217_v35  ;;  %v3238_v55 = vunpack.c.h.bf16 %v3217_v35  ;;  %v2935_v0 = vadd.f32 %v2934_v18, %v10137_v40  ;;  %v8021_v24 = vld [vmem:[#allocation13 + $0x1e0] sm:$0xff]  ;;  %4006 = vmatpush.bf16.msra.mxu3 %v7997_v38  ;;  %4035 = vmatpush.bf16.msra.mxu0 %v8005_v44  ;;  %v8004_v38 = vld [vmem:[#allocation13 + $0x158] sm:$0xff] }
 0x615   :  { %v3159_v34 = vunpack.c.l.bf16 %v3138_v52  ;;  %v3160_v32 = vunpack.c.h.bf16 %v3138_v52  ;;  %v2906_v56 = vadd.f32 %v2905_v60, %v10139_v48  ;;  %v3425_v31 = vmul.f32 0.796875, %v3393_v54  ;;  %v8013_v54 = vld [vmem:[#allocation13 + $0x1a0] sm:$0xff]  ;;  %4093 = vmatpush.bf16.msrb.mxu2 %v8021_v24  ;;  %v8012_v24 = vld [vmem:[#allocation13 + $0x198] sm:$0xff] }
 0x616   :  { %v3269_v1 = vmul.f32 %v3237_v51, %v10195_v49  ;;  %v3270_v4 = vmul.f32 %v3238_v55, %v10197_v15  ;;  %v2993_v47 = vadd.f32 %v2992_v7, %v10145_v20  ;;  %v3426_v14 = vmul.f32 0.796875, %v3394_v42  ;;  %4064 = vmatpush.bf16.msra.mxu1 %v8013_v54  ;;  %v7996_v55 = vld [vmem:[#allocation13 + $0x118] sm:$0xff] }
 0x617   :  { %v3191_v33 = vmul.f32 %v3159_v34, %v10209_v9  ;;  %v3192_v27 = vmul.f32 %v3160_v32, %v10219_v50  ;;  %v2964_v16 = vadd.f32 %v2963_v53, %v10143_v13  ;;  %v3472_v30 = vunpack.c.h.bf16 %v10217_v11 }
 0x618   :  { %v3427_v37 = vmul.f32 0.796875, %v3395_v62  ;;  %v3428_v22 = vmul.f32 0.796875, %v3396_v17  ;;  %v3011_v63 = vpack.c.bf16 %v2935_v0, %v2906_v56  ;;  %v10250_v25 = vpop.eup %8286  ;;  %8288 = vtanh.f32 %v3470_v28  ;;  %v2937_v28 = vpop.f32.mrf.mxu0  ;;  %4007 = vmatpush.bf16.msra.mxu3 %v7996_v55  ;;  %4036 = vmatpush.bf16.msra.mxu0 %v8004_v38 }
 0x619   :  { %v10253_v58 = vmul.f32 0.5, %v10169_v23  ;;  %v3218_v18 = vpack.c.bf16 %v3192_v27, %v3191_v33  ;;  %v3012_v60 = vpack.c.bf16 %v2993_v47, %v2964_v16  ;;  %8290 = vtanh.f32 %v3471_v2  ;;  %v2908_v23 = vpop.f32.mrf.mxu3  ;;  %v2995_v56 = vpop.f32.mrf.mxu2 }
 0x61a   :  { %v10256_v35 = vmul.f32 0.5, %v10173_v5  ;;  %v3297_v11 = vpack.c.bf16 %v3270_v4, %v3269_v1  ;;  %v10258_v42 = vunpack.c.l.bf16 %v3011_v63  ;;  %v3455_v52 = vpack.c.bf16 %v3426_v14, %v3425_v31  ;;  %v8020_v31 = vld [vmem:[#allocation13 + $0x1d8] sm:$0xff]  ;;  %4065 = vmatpush.bf16.msra.mxu1 %v8012_v24  ;;  %v8019_v24 = vld [vmem:[#allocation13 + $0x1d0] sm:$0xff] }
 0x61b   :  { %v3239_v7 = vunpack.c.l.bf16 %v3218_v18  ;;  %v3240_v62 = vunpack.c.h.bf16 %v3218_v18  ;;  %v10260_v17 = vunpack.c.h.bf16 %v3011_v63  ;;  %8292 = vtanh.f32 %v3472_v30  ;;  %4094 = vmatpush.bf16.msrb.mxu2 %v8020_v31 }
 0x61c   :  { %v10263_v2 = vmul.f32 0.5, %v10175_v6  ;;  %v10265_v5 = vpack.c.bf16 %v3428_v22, %v3427_v37  ;;  %v3113_v51 = vmul.f32 0.044677734, %v10258_v42  ;;  %v10271_v21 = vunpack.c.l.bf16 %v3012_v60  ;;  %v2966_v22 = vpop.f32.mrf.mxu1 }
 0x61d   :  { %v3271_v53 = vmul.f32 %v3239_v7, %v10209_v9  ;;  %v3272_v45 = vmul.f32 %v3240_v62, %v10219_v50  ;;  %v3114_v8 = vmul.f32 0.044677734, %v10260_v17  ;;  %v3317_v34 = vunpack.c.l.bf16 %v3297_v11 }
 0x61e   :  { %11863 = vst [vmem:[#allocation58_spill] sm:$0xff] %v10271_v21  ;;  %v10273_v32 = vunpack.c.h.bf16 %v3012_v60  ;;  %v2938_v0 = vadd.f32 %v2937_v28, %v10137_v40  ;;  %v2909_v6 = vadd.f32 %v2908_v23, %v10139_v48  ;;  %v10277_v1 = vpop.eup %8288  ;;  %v3473_v4 = vunpack.c.l.bf16 %v3455_v52 }
 0x61f   :  { %v3318_v47 = vunpack.c.h.bf16 %v3297_v11  ;;  %v3139_v14 = vpack.c.bf16 %v3114_v8, %v3113_v51  ;;  %v3115_v33 = vmul.f32 0.044677734, %v10271_v21  ;;  %v10280_v27 = vpop.eup %8290  ;;  %v3474_v16 = vunpack.c.h.bf16 %v3455_v52  ;;  %4095 = vmatpush.bf16.msrb.mxu2 %v8019_v24 }
 0x620   :  { %11864 = vst [vmem:[#allocation59_spill] sm:$0xff] %v10273_v32  ;;  %v3475_v30 = vunpack.c.l.bf16 %v10265_v5  ;;  %v3116_v37 = vmul.f32 0.044677734, %v10273_v32  ;;  %v3013_v63 = vpack.c.bf16 %v2938_v0, %v2909_v6  ;;  %v3298_v44 = vpack.c.bf16 %v3272_v45, %v3271_v53  ;;  %v7995_v6 = vld [vmem:[#allocation13 + $0x110] sm:$0xff] }
 0x621   :  { %v3161_v18 = vunpack.c.l.bf16 %v3139_v14  ;;  %v3162_v60 = vunpack.c.h.bf16 %v3139_v14  ;;  %v2996_v54 = vadd.f32 %v2995_v56, %v10145_v20  ;;  %v10285_v11 = vpop.eup %8292  ;;  %v3349_v52 = vadd.f32 %v3317_v34, %v10195_v49  ;;  %4008 = vmatpush.bf16.msra.mxu3 %v7995_v6 }
 0x622   :  { %v3140_v62 = vpack.c.bf16 %v3116_v37, %v3115_v33  ;;  %v10289_v28 = vunpack.c.l.bf16 %v3013_v63  ;;  %v3350_v23 = vadd.f32 %v3318_v47, %v10197_v15  ;;  %v2967_v53 = vadd.f32 %v2966_v22, %v10143_v13 }
 0x623   :  { %v3193_v51 = vmul.f32 %v3161_v18, %v10258_v42  ;;  %v3194_v55 = vmul.f32 %v3162_v60, %v10260_v17  ;;  %8294 = vtanh.f32 %v3473_v4  ;;  %v10295_v0 = vunpack.c.h.bf16 %v3013_v63  ;;  %v8003_v18 = vld [vmem:[#allocation13 + $0x150] sm:$0xff]  ;;  %4096 = vmatpush.bf16.msrb.mxu2 %v8018_v39 }
 0x624   :  { %11865 = vst [vmem:[#allocation60_spill] sm:$0xff] %v10289_v28  ;;  %v3163_v45 = vunpack.c.l.bf16 %v3140_v62  ;;  %v3164_v8 = vunpack.c.h.bf16 %v3140_v62  ;;  %v3319_v34 = vunpack.c.l.bf16 %v3298_v44  ;;  %v3117_v31 = vmul.f32 0.044677734, %v10289_v28  ;;  %v8011_v60 = vld [vmem:[#allocation13 + $0x190] sm:$0xff]  ;;  %4037 = vmatpush.bf16.msra.mxu0 %v8003_v18  ;;  %v2939_v18 = vpop.f32.mrf.mxu0 }
 0x625   :  { %11866 = vst [vmem:[#allocation61_spill] sm:$0xff] %v10295_v0  ;;  %v3219_v56 = vpack.c.bf16 %v3194_v55, %v3193_v51  ;;  %v3014_v14 = vpack.c.bf16 %v2996_v54, %v2967_v53  ;;  %8296 = vtanh.f32 %v3474_v16  ;;  %v3118_v37 = vmul.f32 0.044677734, %v10295_v0  ;;  %4066 = vmatpush.bf16.msra.mxu1 %v8011_v60 }
 0x626   :  { %v3195_v47 = vmul.f32 %v3163_v45, %v10271_v21  ;;  %v3196_v33 = vmul.f32 %v3164_v8, %v10273_v32  ;;  %v10301_v22 = vpack.c.bf16 %v3350_v23, %v3349_v52  ;;  %v3320_v4 = vunpack.c.h.bf16 %v3298_v44 }
 0x627   :  { %v3241_v38 = vunpack.c.l.bf16 %v3219_v56  ;;  %v3242_v63 = vunpack.c.h.bf16 %v3219_v56  ;;  %v3141_v51 = vpack.c.bf16 %v3118_v37, %v3117_v31  ;;  %v10303_v55 = vunpack.c.l.bf16 %v3014_v14 }
 0x628   :  { %v3220_v62 = vpack.c.bf16 %v3196_v33, %v3195_v47  ;;  %v10305_v16 = vunpack.c.h.bf16 %v3014_v14  ;;  %8298 = vtanh.f32 %v3475_v30  ;;  %v3351_v54 = vadd.f32 %v3319_v34, %v10209_v9  ;;  %v2910_v14 = vpop.f32.mrf.mxu3  ;;  %v7994_v47 = vld [vmem:[#allocation13 + $0x108] sm:$0xff] }
 0x629   :  { %11867 = vst [vmem:[#allocation40_spill] sm:$0xff] %v10303_v55  ;;  %v3273_v53 = vmul.f32 %v3241_v38, %v10258_v42  ;;  %v3274_v52 = vmul.f32 %v3242_v63, %v10260_v17  ;;  %v10310_v44 = vpop.eup %8294  ;;  %v3165_v8 = vunpack.c.l.bf16 %v3141_v51  ;;  %v3166_v6 = vunpack.c.h.bf16 %v3141_v51  ;;  %4009 = vmatpush.bf16.msra.mxu3 %v7994_v47  ;;  %v2968_v47 = vpop.f32.mrf.mxu1  ;;  %4067 = vmatpush.bf16.msra.mxu1 %v8010_v43 }
 0x62a   :  { %11868 = vst [vmem:[#allocation41_spill] sm:$0xff] %v10305_v16  ;;  %v3243_v23 = vunpack.c.l.bf16 %v3220_v62  ;;  %v3244_v45 = vunpack.c.h.bf16 %v3220_v62  ;;  %v3352_v56 = vadd.f32 %v3320_v4, %v10219_v50  ;;  %v3119_v30 = vmul.f32 0.044677734, %v10303_v55 }
 0x62b   :  { %v3299_v31 = vpack.c.bf16 %v3274_v52, %v3273_v53  ;;  %v3120_v34 = vmul.f32 0.044677734, %v10305_v16  ;;  %v10315_v33 = vpop.eup %8296  ;;  %v3197_v63 = vmul.f32 %v3165_v8, %v10289_v28  ;;  %v3198_v24 = vmul.f32 %v3166_v6, %v10295_v0 }
 0x62c   :  { %v3275_v37 = vmul.f32 %v3243_v23, %v10271_v21  ;;  %v3276_v38 = vmul.f32 %v3244_v45, %v10273_v32  ;;  %v3397_v4 = vunpack.c.l.bf16 %v10301_v22  ;;  %v3398_v53 = vunpack.c.h.bf16 %v10301_v22  ;;  %v2997_v23 = vpop.f32.mrf.mxu2  ;;  %v8002_v45 = vld [vmem:[#allocation13 + $0x148] sm:$0xff] }
 0x62d   :  { %v3321_v60 = vunpack.c.l.bf16 %v3299_v31  ;;  %v3322_v62 = vunpack.c.h.bf16 %v3299_v31  ;;  %v3142_v51 = vpack.c.bf16 %v3120_v34, %v3119_v30  ;;  %v3221_v7 = vpack.c.bf16 %v3198_v24, %v3197_v63  ;;  %4038 = vmatpush.bf16.msra.mxu0 %v8002_v45 }
 0x62e   :  { %v3300_v52 = vpack.c.bf16 %v3276_v38, %v3275_v37  ;;  %v2911_v61 = vadd.f32 %v2910_v14, %v10139_v48  ;;  %v10324_v8 = vpop.eup %8298  ;;  %v3378_v6 = vpack.c.bf16 %v3352_v56, %v3351_v54  ;;  %v2940_v3 = vadd.f32 %v2939_v18, %v10137_v40 }
 0x62f   :  { %v3167_v59 = vunpack.c.l.bf16 %v3142_v51  ;;  %v3168_v19 = vunpack.c.h.bf16 %v3142_v51  ;;  %v3353_v31 = vadd.f32 %v3321_v60, %v10258_v42  ;;  %v3354_v30 = vadd.f32 %v3322_v62, %v10260_v17  ;;  %v7993_v60 = vld [vmem:[#allocation13 + $0x100] sm:$0xff] }
 0x630   :  { %v3245_v22 = vunpack.c.l.bf16 %v3221_v7  ;;  %v3246_v34 = vunpack.c.h.bf16 %v3221_v7  ;;  %v3015_v38 = vpack.c.bf16 %v2940_v3, %v2911_v61  ;;  %v2998_v54 = vadd.f32 %v2997_v23, %v10145_v20  ;;  %v8001_v62 = vld [vmem:[#allocation13 + $0x140] sm:$0xff]  ;;  %4010 = vmatpush.bf16.msra.mxu3 %v7993_v60 }
 0x631   :  { %v3199_v14 = vmul.f32 %v3167_v59, %v10303_v55  ;;  %v3200_v37 = vmul.f32 %v3168_v19, %v10305_v16  ;;  %v3323_v56 = vunpack.c.l.bf16 %v3300_v52  ;;  %v3324_v63 = vunpack.c.h.bf16 %v3300_v52  ;;  %v8009_v7 = vld [vmem:[#allocation13 + $0x180] sm:$0xff]  ;;  %4039 = vmatpush.bf16.msra.mxu0 %v8001_v62 }
 0x632   :  { %v3277_v24 = vmul.f32 %v3245_v22, %v10289_v28  ;;  %v3278_v18 = vmul.f32 %v3246_v34, %v10295_v0  ;;  %v3399_v51 = vunpack.c.l.bf16 %v3378_v6  ;;  %v2969_v45 = vadd.f32 %v2968_v47, %v10143_v13  ;;  %v8017_v19 = vld [vmem:[#allocation13 + $0x1c0] sm:$0xff]  ;;  %4068 = vmatpush.bf16.msra.mxu1 %v8009_v7  ;;  %v2942_v7 = vpop.f32.mrf.mxu0 }
 0x633   :  { %v3222_v39 = vpack.c.bf16 %v3200_v37, %v3199_v14  ;;  %v10335_v59 = vunpack.c.l.bf16 %v3015_v38  ;;  %v3400_v61 = vunpack.c.h.bf16 %v3378_v6  ;;  %v3379_v3 = vpack.c.bf16 %v3354_v30, %v3353_v31  ;;  %4097 = vmatpush.bf16.msrb.mxu2 %v8017_v19 }
 0x634   :  { %v3301_v23 = vpack.c.bf16 %v3278_v18, %v3277_v24  ;;  %v10337_v43 = vunpack.c.h.bf16 %v3015_v38  ;;  %v11869_v52 = vunpack.c.h.bf16 %v10265_v5  ;;  %v3016_v57 = vpack.c.bf16 %v2998_v54, %v2969_v45  ;;  %v2913_v18 = vpop.f32.mrf.mxu3 }
 0x635   :  { %v3247_v22 = vunpack.c.l.bf16 %v3222_v39  ;;  %v3248_v34 = vunpack.c.h.bf16 %v3222_v39  ;;  %v3429_v14 = vmul.f32 0.796875, %v3397_v4  ;;  %v3430_v47 = vmul.f32 0.796875, %v3398_v53 }
 0x636   :  { %8300 = vtanh.f32 %v11869_v52  ;;  %v3355_v37 = vadd.f32 %v3323_v56, %v10271_v21  ;;  %v3356_v6 = vadd.f32 %v3324_v63, %v10273_v32  ;;  %v3325_v31 = vunpack.c.l.bf16 %v3301_v23 }
 0x637   :  { %v3326_v30 = vunpack.c.h.bf16 %v3301_v23  ;;  %v3121_v38 = vmul.f32 0.044677734, %v10335_v59  ;;  %v3122_v24 = vmul.f32 0.044677734, %v10337_v43  ;;  %v3431_v5 = vmul.f32 0.796875, %v3399_v51 }
 0x638   :  { %v3432_v60 = vmul.f32 0.796875, %v3400_v61  ;;  %v3401_v62 = vunpack.c.l.bf16 %v3379_v3  ;;  %v3279_v54 = vmul.f32 %v3247_v22, %v10303_v55  ;;  %v3280_v4 = vmul.f32 %v3248_v34, %v10305_v16 }
 0x639   :  { %v3143_v53 = vpack.c.bf16 %v3122_v24, %v3121_v38  ;;  %v10347_v39 = vunpack.c.l.bf16 %v3016_v57  ;;  %v10349_v56 = vunpack.c.h.bf16 %v3016_v57  ;;  %v10351_v63 = vpack.c.bf16 %v3430_v47, %v3429_v14  ;;  %v3000_v47 = vpop.f32.mrf.mxu2 }
 0x63a   :  { %v3402_v45 = vunpack.c.h.bf16 %v3379_v3  ;;  %v3380_v19 = vpack.c.bf16 %v3356_v6, %v3355_v37  ;;  %v2914_v23 = vadd.f32 %v2913_v18, %v10139_v48  ;;  %v3357_v51 = vadd.f32 %v3325_v31, %v10289_v28  ;;  %v2971_v3 = vpop.f32.mrf.mxu1 }
 0x63b   :  { %v3358_v61 = vadd.f32 %v3326_v30, %v10295_v0  ;;  %v3169_v22 = vunpack.c.l.bf16 %v3143_v53  ;;  %v3170_v46 = vunpack.c.h.bf16 %v3143_v53  ;;  %v10358_v34 = vpack.c.bf16 %v3432_v60, %v3431_v5 }
 0x63c   :  { %v10354_v52 = vpop.eup %8300  ;;  %v3123_v38 = vmul.f32 0.044677734, %v10347_v39  ;;  %v3124_v57 = vmul.f32 0.044677734, %v10349_v56  ;;  %v2943_v14 = vadd.f32 %v2942_v7, %v10137_v40  ;;  %v10363_v37 = vmul.f32 0.796875, %v3401_v62 }
 0x63d   :  { %11870 = vst [vmem:[#allocation42_spill] sm:$0xff] %v10358_v34  ;;  %v3302_v6 = vpack.c.bf16 %v3280_v4, %v3279_v54  ;;  %v3201_v24 = vmul.f32 %v3169_v22, %v10335_v59  ;;  %v3202_v31 = vmul.f32 %v3170_v46, %v10337_v43  ;;  %v10367_v30 = vmul.f32 0.796875, %v3402_v45 }
 0x63e   :  { %v3403_v18 = vunpack.c.l.bf16 %v3380_v19  ;;  %v3144_v5 = vpack.c.bf16 %v3124_v57, %v3123_v38  ;;  %v3017_v60 = vpack.c.bf16 %v2943_v14, %v2914_v23  ;;  %v3404_v53 = vunpack.c.h.bf16 %v3380_v19 }
 0x63f   :  { %v3381_v41 = vpack.c.bf16 %v3358_v61, %v3357_v51  ;;  %v3223_v0 = vpack.c.bf16 %v3202_v31, %v3201_v24  ;;  %v2972_v28 = vadd.f32 %v2971_v3, %v10143_v13  ;;  %v3001_v62 = vadd.f32 %v3000_v47, %v10145_v20  ;;  %v2944_v51 = vpop.f32.mrf.mxu0  ;;  %v2915_v61 = vpop.f32.mrf.mxu3 }
 0x640   :  { %v3171_v7 = vunpack.c.l.bf16 %v3144_v5  ;;  %v3172_v32 = vunpack.c.h.bf16 %v3144_v5  ;;  %v10370_v21 = vunpack.c.l.bf16 %v3017_v60  ;;  %v3327_v54 = vunpack.c.l.bf16 %v3302_v6 }
 0x641   :  { %v3328_v4 = vunpack.c.h.bf16 %v3302_v6  ;;  %v3249_v22 = vunpack.c.l.bf16 %v3223_v0  ;;  %v3250_v46 = vunpack.c.h.bf16 %v3223_v0  ;;  %v10375_v23 = vunpack.c.h.bf16 %v3017_v60 }
 0x642   :  { %v3203_v45 = vmul.f32 %v3171_v7, %v10347_v39  ;;  %v3204_v38 = vmul.f32 %v3172_v32, %v10349_v56  ;;  %v3125_v19 = vmul.f32 0.044677734, %v10370_v21  ;;  %v10378_v57 = vmul.f32 0.796875, %v3403_v18 }
 0x643   :  { %v10380_v14 = vmul.f32 0.796875, %v3404_v53  ;;  %v3281_v3 = vmul.f32 %v3249_v22, %v10335_v59  ;;  %v3282_v47 = vmul.f32 %v3250_v46, %v10337_v43  ;;  %v3405_v6 = vunpack.c.l.bf16 %v3381_v41  ;;  %v3002_v22 = vpop.f32.mrf.mxu2 }
 0x644   :  { %v3224_v0 = vpack.c.bf16 %v3204_v38, %v3203_v45  ;;  %v3126_v24 = vmul.f32 0.044677734, %v10375_v23  ;;  %v3018_v31 = vpack.c.bf16 %v3001_v62, %v2972_v28  ;;  %v3359_v32 = vadd.f32 %v3327_v54, %v10303_v55 }
 0x645   :  { %11871 = vst [vmem:[#allocation43_spill] sm:$0xff] %v10380_v14  ;;  %v3360_v5 = vadd.f32 %v3328_v4, %v10305_v16  ;;  %v2945_v60 = vadd.f32 %v2944_v51, %v10137_v40  ;;  %v2916_v18 = vadd.f32 %v2915_v61, %v10139_v48  ;;  %v3406_v46 = vunpack.c.h.bf16 %v3381_v41  ;;  %v2973_v40 = vpop.f32.mrf.mxu1 }
 0x646   :  { %v3251_v7 = vunpack.c.l.bf16 %v3224_v0  ;;  %v3252_v53 = vunpack.c.h.bf16 %v3224_v0  ;;  %v3145_v50 = vpack.c.bf16 %v3126_v24, %v3125_v19  ;;  %v10389_v9 = vunpack.c.l.bf16 %v3018_v31 }
 0x647   :  { %v3303_v34 = vpack.c.bf16 %v3282_v47, %v3281_v3  ;;  %v10391_v45 = vunpack.c.h.bf16 %v3018_v31  ;;  %v3019_v38 = vpack.c.bf16 %v2945_v60, %v2916_v18  ;;  %v3382_v51 = vpack.c.bf16 %v3360_v5, %v3359_v32 }
 0x648   :  { %v3283_v28 = vmul.f32 %v3251_v7, %v10347_v39  ;;  %v3284_v62 = vmul.f32 %v3252_v53, %v10349_v56  ;;  %v3173_v54 = vunpack.c.l.bf16 %v3145_v50  ;;  %v3174_v4 = vunpack.c.h.bf16 %v3145_v50 }
 0x649   :  { %v3127_v48 = vmul.f32 0.044677734, %v10389_v9  ;;  %v3128_v19 = vmul.f32 0.044677734, %v10391_v45  ;;  %v3003_v61 = vadd.f32 %v3002_v22, %v10145_v20  ;;  %v3437_v0 = vmul.f32 0.796875, %v3405_v6 }
 0x64a   :  { %v3205_v41 = vmul.f32 %v3173_v54, %v10370_v21  ;;  %v3206_v3 = vmul.f32 %v3174_v4, %v10375_v23  ;;  %v10400_v47 = vunpack.c.l.bf16 %v3019_v38  ;;  %v3329_v24 = vunpack.c.l.bf16 %v3303_v34 }
 0x64b   :  { %v3330_v31 = vunpack.c.h.bf16 %v3303_v34  ;;  %v3146_v60 = vpack.c.bf16 %v3128_v19, %v3127_v48  ;;  %v2974_v50 = vadd.f32 %v2973_v40, %v10143_v13  ;;  %v3438_v18 = vmul.f32 0.796875, %v3406_v46 }
 0x64c   :  { %v3304_v32 = vpack.c.bf16 %v3284_v62, %v3283_v28  ;;  %v3225_v5 = vpack.c.bf16 %v3206_v3, %v3205_v41  ;;  %v10403_v7 = vunpack.c.h.bf16 %v3019_v38  ;;  %v3407_v53 = vunpack.c.l.bf16 %v3382_v51 }
 0x64d   :  { %v3175_v16 = vunpack.c.l.bf16 %v3146_v60  ;;  %v3176_v20 = vunpack.c.h.bf16 %v3146_v60  ;;  %v3020_v6 = vpack.c.bf16 %v3003_v61, %v2974_v50  ;;  %v3408_v22 = vunpack.c.h.bf16 %v3382_v51 }
 0x64e   :  { %v3253_v54 = vunpack.c.l.bf16 %v3225_v5  ;;  %v3254_v55 = vunpack.c.h.bf16 %v3225_v5  ;;  %v3129_v4 = vmul.f32 0.044677734, %v10400_v47  ;;  %v3361_v14 = vadd.f32 %v3329_v24, %v10335_v59 }
 0x64f   :  { %v3362_v34 = vadd.f32 %v3330_v31, %v10337_v43  ;;  %v3207_v13 = vmul.f32 %v3175_v16, %v10389_v9  ;;  %v3208_v46 = vmul.f32 %v3176_v20, %v10391_v45  ;;  %v3331_v28 = vunpack.c.l.bf16 %v3304_v32 }
 0x650   :  { %v3285_v38 = vmul.f32 %v3253_v54, %v10370_v21  ;;  %v3286_v62 = vmul.f32 %v3254_v55, %v10375_v23  ;;  %v3130_v40 = vmul.f32 0.044677734, %v10403_v7  ;;  %v3439_v51 = vmul.f32 0.796875, %v3407_v53 }
 0x651   :  { %v3226_v48 = vpack.c.bf16 %v3208_v46, %v3207_v13  ;;  %v10413_v19 = vunpack.c.l.bf16 %v3020_v6  ;;  %v10415_v61 = vunpack.c.h.bf16 %v3020_v6  ;;  %v3440_v41 = vmul.f32 0.796875, %v3408_v22 }
 0x652   :  { %v3332_v3 = vunpack.c.h.bf16 %v3304_v32  ;;  %v3305_v24 = vpack.c.bf16 %v3286_v62, %v3285_v38  ;;  %v3147_v31 = vpack.c.bf16 %v3130_v40, %v3129_v4  ;;  %v3383_v20 = vpack.c.bf16 %v3362_v34, %v3361_v14 }
 0x653   :  { %v3255_v16 = vunpack.c.l.bf16 %v3226_v48  ;;  %v3256_v60 = vunpack.c.h.bf16 %v3226_v48  ;;  %v3131_v50 = vmul.f32 0.044677734, %v10413_v19  ;;  %v3132_v5 = vmul.f32 0.044677734, %v10415_v61 }
 0x654   :  { %v3363_v55 = vadd.f32 %v3331_v28, %v10347_v39  ;;  %v3333_v54 = vunpack.c.l.bf16 %v3305_v24  ;;  %v3334_v53 = vunpack.c.h.bf16 %v3305_v24  ;;  %v3177_v46 = vunpack.c.l.bf16 %v3147_v31 }
 0x655   :  { %v3287_v13 = vmul.f32 %v3255_v16, %v10389_v9  ;;  %v3288_v6 = vmul.f32 %v3256_v60, %v10391_v45  ;;  %v3178_v22 = vunpack.c.h.bf16 %v3147_v31  ;;  %v3364_v32 = vadd.f32 %v3332_v3, %v10349_v56 }
 0x656   :  { %v3365_v4 = vadd.f32 %v3333_v54, %v10370_v21  ;;  %v3366_v38 = vadd.f32 %v3334_v53, %v10375_v23  ;;  %v3148_v62 = vpack.c.bf16 %v3132_v5, %v3131_v50  ;;  %v3209_v14 = vmul.f32 %v3177_v46, %v10400_v47 }
 0x657   :  { %v3306_v40 = vpack.c.bf16 %v3288_v6, %v3287_v13  ;;  %v3210_v34 = vmul.f32 %v3178_v22, %v10403_v7  ;;  %v3533_v28 = vpack.c.bf16 %v10277_v1, %v10250_v25  ;;  %v10429_v48 = vpack.c.bf16 %v3438_v18, %v3437_v0 }
 0x658   :  { %v10431_v24 = vpack.c.bf16 %v3440_v41, %v3439_v51  ;;  %v3179_v31 = vunpack.c.l.bf16 %v3148_v62  ;;  %v3180_v16 = vunpack.c.h.bf16 %v3148_v62  ;;  %v3535_v50 = vpack.c.bf16 %v10315_v33, %v10310_v44 }
 0x659   :  { %v3335_v3 = vunpack.c.l.bf16 %v3306_v40  ;;  %v3336_v60 = vunpack.c.h.bf16 %v3306_v40  ;;  %v3227_v54 = vpack.c.bf16 %v3210_v34, %v3209_v14  ;;  %v3409_v5 = vunpack.c.l.bf16 %v3383_v20 }
 0x65a   :  { %v3384_v53 = vpack.c.bf16 %v3364_v32, %v3363_v55  ;;  %v3211_v13 = vmul.f32 %v3179_v31, %v10413_v19  ;;  %v3212_v6 = vmul.f32 %v3180_v16, %v10415_v61  ;;  %v3385_v46 = vpack.c.bf16 %v3366_v38, %v3365_v4 }
 0x65b   :  { %v3257_v25 = vunpack.c.l.bf16 %v3227_v54  ;;  %v3258_v1 = vunpack.c.h.bf16 %v3227_v54  ;;  %v3549_v0 = vunpack.c.l.bf16 %v3533_v28  ;;  %v3410_v18 = vunpack.c.h.bf16 %v3383_v20 }
 0x65c   :  { %v3367_v51 = vadd.f32 %v3335_v3, %v10389_v9  ;;  %v3228_v41 = vpack.c.bf16 %v3212_v6, %v3211_v13  ;;  %v3550_v22 = vunpack.c.h.bf16 %v3533_v28  ;;  %v3368_v62 = vadd.f32 %v3336_v60, %v10391_v45 }
 0x65d   :  { %v3289_v40 = vmul.f32 %v3257_v25, %v10400_v47  ;;  %v3290_v44 = vmul.f32 %v3258_v1, %v10403_v7  ;;  %v3553_v33 = vunpack.c.l.bf16 %v3535_v50  ;;  %v3411_v55 = vunpack.c.l.bf16 %v3384_v53 }
 0x65e   :  { %v3259_v32 = vunpack.c.l.bf16 %v3228_v41  ;;  %v3260_v14 = vunpack.c.h.bf16 %v3228_v41  ;;  %v3554_v34 = vunpack.c.h.bf16 %v3535_v50  ;;  %v3412_v4 = vunpack.c.h.bf16 %v3384_v53 }
 0x65f   :  { %v3413_v38 = vunpack.c.l.bf16 %v3385_v46  ;;  %v3307_v31 = vpack.c.bf16 %v3290_v44, %v3289_v40  ;;  %v3581_v16 = vadd.f32 1.0, %v3549_v0  ;;  %v3582_v28 = vadd.f32 1.0, %v3550_v22 }
 0x660   :  { %v3291_v20 = vmul.f32 %v3259_v32, %v10413_v19  ;;  %v3292_v3 = vmul.f32 %v3260_v14, %v10415_v61  ;;  %v3585_v54 = vadd.f32 1.0, %v3553_v33  ;;  %v10443_v60 = vmul.f32 0.796875, %v3409_v5 }
 0x661   :  { %v3414_v13 = vunpack.c.h.bf16 %v3385_v46  ;;  %v3386_v6 = vpack.c.bf16 %v3368_v62, %v3367_v51  ;;  %v3085_v25 = vpack.c.bf16 %v10227_v10, %v10222_v26  ;;  %v3337_v1 = vunpack.c.l.bf16 %v3307_v31 }
 0x662   :  { %v3087_v50 = vpack.c.bf16 %v10253_v58, %v10238_v36  ;;  %v3586_v53 = vadd.f32 1.0, %v3554_v34  ;;  %v3613_v41 = vpack.c.bf16 %v3582_v28, %v3581_v16  ;;  %v10449_v0 = vmul.f32 0.796875, %v3410_v18 }
 0x663   :  { %v10451_v40 = vmul.f32 0.796875, %v3411_v55  ;;  %v10453_v44 = vmul.f32 0.796875, %v3412_v4  ;;  %v3338_v22 = vunpack.c.h.bf16 %v3307_v31  ;;  %v10455_v5 = vmul.f32 0.796875, %v3413_v38 }
 0x664   :  { %v3308_v46 = vpack.c.bf16 %v3292_v3, %v3291_v20  ;;  %v3615_v51 = vpack.c.bf16 %v3586_v53, %v3585_v54  ;;  %v3661_v62 = vunpack.c.l.bf16 %v3613_v41  ;;  %v10457_v33 = vmul.f32 0.796875, %v3414_v13 }
 0x665   :  { %v3415_v26 = vunpack.c.l.bf16 %v3386_v6  ;;  %v3416_v10 = vunpack.c.h.bf16 %v3386_v6  ;;  %v3662_v32 = vunpack.c.h.bf16 %v3613_v41  ;;  %v3369_v36 = vadd.f32 %v3337_v1, %v10400_v47 }
 0x666   :  { %v3629_v58 = vunpack.c.l.bf16 %v3085_v25  ;;  %v3633_v18 = vunpack.c.l.bf16 %v3087_v50  ;;  %v3665_v14 = vunpack.c.l.bf16 %v3615_v51  ;;  %v3370_v55 = vadd.f32 %v3338_v22, %v10403_v7 }
 0x667   :  { %v3630_v34 = vunpack.c.h.bf16 %v3085_v25  ;;  %v3634_v4 = vunpack.c.h.bf16 %v3087_v50  ;;  %v3666_v31 = vunpack.c.h.bf16 %v3615_v51  ;;  %v3339_v38 = vunpack.c.l.bf16 %v3308_v46 }
 0x668   :  { %v3340_v16 = vunpack.c.h.bf16 %v3308_v46  ;;  %v3693_v20 = vmul.f32 %v3661_v62, %v3629_v58  ;;  %v3697_v3 = vmul.f32 %v3665_v14, %v3633_v18  ;;  %v3086_v13 = vpack.c.bf16 %v10233_v29, %v10230_v12 }
 0x669   :  { %v3694_v28 = vmul.f32 %v3662_v32, %v3630_v34  ;;  %v3698_v54 = vmul.f32 %v3666_v31, %v3634_v4  ;;  %v3534_v6 = vpack.c.bf16 %v10285_v11, %v10280_v27  ;;  %v3447_v1 = vmul.f32 0.796875, %v3415_v26 }
 0x66a   :  { %v3725_v53 = vpack.c.bf16 %v3697_v3, %v3693_v20  ;;  %v3088_v41 = vpack.c.bf16 %v10263_v2, %v10256_v35  ;;  %v3536_v25 = vpack.c.bf16 %v10354_v52, %v10324_v8  ;;  %v3448_v50 = vmul.f32 0.796875, %v3416_v10 }
 0x66b   :  { %v3726_v22 = vpack.c.bf16 %v3698_v54, %v3694_v28  ;;  %v3551_v46 = vunpack.c.l.bf16 %v3534_v6  ;;  %v3552_v51 = vunpack.c.h.bf16 %v3534_v6  ;;  %v3387_v62 = vpack.c.bf16 %v3370_v55, %v3369_v36 }
 0x66c   :  { %v3371_v32 = vadd.f32 %v3339_v38, %v10413_v19  ;;  %4011 = vmatmul.bf16.vlgmr.msra.gmra.mxu3 %v3725_v53  ;;  %v3555_v12 = vunpack.c.l.bf16 %v3536_v25  ;;  %v3556_v29 = vunpack.c.h.bf16 %v3536_v25  ;;  %v3372_v27 = vadd.f32 %v3340_v16, %v10415_v61 }
 0x66d   :  { %4040 = vmatmul.bf16.vlgmr.msra.gmra.mxu0 %v3726_v22  ;;  %v3583_v11 = vadd.f32 1.0, %v3551_v46  ;;  %v3584_v26 = vadd.f32 1.0, %v3552_v51  ;;  %v3631_v58 = vunpack.c.l.bf16 %v3086_v13  ;;  %v3635_v18 = vunpack.c.l.bf16 %v3088_v41 }
 0x66e   :  { %v3587_v35 = vadd.f32 1.0, %v3555_v12  ;;  %v3588_v2 = vadd.f32 1.0, %v3556_v29  ;;  %v3632_v8 = vunpack.c.h.bf16 %v3086_v13  ;;  %v3636_v10 = vunpack.c.h.bf16 %v3088_v41  ;;  %v11872_v12 = vld [vmem:[#allocation43_spill] sm:$0xff] }
 0x66f   :  { %v3614_v52 = vpack.c.bf16 %v3584_v26, %v3583_v11  ;;  %v3061_v14 = vmul.f32 0.5, %v10195_v49  ;;  %v3062_v36 = vmul.f32 0.5, %v10197_v15  ;;  %v3459_v34 = vpack.c.bf16 %v10367_v30, %v10363_v37  ;;  %v11873_v11 = vld [vmem:[#allocation42_spill] sm:$0xff]  ;;  %v11875_v26 = vld [vmem:[#allocation57_spill] sm:$0xff] }
 0x670   :  { %v3616_v55 = vpack.c.bf16 %v3588_v2, %v3587_v35  ;;  %v3477_v4 = vunpack.c.l.bf16 %v10351_v63  ;;  %v3478_v31 = vunpack.c.h.bf16 %v10351_v63  ;;  %v3065_v20 = vmul.f32 0.5, %v10258_v42 }
 0x671   :  { %v3663_v38 = vunpack.c.l.bf16 %v3614_v52  ;;  %v3664_v16 = vunpack.c.h.bf16 %v3614_v52  ;;  %v3066_v3 = vmul.f32 0.5, %v10260_v17  ;;  %v3481_v13 = vunpack.c.l.bf16 %v3459_v34 }
 0x672   :  { %v3667_v28 = vunpack.c.l.bf16 %v3616_v55  ;;  %v3668_v54 = vunpack.c.h.bf16 %v3616_v55  ;;  %v3482_v49 = vunpack.c.h.bf16 %v3459_v34  ;;  %v3417_v6 = vunpack.c.l.bf16 %v3387_v62  ;;  %v11876_v34 = vld [vmem:[#allocation58_spill] sm:$0xff] }
 0x673   :  { %v3418_v15 = vunpack.c.h.bf16 %v3387_v62  ;;  %v3695_v53 = vmul.f32 %v3663_v38, %v3631_v58  ;;  %8302 = vtanh.f32 %v3477_v4  ;;  %v3696_v37 = vmul.f32 %v3664_v16, %v3632_v8  ;;  %v11877_v38 = vld [vmem:[#allocation59_spill] sm:$0xff] }
 0x674   :  { %v3699_v41 = vmul.f32 %v3667_v28, %v3635_v18  ;;  %v3700_v30 = vmul.f32 %v3668_v54, %v3636_v10  ;;  %8304 = vtanh.f32 %v3478_v31  ;;  %v10481_v63 = vpack.c.bf16 %v10457_v33, %v10455_v5 }
 0x675   :  { %v10483_v25 = vpack.c.bf16 %v3372_v27, %v3371_v32  ;;  %v10485_v42 = vpack.c.bf16 %v3062_v36, %v3061_v14  ;;  %8306 = vtanh.f32 %v3481_v13  ;;  %v10487_v46 = vpack.c.bf16 %v3066_v3, %v3065_v20  ;;  %v11874_v32 = vld [vmem:[#allocation55_spill] sm:$0xff] }
 0x676   :  { %v3727_v17 = vpack.c.bf16 %v3699_v41, %v3695_v53  ;;  %v3728_v22 = vpack.c.bf16 %v3700_v30, %v3696_v37  ;;  %8308 = vtanh.f32 %v3482_v49  ;;  %v10489_v51 = vpack.c.bf16 %v3448_v50, %v3447_v1  ;;  %v11879_v41 = vld [vmem:[#allocation61_spill] sm:$0xff] }
 0x677   :  { %v10491_v62 = vmul.f32 0.796875, %v3417_v6  ;;  %v3460_v29 = vpack.c.bf16 %v11872_v12, %v10378_v57  ;;  %v3479_v5 = vunpack.c.l.bf16 %v11873_v11  ;;  %v10496_v33 = vmul.f32 0.796875, %v3418_v15  ;;  %v11878_v15 = vld [vmem:[#allocation60_spill] sm:$0xff] }
 0x678   :  { %4069 = vmatmul.bf16.vlgmr.msra.gmra.mxu1 %v3727_v17  ;;  %4098 = vmatmul.bf16.vlgmr.msrb.gmra.mxu2 %v3728_v22  ;;  %v3063_v27 = vmul.f32 0.5, %v11874_v32  ;;  %v3064_v58 = vmul.f32 0.5, %v11875_v26  ;;  %v3480_v35 = vunpack.c.h.bf16 %v11873_v11  ;;  %v3419_v1 = vunpack.c.l.bf16 %v10483_v25 }
 0x679   :  { %v8303_v2 = vpop.eup %8302  ;;  %v3483_v50 = vunpack.c.l.bf16 %v3460_v29  ;;  %v3484_v18 = vunpack.c.h.bf16 %v3460_v29  ;;  %8310 = vtanh.f32 %v3479_v5  ;;  %v3420_v57 = vunpack.c.h.bf16 %v10483_v25 }
 0x67a   :  { %v8305_v8 = vpop.eup %8304  ;;  %v3637_v52 = vunpack.c.l.bf16 %v10485_v42  ;;  %v3641_v10 = vunpack.c.l.bf16 %v10487_v46  ;;  %8312 = vtanh.f32 %v3480_v35  ;;  %v3638_v55 = vunpack.c.h.bf16 %v10485_v42 }
 0x67b   :  { %v8307_v14 = vpop.eup %8306  ;;  %v3537_v36 = vpack.c.bf16 %v8305_v8, %v8303_v2  ;;  %v3067_v4 = vmul.f32 0.5, %v11876_v34  ;;  %8314 = vtanh.f32 %v3483_v50  ;;  %v3068_v16 = vmul.f32 0.5, %v11877_v38 }
 0x67c   :  { %v8309_v31 = vpop.eup %8308  ;;  %v10508_v20 = vpack.c.bf16 %v3064_v58, %v3063_v27  ;;  %8316 = vtanh.f32 %v3484_v18  ;;  %v3463_v3 = vpack.c.bf16 %v10449_v0, %v10443_v60  ;;  %v3485_v49 = vunpack.c.l.bf16 %v10429_v48 }
 0x67d   :  { %v3539_v28 = vpack.c.bf16 %v8309_v31, %v8307_v14  ;;  %v3557_v54 = vunpack.c.l.bf16 %v3537_v36  ;;  %v3558_v13 = vunpack.c.h.bf16 %v3537_v36  ;;  %v3642_v6 = vunpack.c.h.bf16 %v10487_v46 }
 0x67e   :  { %v3069_v53 = vmul.f32 0.5, %v11878_v15  ;;  %v3070_v37 = vmul.f32 0.5, %v11879_v41  ;;  %v3486_v30 = vunpack.c.h.bf16 %v10429_v48  ;;  %v10517_v60 = vpack.c.bf16 %v3068_v16, %v3067_v4 }
 0x67f   :  { %v8311_v42 = vpop.eup %8310  ;;  %v3561_v17 = vunpack.c.l.bf16 %v3539_v28  ;;  %v3562_v22 = vunpack.c.h.bf16 %v3539_v28  ;;  %v3589_v12 = vadd.f32 1.0, %v3557_v54  ;;  %v3590_v29 = vadd.f32 1.0, %v3558_v13 }
 0x680   :  { %v8313_v11 = vpop.eup %8312  ;;  %v3639_v0 = vunpack.c.l.bf16 %v10508_v20  ;;  %v3489_v5 = vunpack.c.l.bf16 %v3463_v3  ;;  %8318 = vtanh.f32 %v3485_v49  ;;  %v3640_v48 = vunpack.c.h.bf16 %v10508_v20 }
 0x681   :  { %v8315_v32 = vpop.eup %8314  ;;  %v3593_v46 = vadd.f32 1.0, %v3561_v17  ;;  %v3594_v27 = vadd.f32 1.0, %v3562_v22  ;;  %v3617_v26 = vpack.c.bf16 %v3590_v29, %v3589_v12  ;;  %v3538_v58 = vpack.c.bf16 %v8313_v11, %v8311_v42 }
 0x682   :  { %v8317_v35 = vpop.eup %8316  ;;  %v3073_v2 = vmul.f32 0.5, %v10335_v59  ;;  %v3490_v50 = vunpack.c.h.bf16 %v3463_v3  ;;  %8320 = vtanh.f32 %v3486_v30  ;;  %v3643_v31 = vunpack.c.l.bf16 %v10517_v60 }
 0x683   :  { %v3619_v18 = vpack.c.bf16 %v3594_v27, %v3593_v46  ;;  %v3669_v8 = vunpack.c.l.bf16 %v3617_v26  ;;  %v3670_v14 = vunpack.c.h.bf16 %v3617_v26  ;;  %v3540_v36 = vpack.c.bf16 %v8317_v35, %v8315_v32 }
 0x684   :  { %v3559_v34 = vunpack.c.l.bf16 %v3538_v58  ;;  %v3560_v4 = vunpack.c.h.bf16 %v3538_v58  ;;  %v3644_v38 = vunpack.c.h.bf16 %v10517_v60  ;;  %8322 = vtanh.f32 %v3489_v5 }
 0x685   :  { %v3673_v16 = vunpack.c.l.bf16 %v3619_v18  ;;  %v3701_v28 = vmul.f32 %v3669_v8, %v3637_v52  ;;  %v3674_v54 = vunpack.c.h.bf16 %v3619_v18  ;;  %v3563_v20 = vunpack.c.l.bf16 %v3540_v36 }
 0x686   :  { %v8319_v13 = vpop.eup %8318  ;;  %v3564_v49 = vunpack.c.h.bf16 %v3540_v36  ;;  %v3591_v59 = vadd.f32 1.0, %v3559_v34  ;;  %v3592_v3 = vadd.f32 1.0, %v3560_v4  ;;  %v3702_v41 = vmul.f32 %v3670_v14, %v3638_v55 }
 0x687   :  { %v3705_v15 = vmul.f32 %v3673_v16, %v3641_v10  ;;  %v3706_v30 = vmul.f32 %v3674_v54, %v3642_v6  ;;  %8324 = vtanh.f32 %v3490_v50  ;;  %v3595_v17 = vadd.f32 1.0, %v3563_v20  ;;  %v11880_v54 = vld [vmem:[#allocation40_spill] sm:$0xff] }
 0x688   :  { %v8321_v42 = vpop.eup %8320  ;;  %v3596_v22 = vadd.f32 1.0, %v3564_v49  ;;  %v3618_v12 = vpack.c.bf16 %v3592_v3, %v3591_v59  ;;  %v3074_v29 = vmul.f32 0.5, %v10337_v43  ;;  %v10525_v52 = vpack.c.bf16 %v3070_v37, %v3069_v53  ;;  %v11881_v59 = vld [vmem:[#allocation41_spill] sm:$0xff] }
 0x689   :  { %v3729_v11 = vpack.c.bf16 %v3705_v15, %v3701_v28  ;;  %v3730_v60 = vpack.c.bf16 %v3706_v30, %v3702_v41  ;;  %v3541_v5 = vpack.c.bf16 %v8321_v42, %v8319_v13  ;;  %v3464_v10 = vpack.c.bf16 %v10453_v44, %v10451_v40 }
 0x68a   :  { %v3620_v32 = vpack.c.bf16 %v3596_v22, %v3595_v17  ;;  %v3671_v46 = vunpack.c.l.bf16 %v3618_v12  ;;  %v3672_v27 = vunpack.c.h.bf16 %v3618_v12  ;;  %v8323_v55 = vpop.eup %8322  ;;  %v3487_v58 = vunpack.c.l.bf16 %v10431_v24 }
 0x68b   :  { %4016 = vmatmul.bf16.gmra.mxu3 %v3729_v11  ;;  %4045 = vmatmul.bf16.gmra.mxu0 %v3730_v60  ;;  %v3565_v6 = vunpack.c.l.bf16 %v3541_v5  ;;  %v3566_v26 = vunpack.c.h.bf16 %v3541_v5  ;;  %v3488_v43 = vunpack.c.h.bf16 %v10431_v24  ;;  %v3491_v36 = vunpack.c.l.bf16 %v3464_v10 }
 0x68c   :  { %v3675_v35 = vunpack.c.l.bf16 %v3620_v32  ;;  %v3703_v50 = vmul.f32 %v3671_v46, %v3639_v0  ;;  %v3676_v53 = vunpack.c.h.bf16 %v3620_v32  ;;  %v3704_v37 = vmul.f32 %v3672_v27, %v3640_v48 }
 0x68d   :  { %v8325_v18 = vpop.eup %8324  ;;  %v3597_v8 = vadd.f32 1.0, %v3565_v6  ;;  %v3598_v14 = vadd.f32 1.0, %v3566_v26  ;;  %v3492_v34 = vunpack.c.h.bf16 %v3464_v10  ;;  %8326 = vtanh.f32 %v3487_v58 }
 0x68e   :  { %v3707_v4 = vmul.f32 %v3675_v35, %v3643_v31  ;;  %v3708_v40 = vmul.f32 %v3676_v53, %v3644_v38  ;;  %v3543_v44 = vpack.c.bf16 %v8325_v18, %v8323_v55  ;;  %v3095_v16 = vpack.c.bf16 %v3074_v29, %v3073_v2 }
 0x68f   :  { %v3621_v28 = vpack.c.bf16 %v3598_v14, %v3597_v8  ;;  %v3071_v13 = vmul.f32 0.5, %v11880_v54  ;;  %8328 = vtanh.f32 %v3488_v43  ;;  %v3072_v48 = vmul.f32 0.5, %v11881_v59 }
 0x690   :  { %v3731_v20 = vpack.c.bf16 %v3707_v4, %v3703_v50  ;;  %v3732_v24 = vpack.c.bf16 %v3708_v40, %v3704_v37  ;;  %v3569_v49 = vunpack.c.l.bf16 %v3543_v44  ;;  %v3570_v0 = vunpack.c.h.bf16 %v3543_v44 }
 0x691   :  { %v3075_v3 = vmul.f32 0.5, %v10347_v39  ;;  %v3076_v15 = vmul.f32 0.5, %v10349_v56  ;;  %8330 = vtanh.f32 %v3491_v36  ;;  %v3677_v2 = vunpack.c.l.bf16 %v3621_v28 }
 0x692   :  { %4074 = vmatmul.bf16.gmra.mxu1 %v3731_v20  ;;  %4103 = vmatmul.bf16.gmra.mxu2 %v3732_v24  ;;  %v3601_v31 = vadd.f32 1.0, %v3569_v49  ;;  %v3602_v38 = vadd.f32 1.0, %v3570_v0  ;;  %8332 = vtanh.f32 %v3492_v34  ;;  %v3451_v41 = vmul.f32 0.796875, %v3419_v1 }
 0x693   :  { %v3645_v30 = vunpack.c.l.bf16 %v10525_v52  ;;  %v3649_v42 = vunpack.c.l.bf16 %v3095_v16  ;;  %v3678_v17 = vunpack.c.h.bf16 %v3621_v28  ;;  %v8327_v22 = vpop.eup %8326  ;;  %v3646_v39 = vunpack.c.h.bf16 %v10525_v52 }
 0x694   :  { %v3623_v12 = vpack.c.bf16 %v3602_v38, %v3601_v31  ;;  %v3650_v29 = vunpack.c.h.bf16 %v3095_v16  ;;  %v3467_v56 = vpack.c.bf16 %v10496_v33, %v10491_v62  ;;  %v3094_v60 = vpack.c.bf16 %v3072_v48, %v3071_v13 }
 0x695   :  { %v8329_v11 = vpop.eup %8328  ;;  %v10541_v5 = vpack.c.bf16 %v3076_v15, %v3075_v3  ;;  %v3493_v32 = vunpack.c.l.bf16 %v10481_v63  ;;  %v3494_v1 = vunpack.c.h.bf16 %v10481_v63  ;;  %v3709_v27 = vmul.f32 %v3677_v2, %v3645_v30 }
 0x696   :  { %v3681_v46 = vunpack.c.l.bf16 %v3623_v12  ;;  %v3682_v10 = vunpack.c.h.bf16 %v3623_v12  ;;  %v3542_v55 = vpack.c.bf16 %v8329_v11, %v8327_v22  ;;  %v3710_v26 = vmul.f32 %v3678_v17, %v3646_v39 }
 0x697   :  { %v8331_v6 = vpop.eup %8330  ;;  %v3497_v58 = vunpack.c.l.bf16 %v3467_v56  ;;  %v3498_v52 = vunpack.c.h.bf16 %v3467_v56  ;;  %8334 = vtanh.f32 %v3493_v32  ;;  %v3452_v53 = vmul.f32 0.796875, %v3420_v57 }
 0x698   :  { %v8333_v43 = vpop.eup %8332  ;;  %v3713_v35 = vmul.f32 %v3681_v46, %v3649_v42  ;;  %v3714_v62 = vmul.f32 %v3682_v10, %v3650_v29  ;;  %v3567_v33 = vunpack.c.l.bf16 %v3542_v55  ;;  %v3568_v50 = vunpack.c.h.bf16 %v3542_v55 }
 0x699   :  { %v3544_v37 = vpack.c.bf16 %v8333_v43, %v8331_v6  ;;  %v3647_v18 = vunpack.c.l.bf16 %v3094_v60  ;;  %8336 = vtanh.f32 %v3494_v1  ;;  %v3651_v40 = vunpack.c.l.bf16 %v10541_v5 }
 0x69a   :  { %v3733_v63 = vpack.c.bf16 %v3713_v35, %v3709_v27  ;;  %v3734_v8 = vpack.c.bf16 %v3714_v62, %v3710_v26  ;;  %v3599_v14 = vadd.f32 1.0, %v3567_v33  ;;  %v3600_v36 = vadd.f32 1.0, %v3568_v50 }
 0x69b   :  { %v3571_v34 = vunpack.c.l.bf16 %v3544_v37  ;;  %v3572_v4 = vunpack.c.h.bf16 %v3544_v37  ;;  %8338 = vtanh.f32 %v3497_v58  ;;  %v3077_v16 = vmul.f32 0.5, %v10370_v21 }
 0x69c   :  { %4021 = vmatmul.bf16.gmra.mxu3 %v3733_v63  ;;  %4050 = vmatmul.bf16.gmra.mxu0 %v3734_v8  ;;  %v3622_v44 = vpack.c.bf16 %v3600_v36, %v3599_v14  ;;  %v3078_v25 = vmul.f32 0.5, %v10375_v23  ;;  %8340 = vtanh.f32 %v3498_v52  ;;  %v3648_v13 = vunpack.c.h.bf16 %v3094_v60 }
 0x69d   :  { %v8335_v57 = vpop.eup %8334  ;;  %v3603_v28 = vadd.f32 1.0, %v3571_v34  ;;  %v3604_v54 = vadd.f32 1.0, %v3572_v4  ;;  %v3468_v20 = vpack.c.bf16 %v3452_v53, %v3451_v41  ;;  %v3652_v49 = vunpack.c.h.bf16 %v10541_v5 }
 0x69e   :  { %v3679_v24 = vunpack.c.l.bf16 %v3622_v44  ;;  %v3680_v0 = vunpack.c.h.bf16 %v3622_v44  ;;  %v3495_v59 = vunpack.c.l.bf16 %v10489_v51  ;;  %v3081_v15 = vmul.f32 0.5, %v10400_v47 }
 0x69f   :  { %v8337_v48 = vpop.eup %8336  ;;  %v3624_v3 = vpack.c.bf16 %v3604_v54, %v3603_v28  ;;  %v3496_v21 = vunpack.c.h.bf16 %v10489_v51  ;;  %v3499_v31 = vunpack.c.l.bf16 %v3468_v20  ;;  %v3082_v23 = vmul.f32 0.5, %v10403_v7 }
 0x6a0   :  { %v3097_v38 = vpack.c.bf16 %v3078_v25, %v3077_v16  ;;  %v3545_v2 = vpack.c.bf16 %v8337_v48, %v8335_v57  ;;  %v3500_v30 = vunpack.c.h.bf16 %v3468_v20  ;;  %v3711_v17 = vmul.f32 %v3679_v24, %v3647_v18 }
 0x6a1   :  { %v8339_v42 = vpop.eup %8338  ;;  %v3683_v41 = vunpack.c.l.bf16 %v3624_v3  ;;  %v3684_v22 = vunpack.c.h.bf16 %v3624_v3  ;;  %8342 = vtanh.f32 %v3495_v59  ;;  %v3712_v39 = vmul.f32 %v3680_v0, %v3648_v13 }
 0x6a2   :  { %v8341_v12 = vpop.eup %8340  ;;  %v3573_v29 = vunpack.c.l.bf16 %v3545_v2  ;;  %v3574_v56 = vunpack.c.h.bf16 %v3545_v2  ;;  %8344 = vtanh.f32 %v3496_v21  ;;  %v3099_v51 = vpack.c.bf16 %v3082_v23, %v3081_v15 }
 0x6a3   :  { %v3715_v11 = vmul.f32 %v3683_v41, %v3651_v40  ;;  %v3716_v47 = vmul.f32 %v3684_v22, %v3652_v49  ;;  %v3547_v60 = vpack.c.bf16 %v8341_v12, %v8339_v42  ;;  %8346 = vtanh.f32 %v3499_v31 }
 0x6a4   :  { %v3605_v5 = vadd.f32 1.0, %v3573_v29  ;;  %v3606_v7 = vadd.f32 1.0, %v3574_v56  ;;  %8348 = vtanh.f32 %v3500_v30  ;;  %v3653_v52 = vunpack.c.l.bf16 %v3097_v38 }
 0x6a5   :  { %v3735_v32 = vpack.c.bf16 %v3715_v11, %v3711_v17  ;;  %v3736_v1 = vpack.c.bf16 %v3716_v47, %v3712_v39  ;;  %v3577_v46 = vunpack.c.l.bf16 %v3547_v60  ;;  %v3578_v27 = vunpack.c.h.bf16 %v3547_v60  ;;  %v10559_v11 = vld [vmem:[#allocation14 + $0x1] ss:$0 sm:$0xff] }
 0x6a6   :  { %v3625_v10 = vpack.c.bf16 %v3606_v7, %v3605_v5  ;;  %v3079_v62 = vmul.f32 0.5, %v10389_v9  ;;  %v3657_v53 = vunpack.c.l.bf16 %v3099_v51  ;;  %v3654_v37 = vunpack.c.h.bf16 %v3097_v38 }
 0x6a7   :  { %v8343_v55 = vpop.eup %8342  ;;  %4079 = vmatmul.bf16.gmra.mxu1 %v3735_v32  ;;  %4108 = vmatmul.bf16.gmra.mxu2 %v3736_v1  ;;  %v3609_v6 = vadd.f32 1.0, %v3577_v46  ;;  %v3610_v26 = vadd.f32 1.0, %v3578_v27  ;;  %v3658_v8 = vunpack.c.h.bf16 %v3099_v51  ;;  %v3080_v14 = vmul.f32 0.5, %v10391_v45 }
 0x6a8   :  { %v8345_v58 = vpop.eup %8344  ;;  %v3685_v43 = vunpack.c.l.bf16 %v3625_v10  ;;  %v3686_v35 = vunpack.c.h.bf16 %v3625_v10  ;;  %v3083_v36 = vmul.f32 0.5, %v10413_v19  ;;  %v3084_v34 = vmul.f32 0.5, %v10415_v61 }
 0x6a9   :  { %v8347_v33 = vpop.eup %8346  ;;  %v3627_v50 = vpack.c.bf16 %v3610_v26, %v3609_v6  ;;  %v3546_v18 = vpack.c.bf16 %v8345_v58, %v8343_v55  ;;  %v3098_v24 = vpack.c.bf16 %v3080_v14, %v3079_v62  ;;  %v11882_v26 = vld [vmem:[#allocation48_spill] sm:$0xff] }
 0x6aa   :  { %v8349_v63 = vpop.eup %8348  ;;  %v3717_v25 = vmul.f32 %v3685_v43, %v3653_v52  ;;  %v3718_v57 = vmul.f32 %v3686_v35, %v3654_v37  ;;  %v3100_v49 = vpack.c.bf16 %v3084_v34, %v3083_v36 }
 0x6ab   :  { %v3689_v4 = vunpack.c.l.bf16 %v3627_v50  ;;  %v3690_v40 = vunpack.c.h.bf16 %v3627_v50  ;;  %v3548_v44 = vpack.c.bf16 %v8349_v63, %v8347_v33  ;;  %v3575_v16 = vunpack.c.l.bf16 %v3546_v18  ;;  %v11883_v50 = vld [vmem:[#allocation49_spill] sm:$0xff] }
 0x6ac   :  { %v3576_v9 = vunpack.c.h.bf16 %v3546_v18  ;;  %v3655_v21 = vunpack.c.l.bf16 %v3098_v24  ;;  %v3659_v31 = vunpack.c.l.bf16 %v3100_v49  ;;  %v3656_v30 = vunpack.c.h.bf16 %v3098_v24 }
 0x6ad   :  { %v3721_v28 = vmul.f32 %v3689_v4, %v3657_v53  ;;  %v3722_v54 = vmul.f32 %v3690_v40, %v3658_v8  ;;  %v3579_v13 = vunpack.c.l.bf16 %v3548_v44  ;;  %v3580_v20 = vunpack.c.h.bf16 %v3548_v44 }
 0x6ae   :  { %v3607_v0 = vadd.f32 1.0, %v3575_v16  ;;  %v3608_v59 = vadd.f32 1.0, %v3576_v9  ;;  %v3660_v42 = vunpack.c.h.bf16 %v3100_v49 }
 0x6af   :  { %v3737_v45 = vpack.c.bf16 %v3721_v28, %v3717_v25  ;;  %v3738_v48 = vpack.c.bf16 %v3722_v54, %v3718_v57  ;;  %v3611_v19 = vadd.f32 1.0, %v3579_v13  ;;  %v3612_v3 = vadd.f32 1.0, %v3580_v20  ;;  %v11884_v57 = vld [vmem:[#allocation50_spill] sm:$0xff] }
 0x6b0   :  { %v3626_v61 = vpack.c.bf16 %v3608_v59, %v3607_v0  ;;  %v11885_v59 = vld [vmem:[#allocation51_spill] sm:$0xff] }
 0x6b1   :  { %4026 = vmatmul.bf16.gmra.mxu3 %v3737_v45  ;;  %4055 = vmatmul.bf16.gmra.mxu0 %v3738_v48  ;;  %v3628_v15 = vpack.c.bf16 %v3612_v3, %v3611_v19 }
 0x6b2   :  { %v3687_v23 = vunpack.c.l.bf16 %v3626_v61  ;;  %v3688_v38 = vunpack.c.h.bf16 %v3626_v61 }
 0x6b3   :  { %v3691_v2 = vunpack.c.l.bf16 %v3628_v15  ;;  %v3692_v41 = vunpack.c.h.bf16 %v3628_v15 }
 0x6b4   :  { %v3719_v17 = vmul.f32 %v3687_v23, %v3655_v21  ;;  %v3720_v12 = vmul.f32 %v3688_v38, %v3656_v30 }
 0x6b5   :  { %v3723_v22 = vmul.f32 %v3691_v2, %v3659_v31  ;;  %v3724_v39 = vmul.f32 %v3692_v41, %v3660_v42  ;;  %v8032_v41 = vld [vmem:[#allocation7 + $0xb8] sm:$0xff] }
 0x6b6   :  { %4403 = vmatpush.bf16.msrb.mxu3 %v8032_v41 }
 0x6b7   :  { %v3739_v29 = vpack.c.bf16 %v3723_v22, %v3719_v17  ;;  %v3740_v56 = vpack.c.bf16 %v3724_v39, %v3720_v12  ;;  %v11886_v22 = vld [vmem:[#allocation52_spill] sm:$0xff] }
 0x6b8   :  { %v8031_v39 = vld [vmem:[#allocation7 + $0xb0] sm:$0xff] }
 0x6b9   :  { %4084 = vmatmul.bf16.gmra.mxu1 %v3739_v29  ;;  %4113 = vmatmul.bf16.gmra.mxu2 %v3740_v56 }
 0x6ba   :  { %4404 = vmatpush.bf16.msrb.mxu3 %v8031_v39 }
 0x6ea   :  { %v4041_v51 = vpop.f32.mrf.mxu0 }
 0x6ef   :  { %v4012_v47 = vpop.f32.mrf.mxu3 }
 0x6f0   :  { %v4013_v60 = vadd.f32 %v10559_v11, %v4012_v47  ;;  %v8030_v47 = vld [vmem:[#allocation7 + $0xa8] sm:$0xff] }
 0x6f1   :  { %4405 = vmatpush.bf16.msrb.mxu3 %v8030_v47 }
 0x6f2   :  { %v4042_v5 = vadd.f32 %v4041_v51, %v4013_v60  ;;  %v4043_v10 = vpop.f32.mrf.mxu0 }
 0x6f5   :  { %v4070_v7 = vpop.f32.mrf.mxu1 }
 0x6f6   :  { %v4071_v1 = vadd.f32 %v4070_v7, %v4042_v5 }
 0x6f7   :  { %v4014_v32 = vpop.f32.mrf.mxu3 }
 0x6f8   :  { %v4015_v46 = vadd.f32 %v10559_v11, %v4014_v32  ;;  %v11887_v32 = vld [vmem:[#allocation53_spill] sm:$0xff] }
 0x6fa   :  { %v4044_v6 = vadd.f32 %v4043_v10, %v4015_v46 }
 0x6fb   :  { %v4099_v27 = vpop.f32.mrf.mxu2 }
 0x6fc   :  { %v4100_v55 = vadd.f32 %v4099_v27, %v4071_v1 }
 0x6fd   :  { %v4072_v52 = vpop.f32.mrf.mxu1 }
 0x6fe   :  { %v10564_v58 = vadd.f32 %v4100_v55, %v11882_v26  ;;  %v4073_v43 = vadd.f32 %v4072_v52, %v4044_v6 }
 0x700   :  { %4131 = vadd.xlane.f32.xlu0 %v10564_v58  ;;  %v4155_v35 = vmul.f32 %v10564_v58, %v10564_v58 }
 0x702   :  { %4163 = vadd.xlane.f32.xlu2 %v4155_v35 }
 0x703   :  { %v4101_v62 = vpop.f32.mrf.mxu2 }
 0x704   :  { %v4102_v33 = vadd.f32 %v4101_v62, %v4073_v43 }
 0x706   :  { %v10570_v53 = vadd.f32 %v4102_v33, %v11883_v50  ;;  %v11888_v33 = vld [vmem:[#allocation56_spill] sm:$0xff] }
 0x708   :  { %4133 = vadd.xlane.f32.xlu1 %v10570_v53  ;;  %v4156_v37 = vmul.f32 %v10570_v53, %v10570_v53  ;;  %v4046_v18 = vpop.f32.mrf.mxu0 }
 0x70a   :  { %4165 = vadd.xlane.f32.xlu0 %v4156_v37 }
 0x70e   :  { %v4017_v63 = vpop.f32.mrf.mxu3 }
 0x70f   :  { %v4018_v8 = vadd.f32 %v10559_v11, %v4017_v63  ;;  %v4075_v14 = vpop.f32.mrf.mxu1 }
 0x710   :  { %v4048_v44 = vpop.f32.mrf.mxu0 }
 0x711   :  { %v4047_v36 = vadd.f32 %v4046_v18, %v4018_v8 }
 0x713   :  { %v4076_v34 = vadd.f32 %v4075_v14, %v4047_v36 }
 0x715   :  { %v4104_v4 = vpop.f32.mrf.mxu2 }
 0x716   :  { %v4105_v40 = vadd.f32 %v4104_v4, %v4076_v34  ;;  %v4019_v16 = vpop.f32.mrf.mxu3  ;;  %v11889_v34 = vld [vmem:[#allocation54_spill] sm:$0xff] }
 0x717   :  { %v4020_v25 = vadd.f32 %v10559_v11, %v4019_v16  ;;  %v4077_v54 = vpop.f32.mrf.mxu1  ;;  %v11890_v16 = vld [vmem:[#allocation39_spill] sm:$0xff] }
 0x718   :  { %v10578_v9 = vadd.f32 %v4105_v40, %v11884_v57  ;;  %v8029_v40 = vld [vmem:[#allocation7 + $0xa0] sm:$0xff] }
 0x719   :  { %v4049_v28 = vadd.f32 %v4048_v44, %v4020_v25  ;;  %v4051_v48 = vpop.f32.mrf.mxu0  ;;  %4406 = vmatpush.bf16.msrb.mxu3 %v8029_v40 }
 0x71a   :  { %4135 = vadd.xlane.f32.xlu1 %v10578_v9  ;;  %v4157_v13 = vmul.f32 %v10578_v9, %v10578_v9 }
 0x71b   :  { %v4078_v20 = vadd.f32 %v4077_v54, %v4049_v28 }
 0x71c   :  { %4167 = vadd.xlane.f32.xlu0 %v4157_v13 }
 0x71d   :  { %v4106_v24 = vpop.f32.mrf.mxu2 }
 0x71e   :  { %v4107_v49 = vadd.f32 %v4106_v24, %v4078_v20  ;;  %v8028_v20 = vld [vmem:[#allocation7 + $0x98] sm:$0xff] }
 0x71f   :  { %v4022_v0 = vpop.f32.mrf.mxu3  ;;  %4407 = vmatpush.bf16.msrb.mxu3 %v8028_v20 }
 0x720   :  { %v10584_v45 = vadd.f32 %v4107_v49, %v11885_v59  ;;  %v4023_v19 = vadd.f32 %v10559_v11, %v4022_v0 }
 0x721   :  { %v4053_v2 = vpop.f32.mrf.mxu0 }
 0x722   :  { %4137 = vadd.xlane.f32.xlu2 %v10584_v45  ;;  %v4158_v3 = vmul.f32 %v10584_v45, %v10584_v45  ;;  %v4052_v61 = vadd.f32 %v4051_v48, %v4023_v19 }
 0x724   :  { %v4080_v15 = vpop.f32.mrf.mxu1  ;;  %4169 = vadd.xlane.f32.xlu1 %v4158_v3 }
 0x725   :  { %v4081_v21 = vadd.f32 %v4080_v15, %v4052_v61 }
 0x727   :  { %v4024_v31 = vpop.f32.mrf.mxu3 }
 0x728   :  { %v4025_v23 = vadd.f32 %v10559_v11, %v4024_v31  ;;  %v8027_v31 = vld [vmem:[#allocation7 + $0x90] sm:$0xff] }
 0x729   :  { %4408 = vmatpush.bf16.msrb.mxu3 %v8027_v31 }
 0x72a   :  { %v4109_v38 = vpop.f32.mrf.mxu2  ;;  %v4054_v42 = vadd.f32 %v4053_v2, %v4025_v23 }
 0x72b   :  { %v4110_v30 = vadd.f32 %v4109_v38, %v4081_v21 }
 0x72c   :  { %v4082_v17 = vpop.f32.mrf.mxu1 }
 0x72d   :  { %v10592_v12 = vadd.f32 %v4110_v30, %v11886_v22  ;;  %v4083_v29 = vadd.f32 %v4082_v17, %v4054_v42 }
 0x72e   :  { %v4056_v5 = vpop.f32.mrf.mxu0 }
 0x72f   :  { %4139 = vadd.xlane.f32.xlu2 %v10592_v12  ;;  %v4159_v56 = vmul.f32 %v10592_v12, %v10592_v12 }
 0x731   :  { %4171 = vadd.xlane.f32.xlu1 %v4159_v56 }
 0x732   :  { %v4111_v60 = vpop.f32.mrf.mxu2 }
 0x733   :  { %v4112_v51 = vadd.f32 %v4111_v60, %v4083_v29  ;;  %v8026_v29 = vld [vmem:[#allocation7 + $0x88] sm:$0xff] }
 0x734   :  { %v4027_v7 = vpop.f32.mrf.mxu3  ;;  %4409 = vmatpush.bf16.msrb.mxu3 %v8026_v29 }
 0x735   :  { %v10598_v1 = vadd.f32 %v4112_v51, %v11887_v32  ;;  %v4028_v46 = vadd.f32 %v10559_v11, %v4027_v7 }
 0x736   :  { %v4085_v27 = vpop.f32.mrf.mxu1  ;;  %v4058_v62 = vpop.f32.mrf.mxu0 }
 0x737   :  { %v4057_v10 = vadd.f32 %v4056_v5, %v4028_v46  ;;  %4141 = vadd.xlane.f32.xlu0 %v10598_v1  ;;  %v4160_v55 = vmul.f32 %v10598_v1, %v10598_v1 }
 0x739   :  { %v4086_v6 = vadd.f32 %v4085_v27, %v4057_v10  ;;  %4173 = vadd.xlane.f32.xlu2 %v4160_v55 }
 0x73c   :  { %v4114_v26 = vpop.f32.mrf.mxu2  ;;  %v4029_v52 = vpop.f32.mrf.mxu3 }
 0x73d   :  { %v4115_v43 = vadd.f32 %v4114_v26, %v4086_v6  ;;  %v4030_v35 = vadd.f32 %v10559_v11, %v4029_v52 }
 0x73e   :  { %v4087_v18 = vpop.f32.mrf.mxu1 }
 0x73f   :  { %v10606_v50 = vadd.f32 %v4115_v43, %v11888_v33  ;;  %v4059_v37 = vadd.f32 %v4058_v62, %v4030_v35 }
 0x741   :  { %v4088_v63 = vadd.f32 %v4087_v18, %v4059_v37  ;;  %4143 = vadd.xlane.f32.xlu0 %v10606_v50  ;;  %v4161_v8 = vmul.f32 %v10606_v50, %v10606_v50 }
 0x743   :  { %4175 = vadd.xlane.f32.xlu2 %v4161_v8  ;;  %v10638_v8 = vld [vmem:[#allocation19 + $0x1] ss:$0 sm:$0xff] }
 0x744   :  { %v4116_v14 = vpop.f32.mrf.mxu2 }
 0x745   :  { %v4117_v36 = vadd.f32 %v4116_v14, %v4088_v63  ;;  %v8025_v63 = vld [vmem:[#allocation7 + $0x80] sm:$0xff] }
 0x746   :  { %4410 = vmatpush.bf16.msrb.mxu3 %v8025_v63 }
 0x747   :  { %v10612_v4 = vadd.f32 %v4117_v36, %v11889_v34 }
 0x749   :  { %4145 = vadd.xlane.f32.xlu1 %v10612_v4  ;;  %v4162_v11 = vmul.f32 %v10612_v4, %v10612_v4 }
 0x74b   :  { %4177 = vadd.xlane.f32.xlu0 %v4162_v11 }
 0x773   :  { %v4132_v44 = vpop.xlane.xlu0 %4131 }
 0x774   :  { %v4147_v25 = vmul.f32 %v4132_v44, %v11890_v16 }
 0x775   :  { %v4164_v57 = vpop.xlane.xlu2 %4163 }
 0x776   :  { %v4187_v28 = vmul.f32 %v4147_v25, %v4147_v25  ;;  %v4179_v54 = vmul.f32 %v4164_v57, %v11890_v16  ;;  %v4203_v33 = vsub.f32 %v10564_v58, %v4147_v25 }
 0x778   :  { %v4195_v13 = vsub.f32 %v4179_v54, %v4187_v28  ;;  %v10646_v28 = vld [vmem:[#allocation20 + $0x1] ss:$0 sm:$0xff] }
 0x77a   :  { %v4211_v24 = vadd.f32 1e-05, %v4195_v13 }
 0x77b   :  { %v4134_v49 = vpop.xlane.xlu1 %4133 }
 0x77c   :  { %v4148_v0 = vmul.f32 %v4134_v49, %v11890_v16  ;;  %8350 = vrsqrt.f32 %v4211_v24  ;;  %vm4225_vm12 = vweird.f32 %v4211_v24 }
 0x77d   :  { %v4166_v59 = vpop.xlane.xlu0 %4165 }
 0x77e   :  { %v4188_v48 = vmul.f32 %v4148_v0, %v4148_v0  ;;  %v4180_v19 = vmul.f32 %v4166_v59, %v11890_v16  ;;  %v4204_v37 = vsub.f32 %v10570_v53, %v4148_v0 }
 0x780   :  { %v4196_v3 = vsub.f32 %v4180_v19, %v4188_v48 }
 0x782   :  { %v4212_v61 = vadd.f32 1e-05, %v4196_v3  ;;  %v8351_v15 = vpop.eup %8350 }
 0x783   :  { %v4220_v21 = vmul.f32 %v8351_v15, %v4211_v24  ;;  %vm4226_vm10 = vweird.f32 %v8351_v15 }
 0x784   :  { %8352 = vrsqrt.f32 %v4212_v61  ;;  %vm4227_vm13 = vmor %vm4225_vm12, %vm4226_vm10  ;;  %vm4235_vm14 = vweird.f32 %v4212_v61 }
 0x785   :  { %v4221_v38 = vmul.f32 %v8351_v15, %v4220_v21 }
 0x787   :  { %v4222_v17 = vmul.f32 0.5, %v4221_v38 }
 0x789   :  { %v4223_v51 = vsub.f32 1.5, %v4222_v17 }
 0x78a   :  { %v8353_v23 = vpop.eup %8352 }
 0x78b   :  { %v4230_v2 = vmul.f32 %v8353_v23, %v4212_v61  ;;  %v4224_v27 = vmul.f32 %v8351_v15, %v4223_v51  ;;  %vm4236_vm11 = vweird.f32 %v8353_v23 }
 0x78c   :  { %vm4237_vm15 = vmor %vm4235_vm14, %vm4236_vm11 }
 0x78d   :  { %v4231_v30 = vmul.f32 %v8353_v23, %v4230_v2  ;;  %v4136_v42 = vpop.xlane.xlu1 %4135  ;;  %v4228_v43 = vsel %vm4227_vm13, %v8351_v15, %v4224_v27 }
 0x78e   :  { %v10622_v41 = vmul.f32 %v4136_v42, %v11890_v16  ;;  %v4299_v14 = vmul.f32 %v4228_v43, %v4203_v33 }
 0x78f   :  { %v4232_v22 = vmul.f32 0.5, %v4231_v30  ;;  %v4168_v39 = vpop.xlane.xlu0 %4167 }
 0x790   :  { %v4189_v56 = vmul.f32 %v10622_v41, %v10622_v41  ;;  %v4181_v47 = vmul.f32 %v4168_v39, %v11890_v16  ;;  %v4310_v11 = vmul.f32 %v10638_v8, %v4299_v14  ;;  %v4205_v51 = vsub.f32 %v10578_v9, %v10622_v41 }
 0x791   :  { %v4233_v5 = vsub.f32 1.5, %v4232_v22 }
 0x792   :  { %v4197_v60 = vsub.f32 %v4181_v47, %v4189_v56  ;;  %v10652_v24 = vadd.f32 %v10646_v28, %v4310_v11 }
 0x793   :  { %v4234_v10 = vmul.f32 %v8353_v23, %v4233_v5 }
 0x794   :  { %v10627_v7 = vadd.f32 1e-05, %v4197_v60 }
 0x795   :  { %v4138_v32 = vpop.xlane.xlu2 %4137  ;;  %v4238_v35 = vsel %vm4237_vm15, %v8353_v23, %v4234_v10 }
 0x796   :  { %8354 = vrsqrt.f32 %v10627_v7  ;;  %v10631_v46 = vmul.f32 %v4138_v32, %v11890_v16  ;;  %v4300_v36 = vmul.f32 %v4238_v35, %v4204_v37  ;;  %vm4245_vm2 = vweird.f32 %v10627_v7 }
 0x797   :  { %v4170_v55 = vpop.xlane.xlu1 %4169 }
 0x798   :  { %v4190_v6 = vmul.f32 %v10631_v46, %v10631_v46  ;;  %v4182_v26 = vmul.f32 %v4170_v55, %v11890_v16  ;;  %v4311_v40 = vmul.f32 %v10638_v8, %v4300_v36  ;;  %v4206_v5 = vsub.f32 %v10584_v45, %v10631_v46 }
 0x79a   :  { %v4198_v52 = vsub.f32 %v4182_v26, %v4190_v6  ;;  %v10655_v49 = vadd.f32 %v10646_v28, %v4311_v40 }
 0x79c   :  { %v8355_v62 = vpop.eup %8354  ;;  %v4214_v18 = vadd.f32 1e-05, %v4198_v52  ;;  %v4329_v19 = vpack.c.bf16 %v10655_v49, %v10652_v24 }
 0x79d   :  { %v4240_v34 = vmul.f32 %v8355_v62, %v10627_v7  ;;  %vm4246_vm0 = vweird.f32 %v8355_v62 }
 0x79e   :  { %8356 = vrsqrt.f32 %v4214_v18  ;;  %4411 = vmatmul.bf16.vlgmr.msrb.gmra.mxu3 %v4329_v19  ;;  %vm4247_vm3 = vmor %vm4245_vm2, %vm4246_vm0  ;;  %vm4255_vm4 = vweird.f32 %v4214_v18 }
 0x79f   :  { %v4241_v57 = vmul.f32 %v8355_v62, %v4240_v34 }
 0x7a1   :  { %v4242_v0 = vmul.f32 0.5, %v4241_v57 }
 0x7a2   :  { %v4140_v44 = vpop.xlane.xlu2 %4139 }
 0x7a3   :  { %v10644_v58 = vmul.f32 %v4140_v44, %v11890_v16  ;;  %v4243_v21 = vsub.f32 1.5, %v4242_v0 }
 0x7a4   :  { %v8357_v53 = vpop.eup %8356  ;;  %v4172_v25 = vpop.xlane.xlu1 %4171 }
 0x7a5   :  { %v4250_v54 = vmul.f32 %v8357_v53, %v4214_v18  ;;  %v4191_v13 = vmul.f32 %v10644_v58, %v10644_v58  ;;  %v4183_v20 = vmul.f32 %v4172_v25, %v11890_v16  ;;  %v4244_v42 = vmul.f32 %v8355_v62, %v4243_v21 }
 0x7a6   :  { %vm4256_vm1 = vweird.f32 %v8357_v53 }
 0x7a7   :  { %v4251_v59 = vmul.f32 %v8357_v53, %v4250_v54  ;;  %v4199_v48 = vsub.f32 %v4183_v20, %v4191_v13  ;;  %vm4257_vm5 = vmor %vm4255_vm4, %vm4256_vm1  ;;  %v4248_v56 = vsel %vm4247_vm3, %v8355_v62, %v4244_v42 }
 0x7a8   :  { %v4301_v55 = vmul.f32 %v4248_v56, %v4205_v51 }
 0x7a9   :  { %v4252_v3 = vmul.f32 0.5, %v4251_v59  ;;  %v4215_v61 = vadd.f32 1e-05, %v4199_v48 }
 0x7aa   :  { %v4142_v15 = vpop.xlane.xlu0 %4141  ;;  %v4312_v35 = vmul.f32 %v10638_v8, %v4301_v55 }
 0x7ab   :  { %v4253_v31 = vsub.f32 1.5, %v4252_v3  ;;  %v10660_v23 = vmul.f32 %v4142_v15, %v11890_v16  ;;  %8358 = vrsqrt.f32 %v4215_v61  ;;  %vm4265_vm7 = vweird.f32 %v4215_v61 }
 0x7ac   :  { %v4174_v38 = vpop.xlane.xlu2 %4173  ;;  %v10679_v33 = vadd.f32 %v10646_v28, %v4312_v35 }
 0x7ad   :  { %v4192_v2 = vmul.f32 %v10660_v23, %v10660_v23  ;;  %v4184_v30 = vmul.f32 %v4174_v38, %v11890_v16  ;;  %v4254_v17 = vmul.f32 %v8357_v53, %v4253_v31  ;;  %v4208_v19 = vsub.f32 %v10598_v1, %v10660_v23 }
 0x7af   :  { %v4200_v22 = vsub.f32 %v4184_v30, %v4192_v2  ;;  %v4258_v47 = vsel %vm4257_vm5, %v8357_v53, %v4254_v17  ;;  %v4207_v53 = vsub.f32 %v10592_v12, %v10644_v58 }
 0x7b0   :  { %v4302_v6 = vmul.f32 %v4258_v47, %v4206_v5 }
 0x7b1   :  { %v4216_v39 = vadd.f32 1e-05, %v4200_v22  ;;  %v8359_v29 = vpop.eup %8358 }
 0x7b2   :  { %v4260_v60 = vmul.f32 %v8359_v29, %v4215_v61  ;;  %v4313_v9 = vmul.f32 %v10638_v8, %v4302_v6  ;;  %vm4266_vm6 = vweird.f32 %v8359_v29 }
 0x7b3   :  { %8360 = vrsqrt.f32 %v4216_v39  ;;  %vm4267_vm8 = vmor %vm4265_vm7, %vm4266_vm6  ;;  %vm4275_vm10 = vweird.f32 %v4216_v39 }
 0x7b4   :  { %v4144_v32 = vpop.xlane.xlu0 %4143  ;;  %v4261_v27 = vmul.f32 %v8359_v29, %v4260_v60  ;;  %v10682_v37 = vadd.f32 %v10646_v28, %v4313_v9 }
 0x7b5   :  { %v10671_v10 = vmul.f32 %v4144_v32, %v11890_v16 }
 0x7b6   :  { %v4176_v7 = vpop.xlane.xlu2 %4175  ;;  %v4262_v26 = vmul.f32 0.5, %v4261_v27  ;;  %v4330_v34 = vpack.c.bf16 %v10682_v37, %v10679_v33 }
 0x7b7   :  { %v4193_v52 = vmul.f32 %v10671_v10, %v10671_v10  ;;  %v4185_v43 = vmul.f32 %v4176_v7, %v11890_v16  ;;  %v4209_v47 = vsub.f32 %v10606_v50, %v10671_v10  ;;  %v10715_v10 = vld [vmem:[#allocation8 + $0x2] ss:$0 sm:$0xff] }
 0x7b8   :  { %v4263_v45 = vsub.f32 1.5, %v4262_v26  ;;  %4416 = vmatmul.bf16.gmra.mxu3 %v4330_v34  ;;  %v7677_v34 = vld [vmem:[#allocation10 + $0x2e8] sm:$0xf] }
 0x7b9   :  { %v8361_v41 = vpop.eup %8360  ;;  %v4201_v46 = vsub.f32 %v4185_v43, %v4193_v52 }
 0x7ba   :  { %v4270_v62 = vmul.f32 %v8361_v41, %v4216_v39  ;;  %v4264_v18 = vmul.f32 %v8359_v29, %v4263_v45  ;;  %vm4276_vm9 = vweird.f32 %v8361_v41 }
 0x7bb   :  { %v4217_v63 = vadd.f32 1e-05, %v4201_v46  ;;  %vm4277_vm11 = vmor %vm4275_vm10, %vm4276_vm9 }
 0x7bc   :  { %v4271_v14 = vmul.f32 %v8361_v41, %v4270_v62  ;;  %v4146_v36 = vpop.xlane.xlu1 %4145  ;;  %v4268_v40 = vsel %vm4267_vm8, %v8359_v29, %v4264_v18 }
 0x7bd   :  { %8362 = vrsqrt.f32 %v4217_v63  ;;  %v4154_v11 = vmul.f32 %v4146_v36, %v11890_v16  ;;  %v4303_v0 = vmul.f32 %v4268_v40, %v4207_v53  ;;  %vm4285_vm13 = vweird.f32 %v4217_v63  ;;  %v8062_v40 = vld [vmem:[#allocation10 + $0x2ec] sm:$0xf]  ;;  %v7679_v53 = vld [vmem:[#allocation10 + $0x2f8] sm:$0xf0] }
 0x7be   :  { %v4272_v44 = vmul.f32 0.5, %v4271_v14  ;;  %v4178_v57 = vpop.xlane.xlu0 %4177 }
 0x7bf   :  { %v4194_v25 = vmul.f32 %v4154_v11, %v4154_v11  ;;  %v4186_v54 = vmul.f32 %v4178_v57, %v11890_v16  ;;  %v4314_v12 = vmul.f32 %v10638_v8, %v4303_v0  ;;  %v4210_v32 = vsub.f32 %v10612_v4, %v4154_v11  ;;  %v8064_v11 = vld [vmem:[#allocation10 + $0x2f4] sm:$0xf0]  ;;  %v7671_v0 = vld [vmem:[#allocation10 + $0x2f0] sm:$0xf0] }
 0x7c0   :  { %v4273_v13 = vsub.f32 1.5, %v4272_v44  ;;  %v7678_v57 = vor.u32 %v8064_v11, %v7677_v34 }
 0x7c1   :  { %v4202_v20 = vsub.f32 %v4186_v54, %v4194_v25  ;;  %v10695_v2 = vadd.f32 %v10646_v28, %v4314_v12  ;;  %v7669_v25 = vld [vmem:[#allocation10 + $0x2e0] sm:$0xf]  ;;  %v8063_v54 = vld [vmem:[#allocation10 + $0x2ec] sm:$0xf0] }
 0x7c2   :  { %v4274_v59 = vmul.f32 %v8361_v41, %v4273_v13  ;;  %v7682_v13 = vor.u32 %v8062_v40, %v7679_v53  ;;  %4908 = vmatpush.bf16.msra.mxu2 %v7678_v57  ;;  %v7621_v57 = vld [vmem:[#allocation10 + $0x280] sm:$0xf]  ;;  %v8051_v53 = vld [vmem:[#allocation10 + $0x28c] sm:$0xf0] }
 0x7c3   :  { %v8363_v48 = vpop.eup %8362  ;;  %v4218_v3 = vadd.f32 1e-05, %v4202_v20  ;;  %v7670_v20 = vor.u32 %v8063_v54, %v7669_v25  ;;  %v8049_v25 = vld [vmem:[#allocation10 + $0x284] sm:$0xf]  ;;  %v7622_v54 = vor.u32 %v8051_v53, %v7621_v57  ;;  %v8038_v57 = vld [vmem:[#allocation10 + $0x22c] sm:$0xf] }
 0x7c4   :  { %v4278_v61 = vsel %vm4277_vm11, %v8361_v41, %v4274_v59  ;;  %v4280_v15 = vmul.f32 %v8363_v48, %v4217_v63  ;;  %vm4286_vm12 = vweird.f32 %v8363_v48  ;;  %v7661_v59 = vld [vmem:[#allocation10 + $0x2c8] sm:$0xf]  ;;  %4937 = vmatpush.bf16.msra.mxu3 %v7682_v13  ;;  %v7623_v13 = vld [vmem:[#allocation10 + $0x290] sm:$0xf0]  ;;  %v7583_v53 = vld [vmem:[#allocation10 + $0x238] sm:$0xf0] }
 0x7c5   :  { %8364 = vrsqrt.f32 %v4218_v3  ;;  %v4304_v21 = vmul.f32 %v4278_v61, %v4208_v19  ;;  %vm4287_vm14 = vmor %vm4285_vm13, %vm4286_vm12  ;;  %vm4295_vm0 = vweird.f32 %v4218_v3  ;;  %v8058_v61 = vld [vmem:[#allocation10 + $0x2cc] sm:$0xf]  ;;  %4850 = vmatpush.bf16.msrb.mxu0 %v7670_v20  ;;  %v7613_v20 = vld [vmem:[#allocation10 + $0x268] sm:$0xf] }
 0x7c6   :  { %v4281_v58 = vmul.f32 %v8363_v48, %v4280_v15  ;;  %v7663_v15 = vld [vmem:[#allocation10 + $0x2d8] sm:$0xf0] }
 0x7c7   :  { %v4315_v31 = vmul.f32 %v10638_v8, %v4304_v21  ;;  %v7666_v12 = vor.u32 %v8058_v61, %v7663_v15  ;;  %v7615_v61 = vld [vmem:[#allocation10 + $0x278] sm:$0xf0] }
 0x7c8   :  { %v4282_v38 = vmul.f32 0.5, %v4281_v58  ;;  %v7653_v58 = vld [vmem:[#allocation10 + $0x2c0] sm:$0xf] }
 0x7c9   :  { %v10698_v30 = vadd.f32 %v10646_v28, %v4315_v31  ;;  %v8059_v31 = vld [vmem:[#allocation10 + $0x2cc] sm:$0xf0]  ;;  %4938 = vmatpush.bf16.msra.mxu3 %v7666_v12 }
 0x7ca   :  { %v4283_v42 = vsub.f32 1.5, %v4282_v38  ;;  %v8057_v38 = vld [vmem:[#allocation10 + $0x2c4] sm:$0xf] }
 0x7cb   :  { %v8365_v1 = vpop.eup %8364  ;;  %v4331_v23 = vpack.c.bf16 %v10698_v30, %v10695_v2 }
 0x7cc   :  { %v4284_v17 = vmul.f32 %v8363_v48, %v4283_v42  ;;  %v4290_v22 = vmul.f32 %v8365_v1, %v4218_v3  ;;  %vm4296_vm15 = vweird.f32 %v8365_v1  ;;  %v8060_v3 = vld [vmem:[#allocation10 + $0x2d4] sm:$0xf0] }
 0x7cd   :  { %4421 = vmatmul.bf16.gmra.mxu3 %v4331_v23  ;;  %vm4297_vm1 = vmor %vm4295_vm0, %vm4296_vm15  ;;  %v7662_v21 = vor.u32 %v8060_v3, %v7661_v59  ;;  %v7645_v23 = vld [vmem:[#allocation10 + $0x2a8] sm:$0xf]  ;;  %v7626_v59 = vor.u32 %v8049_v25, %v7623_v13  ;;  %v8046_v3 = vld [vmem:[#allocation10 + $0x26c] sm:$0xf]  ;;  %v7586_v13 = vor.u32 %v8038_v57, %v7583_v53 }
 0x7ce   :  { %v4291_v39 = vmul.f32 %v8365_v1, %v4290_v22  ;;  %v4288_v29 = vsel %vm4287_vm14, %v8363_v48, %v4284_v17  ;;  %v8056_v17 = vld [vmem:[#allocation10 + $0x2b4] sm:$0xf0] }
 0x7cf   :  { %v4305_v51 = vmul.f32 %v4288_v29, %v4209_v47  ;;  %v7647_v29 = vld [vmem:[#allocation10 + $0x2b8] sm:$0xf0]  ;;  %4909 = vmatpush.bf16.msra.mxu2 %v7662_v21  ;;  %v7618_v21 = vor.u32 %v8046_v3, %v7615_v61 }
 0x7d0   :  { %v4292_v56 = vmul.f32 0.5, %v4291_v39  ;;  %v8054_v39 = vld [vmem:[#allocation10 + $0x2ac] sm:$0xf] }
 0x7d1   :  { %v4316_v55 = vmul.f32 %v10638_v8, %v4305_v51 }
 0x7d2   :  { %v4293_v60 = vsub.f32 1.5, %v4292_v56  ;;  %v7646_v56 = vor.u32 %v8056_v17, %v7645_v23  ;;  %v7605_v23 = vld [vmem:[#allocation10 + $0x260] sm:$0xf]  ;;  %v8047_v17 = vld [vmem:[#allocation10 + $0x26c] sm:$0xf0] }
 0x7d3   :  { %v10708_v26 = vadd.f32 %v10646_v28, %v4316_v55 }
 0x7d4   :  { %v4294_v5 = vmul.f32 %v8365_v1, %v4293_v60  ;;  %v7650_v60 = vor.u32 %v8054_v39, %v7647_v29  ;;  %4910 = vmatpush.bf16.msra.mxu2 %v7646_v56  ;;  %v7606_v39 = vor.u32 %v8047_v17, %v7605_v23  ;;  %v8045_v29 = vld [vmem:[#allocation10 + $0x264] sm:$0xf]  ;;  %v7607_v56 = vld [vmem:[#allocation10 + $0x270] sm:$0xf0]  ;;  %v8039_v23 = vld [vmem:[#allocation10 + $0x22c] sm:$0xf0] }
 0x7d5   :  { %v8037_v17 = vld [vmem:[#allocation10 + $0x224] sm:$0xf] }
 0x7d6   :  { %v4298_v27 = vsel %vm4297_vm1, %v8365_v1, %v4294_v5  ;;  %v7655_v1 = vld [vmem:[#allocation10 + $0x2d0] sm:$0xf0]  ;;  %4939 = vmatpush.bf16.msra.mxu3 %v7650_v60  ;;  %v7610_v60 = vor.u32 %v8045_v29, %v7607_v56  ;;  %v7565_v56 = vld [vmem:[#allocation10 + $0x208] sm:$0xf] }
 0x7d7   :  { %v4306_v7 = vmul.f32 %v4298_v27, %v4210_v32  ;;  %v7658_v22 = vor.u32 %v8057_v38, %v7655_v1  ;;  %v7575_v29 = vld [vmem:[#allocation10 + $0x230] sm:$0xf0] }
 0x7d9   :  { %v4317_v6 = vmul.f32 %v10638_v8, %v4306_v7 }
 0x7db   :  { %v10711_v52 = vadd.f32 %v10646_v28, %v4317_v6 }
 0x7dd   :  { %v4332_v50 = vpack.c.bf16 %v10711_v52, %v10708_v26 }
 0x7df   :  { %4426 = vmatmul.bf16.gmra.mxu3 %v4332_v50 }
 0x821   :  { %v4412_v4 = vpop.f32.mrf.mxu3 }
 0x822   :  { %v4413_v43 = vadd.f32 %v10715_v10, %v4412_v4 }
 0x824   :  { %v10719_v35 = vadd.f32 %v4413_v43, %v10652_v24 }
 0x826   :  { %4444 = vadd.xlane.f32.xlu1 %v10719_v35  ;;  %v4468_v8 = vmul.f32 %v10719_v35, %v10719_v35 }
 0x828   :  { %4476 = vadd.xlane.f32.xlu0 %v4468_v8  ;;  %v8055_v8 = vld [vmem:[#allocation10 + $0x2ac] sm:$0xf0] }
 0x829   :  { %v4414_v28 = vpop.f32.mrf.mxu3 }
 0x82a   :  { %v4415_v9 = vadd.f32 %v10715_v10, %v4414_v28  ;;  %v8053_v28 = vld [vmem:[#allocation10 + $0x2a4] sm:$0xf] }
 0x82c   :  { %v10726_v41 = vadd.f32 %v4415_v9, %v10655_v49 }
 0x82e   :  { %4446 = vadd.xlane.f32.xlu2 %v10726_v41  ;;  %v4469_v45 = vmul.f32 %v10726_v41, %v10726_v41 }
 0x830   :  { %4478 = vadd.xlane.f32.xlu1 %v4469_v45  ;;  %v7639_v45 = vld [vmem:[#allocation10 + $0x2b0] sm:$0xf0] }
 0x83b   :  { %v4417_v24 = vpop.f32.mrf.mxu3 }
 0x83c   :  { %v4418_v46 = vadd.f32 %v10715_v10, %v4417_v24  ;;  %v7629_v24 = vld [vmem:[#allocation10 + $0x288] sm:$0xf] }
 0x83e   :  { %v10733_v62 = vadd.f32 %v4418_v46, %v10679_v33  ;;  %v8052_v46 = vld [vmem:[#allocation10 + $0x294] sm:$0xf0] }
 0x840   :  { %4448 = vadd.xlane.f32.xlu2 %v10733_v62  ;;  %v4470_v18 = vmul.f32 %v10733_v62, %v10733_v62 }
 0x842   :  { %4480 = vadd.xlane.f32.xlu1 %v4470_v18  ;;  %v7642_v18 = vor.u32 %v8053_v28, %v7639_v45 }
 0x843   :  { %v4419_v49 = vpop.f32.mrf.mxu3 }
 0x844   :  { %v4420_v63 = vadd.f32 %v10715_v10, %v4419_v49  ;;  %v7630_v49 = vor.u32 %v8052_v46, %v7629_v24  ;;  %v7589_v46 = vld [vmem:[#allocation10 + $0x240] sm:$0xf] }
 0x846   :  { %v10740_v14 = vadd.f32 %v4420_v63, %v10682_v37  ;;  %v8061_v37 = vld [vmem:[#allocation10 + $0x2e4] sm:$0xf]  ;;  %v8050_v63 = vld [vmem:[#allocation10 + $0x28c] sm:$0xf]  ;;  %4911 = vmatpush.bf16.msra.mxu2 %v7630_v49 }
 0x847   :  { %v7674_v19 = vor.u32 %v8061_v37, %v7671_v0  ;;  %v8048_v37 = vld [vmem:[#allocation10 + $0x274] sm:$0xf0]  ;;  %v8041_v49 = vld [vmem:[#allocation10 + $0x244] sm:$0xf] }
 0x848   :  { %4450 = vadd.xlane.f32.xlu0 %v10740_v14  ;;  %v4471_v36 = vmul.f32 %v10740_v14, %v10740_v14 }
 0x849   :  { %4879 = vmatpush.bf16.msrb.mxu1 %v7674_v19  ;;  %v7614_v19 = vor.u32 %v8048_v37, %v7613_v20 }
 0x84a   :  { %4482 = vadd.xlane.f32.xlu2 %v4471_v36 }
 0x84b   :  { %4912 = vmatpush.bf16.msra.mxu2 %v7614_v19 }
 0x84d   :  { %4880 = vmatpush.bf16.msrb.mxu1 %v7658_v22 }
 0x850   :  { %v4422_v33 = vpop.f32.mrf.mxu3 }
 0x851   :  { %v4423_v44 = vadd.f32 %v10715_v10, %v4422_v33  ;;  %4881 = vmatpush.bf16.msrb.mxu1 %v7642_v18  ;;  %v8043_v18 = vld [vmem:[#allocation10 + $0x24c] sm:$0xf0] }
 0x853   :  { %v10747_v48 = vadd.f32 %v4423_v44, %v10695_v2  ;;  %v7654_v2 = vor.u32 %v8059_v31, %v7653_v58 }
 0x855   :  { %4452 = vadd.xlane.f32.xlu0 %v10747_v48  ;;  %v4472_v42 = vmul.f32 %v10747_v48, %v10747_v48  ;;  %4851 = vmatpush.bf16.msrb.mxu0 %v7654_v2 }
 0x856   :  { %4882 = vmatpush.bf16.msrb.mxu1 %v7626_v59 }
 0x857   :  { %4484 = vadd.xlane.f32.xlu2 %v4472_v42 }
 0x858   :  { %v4424_v47 = vpop.f32.mrf.mxu3 }
 0x859   :  { %v4425_v51 = vadd.f32 %v10715_v10, %v4424_v47  ;;  %v7597_v47 = vld [vmem:[#allocation10 + $0x248] sm:$0xf] }
 0x85a   :  { %4883 = vmatpush.bf16.msrb.mxu1 %v7610_v60  ;;  %v7578_v60 = vor.u32 %v8037_v17, %v7575_v29 }
 0x85b   :  { %v10754_v5 = vadd.f32 %v4425_v51, %v10698_v30  ;;  %v8044_v51 = vld [vmem:[#allocation10 + $0x254] sm:$0xf0] }
 0x85d   :  { %4454 = vadd.xlane.f32.xlu1 %v10754_v5  ;;  %v4473_v32 = vmul.f32 %v10754_v5, %v10754_v5 }
 0x85f   :  { %4486 = vadd.xlane.f32.xlu0 %v4473_v32  ;;  %v8042_v32 = vld [vmem:[#allocation10 + $0x24c] sm:$0xf] }
 0x862   :  { %v4427_v27 = vpop.f32.mrf.mxu3 }
 0x863   :  { %v4428_v7 = vadd.f32 %v10715_v10, %v4427_v27 }
 0x865   :  { %v10761_v55 = vadd.f32 %v4428_v7, %v10708_v26  ;;  %v7637_v26 = vld [vmem:[#allocation10 + $0x2a0] sm:$0xf]  ;;  %v7598_v7 = vor.u32 %v8044_v51, %v7597_v47  ;;  %v8036_v47 = vld [vmem:[#allocation10 + $0x214] sm:$0xf0] }
 0x866   :  { %v7638_v9 = vor.u32 %v8055_v8, %v7637_v26  ;;  %v7566_v51 = vor.u32 %v8036_v47, %v7565_v56 }
 0x867   :  { %4456 = vadd.xlane.f32.xlu1 %v10761_v55  ;;  %v4474_v30 = vmul.f32 %v10761_v55, %v10761_v55  ;;  %4913 = vmatpush.bf16.msra.mxu2 %v7598_v7  ;;  %v7557_v7 = vld [vmem:[#allocation10 + $0x200] sm:$0xf] }
 0x868   :  { %4852 = vmatpush.bf16.msrb.mxu0 %v7638_v9 }
 0x869   :  { %4488 = vadd.xlane.f32.xlu0 %v4474_v30  ;;  %v7599_v30 = vld [vmem:[#allocation10 + $0x258] sm:$0xf0] }
 0x86a   :  { %v4429_v6 = vpop.f32.mrf.mxu3 }
 0x86b   :  { %v4430_v50 = vadd.f32 %v10715_v10, %v4429_v6  ;;  %v7631_v10 = vld [vmem:[#allocation10 + $0x298] sm:$0xf0]  ;;  %v7602_v6 = vor.u32 %v8042_v32, %v7599_v30  ;;  %v8034_v32 = vld [vmem:[#allocation10 + $0x20c] sm:$0xf] }
 0x86c   :  { %4853 = vmatpush.bf16.msrb.mxu0 %v7622_v54 }
 0x86d   :  { %v10768_v4 = vadd.f32 %v4430_v50, %v10711_v52  ;;  %v7634_v52 = vor.u32 %v8050_v63, %v7631_v10  ;;  %v7590_v10 = vor.u32 %v8043_v18, %v7589_v46 }
 0x86f   :  { %4458 = vadd.xlane.f32.xlu2 %v10768_v4  ;;  %v4475_v43 = vmul.f32 %v10768_v4, %v10768_v4  ;;  %4940 = vmatpush.bf16.msra.mxu3 %v7634_v52  ;;  %v7581_v52 = vld [vmem:[#allocation10 + $0x228] sm:$0xf] }
 0x870   :  { %4854 = vmatpush.bf16.msrb.mxu0 %v7606_v39 }
 0x871   :  { %4490 = vadd.xlane.f32.xlu1 %v4475_v43 }
 0x873   :  { %4941 = vmatpush.bf16.msra.mxu3 %v7618_v21 }
 0x874   :  { %4855 = vmatpush.bf16.msrb.mxu0 %v7590_v10 }
 0x877   :  { %4942 = vmatpush.bf16.msra.mxu3 %v7602_v6 }
 0x87b   :  { %4943 = vmatpush.bf16.msra.mxu3 %v7586_v13 }
 0x899   :  { %v4445_v36 = vpop.xlane.xlu1 %4444 }
 0x89a   :  { %v10774_v33 = vmul.f32 %v4445_v36, %v11890_v16  ;;  %v7591_v36 = vld [vmem:[#allocation10 + $0x250] sm:$0xf0] }
 0x89b   :  { %v4477_v34 = vpop.xlane.xlu0 %4476 }
 0x89c   :  { %v4500_v11 = vmul.f32 %v10774_v33, %v10774_v33  ;;  %v4492_v40 = vmul.f32 %v4477_v34, %v11890_v16  ;;  %v8040_v34 = vld [vmem:[#allocation10 + $0x234] sm:$0xf0] }
 0x89e   :  { %v4508_v44 = vsub.f32 %v4492_v40, %v4500_v11  ;;  %v7594_v40 = vor.u32 %v8041_v49, %v7591_v36 }
 0x8a0   :  { %v10779_v0 = vadd.f32 1e-05, %v4508_v44  ;;  %v7582_v44 = vor.u32 %v8040_v34, %v7581_v52  ;;  %4884 = vmatpush.bf16.msrb.mxu1 %v7594_v40 }
 0x8a1   :  { %v4447_v15 = vpop.xlane.xlu2 %4446 }
 0x8a2   :  { %8366 = vrsqrt.f32 %v10779_v0  ;;  %v10783_v12 = vmul.f32 %v4447_v15, %v11890_v16  ;;  %4914 = vmatpush.bf16.msra.mxu2 %v7582_v44  ;;  %vm4538_vm4 = vweird.f32 %v10779_v0 }
 0x8a3   :  { %v4479_v58 = vpop.xlane.xlu1 %4478 }
 0x8a4   :  { %v4501_v31 = vmul.f32 %v10783_v12, %v10783_v12  ;;  %v4493_v38 = vmul.f32 %v4479_v58, %v11890_v16  ;;  %v4516_v58 = vsub.f32 %v10719_v35, %v10774_v33  ;;  %4885 = vmatpush.bf16.msrb.mxu1 %v7578_v60 }
 0x8a6   :  { %v4509_v42 = vsub.f32 %v4493_v38, %v4501_v31  ;;  %v10826_v31 = vld [vmem:[#allocation16 + $0x2] ss:$0 sm:$0xff]  ;;  %4915 = vmatpush.bf16.msra.mxu2 %v7566_v51 }
 0x8a8   :  { %v10788_v2 = vpop.eup %8366  ;;  %v4525_v1 = vadd.f32 1e-05, %v4509_v42 }
 0x8a9   :  { %v4533_v22 = vmul.f32 %v10788_v2, %v10779_v0  ;;  %vm4539_vm2 = vweird.f32 %v10788_v2 }
 0x8aa   :  { %8368 = vrsqrt.f32 %v4525_v1  ;;  %vm10809_vm5 = vmor %vm4538_vm4, %vm4539_vm2  ;;  %vm4548_vm6 = vweird.f32 %v4525_v1 }
 0x8ab   :  { %v4534_v27 = vmul.f32 %v10788_v2, %v4533_v22 }
 0x8ad   :  { %v4535_v50 = vmul.f32 0.5, %v4534_v27  ;;  %v7567_v27 = vld [vmem:[#allocation10 + $0x218] sm:$0xf0] }
 0x8ae   :  { %v7570_v6 = vor.u32 %v8034_v32, %v7567_v27 }
 0x8af   :  { %v4536_v8 = vsub.f32 1.5, %v4535_v50  ;;  %v7559_v50 = vld [vmem:[#allocation10 + $0x210] sm:$0xf0] }
 0x8b0   :  { %v10796_v9 = vpop.eup %8368  ;;  %4944 = vmatpush.bf16.msra.mxu3 %v7570_v6 }
 0x8b1   :  { %v4543_v63 = vmul.f32 %v10796_v9, %v4525_v1  ;;  %v4537_v25 = vmul.f32 %v10788_v2, %v4536_v8  ;;  %vm4549_vm3 = vweird.f32 %v10796_v9  ;;  %v7573_v1 = vld [vmem:[#allocation10 + $0x220] sm:$0xf] }
 0x8b2   :  { %vm10820_vm7 = vmor %vm4548_vm6, %vm4549_vm3  ;;  %v7574_v39 = vor.u32 %v8039_v23, %v7573_v1 }
 0x8b3   :  { %v4449_v43 = vpop.xlane.xlu2 %4448  ;;  %v4544_v54 = vmul.f32 %v10796_v9, %v4543_v63  ;;  %v4541_v61 = vsel %vm10809_vm5, %v10788_v2, %v4537_v25  ;;  %v4517_v2 = vsub.f32 %v10726_v41, %v10783_v12  ;;  %v8035_v41 = vld [vmem:[#allocation10 + $0x20c] sm:$0xf0]  ;;  %v8033_v12 = vld [vmem:[#allocation10 + $0x204] sm:$0xf] }
 0x8b4   :  { %v10794_v26 = vmul.f32 %v4449_v43, %v11890_v16  ;;  %v4612_v35 = vmul.f32 %v4541_v61, %v4516_v58  ;;  %4856 = vmatpush.bf16.msrb.mxu0 %v7574_v39 }
 0x8b5   :  { %v4481_v28 = vpop.xlane.xlu1 %4480  ;;  %v4545_v37 = vmul.f32 0.5, %v4544_v54 }
 0x8b6   :  { %v4502_v45 = vmul.f32 %v10794_v26, %v10794_v26  ;;  %v4494_v24 = vmul.f32 %v4481_v28, %v11890_v16  ;;  %v4623_v49 = vmul.f32 %v10826_v31, %v4612_v35 }
 0x8b7   :  { %v4546_v15 = vsub.f32 1.5, %v4545_v37 }
 0x8b8   :  { %v4510_v11 = vsub.f32 %v4494_v24, %v4502_v45  ;;  %v7558_v45 = vor.u32 %v8035_v41, %v7557_v7  ;;  %v7562_v24 = vor.u32 %v8033_v12, %v7559_v50 }
 0x8b9   :  { %v4547_v22 = vmul.f32 %v10796_v9, %v4546_v15 }
 0x8ba   :  { %v10806_v20 = vadd.f32 1e-05, %v4510_v11  ;;  %4857 = vmatpush.bf16.msrb.mxu0 %v7558_v45  ;;  %4886 = vmatpush.bf16.msrb.mxu1 %v7562_v24  ;;  %v10846_v11 = vld [vmem:[#allocation17 + $0x2] ss:$0 sm:$0xff] }
 0x8bb   :  { %v4451_v59 = vpop.xlane.xlu0 %4450  ;;  %v4551_v30 = vsel %vm10820_vm7, %v10796_v9, %v4547_v22  ;;  %v10849_v57 = vadd.f32 %v10846_v11, %v4623_v49  ;;  %v4518_v22 = vsub.f32 %v10733_v62, %v10794_v26 }
 0x8bc   :  { %8370 = vrsqrt.f32 %v10806_v20  ;;  %v10815_v3 = vmul.f32 %v4451_v59, %v11890_v16  ;;  %v4613_v8 = vmul.f32 %v4551_v30, %v4517_v2  ;;  %vm4558_vm9 = vweird.f32 %v10806_v20 }
 0x8bd   :  { %v4483_v21 = vpop.xlane.xlu2 %4482  ;;  %11895 = vst [vmem:[#allocation45_spill] sm:$0xff] %v10849_v57 }
 0x8be   :  { %v4503_v38 = vmul.f32 %v10815_v3, %v10815_v3  ;;  %v4495_v42 = vmul.f32 %v4483_v21, %v11890_v16  ;;  %v4624_v9 = vmul.f32 %v10826_v31, %v4613_v8  ;;  %v4519_v35 = vsub.f32 %v10740_v14, %v10815_v3 }
 0x8c0   :  { %v4511_v33 = vsub.f32 %v4495_v42, %v4503_v38  ;;  %v10852_v53 = vadd.f32 %v10846_v11, %v4624_v9 }
 0x8c2   :  { %v8371_v43 = vpop.eup %8370  ;;  %v4527_v28 = vadd.f32 1e-05, %v4511_v33  ;;  %11896 = vst [vmem:[#allocation44_spill] sm:$0xff] %v10852_v53  ;;  %v4642_v37 = vpack.c.bf16 %v10852_v53, %v10849_v57 }
 0x8c3   :  { %v4553_v46 = vmul.f32 %v8371_v43, %v10806_v20  ;;  %vm4559_vm8 = vweird.f32 %v8371_v43 }
 0x8c4   :  { %8372 = vrsqrt.f32 %v4527_v28  ;;  %4858 = vmatmul.bf16.vlgmr.msrb.gmra.mxu0 %v4642_v37  ;;  %4887 = vmatmul.bf16.vlgmr.msrb.gmra.mxu1 %v4642_v37  ;;  %vm4560_vm10 = vmor %vm4558_vm9, %vm4559_vm8  ;;  %vm4568_vm12 = vweird.f32 %v4527_v28 }
 0x8c5   :  { %v4554_v10 = vmul.f32 %v8371_v43, %v4553_v46  ;;  %4916 = vmatmul.bf16.vlgmr.msra.gmra.mxu2 %v4642_v37  ;;  %4945 = vmatmul.bf16.vlgmr.msra.gmra.mxu3 %v4642_v37 }
 0x8c7   :  { %v4555_v40 = vmul.f32 0.5, %v4554_v10 }
 0x8c8   :  { %v4453_v18 = vpop.xlane.xlu0 %4452 }
 0x8c9   :  { %v10841_v63 = vmul.f32 %v4453_v18, %v11890_v16  ;;  %v4556_v25 = vsub.f32 1.5, %v4555_v40 }
 0x8ca   :  { %v4485_v36 = vpop.xlane.xlu2 %4484  ;;  %v8373_v54 = vpop.eup %8372 }
 0x8cb   :  { %v4504_v52 = vmul.f32 %v10841_v63, %v10841_v63  ;;  %v4496_v34 = vmul.f32 %v4485_v36, %v11890_v16  ;;  %v4563_v59 = vmul.f32 %v8373_v54, %v4527_v28  ;;  %v4557_v15 = vmul.f32 %v8371_v43, %v4556_v25 }
 0x8cc   :  { %vm4569_vm11 = vweird.f32 %v8373_v54 }
 0x8cd   :  { %v4512_v44 = vsub.f32 %v4496_v34, %v4504_v52  ;;  %v4564_v0 = vmul.f32 %v8373_v54, %v4563_v59  ;;  %v4561_v23 = vsel %vm4560_vm10, %v8371_v43, %v4557_v15  ;;  %vm4570_vm13 = vmor %vm4568_vm12, %vm4569_vm11  ;;  %v4520_v52 = vsub.f32 %v10747_v48, %v10841_v63 }
 0x8ce   :  { %v4614_v47 = vmul.f32 %v4561_v23, %v4518_v22 }
 0x8cf   :  { %v4528_v13 = vadd.f32 1e-05, %v4512_v44  ;;  %v4565_v42 = vmul.f32 0.5, %v4564_v0 }
 0x8d0   :  { %v4455_v19 = vpop.xlane.xlu1 %4454  ;;  %v4625_v30 = vmul.f32 %v10826_v31, %v4614_v47 }
 0x8d1   :  { %8374 = vrsqrt.f32 %v4528_v13  ;;  %v10857_v61 = vmul.f32 %v4455_v19, %v11890_v16  ;;  %v4566_v17 = vsub.f32 1.5, %v4565_v42  ;;  %vm4578_vm15 = vweird.f32 %v4528_v13 }
 0x8d2   :  { %v4487_v21 = vpop.xlane.xlu0 %4486  ;;  %v10876_v12 = vadd.f32 %v10846_v11, %v4625_v30 }
 0x8d3   :  { %v4505_v58 = vmul.f32 %v10857_v61, %v10857_v61  ;;  %v4497_v38 = vmul.f32 %v4487_v21, %v11890_v16  ;;  %v4567_v29 = vmul.f32 %v8373_v54, %v4566_v17  ;;  %v4521_v37 = vsub.f32 %v10754_v5, %v10857_v61 }
 0x8d4   :  { %11897 = vst [vmem:[#allocation46_spill] sm:$0xff] %v10876_v12 }
 0x8d5   :  { %v4513_v1 = vsub.f32 %v4497_v38, %v4505_v58  ;;  %v4571_v33 = vsel %vm4570_vm13, %v8373_v54, %v4567_v29 }
 0x8d6   :  { %v4615_v32 = vmul.f32 %v4571_v33, %v4519_v35 }
 0x8d7   :  { %v8375_v2 = vpop.eup %8374  ;;  %v4529_v39 = vadd.f32 1e-05, %v4513_v1 }
 0x8d8   :  { %v4573_v56 = vmul.f32 %v8375_v2, %v4528_v13  ;;  %v4626_v14 = vmul.f32 %v10826_v31, %v4615_v32  ;;  %vm4579_vm14 = vweird.f32 %v8375_v2 }
 0x8d9   :  { %8376 = vrsqrt.f32 %v4529_v39  ;;  %vm4580_vm0 = vmor %vm4578_vm15, %vm4579_vm14  ;;  %vm4588_vm2 = vweird.f32 %v4529_v39 }
 0x8da   :  { %v4457_v20 = vpop.xlane.xlu1 %4456  ;;  %v4574_v60 = vmul.f32 %v8375_v2, %v4573_v56  ;;  %v10879_v50 = vadd.f32 %v10846_v11, %v4626_v14 }
 0x8db   :  { %v10868_v51 = vmul.f32 %v4457_v20, %v11890_v16 }
 0x8dc   :  { %v4489_v27 = vpop.xlane.xlu0 %4488  ;;  %v4575_v7 = vmul.f32 0.5, %v4574_v60  ;;  %11898 = vst [vmem:[#allocation47_spill] sm:$0xff] %v10879_v50  ;;  %v4643_v24 = vpack.c.bf16 %v10879_v50, %v10876_v12  ;;  %v8065_v12 = vld [vmem:[#allocation13 + $0x200] sm:$0xff] }
 0x8dd   :  { %v4506_v62 = vmul.f32 %v10868_v51, %v10868_v51  ;;  %v4498_v26 = vmul.f32 %v4489_v27, %v11890_v16  ;;  %v4522_v29 = vsub.f32 %v10761_v55, %v10868_v51 }
 0x8de   :  { %v4576_v3 = vsub.f32 1.5, %v4575_v7  ;;  %4863 = vmatmul.bf16.gmra.mxu0 %v4643_v24  ;;  %4892 = vmatmul.bf16.gmra.mxu1 %v4643_v24 }
 0x8df   :  { %v4514_v6 = vsub.f32 %v4498_v26, %v4506_v62  ;;  %v8377_v41 = vpop.eup %8376  ;;  %4921 = vmatmul.bf16.gmra.mxu2 %v4643_v24  ;;  %4950 = vmatmul.bf16.gmra.mxu3 %v4643_v24 }
 0x8e0   :  { %v4577_v43 = vmul.f32 %v8375_v2, %v4576_v3  ;;  %v4583_v8 = vmul.f32 %v8377_v41, %v4529_v39  ;;  %vm4589_vm1 = vweird.f32 %v8377_v41 }
 0x8e1   :  { %v4530_v28 = vadd.f32 1e-05, %v4514_v6  ;;  %vm4590_vm3 = vmor %vm4588_vm2, %vm4589_vm1 }
 0x8e2   :  { %v4459_v45 = vpop.xlane.xlu2 %4458  ;;  %v4584_v46 = vmul.f32 %v8377_v41, %v4583_v8  ;;  %v4581_v9 = vsel %vm4580_vm0, %v8375_v2, %v4577_v43 }
 0x8e3   :  { %8378 = vrsqrt.f32 %v4530_v28  ;;  %v4467_v18 = vmul.f32 %v4459_v45, %v11890_v16  ;;  %v4616_v44 = vmul.f32 %v4581_v9, %v4520_v52  ;;  %vm4598_vm5 = vweird.f32 %v4530_v28 }
 0x8e4   :  { %v4491_v49 = vpop.xlane.xlu1 %4490  ;;  %v4585_v10 = vmul.f32 0.5, %v4584_v46 }
 0x8e5   :  { %v4499_v36 = vmul.f32 %v4491_v49, %v11890_v16  ;;  %v4507_v34 = vmul.f32 %v4467_v18, %v4467_v18  ;;  %v4627_v48 = vmul.f32 %v10826_v31, %v4616_v44  ;;  %v4523_v20 = vsub.f32 %v10768_v4, %v4467_v18  ;;  %v4680_v4 = vld [vmem:[#allocation11 + $0x8] sm:$0xf] }
 0x8e6   :  { %v4586_v40 = vsub.f32 1.5, %v4585_v10  ;;  %v10912_v51 = vperm.slane %v4680_v4, 0  ;;  %v10914_v26 = vperm.slane %v4680_v4, 1  ;;  %v10922_v43 = vperm.slane %v4680_v4, 2 }
 0x8e7   :  { %v4515_v25 = vsub.f32 %v4499_v36, %v4507_v34  ;;  %v10892_v42 = vadd.f32 %v10846_v11, %v4627_v48  ;;  %v10924_v8 = vperm.slane %v4680_v4, 3 }
 0x8e8   :  { %v4587_v13 = vmul.f32 %v8377_v41, %v4586_v40 }
 0x8e9   :  { %v8379_v54 = vpop.eup %8378  ;;  %v4531_v19 = vadd.f32 1e-05, %v4515_v25  ;;  %11899 = vst [vmem:[#allocation43_spill] sm:$0xff] %v10892_v42 }
 0x8ea   :  { %v4593_v59 = vmul.f32 %v8379_v54, %v4530_v28  ;;  %v4591_v15 = vsel %vm4590_vm3, %v8377_v41, %v4587_v13  ;;  %vm4599_vm4 = vweird.f32 %v8379_v54 }
 0x8eb   :  { %v4617_v0 = vmul.f32 %v4591_v15, %v4521_v37  ;;  %8380 = vrsqrt.f32 %v4531_v19  ;;  %vm4600_vm6 = vmor %vm4598_vm5, %vm4599_vm4  ;;  %vm4608_vm8 = vweird.f32 %v4531_v19 }
 0x8ec   :  { %v4594_v21 = vmul.f32 %v8379_v54, %v4593_v59 }
 0x8ed   :  { %v4628_v58 = vmul.f32 %v10826_v31, %v4617_v0 }
 0x8ee   :  { %v4595_v63 = vmul.f32 0.5, %v4594_v21 }
 0x8ef   :  { %v10895_v1 = vadd.f32 %v10846_v11, %v4628_v58 }
 0x8f0   :  { %v4596_v38 = vsub.f32 1.5, %v4595_v63 }
 0x8f1   :  { %11900 = vst [vmem:[#allocation42_spill] sm:$0xff] %v10895_v1  ;;  %v8381_v5 = vpop.eup %8380  ;;  %v4644_v61 = vpack.c.bf16 %v10895_v1, %v10892_v42 }
 0x8f2   :  { %v4597_v23 = vmul.f32 %v8379_v54, %v4596_v38  ;;  %v4603_v17 = vmul.f32 %v8381_v5, %v4531_v19  ;;  %vm4609_vm7 = vweird.f32 %v8381_v5 }
 0x8f3   :  { %4868 = vmatmul.bf16.gmra.mxu0 %v4644_v61  ;;  %4897 = vmatmul.bf16.gmra.mxu1 %v4644_v61  ;;  %vm4610_vm9 = vmor %vm4608_vm8, %vm4609_vm7 }
 0x8f4   :  { %v4604_v2 = vmul.f32 %v8381_v5, %v4603_v17  ;;  %4926 = vmatmul.bf16.gmra.mxu2 %v4644_v61  ;;  %4955 = vmatmul.bf16.gmra.mxu3 %v4644_v61  ;;  %v4601_v22 = vsel %vm4600_vm6, %v8379_v54, %v4597_v23 }
 0x8f5   :  { %v4618_v47 = vmul.f32 %v4601_v22, %v4522_v29 }
 0x8f6   :  { %v4605_v39 = vmul.f32 0.5, %v4604_v2 }
 0x8f7   :  { %v4629_v32 = vmul.f32 %v10826_v31, %v4618_v47 }
 0x8f8   :  { %v4606_v56 = vsub.f32 1.5, %v4605_v39 }
 0x8f9   :  { %v10905_v7 = vadd.f32 %v10846_v11, %v4629_v32 }
 0x8fa   :  { %v4607_v35 = vmul.f32 %v8381_v5, %v4606_v56 }
 0x8fb   :  { %11901 = vst [vmem:[#allocation55_spill] sm:$0xff] %v10905_v7 }
 0x8fc   :  { %v4611_v33 = vsel %vm4610_vm9, %v8381_v5, %v4607_v35 }
 0x8fd   :  { %v4619_v60 = vmul.f32 %v4611_v33, %v4523_v20  ;;  %v8088_v20 = vld [vmem:[#allocation13 + $0x2b8] sm:$0xff] }
 0x8fe   :  { %v8072_v33 = vld [vmem:[#allocation13 + $0x238] sm:$0xff]  ;;  %6022 = vmatpush.bf16.msrb.mxu2 %v8088_v20 }
 0x8ff   :  { %v4630_v27 = vmul.f32 %v10826_v31, %v4619_v60  ;;  %v8096_v60 = vld [vmem:[#allocation13 + $0x2f8] sm:$0xff]  ;;  %5964 = vmatpush.bf16.msra.mxu0 %v8072_v33 }
 0x900   :  { %6051 = vmatpush.bf16.msrb.mxu3 %v8096_v60 }
 0x901   :  { %v10908_v62 = vadd.f32 %v10846_v11, %v4630_v27 }
 0x903   :  { %11902 = vst [vmem:[#allocation57_spill] sm:$0xff] %v10908_v62  ;;  %v4645_v55 = vpack.c.bf16 %v10908_v62, %v10905_v7 }
 0x905   :  { %4873 = vmatmul.bf16.gmra.mxu0 %v4645_v55  ;;  %4902 = vmatmul.bf16.gmra.mxu1 %v4645_v55 }
 0x906   :  { %4931 = vmatmul.bf16.gmra.mxu2 %v4645_v55  ;;  %4960 = vmatmul.bf16.gmra.mxu3 %v4645_v55 }
 0x941   :  { %v4859_v30 = vpop.f32.mrf.mxu0  ;;  %v4888_v31 = vpop.f32.mrf.mxu1 }
 0x942   :  { %v4860_v14 = vadd.f32 %v4859_v30, %v10912_v51  ;;  %v4889_v3 = vadd.f32 %v4888_v31, %v10914_v26  ;;  %v8080_v30 = vld [vmem:[#allocation13 + $0x278] sm:$0xff] }
 0x943   :  { %5993 = vmatpush.bf16.msra.mxu1 %v8080_v30 }
 0x944   :  { %v4966_v11 = vpack.c.bf16 %v4889_v3, %v4860_v14 }
 0x946   :  { %v10918_v6 = vunpack.c.l.bf16 %v4966_v11  ;;  %v10920_v41 = vunpack.c.h.bf16 %v4966_v11 }
 0x948   :  { %v5062_v28 = vmul.f32 0.044677734, %v10918_v6  ;;  %v5063_v45 = vmul.f32 0.044677734, %v10920_v41  ;;  %v4917_v24 = vpop.f32.mrf.mxu2  ;;  %v4946_v46 = vpop.f32.mrf.mxu3 }
 0x949   :  { %v4918_v18 = vadd.f32 %v4917_v24, %v10922_v43  ;;  %v4947_v49 = vadd.f32 %v4946_v46, %v10924_v8  ;;  %v4861_v54 = vpop.f32.mrf.mxu0  ;;  %v4890_v13 = vpop.f32.mrf.mxu1 }
 0x94a   :  { %v5094_v9 = vpack.c.bf16 %v5063_v45, %v5062_v28  ;;  %v4862_v15 = vadd.f32 %v4861_v54, %v10912_v51  ;;  %v4891_v0 = vadd.f32 %v4890_v13, %v10914_v26 }
 0x94b   :  { %v4967_v10 = vpack.c.bf16 %v4947_v49, %v4918_v18 }
 0x94c   :  { %v5110_v36 = vunpack.c.l.bf16 %v5094_v9  ;;  %v5111_v52 = vunpack.c.h.bf16 %v5094_v9  ;;  %v4968_v58 = vpack.c.bf16 %v4891_v0, %v4862_v15 }
 0x94d   :  { %v10930_v34 = vunpack.c.l.bf16 %v4967_v10  ;;  %v10932_v40 = vunpack.c.h.bf16 %v4967_v10 }
 0x94e   :  { %v5142_v44 = vmul.f32 %v5110_v36, %v10918_v6  ;;  %v5143_v25 = vmul.f32 %v5111_v52, %v10920_v41  ;;  %v10942_v17 = vunpack.c.l.bf16 %v4968_v58  ;;  %v10944_v2 = vunpack.c.h.bf16 %v4968_v58 }
 0x94f   :  { %v5064_v37 = vmul.f32 0.044677734, %v10930_v34  ;;  %v5065_v59 = vmul.f32 0.044677734, %v10932_v40  ;;  %v10976_v30 = vmul.f32 0.5, %v10932_v40 }
 0x950   :  { %v5174_v19 = vpack.c.bf16 %v5143_v25, %v5142_v44  ;;  %v5066_v56 = vmul.f32 0.044677734, %v10942_v17  ;;  %v5067_v35 = vmul.f32 0.044677734, %v10944_v2  ;;  %v4919_v32 = vpop.f32.mrf.mxu2  ;;  %v4948_v27 = vpop.f32.mrf.mxu3 }
 0x951   :  { %v5095_v21 = vpack.c.bf16 %v5065_v59, %v5064_v37  ;;  %v4920_v31 = vadd.f32 %v4919_v32, %v10922_v43  ;;  %v4949_v14 = vadd.f32 %v4948_v27, %v10924_v8  ;;  %v8087_v32 = vld [vmem:[#allocation13 + $0x2b0] sm:$0xff] }
 0x952   :  { %v5190_v48 = vunpack.c.l.bf16 %v5174_v19  ;;  %v5191_v63 = vunpack.c.h.bf16 %v5174_v19  ;;  %v5096_v28 = vpack.c.bf16 %v5067_v35, %v5066_v56  ;;  %v5015_v35 = vmul.f32 0.5, %v10920_v41  ;;  %v8071_v27 = vld [vmem:[#allocation13 + $0x230] sm:$0xff]  ;;  %6023 = vmatpush.bf16.msrb.mxu2 %v8087_v32 }
 0x953   :  { %v5112_v38 = vunpack.c.l.bf16 %v5095_v21  ;;  %v5113_v5 = vunpack.c.h.bf16 %v5095_v21  ;;  %v4969_v46 = vpack.c.bf16 %v4949_v14, %v4920_v31  ;;  %v8079_v14 = vld [vmem:[#allocation13 + $0x270] sm:$0xff]  ;;  %5965 = vmatpush.bf16.msra.mxu0 %v8071_v27 }
 0x954   :  { %v5222_v61 = vmul.f32 %v5190_v48, %v10918_v6  ;;  %v5223_v23 = vmul.f32 %v5191_v63, %v10920_v41  ;;  %v5114_v9 = vunpack.c.l.bf16 %v5096_v28  ;;  %v5115_v10 = vunpack.c.h.bf16 %v5096_v28  ;;  %5994 = vmatpush.bf16.msra.mxu1 %v8079_v14 }
 0x955   :  { %v5144_v22 = vmul.f32 %v5112_v38, %v10930_v34  ;;  %v5145_v39 = vmul.f32 %v5113_v5, %v10932_v40  ;;  %v10956_v52 = vunpack.c.l.bf16 %v4969_v46  ;;  %v10958_v44 = vunpack.c.h.bf16 %v4969_v46 }
 0x956   :  { %v5254_v29 = vpack.c.bf16 %v5223_v23, %v5222_v61  ;;  %v5146_v13 = vmul.f32 %v5114_v9, %v10942_v17  ;;  %v5147_v37 = vmul.f32 %v5115_v10, %v10944_v2 }
 0x957   :  { %v5175_v47 = vpack.c.bf16 %v5145_v39, %v5144_v22  ;;  %v5068_v48 = vmul.f32 0.044677734, %v10956_v52  ;;  %v5069_v38 = vmul.f32 0.044677734, %v10958_v44 }
 0x958   :  { %v5270_v55 = vunpack.c.l.bf16 %v5254_v29  ;;  %v5271_v4 = vunpack.c.h.bf16 %v5254_v29  ;;  %v5176_v21 = vpack.c.bf16 %v5147_v37, %v5146_v13  ;;  %v5014_v29 = vmul.f32 0.5, %v10918_v6 }
 0x959   :  { %v5192_v3 = vunpack.c.l.bf16 %v5175_v47  ;;  %v5193_v11 = vunpack.c.h.bf16 %v5175_v47  ;;  %v5097_v56 = vpack.c.bf16 %v5069_v38, %v5068_v48 }
 0x95a   :  { %v5302_v45 = vadd.f32 %v5270_v55, %v10918_v6  ;;  %v5303_v24 = vadd.f32 %v5271_v4, %v10920_v41  ;;  %v5194_v22 = vunpack.c.l.bf16 %v5176_v21  ;;  %v5195_v39 = vunpack.c.h.bf16 %v5176_v21  ;;  %v8095_v55 = vld [vmem:[#allocation13 + $0x2f0] sm:$0xff] }
 0x95b   :  { %v5224_v18 = vmul.f32 %v5192_v3, %v10930_v34  ;;  %v5225_v49 = vmul.f32 %v5193_v11, %v10932_v40  ;;  %v4864_v25 = vpop.f32.mrf.mxu0  ;;  %v4893_v59 = vpop.f32.mrf.mxu1  ;;  %v10973_v4 = vmul.f32 0.5, %v10930_v34  ;;  %v5116_v31 = vunpack.c.l.bf16 %v5097_v56  ;;  %6052 = vmatpush.bf16.msrb.mxu3 %v8095_v55 }
 0x95c   :  { %v5334_v36 = vpack.c.bf16 %v5303_v24, %v5302_v45  ;;  %v4865_v19 = vadd.f32 %v4864_v25, %v10912_v51  ;;  %v4894_v5 = vadd.f32 %v4893_v59, %v10914_v26  ;;  %v5226_v33 = vmul.f32 %v5194_v22, %v10942_v17 }
 0x95d   :  { %v5255_v54 = vpack.c.bf16 %v5225_v49, %v5224_v18  ;;  %v5227_v60 = vmul.f32 %v5195_v39, %v10944_v2  ;;  %v5117_v6 = vunpack.c.h.bf16 %v5097_v56  ;;  %v10981_v24 = vmul.f32 0.5, %v10942_v17 }
 0x95e   :  { %v5350_v63 = vunpack.c.l.bf16 %v5334_v36  ;;  %v5351_v58 = vunpack.c.h.bf16 %v5334_v36  ;;  %v4970_v47 = vpack.c.bf16 %v4894_v5, %v4865_v19 }
 0x95f   :  { %v5272_v15 = vunpack.c.l.bf16 %v5255_v54  ;;  %v5273_v0 = vunpack.c.h.bf16 %v5255_v54  ;;  %v5256_v28 = vpack.c.bf16 %v5227_v60, %v5226_v33  ;;  %v5149_v46 = vmul.f32 %v5117_v6, %v10958_v44 }
 0x960   :  { %v5382_v11 = vmul.f32 0.796875, %v5350_v63  ;;  %v5383_v41 = vmul.f32 0.796875, %v5351_v58  ;;  %v10978_v45 = vunpack.c.l.bf16 %v4970_v47  ;;  %v11006_v6 = vpack.c.bf16 %v5015_v35, %v5014_v29 }
 0x961   :  { %v5304_v61 = vadd.f32 %v5272_v15, %v10930_v34  ;;  %v5305_v23 = vadd.f32 %v5273_v0, %v10932_v40  ;;  %v5148_v34 = vmul.f32 %v5116_v31, %v10956_v52  ;;  %v10985_v40 = vunpack.c.h.bf16 %v4970_v47 }
 0x962   :  { %v4922_v3 = vpop.f32.mrf.mxu2  ;;  %v4951_v18 = vpop.f32.mrf.mxu3  ;;  %v5274_v10 = vunpack.c.l.bf16 %v5256_v28  ;;  %v5275_v25 = vunpack.c.h.bf16 %v5256_v28  ;;  %v5070_v13 = vmul.f32 0.044677734, %v10978_v45  ;;  %v10990_v19 = vpack.c.bf16 %v5383_v41, %v5382_v11 }
 0x963   :  { %v5335_v20 = vpack.c.bf16 %v5305_v23, %v5304_v61  ;;  %v4923_v36 = vadd.f32 %v4922_v3, %v10922_v43  ;;  %v5177_v54 = vpack.c.bf16 %v5149_v46, %v5148_v34  ;;  %v5071_v37 = vmul.f32 0.044677734, %v10985_v40  ;;  %v4866_v59 = vpop.f32.mrf.mxu0  ;;  %v4895_v5 = vpop.f32.mrf.mxu1 }
 0x964   :  { %v10993_v15 = vmul.f32 0.5, %v10944_v2  ;;  %v5306_v0 = vadd.f32 %v5274_v10, %v10942_v17  ;;  %v4952_v21 = vadd.f32 %v4951_v18, %v10924_v8  ;;  %v5307_v48 = vadd.f32 %v5275_v25, %v10944_v2 }
 0x965   :  { %v5352_v49 = vunpack.c.l.bf16 %v5335_v20  ;;  %v5353_v9 = vunpack.c.h.bf16 %v5335_v20  ;;  %v5196_v63 = vunpack.c.l.bf16 %v5177_v54  ;;  %v5197_v58 = vunpack.c.h.bf16 %v5177_v54 }
 0x966   :  { %v5098_v38 = vpack.c.bf16 %v5071_v37, %v5070_v13  ;;  %v4971_v22 = vpack.c.bf16 %v4952_v21, %v4923_v36  ;;  %v4867_v39 = vadd.f32 %v4866_v59, %v10912_v51  ;;  %v5336_v56 = vpack.c.bf16 %v5307_v48, %v5306_v0  ;;  %v8086_v59 = vld [vmem:[#allocation13 + $0x2a8] sm:$0xff] }
 0x967   :  { %v5384_v61 = vmul.f32 0.796875, %v5352_v49  ;;  %v5385_v23 = vmul.f32 0.796875, %v5353_v9  ;;  %v5228_v47 = vmul.f32 %v5196_v63, %v10956_v52  ;;  %v5229_v20 = vmul.f32 %v5197_v58, %v10958_v44  ;;  %v8070_v0 = vld [vmem:[#allocation13 + $0x228] sm:$0xff]  ;;  %6024 = vmatpush.bf16.msrb.mxu2 %v8086_v59 }
 0x968   :  { %v5118_v33 = vunpack.c.l.bf16 %v5098_v38  ;;  %v5119_v17 = vunpack.c.h.bf16 %v5098_v38  ;;  %v11001_v60 = vunpack.c.l.bf16 %v4971_v22  ;;  %v11003_v32 = vunpack.c.h.bf16 %v4971_v22  ;;  %v8094_v21 = vld [vmem:[#allocation13 + $0x2e8] sm:$0xff]  ;;  %5966 = vmatpush.bf16.msra.mxu0 %v8070_v0 }
 0x969   :  { %v4896_v2 = vadd.f32 %v4895_v5, %v10914_v26  ;;  %v5354_v27 = vunpack.c.l.bf16 %v5336_v56  ;;  %v5355_v55 = vunpack.c.h.bf16 %v5336_v56  ;;  %v5257_v31 = vpack.c.bf16 %v5229_v20, %v5228_v47  ;;  %v8078_v38 = vld [vmem:[#allocation13 + $0x268] sm:$0xff]  ;;  %6053 = vmatpush.bf16.msrb.mxu3 %v8094_v21 }
 0x96a   :  { %11903 = vst [vmem:[#allocation58_spill] sm:$0xff] %v11001_v60  ;;  %v5150_v14 = vmul.f32 %v5118_v33, %v10978_v45  ;;  %v5151_v3 = vmul.f32 %v5119_v17, %v10985_v40  ;;  %v5072_v11 = vmul.f32 0.044677734, %v11001_v60  ;;  %v5073_v41 = vmul.f32 0.044677734, %v11003_v32  ;;  %v4924_v35 = vpop.f32.mrf.mxu2  ;;  %v4953_v36 = vpop.f32.mrf.mxu3  ;;  %5995 = vmatpush.bf16.msra.mxu1 %v8078_v38 }
 0x96b   :  { %11904 = vst [vmem:[#allocation59_spill] sm:$0xff] %v11003_v32  ;;  %v5430_v28 = vunpack.c.l.bf16 %v10990_v19  ;;  %v5431_v34 = vunpack.c.h.bf16 %v10990_v19  ;;  %v5276_v46 = vunpack.c.l.bf16 %v5257_v31  ;;  %v5277_v18 = vunpack.c.h.bf16 %v5257_v31 }
 0x96c   :  { %v11014_v49 = vpack.c.bf16 %v5385_v23, %v5384_v61  ;;  %v5178_v9 = vpack.c.bf16 %v5151_v3, %v5150_v14  ;;  %v5099_v10 = vpack.c.bf16 %v5073_v41, %v5072_v11  ;;  %v4972_v29 = vpack.c.bf16 %v4896_v2, %v4867_v39 }
 0x96d   :  { %v5386_v25 = vmul.f32 0.796875, %v5354_v27  ;;  %v5387_v54 = vmul.f32 0.796875, %v5355_v55  ;;  %v5308_v13 = vadd.f32 %v5276_v46, %v10956_v52  ;;  %v5309_v37 = vadd.f32 %v5277_v18, %v10958_v44 }
 0x96e   :  { %v5198_v48 = vunpack.c.l.bf16 %v5178_v9  ;;  %v5199_v19 = vunpack.c.h.bf16 %v5178_v9  ;;  %v5120_v63 = vunpack.c.l.bf16 %v5099_v10  ;;  %v5121_v58 = vunpack.c.h.bf16 %v5099_v10 }
 0x96f   :  { %v5337_v5 = vpack.c.bf16 %v5309_v37, %v5308_v13  ;;  %v11018_v61 = vunpack.c.l.bf16 %v4972_v29  ;;  %v4925_v23 = vadd.f32 %v4924_v35, %v10922_v43  ;;  %v4954_v22 = vadd.f32 %v4953_v36, %v10924_v8  ;;  %v8069_v35 = vld [vmem:[#allocation13 + $0x220] sm:$0xff] }
 0x970   :  { %v5230_v39 = vmul.f32 %v5198_v48, %v10978_v45  ;;  %v5231_v56 = vmul.f32 %v5199_v19, %v10985_v40  ;;  %v5152_v47 = vmul.f32 %v5120_v63, %v11001_v60  ;;  %v5153_v20 = vmul.f32 %v5121_v58, %v11003_v32  ;;  %5967 = vmatpush.bf16.msra.mxu0 %v8069_v35  ;;  %v4869_v58 = vpop.f32.mrf.mxu0 }
 0x971   :  { %8382 = vtanh.f32 %v5430_v28  ;;  %v5356_v33 = vunpack.c.l.bf16 %v5337_v5  ;;  %v5357_v17 = vunpack.c.h.bf16 %v5337_v5  ;;  %v11026_v2 = vunpack.c.h.bf16 %v4972_v29  ;;  %v8077_v29 = vld [vmem:[#allocation13 + $0x260] sm:$0xff] }
 0x972   :  { %v5432_v27 = vunpack.c.l.bf16 %v11014_v49  ;;  %v5258_v55 = vpack.c.bf16 %v5231_v56, %v5230_v39  ;;  %v5179_v31 = vpack.c.bf16 %v5153_v20, %v5152_v47  ;;  %v5074_v14 = vmul.f32 0.044677734, %v11018_v61  ;;  %5996 = vmatpush.bf16.msra.mxu1 %v8077_v29  ;;  %v8076_v39 = vld [vmem:[#allocation13 + $0x258] sm:$0xff] }
 0x973   :  { %v11030_v3 = vpack.c.bf16 %v5387_v54, %v5386_v25  ;;  %v5388_v11 = vmul.f32 0.796875, %v5356_v33  ;;  %v5075_v41 = vmul.f32 0.044677734, %v11026_v2  ;;  %v4973_v46 = vpack.c.bf16 %v4954_v22, %v4925_v23  ;;  %v4898_v23 = vpop.f32.mrf.mxu1  ;;  %v8068_v22 = vld [vmem:[#allocation13 + $0x218] sm:$0xff] }
 0x974   :  { %v5389_v18 = vmul.f32 0.796875, %v5357_v17  ;;  %v5278_v9 = vunpack.c.l.bf16 %v5258_v55  ;;  %v5200_v28 = vunpack.c.l.bf16 %v5179_v31  ;;  %v5201_v10 = vunpack.c.h.bf16 %v5179_v31  ;;  %5968 = vmatpush.bf16.msra.mxu0 %v8068_v22 }
 0x975   :  { %v5279_v36 = vunpack.c.h.bf16 %v5258_v55  ;;  %v5100_v13 = vpack.c.bf16 %v5075_v41, %v5074_v14  ;;  %v11033_v37 = vunpack.c.l.bf16 %v4973_v46  ;;  %v11035_v59 = vunpack.c.h.bf16 %v4973_v46  ;;  %v8085_v14 = vld [vmem:[#allocation13 + $0x2a0] sm:$0xff] }
 0x976   :  { %8384 = vtanh.f32 %v5431_v34  ;;  %v5433_v25 = vunpack.c.h.bf16 %v11014_v49  ;;  %v5232_v54 = vmul.f32 %v5200_v28, %v11001_v60  ;;  %v5233_v0 = vmul.f32 %v5201_v10, %v11003_v32  ;;  %5997 = vmatpush.bf16.msra.mxu1 %v8076_v39  ;;  %6025 = vmatpush.bf16.msrb.mxu2 %v8085_v14 }
 0x977   :  { %11905 = vst [vmem:[#allocation60_spill] sm:$0xff] %v11033_v37  ;;  %v11040_v21 = vpop.eup %8382  ;;  %8386 = vtanh.f32 %v5432_v27  ;;  %v5434_v48 = vunpack.c.l.bf16 %v11030_v3  ;;  %v5122_v19 = vunpack.c.l.bf16 %v5100_v13  ;;  %v5123_v63 = vunpack.c.h.bf16 %v5100_v13  ;;  %v4927_v17 = vpop.f32.mrf.mxu2  ;;  %v8075_v13 = vld [vmem:[#allocation13 + $0x250] sm:$0xff] }
 0x978   :  { %11906 = vst [vmem:[#allocation61_spill] sm:$0xff] %v11035_v59  ;;  %v11043_v38 = vpack.c.bf16 %v5389_v18, %v5388_v11  ;;  %v5259_v5 = vpack.c.bf16 %v5233_v0, %v5232_v54  ;;  %v5076_v34 = vmul.f32 0.044677734, %v11033_v37  ;;  %v5077_v49 = vmul.f32 0.044677734, %v11035_v59  ;;  %v8093_v11 = vld [vmem:[#allocation13 + $0x2e0] sm:$0xff]  ;;  %v4956_v28 = vpop.f32.mrf.mxu3 }
 0x979   :  { %v5310_v56 = vadd.f32 %v5278_v9, %v10978_v45  ;;  %v5311_v47 = vadd.f32 %v5279_v36, %v10985_v40  ;;  %v5154_v20 = vmul.f32 %v5122_v19, %v11018_v61  ;;  %v5155_v33 = vmul.f32 %v5123_v63, %v11026_v2  ;;  %6054 = vmatpush.bf16.msrb.mxu3 %v8093_v11  ;;  %v8067_v36 = vld [vmem:[#allocation13 + $0x210] sm:$0xff] }
 0x97a   :  { %8388 = vtanh.f32 %v5433_v25  ;;  %v11052_v27 = vmul.f32 0.5, %v10956_v52  ;;  %v5280_v55 = vunpack.c.l.bf16 %v5259_v5  ;;  %v4870_v31 = vadd.f32 %v4869_v58, %v10912_v51  ;;  %5969 = vmatpush.bf16.msra.mxu0 %v8067_v36  ;;  %5998 = vmatpush.bf16.msra.mxu1 %v8075_v13  ;;  %v4871_v36 = vpop.f32.mrf.mxu0  ;;  %v8091_v13 = vld [vmem:[#allocation13 + $0x2d0] sm:$0xff] }
 0x97b   :  { %v5281_v41 = vunpack.c.h.bf16 %v5259_v5  ;;  %v5180_v46 = vpack.c.bf16 %v5155_v33, %v5154_v20  ;;  %v5101_v18 = vpack.c.bf16 %v5077_v49, %v5076_v34  ;;  %v4899_v9 = vadd.f32 %v4898_v23, %v10914_v26  ;;  %v8084_v34 = vld [vmem:[#allocation13 + $0x298] sm:$0xff] }
 0x97c   :  { %v11056_v10 = vpop.eup %8384  ;;  %v5435_v35 = vunpack.c.h.bf16 %v11030_v3  ;;  %8390 = vtanh.f32 %v5434_v48  ;;  %v5436_v52 = vunpack.c.l.bf16 %v11043_v38  ;;  %v4928_v29 = vadd.f32 %v4927_v17, %v10922_v43  ;;  %v8092_v49 = vld [vmem:[#allocation13 + $0x2d8] sm:$0xff]  ;;  %6026 = vmatpush.bf16.msrb.mxu2 %v8084_v34 }
 0x97d   :  { %v11061_v25 = vpop.eup %8386  ;;  %v11063_v54 = vpack.c.bf16 %v5311_v47, %v5310_v56  ;;  %v5202_v0 = vunpack.c.l.bf16 %v5180_v46  ;;  %v5203_v19 = vunpack.c.h.bf16 %v5180_v46  ;;  %v5124_v63 = vunpack.c.l.bf16 %v5101_v18  ;;  %6055 = vmatpush.bf16.msrb.mxu3 %v8092_v49 }
 0x97e   :  { %v5312_v58 = vadd.f32 %v5280_v55, %v11001_v60  ;;  %v5125_v5 = vunpack.c.h.bf16 %v5101_v18  ;;  %v4974_v3 = vpack.c.bf16 %v4899_v9, %v4870_v31  ;;  %v4957_v48 = vadd.f32 %v4956_v28, %v10924_v8 }
 0x97f   :  { %v5313_v23 = vadd.f32 %v5281_v41, %v11003_v32  ;;  %v5234_v22 = vmul.f32 %v5202_v0, %v11018_v61  ;;  %v5235_v39 = vmul.f32 %v5203_v19, %v11026_v2  ;;  %v5156_v56 = vmul.f32 %v5124_v63, %v11033_v37  ;;  %v4929_v34 = vpop.f32.mrf.mxu2 }
 0x980   :  { %v11071_v47 = vpop.eup %8388  ;;  %v5157_v20 = vmul.f32 %v5125_v5, %v11035_v59  ;;  %v11074_v33 = vunpack.c.l.bf16 %v4974_v3  ;;  %v11076_v17 = vunpack.c.h.bf16 %v4974_v3  ;;  %v4975_v55 = vpack.c.bf16 %v4957_v48, %v4928_v29  ;;  %v8083_v29 = vld [vmem:[#allocation13 + $0x290] sm:$0xff]  ;;  %v4900_v48 = vpop.f32.mrf.mxu1 }
 0x981   :  { %8392 = vtanh.f32 %v5435_v35  ;;  %v11079_v31 = vmul.f32 0.5, %v10958_v44  ;;  %v5260_v11 = vpack.c.bf16 %v5235_v39, %v5234_v22  ;;  %v5358_v35 = vunpack.c.l.bf16 %v11063_v54  ;;  %6027 = vmatpush.bf16.msrb.mxu2 %v8083_v29  ;;  %6056 = vmatpush.bf16.msrb.mxu3 %v8091_v13  ;;  %v8066_v29 = vld [vmem:[#allocation13 + $0x208] sm:$0xff] }
 0x982   :  { %11907 = vst [vmem:[#allocation40_spill] sm:$0xff] %v11074_v33  ;;  %v11082_v41 = vpop.eup %8390  ;;  %v5181_v46 = vpack.c.bf16 %v5157_v20, %v5156_v56  ;;  %v5078_v18 = vmul.f32 0.044677734, %v11074_v33  ;;  %v5079_v9 = vmul.f32 0.044677734, %v11076_v17  ;;  %v11086_v28 = vunpack.c.l.bf16 %v4975_v55  ;;  %v4958_v56 = vpop.f32.mrf.mxu3  ;;  %v8074_v13 = vld [vmem:[#allocation13 + $0x248] sm:$0xff]  ;;  %5970 = vmatpush.bf16.msra.mxu0 %v8066_v29 }
 0x983   :  { %11908 = vst [vmem:[#allocation41_spill] sm:$0xff] %v11076_v17  ;;  %8394 = vtanh.f32 %v5436_v52  ;;  %v5359_v44 = vunpack.c.h.bf16 %v11063_v54  ;;  %v5339_v0 = vpack.c.bf16 %v5313_v23, %v5312_v58  ;;  %v11090_v3 = vunpack.c.h.bf16 %v4975_v55  ;;  %5999 = vmatpush.bf16.msra.mxu1 %v8074_v13 }
 0x984   :  { %11909 = vst [vmem:[#allocation48_spill] sm:$0xff] %v11086_v28  ;;  %v5204_v19 = vunpack.c.l.bf16 %v5181_v46  ;;  %v5205_v63 = vunpack.c.h.bf16 %v5181_v46  ;;  %v5102_v5 = vpack.c.bf16 %v5079_v9, %v5078_v18  ;;  %v5282_v49 = vunpack.c.l.bf16 %v5260_v11 }
 0x985   :  { %11910 = vst [vmem:[#allocation49_spill] sm:$0xff] %v11090_v3  ;;  %v5283_v22 = vunpack.c.h.bf16 %v5260_v11  ;;  %v5080_v39 = vmul.f32 0.044677734, %v11086_v28  ;;  %v4872_v52 = vadd.f32 %v4871_v36, %v10912_v51  ;;  %v5360_v55 = vunpack.c.l.bf16 %v5339_v0 }
 0x986   :  { %v5236_v20 = vmul.f32 %v5204_v19, %v11033_v37  ;;  %v5237_v54 = vmul.f32 %v5205_v63, %v11035_v59  ;;  %v5126_v58 = vunpack.c.l.bf16 %v5102_v5  ;;  %v5127_v23 = vunpack.c.h.bf16 %v5102_v5  ;;  %5971 = vmatpush.bf16.msra.mxu0 %v8065_v12 }
 0x987   :  { %v11096_v46 = vpop.eup %8392  ;;  %v5081_v18 = vmul.f32 0.044677734, %v11090_v3  ;;  %v4901_v9 = vadd.f32 %v4900_v48, %v10914_v26  ;;  %v4930_v11 = vadd.f32 %v4929_v34, %v10922_v43  ;;  %v4959_v63 = vadd.f32 %v4958_v56, %v10924_v8  ;;  %v8073_v56 = vld [vmem:[#allocation13 + $0x240] sm:$0xff] }
 0x988   :  { %v5261_v14 = vpack.c.bf16 %v5237_v54, %v5236_v20  ;;  %v5158_v36 = vmul.f32 %v5126_v58, %v11074_v33  ;;  %v5159_v19 = vmul.f32 %v5127_v23, %v11076_v17  ;;  %v5390_v5 = vmul.f32 0.796875, %v5358_v35  ;;  %6000 = vmatpush.bf16.msra.mxu1 %v8073_v56 }
 0x989   :  { %v11104_v16 = vpop.eup %8394  ;;  %v5361_v62 = vunpack.c.h.bf16 %v5339_v0  ;;  %v5103_v7 = vpack.c.bf16 %v5081_v18, %v5080_v39  ;;  %v4976_v1 = vpack.c.bf16 %v4901_v9, %v4872_v52  ;;  %v5391_v48 = vmul.f32 0.796875, %v5359_v44 }
 0x98a   :  { %v5314_v34 = vadd.f32 %v5282_v49, %v11018_v61  ;;  %v5315_v42 = vadd.f32 %v5283_v22, %v11026_v2  ;;  %v5182_v20 = vpack.c.bf16 %v5159_v19, %v5158_v36  ;;  %v5392_v54 = vmul.f32 0.796875, %v5360_v55  ;;  %v8082_v49 = vld [vmem:[#allocation13 + $0x288] sm:$0xff] }
 0x98b   :  { %v5128_v58 = vunpack.c.l.bf16 %v5103_v7  ;;  %v5129_v50 = vunpack.c.h.bf16 %v5103_v7  ;;  %v4977_v23 = vpack.c.bf16 %v4959_v63, %v4930_v11  ;;  %v5284_v53 = vunpack.c.l.bf16 %v5261_v14  ;;  %v8090_v22 = vld [vmem:[#allocation13 + $0x2c8] sm:$0xff]  ;;  %6028 = vmatpush.bf16.msrb.mxu2 %v8082_v49  ;;  %v4903_v49 = vpop.f32.mrf.mxu1 }
 0x98c   :  { %v5285_v57 = vunpack.c.h.bf16 %v5261_v14  ;;  %v5206_v35 = vunpack.c.l.bf16 %v5182_v20  ;;  %v5207_v0 = vunpack.c.h.bf16 %v5182_v20  ;;  %v5393_v39 = vmul.f32 0.796875, %v5361_v62  ;;  %6057 = vmatpush.bf16.msrb.mxu3 %v8090_v22  ;;  %v4874_v20 = vpop.f32.mrf.mxu0 }
 0x98d   :  { %v5160_v52 = vmul.f32 %v5128_v58, %v11086_v28  ;;  %v5161_v44 = vmul.f32 %v5129_v50, %v11090_v3  ;;  %v11110_v18 = vunpack.c.l.bf16 %v4976_v1  ;;  %v11112_v55 = vpack.c.bf16 %v5315_v42, %v5314_v34  ;;  %v8081_v58 = vld [vmem:[#allocation13 + $0x280] sm:$0xff] }
 0x98e   :  { %v5238_v7 = vmul.f32 %v5206_v35, %v11074_v33  ;;  %v5239_v9 = vmul.f32 %v5207_v0, %v11076_v17  ;;  %v11116_v14 = vunpack.c.h.bf16 %v4976_v1  ;;  %v11119_v29 = vunpack.c.l.bf16 %v4977_v23 }
 0x98f   :  { %v5183_v11 = vpack.c.bf16 %v5161_v44, %v5160_v52  ;;  %v5082_v62 = vmul.f32 0.044677734, %v11110_v18  ;;  %v11121_v50 = vunpack.c.h.bf16 %v4977_v23  ;;  %v5316_v12 = vadd.f32 %v5284_v53, %v11033_v37  ;;  %6029 = vmatpush.bf16.msrb.mxu2 %v8081_v58 }
 0x990   :  { %v5317_v42 = vadd.f32 %v5285_v57, %v11035_v59  ;;  %v5262_v13 = vpack.c.bf16 %v5239_v9, %v5238_v7  ;;  %v5083_v36 = vmul.f32 0.044677734, %v11116_v14  ;;  %v5084_v1 = vmul.f32 0.044677734, %v11119_v29 }
 0x991   :  { %v5208_v19 = vunpack.c.l.bf16 %v5183_v11  ;;  %v5209_v63 = vunpack.c.h.bf16 %v5183_v11  ;;  %v5085_v34 = vmul.f32 0.044677734, %v11121_v50  ;;  %v11911_v23 = vunpack.c.h.bf16 %v11043_v38 }
 0x992   :  { %v11130_v56 = vpack.c.bf16 %v5391_v48, %v5390_v5  ;;  %v5286_v35 = vunpack.c.l.bf16 %v5262_v13  ;;  %v5287_v53 = vunpack.c.h.bf16 %v5262_v13  ;;  %v5104_v52 = vpack.c.bf16 %v5083_v36, %v5082_v62 }
 0x993   :  { %8396 = vtanh.f32 %v11911_v23  ;;  %v5240_v57 = vmul.f32 %v5208_v19, %v11086_v28  ;;  %v5241_v0 = vmul.f32 %v5209_v63, %v11090_v3  ;;  %v5105_v44 = vpack.c.bf16 %v5085_v34, %v5084_v1 }
 0x994   :  { %v11134_v22 = vpack.c.bf16 %v5393_v39, %v5392_v54  ;;  %v5362_v7 = vunpack.c.l.bf16 %v11112_v55  ;;  %v11137_v9 = vpack.c.bf16 %v5317_v42, %v5316_v12  ;;  %v4875_v38 = vadd.f32 %v4874_v20, %v10912_v51  ;;  %v4932_v42 = vpop.f32.mrf.mxu2 }
 0x995   :  { %v5263_v5 = vpack.c.bf16 %v5241_v0, %v5240_v57  ;;  %v5130_v48 = vunpack.c.l.bf16 %v5104_v52  ;;  %v5131_v11 = vunpack.c.h.bf16 %v5104_v52  ;;  %v5132_v13 = vunpack.c.l.bf16 %v5105_v44 }
 0x996   :  { %11912 = vst [vmem:[#allocation50_spill] sm:$0xff] %v11134_v22  ;;  %v5318_v19 = vadd.f32 %v5286_v35, %v11074_v33  ;;  %v5319_v63 = vadd.f32 %v5287_v53, %v11076_v17  ;;  %v5133_v62 = vunpack.c.h.bf16 %v5105_v44  ;;  %v4904_v36 = vadd.f32 %v4903_v49, %v10914_v26  ;;  %v4961_v53 = vpop.f32.mrf.mxu3 }
 0x997   :  { %v5288_v1 = vunpack.c.l.bf16 %v5263_v5  ;;  %v5289_v54 = vunpack.c.h.bf16 %v5263_v5  ;;  %v5162_v39 = vmul.f32 %v5130_v48, %v11110_v18  ;;  %v5163_v12 = vmul.f32 %v5131_v11, %v11116_v14 }
 0x998   :  { %v5363_v20 = vunpack.c.h.bf16 %v11112_v55  ;;  %v11148_v58 = vmul.f32 0.796875, %v5362_v7  ;;  %v5164_v23 = vmul.f32 %v5132_v13, %v11119_v29  ;;  %v5165_v35 = vmul.f32 %v5133_v62, %v11121_v50 }
 0x999   :  { %v11145_v34 = vpop.eup %8396  ;;  %v5320_v57 = vadd.f32 %v5288_v1, %v11086_v28  ;;  %v5321_v0 = vadd.f32 %v5289_v54, %v11090_v3  ;;  %v5184_v52 = vpack.c.bf16 %v5163_v12, %v5162_v39  ;;  %v4978_v44 = vpack.c.bf16 %v4904_v36, %v4875_v38 }
 0x99a   :  { %v5364_v49 = vunpack.c.l.bf16 %v11137_v9  ;;  %v5342_v5 = vpack.c.bf16 %v5319_v63, %v5318_v19  ;;  %v5185_v48 = vpack.c.bf16 %v5165_v35, %v5164_v23  ;;  %v4933_v11 = vadd.f32 %v4932_v42, %v10922_v43  ;;  %v4876_v63 = vpop.f32.mrf.mxu0  ;;  %v4905_v23 = vpop.f32.mrf.mxu1 }
 0x99b   :  { %v5210_v55 = vunpack.c.l.bf16 %v5184_v52  ;;  %v5211_v7 = vunpack.c.h.bf16 %v5184_v52  ;;  %v11156_v17 = vunpack.c.l.bf16 %v4978_v44  ;;  %v4962_v13 = vadd.f32 %v4961_v53, %v10924_v8 }
 0x99c   :  { %v5395_v62 = vmul.f32 0.796875, %v5363_v20  ;;  %v5212_v33 = vunpack.c.l.bf16 %v5185_v48  ;;  %v5213_v59 = vunpack.c.h.bf16 %v5185_v48  ;;  %v11159_v1 = vunpack.c.h.bf16 %v4978_v44 }
 0x99d   :  { %v5365_v54 = vunpack.c.h.bf16 %v11137_v9  ;;  %v5343_v38 = vpack.c.bf16 %v5321_v0, %v5320_v57  ;;  %v5242_v36 = vmul.f32 %v5210_v55, %v11110_v18  ;;  %v5243_v19 = vmul.f32 %v5211_v7, %v11116_v14 }
 0x99e   :  { %v5244_v39 = vmul.f32 %v5212_v33, %v11119_v29  ;;  %v5245_v12 = vmul.f32 %v5213_v59, %v11121_v50  ;;  %v5086_v42 = vmul.f32 0.044677734, %v11156_v17  ;;  %v5087_v20 = vmul.f32 0.044677734, %v11159_v1 }
 0x99f   :  { %v5396_v35 = vmul.f32 0.796875, %v5364_v49  ;;  %v5366_v53 = vunpack.c.l.bf16 %v5342_v5  ;;  %v5264_v52 = vpack.c.bf16 %v5243_v19, %v5242_v36  ;;  %v4979_v44 = vpack.c.bf16 %v4962_v13, %v4933_v11  ;;  %v4934_v19 = vpop.f32.mrf.mxu2 }
 0x9a0   :  { %v5367_v9 = vunpack.c.h.bf16 %v5342_v5  ;;  %v5265_v57 = vpack.c.bf16 %v5245_v12, %v5244_v39  ;;  %v5106_v0 = vpack.c.bf16 %v5087_v20, %v5086_v42  ;;  %v4877_v48 = vadd.f32 %v4876_v63, %v10912_v51  ;;  %v4963_v12 = vpop.f32.mrf.mxu3 }
 0x9a1   :  { %v5290_v55 = vunpack.c.l.bf16 %v5264_v52  ;;  %v5291_v7 = vunpack.c.h.bf16 %v5264_v52  ;;  %v11169_v3 = vunpack.c.l.bf16 %v4979_v44  ;;  %v4906_v59 = vadd.f32 %v4905_v23, %v10914_v26 }
 0x9a2   :  { %v5368_v33 = vunpack.c.l.bf16 %v5343_v38  ;;  %v5369_v28 = vunpack.c.h.bf16 %v5343_v38  ;;  %v5134_v37 = vunpack.c.l.bf16 %v5106_v0  ;;  %v5135_v22 = vunpack.c.h.bf16 %v5106_v0 }
 0x9a3   :  { %v5292_v32 = vunpack.c.l.bf16 %v5265_v57  ;;  %v5293_v49 = vunpack.c.h.bf16 %v5265_v57  ;;  %v11172_v60 = vunpack.c.h.bf16 %v4979_v44  ;;  %v5088_v5 = vmul.f32 0.044677734, %v11169_v3 }
 0x9a4   :  { %v5397_v11 = vmul.f32 0.796875, %v5365_v54  ;;  %v5398_v13 = vmul.f32 0.796875, %v5366_v53  ;;  %v5166_v51 = vmul.f32 %v5134_v37, %v11156_v17  ;;  %v5167_v36 = vmul.f32 %v5135_v22, %v11159_v1 }
 0x9a5   :  { %v5322_v63 = vadd.f32 %v5290_v55, %v11110_v18  ;;  %v5323_v26 = vadd.f32 %v5291_v7, %v11116_v14  ;;  %v5089_v38 = vmul.f32 0.044677734, %v11172_v60  ;;  %v4980_v39 = vpack.c.bf16 %v4906_v59, %v4877_v48 }
 0x9a6   :  { %v5399_v42 = vmul.f32 0.796875, %v5367_v9  ;;  %v5400_v20 = vmul.f32 0.796875, %v5368_v33  ;;  %v5401_v23 = vmul.f32 0.796875, %v5369_v28  ;;  %v5186_v52 = vpack.c.bf16 %v5167_v36, %v5166_v51 }
 0x9a7   :  { %v5324_v54 = vadd.f32 %v5292_v32, %v11119_v29  ;;  %v5325_v53 = vadd.f32 %v5293_v49, %v11121_v50  ;;  %v5107_v37 = vpack.c.bf16 %v5089_v38, %v5088_v5  ;;  %v4935_v22 = vadd.f32 %v4934_v19, %v10922_v43  ;;  %v8089_v49 = vld [vmem:[#allocation13 + $0x2c0] sm:$0xff] }
 0x9a8   :  { %v5214_v44 = vunpack.c.l.bf16 %v5186_v52  ;;  %v5215_v57 = vunpack.c.h.bf16 %v5186_v52  ;;  %v11183_v0 = vunpack.c.l.bf16 %v4980_v39  ;;  %v4964_v55 = vadd.f32 %v4963_v12, %v10924_v8  ;;  %6058 = vmatpush.bf16.msrb.mxu3 %v8089_v49 }
 0x9a9   :  { %v11187_v48 = vpack.c.bf16 %v5395_v62, %v11148_v58  ;;  %v5344_v9 = vpack.c.bf16 %v5323_v26, %v5322_v63  ;;  %v5136_v7 = vunpack.c.l.bf16 %v5107_v37  ;;  %v5137_v28 = vunpack.c.h.bf16 %v5107_v37 }
 0x9aa   :  { %v11189_v59 = vpack.c.bf16 %v5397_v11, %v5396_v35  ;;  %v11191_v32 = vpack.c.bf16 %v5399_v42, %v5398_v13  ;;  %v5246_v33 = vmul.f32 %v5214_v44, %v11156_v17  ;;  %v5247_v43 = vmul.f32 %v5215_v57, %v11159_v1 }
 0x9ab   :  { %v11195_v5 = vpack.c.bf16 %v5401_v23, %v5400_v20  ;;  %v5168_v51 = vmul.f32 %v5136_v7, %v11169_v3  ;;  %v5169_v8 = vmul.f32 %v5137_v28, %v11172_v60  ;;  %v11199_v58 = vunpack.c.h.bf16 %v4980_v39 }
 0x9ac   :  { %v5345_v62 = vpack.c.bf16 %v5325_v53, %v5324_v54  ;;  %v5266_v36 = vpack.c.bf16 %v5247_v43, %v5246_v33  ;;  %v5090_v35 = vmul.f32 0.044677734, %v11183_v0  ;;  %v4981_v11 = vpack.c.bf16 %v4964_v55, %v4935_v22 }
 0x9ad   :  { %v5370_v13 = vunpack.c.l.bf16 %v5344_v9  ;;  %v5187_v19 = vpack.c.bf16 %v5169_v8, %v5168_v51  ;;  %v5091_v63 = vmul.f32 0.044677734, %v11199_v58  ;;  %v11205_v26 = vpack.c.bf16 %v10993_v15, %v10981_v24 }
 0x9ae   :  { %v5294_v38 = vunpack.c.l.bf16 %v5266_v36  ;;  %v11207_v12 = vunpack.c.l.bf16 %v4981_v11  ;;  %v11209_v42 = vunpack.c.h.bf16 %v4981_v11  ;;  %v5494_v39 = vpack.c.bf16 %v11056_v10, %v11040_v21 }
 0x9af   :  { %v5295_v20 = vunpack.c.h.bf16 %v5266_v36  ;;  %v5216_v23 = vunpack.c.l.bf16 %v5187_v19  ;;  %v5217_v52 = vunpack.c.h.bf16 %v5187_v19  ;;  %v5108_v54 = vpack.c.bf16 %v5091_v63, %v5090_v35 }
 0x9b0   :  { %v5371_v53 = vunpack.c.h.bf16 %v5344_v9  ;;  %v5092_v37 = vmul.f32 0.044677734, %v11207_v12  ;;  %v5093_v22 = vmul.f32 0.044677734, %v11209_v42  ;;  %v5496_v24 = vpack.c.bf16 %v11096_v46, %v11082_v41 }
 0x9b1   :  { %v5248_v15 = vmul.f32 %v5216_v23, %v11169_v3  ;;  %v5249_v44 = vmul.f32 %v5217_v52, %v11172_v60  ;;  %v5138_v57 = vunpack.c.l.bf16 %v5108_v54  ;;  %v5139_v55 = vunpack.c.h.bf16 %v5108_v54 }
 0x9b2   :  { %v5372_v7 = vunpack.c.l.bf16 %v5345_v62  ;;  %v5373_v21 = vunpack.c.h.bf16 %v5345_v62  ;;  %v5109_v10 = vpack.c.bf16 %v5093_v22, %v5092_v37  ;;  %v5510_v28 = vunpack.c.l.bf16 %v5494_v39 }
 0x9b3   :  { %v5326_v33 = vadd.f32 %v5294_v38, %v11156_v17  ;;  %v5327_v9 = vadd.f32 %v5295_v20, %v11159_v1  ;;  %v5170_v43 = vmul.f32 %v5138_v57, %v11183_v0  ;;  %v5171_v49 = vmul.f32 %v5139_v55, %v11199_v58 }
 0x9b4   :  { %v5140_v51 = vunpack.c.l.bf16 %v5109_v10  ;;  %v5141_v41 = vunpack.c.h.bf16 %v5109_v10  ;;  %v5511_v46 = vunpack.c.h.bf16 %v5494_v39  ;;  %v5514_v8 = vunpack.c.l.bf16 %v5496_v24 }
 0x9b5   :  { %v5402_v36 = vmul.f32 0.796875, %v5370_v13  ;;  %v5267_v35 = vpack.c.bf16 %v5249_v44, %v5248_v15  ;;  %v5188_v11 = vpack.c.bf16 %v5171_v49, %v5170_v43  ;;  %v5515_v19 = vunpack.c.h.bf16 %v5496_v24 }
 0x9b6   :  { %v5403_v63 = vmul.f32 0.796875, %v5371_v53  ;;  %v5172_v62 = vmul.f32 %v5140_v51, %v11207_v12  ;;  %v5173_v23 = vmul.f32 %v5141_v41, %v11209_v42  ;;  %v5542_v38 = vadd.f32 1.0, %v5510_v28 }
 0x9b7   :  { %v5404_v52 = vmul.f32 0.796875, %v5372_v7  ;;  %v5346_v20 = vpack.c.bf16 %v5327_v9, %v5326_v33  ;;  %v5218_v54 = vunpack.c.l.bf16 %v5188_v11  ;;  %v5219_v37 = vunpack.c.h.bf16 %v5188_v11 }
 0x9b8   :  { %v5405_v22 = vmul.f32 0.796875, %v5373_v21  ;;  %v5189_v57 = vpack.c.bf16 %v5173_v23, %v5172_v62  ;;  %v5543_v55 = vadd.f32 1.0, %v5511_v46  ;;  %v5546_v10 = vadd.f32 1.0, %v5514_v8 }
 0x9b9   :  { %v5296_v39 = vunpack.c.l.bf16 %v5267_v35  ;;  %v5250_v13 = vmul.f32 %v5218_v54, %v11183_v0  ;;  %v5251_v15 = vmul.f32 %v5219_v37, %v11199_v58  ;;  %v5547_v24 = vadd.f32 1.0, %v5515_v19 }
 0x9ba   :  { %v5297_v53 = vunpack.c.h.bf16 %v5267_v35  ;;  %v5220_v44 = vunpack.c.l.bf16 %v5189_v57  ;;  %v5221_v43 = vunpack.c.h.bf16 %v5189_v57  ;;  %v5574_v49 = vpack.c.bf16 %v5543_v55, %v5542_v38 }
 0x9bb   :  { %v11227_v51 = vpack.c.bf16 %v5403_v63, %v5402_v36  ;;  %v5374_v7 = vunpack.c.l.bf16 %v5346_v20  ;;  %v5268_v28 = vpack.c.bf16 %v5251_v15, %v5250_v13  ;;  %v5576_v33 = vpack.c.bf16 %v5547_v24, %v5546_v10 }
 0x9bc   :  { %v5375_v9 = vunpack.c.h.bf16 %v5346_v20  ;;  %v5252_v21 = vmul.f32 %v5220_v44, %v11207_v12  ;;  %v5253_v41 = vmul.f32 %v5221_v43, %v11209_v42  ;;  %v5622_v46 = vunpack.c.l.bf16 %v5574_v49 }
 0x9bd   :  { %v5328_v8 = vadd.f32 %v5296_v39, %v11169_v3  ;;  %v5298_v11 = vunpack.c.l.bf16 %v5268_v28  ;;  %v5299_v62 = vunpack.c.h.bf16 %v5268_v28  ;;  %v5590_v35 = vunpack.c.l.bf16 %v11006_v6 }
 0x9be   :  { %v5329_v19 = vadd.f32 %v5297_v53, %v11172_v60  ;;  %v5269_v23 = vpack.c.bf16 %v5253_v41, %v5252_v21  ;;  %v5594_v36 = vunpack.c.l.bf16 %v11205_v26  ;;  %v5626_v63 = vunpack.c.l.bf16 %v5576_v33 }
 0x9bf   :  { %v5406_v38 = vmul.f32 0.796875, %v5374_v7  ;;  %v5330_v20 = vadd.f32 %v5298_v11, %v11183_v0  ;;  %v5331_v54 = vadd.f32 %v5299_v62, %v11199_v58  ;;  %v5654_v37 = vmul.f32 %v5622_v46, %v5590_v35 }
 0x9c0   :  { %v5300_v57 = vunpack.c.l.bf16 %v5269_v23  ;;  %v5301_v55 = vunpack.c.h.bf16 %v5269_v23  ;;  %v5658_v10 = vmul.f32 %v5626_v63, %v5594_v36  ;;  %v5623_v39 = vunpack.c.h.bf16 %v5574_v49 }
 0x9c1   :  { %v5348_v13 = vpack.c.bf16 %v5331_v54, %v5330_v20  ;;  %v5591_v15 = vunpack.c.h.bf16 %v11006_v6  ;;  %v5595_v24 = vunpack.c.h.bf16 %v11205_v26  ;;  %v5627_v53 = vunpack.c.h.bf16 %v5576_v33 }
 0x9c2   :  { %v5407_v44 = vmul.f32 0.796875, %v5375_v9  ;;  %v5347_v43 = vpack.c.bf16 %v5329_v19, %v5328_v8  ;;  %v5332_v28 = vadd.f32 %v5300_v57, %v11207_v12  ;;  %v5686_v7 = vpack.c.bf16 %v5658_v10, %v5654_v37 }
 0x9c3   :  { %v5333_v21 = vadd.f32 %v5301_v55, %v11209_v42  ;;  %v5655_v41 = vmul.f32 %v5623_v39, %v5591_v15  ;;  %v5659_v11 = vmul.f32 %v5627_v53, %v5595_v24  ;;  %v5495_v46 = vpack.c.bf16 %v11071_v47, %v11061_v25 }
 0x9c4   :  { %v11243_v62 = vpack.c.bf16 %v5405_v22, %v5404_v52  ;;  %5972 = vmatmul.bf16.vlgmr.msra.gmra.mxu0 %v5686_v7  ;;  %v5047_v6 = vpack.c.bf16 %v10976_v30, %v10973_v4  ;;  %v5049_v26 = vpack.c.bf16 %v11079_v31, %v11052_v27  ;;  %v5497_v49 = vpack.c.bf16 %v11145_v34, %v11104_v16 }
 0x9c5   :  { %v5378_v33 = vunpack.c.l.bf16 %v5348_v13  ;;  %v5379_v9 = vunpack.c.h.bf16 %v5348_v13  ;;  %v5687_v8 = vpack.c.bf16 %v5659_v11, %v5655_v41  ;;  %v5512_v35 = vunpack.c.l.bf16 %v5495_v46 }
 0x9c6   :  { %v11251_v19 = vpack.c.bf16 %v5407_v44, %v5406_v38  ;;  %v5376_v23 = vunpack.c.l.bf16 %v5347_v43  ;;  %v5513_v25 = vunpack.c.h.bf16 %v5495_v46  ;;  %v5516_v47 = vunpack.c.l.bf16 %v5497_v49 }
 0x9c7   :  { %v5377_v52 = vunpack.c.h.bf16 %v5347_v43  ;;  %v11253_v22 = vpack.c.bf16 %v5333_v21, %v5332_v28  ;;  %6001 = vmatmul.bf16.vlgmr.msra.gmra.mxu1 %v5687_v8  ;;  %v5517_v4 = vunpack.c.h.bf16 %v5497_v49  ;;  %v5544_v30 = vadd.f32 1.0, %v5512_v35  ;;  %v11914_v8 = vld [vmem:[#allocation59_spill] sm:$0xff] }
 0x9c8   :  { %v5545_v36 = vadd.f32 1.0, %v5513_v25  ;;  %v5548_v27 = vadd.f32 1.0, %v5516_v47  ;;  %v5592_v31 = vunpack.c.l.bf16 %v5047_v6  ;;  %v5596_v63 = vunpack.c.l.bf16 %v5049_v26  ;;  %v11915_v25 = vld [vmem:[#allocation50_spill] sm:$0xff] }
 0x9c9   :  { %v5410_v16 = vmul.f32 0.796875, %v5378_v33  ;;  %v5411_v34 = vmul.f32 0.796875, %v5379_v9  ;;  %v5549_v20 = vadd.f32 1.0, %v5517_v4  ;;  %v5593_v54 = vunpack.c.h.bf16 %v5047_v6  ;;  %v11913_v33 = vld [vmem:[#allocation58_spill] sm:$0xff] }
 0x9ca   :  { %v5575_v37 = vpack.c.bf16 %v5545_v36, %v5544_v30  ;;  %v5597_v38 = vunpack.c.h.bf16 %v5049_v26  ;;  %v5022_v57 = vmul.f32 0.5, %v10978_v45  ;;  %v5023_v55 = vmul.f32 0.5, %v10985_v40 }
 0x9cb   :  { %v5577_v10 = vpack.c.bf16 %v5549_v20, %v5548_v27  ;;  %v5026_v39 = vmul.f32 0.5, %v11018_v61  ;;  %v5438_v13 = vunpack.c.l.bf16 %v11130_v56  ;;  %v5439_v15 = vunpack.c.h.bf16 %v11130_v56 }
 0x9cc   :  { %v5624_v24 = vunpack.c.l.bf16 %v5575_v37  ;;  %v5625_v53 = vunpack.c.h.bf16 %v5575_v37  ;;  %v5027_v44 = vmul.f32 0.5, %v11026_v2  ;;  %v5442_v43 = vunpack.c.l.bf16 %v11187_v48 }
 0x9cd   :  { %v5628_v28 = vunpack.c.l.bf16 %v5577_v10  ;;  %v5629_v7 = vunpack.c.h.bf16 %v5577_v10  ;;  %v5443_v21 = vunpack.c.h.bf16 %v11187_v48  ;;  %8398 = vtanh.f32 %v5438_v13 }
 0x9ce   :  { %v5380_v45 = vunpack.c.l.bf16 %v11253_v22  ;;  %v5656_v40 = vmul.f32 %v5624_v24, %v5592_v31  ;;  %v11264_v41 = vpack.c.bf16 %v5023_v55, %v5022_v57  ;;  %8400 = vtanh.f32 %v5439_v15  ;;  %v11919_v24 = vld [vmem:[#allocation41_spill] sm:$0xff] }
 0x9cf   :  { %v5660_v61 = vmul.f32 %v5628_v28, %v5596_v63  ;;  %v5657_v11 = vmul.f32 %v5625_v53, %v5593_v54  ;;  %v5661_v56 = vmul.f32 %v5629_v7, %v5597_v38  ;;  %8402 = vtanh.f32 %v5442_v43  ;;  %v11916_v54 = vld [vmem:[#allocation60_spill] sm:$0xff]  ;;  %v11917_v38 = vld [vmem:[#allocation61_spill] sm:$0xff] }
 0x9d0   :  { %v11266_v46 = vmul.f32 0.796875, %v5376_v23  ;;  %v11268_v2 = vmul.f32 0.796875, %v5377_v52  ;;  %v11270_v6 = vpack.c.bf16 %v5027_v44, %v5026_v39  ;;  %8404 = vtanh.f32 %v5443_v21 }
 0x9d1   :  { %v5381_v48 = vunpack.c.h.bf16 %v11253_v22  ;;  %v5688_v26 = vpack.c.bf16 %v5660_v61, %v5656_v40  ;;  %v5689_v49 = vpack.c.bf16 %v5661_v56, %v5657_v11  ;;  %v5024_v9 = vmul.f32 0.5, %v11913_v33 }
 0x9d2   :  { %v5025_v35 = vmul.f32 0.5, %v11914_v8  ;;  %v5440_v47 = vunpack.c.l.bf16 %v11915_v25  ;;  %v5441_v4 = vunpack.c.h.bf16 %v11915_v25  ;;  %v5444_v23 = vunpack.c.l.bf16 %v11189_v59 }
 0x9d3   :  { %v8399_v30 = vpop.eup %8398  ;;  %v11278_v52 = vpack.c.bf16 %v5411_v34, %v5410_v16  ;;  %v11280_v36 = vmul.f32 0.796875, %v5380_v45  ;;  %6030 = vmatmul.bf16.vlgmr.msrb.gmra.mxu2 %v5688_v26  ;;  %6059 = vmatmul.bf16.vlgmr.msrb.gmra.mxu3 %v5689_v49  ;;  %v5598_v27 = vunpack.c.l.bf16 %v11264_v41  ;;  %v5445_v31 = vunpack.c.h.bf16 %v11189_v59  ;;  %v11918_v59 = vld [vmem:[#allocation40_spill] sm:$0xff] }
 0x9d4   :  { %v8401_v63 = vpop.eup %8400  ;;  %v5602_v20 = vunpack.c.l.bf16 %v11270_v6  ;;  %v5028_v37 = vmul.f32 0.5, %v11916_v54  ;;  %v5029_v57 = vmul.f32 0.5, %v11917_v38  ;;  %8406 = vtanh.f32 %v5440_v47 }
 0x9d5   :  { %v8403_v55 = vpop.eup %8402  ;;  %v5498_v10 = vpack.c.bf16 %v8401_v63, %v8399_v30  ;;  %v5599_v16 = vunpack.c.h.bf16 %v11264_v41  ;;  %v5603_v34 = vunpack.c.h.bf16 %v11270_v6  ;;  %8408 = vtanh.f32 %v5441_v4 }
 0x9d6   :  { %v8405_v39 = vpop.eup %8404  ;;  %v11289_v13 = vpack.c.bf16 %v5025_v35, %v5024_v9  ;;  %8410 = vtanh.f32 %v5444_v23  ;;  %v5030_v15 = vmul.f32 0.5, %v11918_v59  ;;  %v5031_v53 = vmul.f32 0.5, %v11919_v24 }
 0x9d7   :  { %v5500_v44 = vpack.c.bf16 %v8405_v39, %v8403_v55  ;;  %v5518_v43 = vunpack.c.l.bf16 %v5498_v10  ;;  %v5519_v28 = vunpack.c.h.bf16 %v5498_v10  ;;  %8412 = vtanh.f32 %v5445_v31 }
 0x9d8   :  { %v11293_v7 = vpack.c.bf16 %v5029_v57, %v5028_v37  ;;  %v5446_v21 = vunpack.c.l.bf16 %v11191_v32  ;;  %v5447_v45 = vunpack.c.h.bf16 %v11191_v32  ;;  %v5450_v40 = vunpack.c.l.bf16 %v11227_v51 }
 0x9d9   :  { %v5522_v61 = vunpack.c.l.bf16 %v5500_v44  ;;  %v5523_v11 = vunpack.c.h.bf16 %v5500_v44  ;;  %v5550_v56 = vadd.f32 1.0, %v5518_v43  ;;  %v5551_v6 = vadd.f32 1.0, %v5519_v28 }
 0x9da   :  { %v8407_v26 = vpop.eup %8406  ;;  %v5034_v49 = vmul.f32 0.5, %v11110_v18  ;;  %v5035_v33 = vmul.f32 0.5, %v11116_v14  ;;  %v5451_v9 = vunpack.c.h.bf16 %v11227_v51  ;;  %8414 = vtanh.f32 %v5446_v21 }
 0x9db   :  { %v8409_v8 = vpop.eup %8408  ;;  %v5554_v35 = vadd.f32 1.0, %v5522_v61  ;;  %v5555_v25 = vadd.f32 1.0, %v5523_v11  ;;  %v5578_v47 = vpack.c.bf16 %v5551_v6, %v5550_v56  ;;  %8416 = vtanh.f32 %v5447_v45 }
 0x9dc   :  { %v8411_v32 = vpop.eup %8410  ;;  %v5499_v4 = vpack.c.bf16 %v8409_v8, %v8407_v26  ;;  %v5600_v23 = vunpack.c.l.bf16 %v11289_v13  ;;  %v5601_v30 = vunpack.c.h.bf16 %v11289_v13  ;;  %8418 = vtanh.f32 %v5450_v40 }
 0x9dd   :  { %v8413_v31 = vpop.eup %8412  ;;  %v5580_v63 = vpack.c.bf16 %v5555_v25, %v5554_v35  ;;  %v5630_v18 = vunpack.c.l.bf16 %v5578_v47  ;;  %v5631_v54 = vunpack.c.h.bf16 %v5578_v47  ;;  %8420 = vtanh.f32 %v5451_v9 }
 0x9de   :  { %v5501_v14 = vpack.c.bf16 %v8413_v31, %v8411_v32  ;;  %v5520_v51 = vunpack.c.l.bf16 %v5499_v4  ;;  %v5521_v37 = vunpack.c.h.bf16 %v5499_v4  ;;  %v5604_v38 = vunpack.c.l.bf16 %v11293_v7 }
 0x9df   :  { %v5634_v57 = vunpack.c.l.bf16 %v5580_v63  ;;  %v5635_v55 = vunpack.c.h.bf16 %v5580_v63  ;;  %v5605_v10 = vunpack.c.h.bf16 %v11293_v7  ;;  %v11305_v39 = vpack.c.bf16 %v5031_v53, %v5030_v15 }
 0x9e0   :  { %v8415_v59 = vpop.eup %8414  ;;  %v5524_v24 = vunpack.c.l.bf16 %v5501_v14  ;;  %v5525_v13 = vunpack.c.h.bf16 %v5501_v14  ;;  %v5552_v44 = vadd.f32 1.0, %v5520_v51  ;;  %v5553_v43 = vadd.f32 1.0, %v5521_v37 }
 0x9e1   :  { %v8417_v28 = vpop.eup %8416  ;;  %v5662_v21 = vmul.f32 %v5630_v18, %v5598_v27  ;;  %v5666_v45 = vmul.f32 %v5634_v57, %v5602_v20  ;;  %v5663_v40 = vmul.f32 %v5631_v54, %v5599_v16  ;;  %v5667_v61 = vmul.f32 %v5635_v55, %v5603_v34  ;;  %v11920_v20 = vld [vmem:[#allocation48_spill] sm:$0xff] }
 0x9e2   :  { %v8419_v11 = vpop.eup %8418  ;;  %v5556_v56 = vadd.f32 1.0, %v5524_v24  ;;  %v5557_v6 = vadd.f32 1.0, %v5525_v13  ;;  %v5579_v26 = vpack.c.bf16 %v5553_v43, %v5552_v44  ;;  %v5502_v9 = vpack.c.bf16 %v8417_v28, %v8415_v59  ;;  %v11921_v43 = vld [vmem:[#allocation49_spill] sm:$0xff] }
 0x9e3   :  { %v8421_v7 = vpop.eup %8420  ;;  %v5690_v15 = vpack.c.bf16 %v5666_v45, %v5662_v21  ;;  %v5691_v53 = vpack.c.bf16 %v5667_v61, %v5663_v40  ;;  %v5056_v8 = vpack.c.bf16 %v5035_v33, %v5034_v49  ;;  %v5606_v35 = vunpack.c.l.bf16 %v11305_v39 }
 0x9e4   :  { %v5581_v25 = vpack.c.bf16 %v5557_v6, %v5556_v56  ;;  %v5632_v47 = vunpack.c.l.bf16 %v5579_v26  ;;  %v5633_v32 = vunpack.c.h.bf16 %v5579_v26  ;;  %v5504_v4 = vpack.c.bf16 %v8421_v7, %v8419_v11 }
 0x9e5   :  { %5977 = vmatmul.bf16.gmra.mxu0 %v5690_v15  ;;  %6006 = vmatmul.bf16.gmra.mxu1 %v5691_v53  ;;  %v5526_v41 = vunpack.c.l.bf16 %v5502_v9  ;;  %v5527_v27 = vunpack.c.h.bf16 %v5502_v9  ;;  %v5032_v16 = vmul.f32 0.5, %v11920_v20  ;;  %v5448_v34 = vunpack.c.l.bf16 %v11195_v5 }
 0x9e6   :  { %v5636_v31 = vunpack.c.l.bf16 %v5581_v25  ;;  %v5664_v63 = vmul.f32 %v5632_v47, %v5600_v23  ;;  %v5637_v18 = vunpack.c.h.bf16 %v5581_v25  ;;  %v5665_v54 = vmul.f32 %v5633_v32, %v5601_v30 }
 0x9e7   :  { %v5530_v14 = vunpack.c.l.bf16 %v5504_v4  ;;  %v5531_v49 = vunpack.c.h.bf16 %v5504_v4  ;;  %v5558_v33 = vadd.f32 1.0, %v5526_v41  ;;  %v5559_v51 = vadd.f32 1.0, %v5527_v27 }
 0x9e8   :  { %v5668_v37 = vmul.f32 %v5636_v31, %v5604_v38  ;;  %v5669_v57 = vmul.f32 %v5637_v18, %v5605_v10  ;;  %v5449_v55 = vunpack.c.h.bf16 %v11195_v5  ;;  %v5452_v59 = vunpack.c.l.bf16 %v11243_v62 }
 0x9e9   :  { %v5562_v24 = vadd.f32 1.0, %v5530_v14  ;;  %v5563_v13 = vadd.f32 1.0, %v5531_v49  ;;  %v5582_v44 = vpack.c.bf16 %v5559_v51, %v5558_v33  ;;  %v5033_v28 = vmul.f32 0.5, %v11921_v43 }
 0x9ea   :  { %v5692_v21 = vpack.c.bf16 %v5668_v37, %v5664_v63  ;;  %v5693_v45 = vpack.c.bf16 %v5669_v57, %v5665_v54  ;;  %v5453_v23 = vunpack.c.h.bf16 %v11243_v62  ;;  %8422 = vtanh.f32 %v5448_v34 }
 0x9eb   :  { %v5584_v30 = vpack.c.bf16 %v5563_v13, %v5562_v24  ;;  %v5638_v40 = vunpack.c.l.bf16 %v5582_v44  ;;  %v5639_v61 = vunpack.c.h.bf16 %v5582_v44  ;;  %8424 = vtanh.f32 %v5449_v55 }
 0x9ec   :  { %6035 = vmatmul.bf16.gmra.mxu2 %v5692_v21  ;;  %6064 = vmatmul.bf16.gmra.mxu3 %v5693_v45  ;;  %v5610_v38 = vunpack.c.l.bf16 %v5056_v8  ;;  %v5607_v5 = vunpack.c.h.bf16 %v11305_v39  ;;  %v5611_v10 = vunpack.c.h.bf16 %v5056_v8  ;;  %8426 = vtanh.f32 %v5452_v59 }
 0x9ed   :  { %v5642_v11 = vunpack.c.l.bf16 %v5584_v30  ;;  %v5643_v56 = vunpack.c.h.bf16 %v5584_v30  ;;  %v5036_v6 = vmul.f32 0.5, %v11119_v29  ;;  %v5037_v26 = vmul.f32 0.5, %v11121_v50 }
 0x9ee   :  { %v5413_v62 = vmul.f32 0.796875, %v5381_v48  ;;  %v5670_v9 = vmul.f32 %v5638_v40, %v5606_v35  ;;  %v11321_v7 = vpack.c.bf16 %v5033_v28, %v5032_v16  ;;  %8428 = vtanh.f32 %v5453_v23 }
 0x9ef   :  { %v5674_v15 = vmul.f32 %v5642_v11, %v5610_v38  ;;  %v5671_v53 = vmul.f32 %v5639_v61, %v5607_v5  ;;  %v5675_v25 = vmul.f32 %v5643_v56, %v5611_v10  ;;  %v5454_v39 = vunpack.c.l.bf16 %v11251_v19 }
 0x9f0   :  { %v8423_v8 = vpop.eup %8422  ;;  %v5427_v47 = vpack.c.bf16 %v11268_v2, %v11266_v46  ;;  %v5455_v29 = vunpack.c.h.bf16 %v11251_v19  ;;  %v5458_v50 = vunpack.c.l.bf16 %v11278_v52  ;;  %v5459_v22 = vunpack.c.h.bf16 %v11278_v52 }
 0x9f1   :  { %v8425_v48 = vpop.eup %8424  ;;  %v5694_v35 = vpack.c.bf16 %v5674_v15, %v5670_v9  ;;  %v5695_v32 = vpack.c.bf16 %v5675_v25, %v5671_v53  ;;  %v11329_v4 = vpack.c.bf16 %v5037_v26, %v5036_v6  ;;  %8430 = vtanh.f32 %v5454_v39 }
 0x9f2   :  { %v8427_v41 = vpop.eup %8426  ;;  %v5503_v27 = vpack.c.bf16 %v8425_v48, %v8423_v8  ;;  %v5038_v20 = vmul.f32 0.5, %v11156_v17  ;;  %v5039_v16 = vmul.f32 0.5, %v11159_v1  ;;  %8432 = vtanh.f32 %v5455_v29 }
 0x9f3   :  { %v5429_v46 = vpack.c.bf16 %v5413_v62, %v11280_v36  ;;  %v5608_v19 = vunpack.c.l.bf16 %v11321_v7  ;;  %v5042_v2 = vmul.f32 0.5, %v11183_v0  ;;  %8434 = vtanh.f32 %v5458_v50 }
 0x9f4   :  { %v8429_v52 = vpop.eup %8428  ;;  %v5528_v34 = vunpack.c.l.bf16 %v5503_v27  ;;  %v5529_v31 = vunpack.c.h.bf16 %v5503_v27  ;;  %v5043_v63 = vmul.f32 0.5, %v11199_v58  ;;  %8436 = vtanh.f32 %v5459_v22 }
 0x9f5   :  { %5982 = vmatmul.bf16.gmra.mxu0 %v5694_v35  ;;  %6011 = vmatmul.bf16.gmra.mxu1 %v5695_v32  ;;  %v5505_v18 = vpack.c.bf16 %v8429_v52, %v8427_v41  ;;  %v5612_v17 = vunpack.c.l.bf16 %v11329_v4  ;;  %v5609_v1 = vunpack.c.h.bf16 %v11321_v7  ;;  %v5456_v54 = vunpack.c.l.bf16 %v5427_v47 }
 0x9f6   :  { %v5560_v36 = vadd.f32 1.0, %v5528_v34  ;;  %v5561_v14 = vadd.f32 1.0, %v5529_v31  ;;  %v11339_v49 = vpack.c.bf16 %v5039_v16, %v5038_v20  ;;  %v5457_v0 = vunpack.c.h.bf16 %v5427_v47 }
 0x9f7   :  { %v8431_v33 = vpop.eup %8430  ;;  %v5532_v51 = vunpack.c.l.bf16 %v5505_v18  ;;  %v5533_v37 = vunpack.c.h.bf16 %v5505_v18  ;;  %v5613_v57 = vunpack.c.h.bf16 %v11329_v4  ;;  %v5460_v58 = vunpack.c.l.bf16 %v5429_v46 }
 0x9f8   :  { %v8433_v55 = vpop.eup %8432  ;;  %v5583_v59 = vpack.c.bf16 %v5561_v14, %v5560_v36  ;;  %v5060_v24 = vpack.c.bf16 %v5043_v63, %v5042_v2  ;;  %v5461_v13 = vunpack.c.h.bf16 %v5429_v46  ;;  %8438 = vtanh.f32 %v5456_v54 }
 0x9f9   :  { %v8435_v44 = vpop.eup %8434  ;;  %v5564_v43 = vadd.f32 1.0, %v5532_v51  ;;  %v5565_v28 = vadd.f32 1.0, %v5533_v37  ;;  %v5506_v21 = vpack.c.bf16 %v8433_v55, %v8431_v33  ;;  %8440 = vtanh.f32 %v5457_v0 }
 0x9fa   :  { %v8437_v45 = vpop.eup %8436  ;;  %v5640_v23 = vunpack.c.l.bf16 %v5583_v59  ;;  %v5641_v30 = vunpack.c.h.bf16 %v5583_v59  ;;  %v5614_v40 = vunpack.c.l.bf16 %v11339_v49  ;;  %8442 = vtanh.f32 %v5460_v58 }
 0x9fb   :  { %v5585_v61 = vpack.c.bf16 %v5565_v28, %v5564_v43  ;;  %v5508_v38 = vpack.c.bf16 %v8437_v45, %v8435_v44  ;;  %v5534_v5 = vunpack.c.l.bf16 %v5506_v21  ;;  %v5535_v10 = vunpack.c.h.bf16 %v5506_v21 }
 0x9fc   :  { %v5618_v11 = vunpack.c.l.bf16 %v5060_v24  ;;  %v5615_v56 = vunpack.c.h.bf16 %v11339_v49  ;;  %v5040_v6 = vmul.f32 0.5, %v11169_v3  ;;  %8444 = vtanh.f32 %v5461_v13 }
 0x9fd   :  { %v5644_v26 = vunpack.c.l.bf16 %v5585_v61  ;;  %v5645_v62 = vunpack.c.h.bf16 %v5585_v61  ;;  %v5538_v9 = vunpack.c.l.bf16 %v5508_v38  ;;  %v5539_v7 = vunpack.c.h.bf16 %v5508_v38 }
 0x9fe   :  { %v8439_v15 = vpop.eup %8438  ;;  %v5672_v53 = vmul.f32 %v5640_v23, %v5608_v19  ;;  %v5673_v25 = vmul.f32 %v5641_v30, %v5609_v1  ;;  %v5566_v39 = vadd.f32 1.0, %v5534_v5  ;;  %v5567_v8 = vadd.f32 1.0, %v5535_v10 }
 0x9ff   :  { %v8441_v47 = vpop.eup %8440  ;;  %v5676_v29 = vmul.f32 %v5644_v26, %v5612_v17  ;;  %v5677_v50 = vmul.f32 %v5645_v62, %v5613_v57  ;;  %v5570_v22 = vadd.f32 1.0, %v5538_v9  ;;  %v5571_v48 = vadd.f32 1.0, %v5539_v7 }
 0xa00   :  { %v8443_v35 = vpop.eup %8442  ;;  %v5586_v32 = vpack.c.bf16 %v5567_v8, %v5566_v39  ;;  %v5041_v4 = vmul.f32 0.5, %v11172_v60  ;;  %v5044_v3 = vmul.f32 0.5, %v11207_v12  ;;  %v5507_v41 = vpack.c.bf16 %v8441_v47, %v8439_v15  ;;  %v11922_v47 = vld [vmem:[#allocation45_spill] sm:$0xff] }
 0xa01   :  { %v5696_v27 = vpack.c.bf16 %v5676_v29, %v5672_v53  ;;  %v5697_v20 = vpack.c.bf16 %v5677_v50, %v5673_v25  ;;  %v5588_v16 = vpack.c.bf16 %v5571_v48, %v5570_v22  ;;  %v5045_v46 = vmul.f32 0.5, %v11209_v42 }
 0xa02   :  { %v8445_v19 = vpop.eup %8444  ;;  %v5646_v2 = vunpack.c.l.bf16 %v5586_v32  ;;  %v5647_v52 = vunpack.c.h.bf16 %v5586_v32  ;;  %v5536_v34 = vunpack.c.l.bf16 %v5507_v41  ;;  %v5537_v31 = vunpack.c.h.bf16 %v5507_v41 }
 0xa03   :  { %6040 = vmatmul.bf16.gmra.mxu2 %v5696_v27  ;;  %6069 = vmatmul.bf16.gmra.mxu3 %v5697_v20  ;;  %v5650_v63 = vunpack.c.l.bf16 %v5588_v16  ;;  %v5619_v18 = vunpack.c.h.bf16 %v5060_v24  ;;  %v5651_v17 = vunpack.c.h.bf16 %v5588_v16  ;;  %v5509_v1 = vpack.c.bf16 %v8445_v19, %v8443_v35  ;;  %v11923_v27 = vld [vmem:[#allocation44_spill] sm:$0xff] }
 0xa04   :  { %v5678_v60 = vmul.f32 %v5646_v2, %v5614_v40  ;;  %v5679_v54 = vmul.f32 %v5647_v52, %v5615_v56  ;;  %v5568_v12 = vadd.f32 1.0, %v5536_v34  ;;  %v5569_v36 = vadd.f32 1.0, %v5537_v31 }
 0xa05   :  { %v5682_v14 = vmul.f32 %v5650_v63, %v5618_v11  ;;  %v5683_v49 = vmul.f32 %v5651_v17, %v5619_v18  ;;  %v5540_v0 = vunpack.c.l.bf16 %v5509_v1  ;;  %v5541_v33 = vunpack.c.h.bf16 %v5509_v1 }
 0xa06   :  { %v5059_v42 = vpack.c.bf16 %v5041_v4, %v5040_v6  ;;  %v5061_v51 = vpack.c.bf16 %v5045_v46, %v5044_v3  ;;  %v5587_v37 = vpack.c.bf16 %v5569_v36, %v5568_v12  ;;  %v11348_v6 = vld [vmem:[#allocation14 + $0x2] ss:$0 sm:$0xff] }
 0xa07   :  { %v5698_v57 = vpack.c.bf16 %v5682_v14, %v5678_v60  ;;  %v5699_v58 = vpack.c.bf16 %v5683_v49, %v5679_v54  ;;  %v5572_v55 = vadd.f32 1.0, %v5540_v0  ;;  %v5573_v59 = vadd.f32 1.0, %v5541_v33  ;;  %v11924_v60 = vld [vmem:[#allocation46_spill] sm:$0xff] }
 0xa08   :  { %v5648_v13 = vunpack.c.l.bf16 %v5587_v37  ;;  %v5649_v44 = vunpack.c.h.bf16 %v5587_v37  ;;  %v5616_v43 = vunpack.c.l.bf16 %v5059_v42  ;;  %v5620_v28 = vunpack.c.l.bf16 %v5061_v51 }
 0xa09   :  { %5987 = vmatmul.bf16.gmra.mxu0 %v5698_v57  ;;  %6016 = vmatmul.bf16.gmra.mxu1 %v5699_v58  ;;  %v5589_v24 = vpack.c.bf16 %v5573_v59, %v5572_v55  ;;  %v5617_v45 = vunpack.c.h.bf16 %v5059_v42  ;;  %v5621_v23 = vunpack.c.h.bf16 %v5061_v51  ;;  %v11925_v51 = vld [vmem:[#allocation47_spill] sm:$0xff] }
 0xa0a   :  { %v5680_v40 = vmul.f32 %v5648_v13, %v5616_v43 }
 0xa0b   :  { %v5652_v21 = vunpack.c.l.bf16 %v5589_v24  ;;  %v5653_v30 = vunpack.c.h.bf16 %v5589_v24  ;;  %v5681_v38 = vmul.f32 %v5649_v44, %v5617_v45 }
 0xa0d   :  { %v5684_v61 = vmul.f32 %v5652_v21, %v5620_v28  ;;  %v5685_v5 = vmul.f32 %v5653_v30, %v5621_v23  ;;  %v8104_v28 = vld [vmem:[#allocation22 + $0x38] sm:$0xff]  ;;  %v8103_v30 = vld [vmem:[#allocation22 + $0x30] sm:$0xff] }
 0xa0e   :  { %6362 = vmatpush.bf16.msrb.mxu0 %v8104_v28 }
 0xa0f   :  { %v5700_v10 = vpack.c.bf16 %v5684_v61, %v5680_v40  ;;  %v5701_v11 = vpack.c.bf16 %v5685_v5, %v5681_v38  ;;  %v11926_v40 = vld [vmem:[#allocation43_spill] sm:$0xff] }
 0xa12   :  { %6363 = vmatpush.bf16.msrb.mxu0 %v8103_v30 }
 0xa13   :  { %6045 = vmatmul.bf16.gmra.mxu2 %v5700_v10  ;;  %6074 = vmatmul.bf16.gmra.mxu3 %v5701_v11  ;;  %v8102_v11 = vld [vmem:[#allocation22 + $0x28] sm:$0xff] }
 0xa16   :  { %6364 = vmatpush.bf16.msrb.mxu0 %v8102_v11 }
 0xa41   :  { %v5973_v56 = vpop.f32.mrf.mxu0 }
 0xa42   :  { %v5974_v26 = vadd.f32 %v11348_v6, %v5973_v56 }
 0xa44   :  { %v6002_v62 = vpop.f32.mrf.mxu1 }
 0xa45   :  { %v6003_v9 = vadd.f32 %v6002_v62, %v5974_v26 }
 0xa49   :  { %v5975_v7 = vpop.f32.mrf.mxu0 }
 0xa4a   :  { %v5976_v39 = vadd.f32 %v11348_v6, %v5975_v7 }
 0xa4c   :  { %v6004_v50 = vpop.f32.mrf.mxu1 }
 0xa4d   :  { %v6005_v22 = vadd.f32 %v6004_v50, %v5976_v39 }
 0xa56   :  { %v6031_v15 = vpop.f32.mrf.mxu2  ;;  %v6060_v53 = vpop.f32.mrf.mxu3 }
 0xa57   :  { %v6032_v25 = vadd.f32 %v6031_v15, %v6003_v9 }
 0xa59   :  { %v6061_v8 = vadd.f32 %v6060_v53, %v6032_v25  ;;  %v11927_v53 = vld [vmem:[#allocation42_spill] sm:$0xff] }
 0xa5b   :  { %v11353_v29 = vadd.f32 %v6061_v8, %v11922_v47 }
 0xa5d   :  { %6092 = vadd.xlane.f32.xlu2 %v11353_v29  ;;  %v6116_v48 = vmul.f32 %v11353_v29, %v11353_v29 }
 0xa5e   :  { %v6033_v35 = vpop.f32.mrf.mxu2  ;;  %v6062_v4 = vpop.f32.mrf.mxu3 }
 0xa5f   :  { %v6034_v32 = vadd.f32 %v6033_v35, %v6005_v22  ;;  %6124 = vadd.xlane.f32.xlu1 %v6116_v48 }
 0xa61   :  { %v6063_v3 = vadd.f32 %v6062_v4, %v6034_v32  ;;  %v11928_v4 = vld [vmem:[#allocation55_spill] sm:$0xff] }
 0xa62   :  { %v5978_v41 = vpop.f32.mrf.mxu0  ;;  %v6007_v19 = vpop.f32.mrf.mxu1 }
 0xa63   :  { %v11359_v20 = vadd.f32 %v6063_v3, %v11923_v27  ;;  %v5979_v46 = vadd.f32 %v11348_v6, %v5978_v41 }
 0xa65   :  { %6094 = vadd.xlane.f32.xlu0 %v11359_v20  ;;  %v6117_v16 = vmul.f32 %v11359_v20, %v11359_v20  ;;  %v6008_v52 = vadd.f32 %v6007_v19, %v5979_v46 }
 0xa67   :  { %6126 = vadd.xlane.f32.xlu2 %v6117_v16 }
 0xa6a   :  { %v5980_v2 = vpop.f32.mrf.mxu0  ;;  %v6009_v1 = vpop.f32.mrf.mxu1 }
 0xa6b   :  { %v5981_v18 = vadd.f32 %v11348_v6, %v5980_v2 }
 0xa6d   :  { %v6010_v12 = vadd.f32 %v6009_v1, %v5981_v18 }
 0xa6f   :  { %v6036_v34 = vpop.f32.mrf.mxu2  ;;  %v6065_v31 = vpop.f32.mrf.mxu3 }
 0xa70   :  { %v6037_v63 = vadd.f32 %v6036_v34, %v6008_v52  ;;  %v11929_v34 = vld [vmem:[#allocation57_spill] sm:$0xff] }
 0xa72   :  { %v6066_v17 = vadd.f32 %v6065_v31, %v6037_v63  ;;  %v5983_v14 = vpop.f32.mrf.mxu0  ;;  %v6012_v57 = vpop.f32.mrf.mxu1  ;;  %v8101_v63 = vld [vmem:[#allocation22 + $0x20] sm:$0xff] }
 0xa73   :  { %v5984_v55 = vadd.f32 %v11348_v6, %v5983_v14  ;;  %6365 = vmatpush.bf16.msrb.mxu0 %v8101_v63 }
 0xa74   :  { %v11367_v54 = vadd.f32 %v6066_v17, %v11924_v60  ;;  %v11930_v17 = vld [vmem:[#allocation39_spill] sm:$0xff] }
 0xa75   :  { %v6013_v24 = vadd.f32 %v6012_v57, %v5984_v55 }
 0xa76   :  { %6096 = vadd.xlane.f32.xlu0 %v11367_v54  ;;  %v6118_v36 = vmul.f32 %v11367_v54, %v11367_v54 }
 0xa77   :  { %v6038_v49 = vpop.f32.mrf.mxu2  ;;  %v6067_v33 = vpop.f32.mrf.mxu3 }
 0xa78   :  { %v6039_v0 = vadd.f32 %v6038_v49, %v6010_v12  ;;  %6128 = vadd.xlane.f32.xlu2 %v6118_v36  ;;  %v8100_v49 = vld [vmem:[#allocation22 + $0x18] sm:$0xff] }
 0xa79   :  { %6366 = vmatpush.bf16.msrb.mxu0 %v8100_v49 }
 0xa7a   :  { %v6068_v42 = vadd.f32 %v6067_v33, %v6039_v0  ;;  %v5985_v59 = vpop.f32.mrf.mxu0  ;;  %v6014_v21 = vpop.f32.mrf.mxu1 }
 0xa7b   :  { %v5986_v45 = vadd.f32 %v11348_v6, %v5985_v59 }
 0xa7c   :  { %v11373_v37 = vadd.f32 %v6068_v42, %v11925_v51 }
 0xa7d   :  { %v6015_v5 = vadd.f32 %v6014_v21, %v5986_v45 }
 0xa7e   :  { %6098 = vadd.xlane.f32.xlu1 %v11373_v37  ;;  %v6119_v58 = vmul.f32 %v11373_v37, %v11373_v37 }
 0xa80   :  { %6130 = vadd.xlane.f32.xlu0 %v6119_v58 }
 0xa86   :  { %v6041_v13 = vpop.f32.mrf.mxu2  ;;  %v6070_v44 = vpop.f32.mrf.mxu3 }
 0xa87   :  { %v6042_v43 = vadd.f32 %v6041_v13, %v6013_v24  ;;  %v5988_v38 = vpop.f32.mrf.mxu0  ;;  %v6017_v15 = vpop.f32.mrf.mxu1 }
 0xa88   :  { %v5989_v9 = vadd.f32 %v11348_v6, %v5988_v38 }
 0xa89   :  { %v6071_v23 = vadd.f32 %v6070_v44, %v6042_v43  ;;  %v8099_v44 = vld [vmem:[#allocation22 + $0x10] sm:$0xff] }
 0xa8a   :  { %v6018_v39 = vadd.f32 %v6017_v15, %v5989_v9  ;;  %6367 = vmatpush.bf16.msrb.mxu0 %v8099_v44 }
 0xa8b   :  { %v11381_v61 = vadd.f32 %v6071_v23, %v11926_v40 }
 0xa8d   :  { %6100 = vadd.xlane.f32.xlu1 %v11381_v61  ;;  %v6120_v10 = vmul.f32 %v11381_v61, %v11381_v61 }
 0xa8e   :  { %v6043_v56 = vpop.f32.mrf.mxu2  ;;  %v6072_v26 = vpop.f32.mrf.mxu3 }
 0xa8f   :  { %v6044_v62 = vadd.f32 %v6043_v56, %v6015_v5  ;;  %6132 = vadd.xlane.f32.xlu0 %v6120_v10  ;;  %v5990_v8 = vpop.f32.mrf.mxu0  ;;  %v6019_v41 = vpop.f32.mrf.mxu1  ;;  %v8098_v5 = vld [vmem:[#allocation22 + $0x8] sm:$0xff] }
 0xa90   :  { %v5991_v35 = vadd.f32 %v11348_v6, %v5990_v8  ;;  %6368 = vmatpush.bf16.msrb.mxu0 %v8098_v5 }
 0xa91   :  { %v6073_v7 = vadd.f32 %v6072_v26, %v6044_v62 }
 0xa92   :  { %v6020_v27 = vadd.f32 %v6019_v41, %v5991_v35 }
 0xa93   :  { %v11388_v25 = vadd.f32 %v6073_v7, %v11927_v53 }
 0xa95   :  { %6102 = vadd.xlane.f32.xlu2 %v11388_v25  ;;  %v6121_v47 = vmul.f32 %v11388_v25, %v11388_v25 }
 0xa96   :  { %v6046_v50 = vpop.f32.mrf.mxu2  ;;  %v6075_v22 = vpop.f32.mrf.mxu3 }
 0xa97   :  { %v6047_v48 = vadd.f32 %v6046_v50, %v6018_v39  ;;  %6134 = vadd.xlane.f32.xlu1 %v6121_v47 }
 0xa99   :  { %v6076_v32 = vadd.f32 %v6075_v22, %v6047_v48 }
 0xa9b   :  { %v11395_v3 = vadd.f32 %v6076_v32, %v11928_v4 }
 0xa9d   :  { %6104 = vadd.xlane.f32.xlu2 %v11395_v3  ;;  %v6122_v16 = vmul.f32 %v11395_v3, %v11395_v3 }
 0xa9e   :  { %v6048_v46 = vpop.f32.mrf.mxu2  ;;  %v6077_v2 = vpop.f32.mrf.mxu3 }
 0xa9f   :  { %v6049_v19 = vadd.f32 %v6048_v46, %v6020_v27  ;;  %6136 = vadd.xlane.f32.xlu1 %v6122_v16 }
 0xaa1   :  { %v6078_v52 = vadd.f32 %v6077_v2, %v6049_v19  ;;  %v11424_v19 = vld [vmem:[#allocation19 + $0x2] ss:$0 sm:$0xff] }
 0xaa3   :  { %v11401_v31 = vadd.f32 %v6078_v52, %v11929_v34 }
 0xaa5   :  { %6106 = vadd.xlane.f32.xlu0 %v11401_v31  ;;  %v6123_v6 = vmul.f32 %v11401_v31, %v11401_v31 }
 0xaa7   :  { %6138 = vadd.xlane.f32.xlu2 %v6123_v6  ;;  %v8097_v6 = vld [vmem:[#allocation22] sm:$0xff] }
 0xaa8   :  { %6369 = vmatpush.bf16.msrb.mxu0 %v8097_v6 }
 0xad0   :  { %v6093_v18 = vpop.xlane.xlu2 %6092 }
 0xad1   :  { %v6108_v1 = vmul.f32 %v6093_v18, %v11930_v17 }
 0xad2   :  { %v6125_v60 = vpop.xlane.xlu1 %6124 }
 0xad3   :  { %v6148_v12 = vmul.f32 %v6108_v1, %v6108_v1  ;;  %v6140_v36 = vmul.f32 %v6125_v60, %v11930_v17  ;;  %v6164_v41 = vsub.f32 %v11353_v29, %v6108_v1  ;;  %v11428_v60 = vld [vmem:[#allocation20 + $0x2] ss:$0 sm:$0xff] }
 0xad5   :  { %v6156_v14 = vsub.f32 %v6140_v36, %v6148_v12 }
 0xad7   :  { %v6172_v0 = vadd.f32 1e-05, %v6156_v14 }
 0xad8   :  { %v6095_v33 = vpop.xlane.xlu0 %6094 }
 0xad9   :  { %v6109_v42 = vmul.f32 %v6095_v33, %v11930_v17  ;;  %8446 = vrsqrt.f32 %v6172_v0  ;;  %vm6186_vm12 = vweird.f32 %v6172_v0 }
 0xada   :  { %v6127_v51 = vpop.xlane.xlu2 %6126 }
 0xadb   :  { %v6149_v57 = vmul.f32 %v6109_v42, %v6109_v42  ;;  %v6141_v58 = vmul.f32 %v6127_v51, %v11930_v17  ;;  %v6165_v27 = vsub.f32 %v11359_v20, %v6109_v42 }
 0xadd   :  { %v6157_v55 = vsub.f32 %v6141_v58, %v6149_v57 }
 0xadf   :  { %v6173_v59 = vadd.f32 1e-05, %v6157_v55  ;;  %v8447_v24 = vpop.eup %8446 }
 0xae0   :  { %v6181_v13 = vmul.f32 %v8447_v24, %v6172_v0  ;;  %vm6187_vm10 = vweird.f32 %v8447_v24 }
 0xae1   :  { %8448 = vrsqrt.f32 %v6173_v59  ;;  %vm6188_vm13 = vmor %vm6186_vm12, %vm6187_vm10  ;;  %vm6196_vm14 = vweird.f32 %v6173_v59 }
 0xae2   :  { %v6182_v28 = vmul.f32 %v8447_v24, %v6181_v13 }
 0xae4   :  { %v6183_v40 = vmul.f32 0.5, %v6182_v28 }
 0xae6   :  { %v6184_v62 = vsub.f32 1.5, %v6183_v40 }
 0xae7   :  { %v8449_v43 = vpop.eup %8448 }
 0xae8   :  { %v6191_v21 = vmul.f32 %v8449_v43, %v6173_v59  ;;  %v6185_v39 = vmul.f32 %v8447_v24, %v6184_v62  ;;  %vm6197_vm11 = vweird.f32 %v8449_v43 }
 0xae9   :  { %v6097_v45 = vpop.xlane.xlu0 %6096  ;;  %vm6198_vm15 = vmor %vm6196_vm14, %vm6197_vm11 }
 0xaea   :  { %v6192_v23 = vmul.f32 %v8449_v43, %v6191_v21  ;;  %v11411_v30 = vmul.f32 %v6097_v45, %v11930_v17  ;;  %v6189_v35 = vsel %vm6188_vm13, %v8447_v24, %v6185_v39 }
 0xaeb   :  { %v6129_v38 = vpop.xlane.xlu2 %6128  ;;  %v6260_v2 = vmul.f32 %v6189_v35, %v6164_v41 }
 0xaec   :  { %v6193_v10 = vmul.f32 0.5, %v6192_v23  ;;  %v6150_v11 = vmul.f32 %v11411_v30, %v11411_v30  ;;  %v6142_v56 = vmul.f32 %v6129_v38, %v11930_v17  ;;  %v6166_v5 = vsub.f32 %v11367_v54, %v11411_v30 }
 0xaed   :  { %v6271_v63 = vmul.f32 %v11424_v19, %v6260_v2 }
 0xaee   :  { %v6158_v26 = vsub.f32 %v6142_v56, %v6150_v11  ;;  %v6194_v9 = vsub.f32 1.5, %v6193_v10 }
 0xaef   :  { %v6282_v49 = vadd.f32 %v11428_v60, %v6271_v63 }
 0xaf0   :  { %v6174_v7 = vadd.f32 1e-05, %v6158_v26  ;;  %v6195_v8 = vmul.f32 %v8449_v43, %v6194_v9 }
 0xaf1   :  { %v6099_v15 = vpop.xlane.xlu1 %6098 }
 0xaf2   :  { %8450 = vrsqrt.f32 %v6174_v7  ;;  %v11417_v53 = vmul.f32 %v6099_v15, %v11930_v17  ;;  %v6199_v32 = vsel %vm6198_vm15, %v8449_v43, %v6195_v8  ;;  %vm6206_vm1 = vweird.f32 %v6174_v7 }
 0xaf3   :  { %v6131_v47 = vpop.xlane.xlu0 %6130  ;;  %v6261_v52 = vmul.f32 %v6199_v32, %v6165_v27 }
 0xaf4   :  { %v6151_v50 = vmul.f32 %v11417_v53, %v11417_v53  ;;  %v6143_v22 = vmul.f32 %v6131_v47, %v11930_v17  ;;  %v6167_v9 = vsub.f32 %v11373_v37, %v11417_v53 }
 0xaf5   :  { %v6272_v18 = vmul.f32 %v11424_v19, %v6261_v52 }
 0xaf6   :  { %v6159_v48 = vsub.f32 %v6143_v22, %v6151_v50 }
 0xaf7   :  { %v6283_v0 = vadd.f32 %v11428_v60, %v6272_v18 }
 0xaf8   :  { %v8451_v4 = vpop.eup %8450  ;;  %v6175_v16 = vadd.f32 1e-05, %v6159_v48 }
 0xaf9   :  { %v6201_v46 = vmul.f32 %v8451_v4, %v6174_v7  ;;  %v6290_v58 = vpack.c.bf16 %v6283_v0, %v6282_v49  ;;  %vm6207_vm0 = vweird.f32 %v8451_v4 }
 0xafa   :  { %8452 = vrsqrt.f32 %v6175_v16  ;;  %vm6208_vm2 = vmor %vm6206_vm1, %vm6207_vm0  ;;  %vm6216_vm4 = vweird.f32 %v6175_v16 }
 0xafb   :  { %v6202_v34 = vmul.f32 %v8451_v4, %v6201_v46  ;;  %6370 = vmatmul.bf16.vlgmr.msrb.gmra.mxu0 %v6290_v58 }
 0xafd   :  { %v6203_v12 = vmul.f32 0.5, %v6202_v34 }
 0xaff   :  { %v6204_v33 = vsub.f32 1.5, %v6203_v12 }
 0xb00   :  { %v8453_v29 = vpop.eup %8452  ;;  %v6101_v1 = vpop.xlane.xlu1 %6100 }
 0xb01   :  { %v6211_v20 = vmul.f32 %v8453_v29, %v6175_v16  ;;  %v11431_v36 = vmul.f32 %v6101_v1, %v11930_v17  ;;  %v6205_v24 = vmul.f32 %v8451_v4, %v6204_v33  ;;  %vm6217_vm3 = vweird.f32 %v8453_v29 }
 0xb02   :  { %v6133_v14 = vpop.xlane.xlu0 %6132  ;;  %vm6218_vm5 = vmor %vm6216_vm4, %vm6217_vm3 }
 0xb03   :  { %v6212_v42 = vmul.f32 %v8453_v29, %v6211_v20  ;;  %v6152_v51 = vmul.f32 %v11431_v36, %v11431_v36  ;;  %v6144_v57 = vmul.f32 %v6133_v14, %v11930_v17  ;;  %v6209_v45 = vsel %vm6208_vm2, %v8451_v4, %v6205_v24 }
 0xb04   :  { %v6262_v11 = vmul.f32 %v6209_v45, %v6166_v5  ;;  %v6168_v20 = vsub.f32 %v11381_v61, %v11431_v36 }
 0xb05   :  { %v6213_v55 = vmul.f32 0.5, %v6212_v42  ;;  %v6160_v59 = vsub.f32 %v6144_v57, %v6152_v51 }
 0xb06   :  { %v6273_v54 = vmul.f32 %v11424_v19, %v6262_v11 }
 0xb07   :  { %v6214_v13 = vsub.f32 1.5, %v6213_v55  ;;  %v6176_v44 = vadd.f32 1e-05, %v6160_v59 }
 0xb08   :  { %v6103_v43 = vpop.xlane.xlu2 %6102  ;;  %v6284_v53 = vadd.f32 %v11428_v60, %v6273_v54 }
 0xb09   :  { %v11439_v28 = vmul.f32 %v6103_v43, %v11930_v17  ;;  %8454 = vrsqrt.f32 %v6176_v44  ;;  %v6215_v23 = vmul.f32 %v8453_v29, %v6214_v13  ;;  %vm6226_vm7 = vweird.f32 %v6176_v44 }
 0xb0a   :  { %v6135_v21 = vpop.xlane.xlu1 %6134 }
 0xb0b   :  { %v6153_v40 = vmul.f32 %v11439_v28, %v11439_v28  ;;  %v6145_v38 = vmul.f32 %v6135_v21, %v11930_v17  ;;  %v6219_v56 = vsel %vm6218_vm5, %v8453_v29, %v6215_v23  ;;  %v6169_v57 = vsub.f32 %v11388_v25, %v11439_v28 }
 0xb0c   :  { %v6263_v47 = vmul.f32 %v6219_v56, %v6167_v9 }
 0xb0d   :  { %v6161_v10 = vsub.f32 %v6145_v38, %v6153_v40 }
 0xb0e   :  { %v6274_v48 = vmul.f32 %v11424_v19, %v6263_v47 }
 0xb0f   :  { %v6177_v26 = vadd.f32 1e-05, %v6161_v10  ;;  %v8455_v62 = vpop.eup %8454 }
 0xb10   :  { %v6105_v7 = vpop.xlane.xlu2 %6104  ;;  %v6221_v15 = vmul.f32 %v8455_v62, %v6176_v44  ;;  %v6285_v32 = vadd.f32 %v11428_v60, %v6274_v48  ;;  %vm6227_vm6 = vweird.f32 %v8455_v62 }
 0xb11   :  { %8456 = vrsqrt.f32 %v6177_v26  ;;  %v11449_v39 = vmul.f32 %v6105_v7, %v11930_v17  ;;  %vm6228_vm8 = vmor %vm6226_vm7, %vm6227_vm6  ;;  %vm6236_vm10 = vweird.f32 %v6177_v26 }
 0xb12   :  { %v6137_v8 = vpop.xlane.xlu1 %6136  ;;  %v6222_v30 = vmul.f32 %v8455_v62, %v6221_v15  ;;  %v6291_v2 = vpack.c.bf16 %v6285_v32, %v6284_v53 }
 0xb13   :  { %v6146_v50 = vmul.f32 %v6137_v8, %v11930_v17  ;;  %v6154_v22 = vmul.f32 %v11449_v39, %v11449_v39  ;;  %v6170_v10 = vsub.f32 %v11395_v3, %v11449_v39  ;;  %v8168_v3 = vld [vmem:[#allocation23] ss:$0 sm:$0xff] }
 0xb14   :  { %v6223_v35 = vmul.f32 0.5, %v6222_v30  ;;  %6375 = vmatmul.bf16.gmra.mxu0 %v6291_v2 }
 0xb15   :  { %v6162_v37 = vsub.f32 %v6146_v50, %v6154_v22 }
 0xb16   :  { %v6224_v41 = vsub.f32 1.5, %v6223_v35 }
 0xb17   :  { %v8457_v4 = vpop.eup %8456  ;;  %v6178_v16 = vadd.f32 1e-05, %v6162_v37 }
 0xb18   :  { %v6231_v27 = vmul.f32 %v8457_v4, %v6177_v26  ;;  %v6107_v46 = vpop.xlane.xlu0 %6106  ;;  %v6225_v52 = vmul.f32 %v8455_v62, %v6224_v41  ;;  %vm6237_vm9 = vweird.f32 %v8457_v4  ;;  %v8112_v41 = vld [vmem:[%s11722_s18 + $0x38] sm:$0xff] }
 0xb19   :  { %v6115_v34 = vmul.f32 %v6107_v46, %v11930_v17  ;;  %8458 = vrsqrt.f32 %v6178_v16  ;;  %vm6238_vm11 = vmor %vm6236_vm10, %vm6237_vm9  ;;  %vm6246_vm13 = vweird.f32 %v6178_v16  ;;  %6735 = vmatpush.bf16.msrb.mxu1 %v8112_v41 }
 0xb1a   :  { %v6232_v6 = vmul.f32 %v8457_v4, %v6231_v27  ;;  %v6139_v63 = vpop.xlane.xlu2 %6138  ;;  %v6229_v29 = vsel %vm6228_vm8, %v8455_v62, %v6225_v52 }
 0xb1b   :  { %v6155_v18 = vmul.f32 %v6115_v34, %v6115_v34  ;;  %v6147_v12 = vmul.f32 %v6139_v63, %v11930_v17  ;;  %v6264_v33 = vmul.f32 %v6229_v29, %v6168_v20  ;;  %v6171_v62 = vsub.f32 %v11401_v31, %v6115_v34  ;;  %v8111_v20 = vld [vmem:[%s11722_s18 + $0x30] sm:$0xff] }
 0xb1c   :  { %v6233_v1 = vmul.f32 0.5, %v6232_v6 }
 0xb1d   :  { %v6163_v14 = vsub.f32 %v6147_v12, %v6155_v18  ;;  %v6275_v13 = vmul.f32 %v11424_v19, %v6264_v33  ;;  %6736 = vmatpush.bf16.msrb.mxu1 %v8111_v20  ;;  %v8107_v20 = vld [vmem:[%s11722_s18 + $0x10] sm:$0xff] }
 0xb1e   :  { %v6234_v49 = vsub.f32 1.5, %v6233_v1 }
 0xb1f   :  { %v6179_v0 = vadd.f32 1e-05, %v6163_v14  ;;  %v8459_v42 = vpop.eup %8458  ;;  %v6286_v21 = vadd.f32 %v11428_v60, %v6275_v13 }
 0xb20   :  { %v6235_v51 = vmul.f32 %v8457_v4, %v6234_v49  ;;  %v6241_v58 = vmul.f32 %v8459_v42, %v6178_v16  ;;  %vm6247_vm12 = vweird.f32 %v8459_v42 }
 0xb21   :  { %8460 = vrsqrt.f32 %v6179_v0  ;;  %vm6248_vm14 = vmor %vm6246_vm13, %vm6247_vm12  ;;  %vm6256_vm0 = vweird.f32 %v6179_v0 }
 0xb22   :  { %v6239_v55 = vsel %vm6238_vm11, %v8457_v4, %v6235_v51  ;;  %v6242_v59 = vmul.f32 %v8459_v42, %v6241_v58  ;;  %v8110_v58 = vld [vmem:[%s11722_s18 + $0x28] sm:$0xff] }
 0xb23   :  { %v6265_v24 = vmul.f32 %v6239_v55, %v6169_v57  ;;  %6737 = vmatpush.bf16.msrb.mxu1 %v8110_v58 }
 0xb24   :  { %v6243_v61 = vmul.f32 0.5, %v6242_v59 }
 0xb25   :  { %v6276_v36 = vmul.f32 %v11424_v19, %v6265_v24 }
 0xb26   :  { %v6244_v43 = vsub.f32 1.5, %v6243_v61 }
 0xb27   :  { %v8461_v44 = vpop.eup %8460  ;;  %v6287_v45 = vadd.f32 %v11428_v60, %v6276_v36 }
 0xb28   :  { %v6251_v23 = vmul.f32 %v8461_v44, %v6179_v0  ;;  %v6245_v25 = vmul.f32 %v8459_v42, %v6244_v43  ;;  %vm6257_vm15 = vweird.f32 %v8461_v44 }
 0xb29   :  { %v6292_v28 = vpack.c.bf16 %v6287_v45, %v6286_v21  ;;  %vm6258_vm1 = vmor %vm6256_vm0, %vm6257_vm15 }
 0xb2a   :  { %v6252_v40 = vmul.f32 %v8461_v44, %v6251_v23  ;;  %v6249_v38 = vsel %vm6248_vm14, %v8459_v42, %v6245_v25  ;;  %v8109_v23 = vld [vmem:[%s11722_s18 + $0x20] sm:$0xff] }
 0xb2b   :  { %6380 = vmatmul.bf16.gmra.mxu0 %v6292_v28  ;;  %v6266_v56 = vmul.f32 %v6249_v38, %v6170_v10  ;;  %6738 = vmatpush.bf16.msrb.mxu1 %v8109_v23 }
 0xb2c   :  { %v6253_v5 = vmul.f32 0.5, %v6252_v40 }
 0xb2d   :  { %v6277_v15 = vmul.f32 %v11424_v19, %v6266_v56 }
 0xb2e   :  { %v6254_v11 = vsub.f32 1.5, %v6253_v5 }
 0xb2f   :  { %v6288_v47 = vadd.f32 %v11428_v60, %v6277_v15  ;;  %v11538_v15 = vld [vmem:[#allocation25] ss:$0 sm:$0xff] }
 0xb30   :  { %v6255_v26 = vmul.f32 %v8461_v44, %v6254_v11 }
 0xb32   :  { %v6259_v9 = vsel %vm6258_vm1, %v8461_v44, %v6255_v26 }
 0xb33   :  { %v6267_v7 = vmul.f32 %v6259_v9, %v6171_v62 }
 0xb35   :  { %v6278_v8 = vmul.f32 %v11424_v19, %v6267_v7 }
 0xb37   :  { %v6289_v54 = vadd.f32 %v11428_v60, %v6278_v8 }
 0xb39   :  { %v6293_v30 = vpack.c.bf16 %v6289_v54, %v6288_v47 }
 0xb3b   :  { %6385 = vmatmul.bf16.gmra.mxu0 %v6293_v30 }
 0xb78   :  { %v6371_v39 = vpop.f32.mrf.mxu0 }
 0xb79   :  { %v11475_v50 = vadd.f32 %v8168_v3, %v6371_v39 }
 0xb7b   :  { %6393 = vadd.xlane.f32.xlu0 %v11475_v50  ;;  %v6417_v31 = vmul.f32 %v11475_v50, %v11475_v50 }
 0xb7d   :  { %6425 = vadd.xlane.f32.xlu2 %v6417_v31 }
 0xb80   :  { %v6373_v22 = vpop.f32.mrf.mxu0 }
 0xb81   :  { %v11480_v48 = vadd.f32 %v8168_v3, %v6373_v22 }
 0xb83   :  { %6395 = vadd.xlane.f32.xlu1 %v11480_v48  ;;  %v6418_v19 = vmul.f32 %v11480_v48, %v11480_v48 }
 0xb85   :  { %6427 = vadd.xlane.f32.xlu0 %v6418_v19 }
 0xb91   :  { %v6376_v60 = vpop.f32.mrf.mxu0 }
 0xb92   :  { %v11485_v35 = vadd.f32 %v8168_v3, %v6376_v60 }
 0xb94   :  { %6397 = vadd.xlane.f32.xlu1 %v11485_v35  ;;  %v6419_v37 = vmul.f32 %v11485_v35, %v11485_v35 }
 0xb96   :  { %6429 = vadd.xlane.f32.xlu0 %v6419_v37 }
 0xb99   :  { %v6378_v53 = vpop.f32.mrf.mxu0 }
 0xb9a   :  { %v11490_v32 = vadd.f32 %v8168_v3, %v6378_v53 }
 0xb9c   :  { %6399 = vadd.xlane.f32.xlu2 %v11490_v32  ;;  %v6420_v4 = vmul.f32 %v11490_v32, %v11490_v32 }
 0xb9e   :  { %6431 = vadd.xlane.f32.xlu1 %v6420_v4 }
 0xba8   :  { %v6381_v27 = vpop.f32.mrf.mxu0 }
 0xba9   :  { %v11498_v16 = vadd.f32 %v8168_v3, %v6381_v27 }
 0xbab   :  { %6401 = vadd.xlane.f32.xlu2 %v11498_v16  ;;  %v6421_v46 = vmul.f32 %v11498_v16, %v11498_v16 }
 0xbad   :  { %6433 = vadd.xlane.f32.xlu1 %v6421_v46 }
 0xbb0   :  { %v6383_v2 = vpop.f32.mrf.mxu0 }
 0xbb1   :  { %v11503_v52 = vadd.f32 %v8168_v3, %v6383_v2 }
 0xbb3   :  { %6403 = vadd.xlane.f32.xlu0 %v11503_v52  ;;  %v6422_v34 = vmul.f32 %v11503_v52, %v11503_v52 }
 0xbb5   :  { %6435 = vadd.xlane.f32.xlu2 %v6422_v34 }
 0xbb8   :  { %v6386_v6 = vpop.f32.mrf.mxu0 }
 0xbb9   :  { %v11508_v63 = vadd.f32 %v8168_v3, %v6386_v6 }
 0xbbb   :  { %6405 = vadd.xlane.f32.xlu0 %v11508_v63  ;;  %v6423_v18 = vmul.f32 %v11508_v63, %v11508_v63 }
 0xbbd   :  { %6437 = vadd.xlane.f32.xlu2 %v6423_v18 }
 0xbc0   :  { %v6388_v12 = vpop.f32.mrf.mxu0 }
 0xbc1   :  { %v11513_v29 = vadd.f32 %v8168_v3, %v6388_v12  ;;  %v8108_v3 = vld [vmem:[%s11722_s18 + $0x18] sm:$0xff] }
 0xbc2   :  { %6739 = vmatpush.bf16.msrb.mxu1 %v8108_v3 }
 0xbc3   :  { %6407 = vadd.xlane.f32.xlu1 %v11513_v29  ;;  %v6424_v1 = vmul.f32 %v11513_v29, %v11513_v29 }
 0xbc5   :  { %6439 = vadd.xlane.f32.xlu0 %v6424_v1 }
 0xbc6   :  { %6740 = vmatpush.bf16.msrb.mxu1 %v8107_v20 }
 0xbee   :  { %v6394_v14 = vpop.xlane.xlu0 %6393 }
 0xbef   :  { %v6409_v49 = vmul.f32 %v6394_v14, %v11930_v17 }
 0xbf0   :  { %v6426_v0 = vpop.xlane.xlu2 %6425 }
 0xbf1   :  { %v6449_v33 = vmul.f32 %v6409_v49, %v6409_v49  ;;  %v6441_v42 = vmul.f32 %v6426_v0, %v11930_v17  ;;  %v6465_v9 = vsub.f32 %v11475_v50, %v6409_v49  ;;  %v11546_v50 = vld [vmem:[#allocation26] ss:$0 sm:$0xff] }
 0xbf3   :  { %v6457_v51 = vsub.f32 %v6441_v42, %v6449_v33 }
 0xbf5   :  { %v6473_v57 = vadd.f32 1e-05, %v6457_v51 }
 0xbf6   :  { %v6396_v55 = vpop.xlane.xlu1 %6395 }
 0xbf7   :  { %8462 = vrsqrt.f32 %v6473_v57  ;;  %v6410_v59 = vmul.f32 %v6396_v55, %v11930_v17  ;;  %vm6487_vm3 = vweird.f32 %v6473_v57 }
 0xbf8   :  { %v6428_v24 = vpop.xlane.xlu0 %6427 }
 0xbf9   :  { %v6450_v13 = vmul.f32 %v6410_v59, %v6410_v59  ;;  %v6442_v61 = vmul.f32 %v6428_v24, %v11930_v17  ;;  %v6466_v27 = vsub.f32 %v11480_v48, %v6410_v59 }
 0xbfb   :  { %v6458_v36 = vsub.f32 %v6442_v61, %v6450_v13 }
 0xbfd   :  { %v8463_v44 = vpop.eup %8462  ;;  %v6474_v43 = vadd.f32 1e-05, %v6458_v36 }
 0xbfe   :  { %v6482_v21 = vmul.f32 %v8463_v44, %v6473_v57  ;;  %vm6488_vm2 = vweird.f32 %v8463_v44 }
 0xbff   :  { %8464 = vrsqrt.f32 %v6474_v43  ;;  %vm6489_vm4 = vmor %vm6487_vm3, %vm6488_vm2  ;;  %vm6497_vm6 = vweird.f32 %v6474_v43 }
 0xc00   :  { %v6483_v45 = vmul.f32 %v8463_v44, %v6482_v21 }
 0xc02   :  { %v6484_v25 = vmul.f32 0.5, %v6483_v45 }
 0xc04   :  { %v6485_v38 = vsub.f32 1.5, %v6484_v25  ;;  %v8106_v25 = vld [vmem:[%s11722_s18 + $0x8] sm:$0xff] }
 0xc05   :  { %v8465_v10 = vpop.eup %8464  ;;  %6741 = vmatpush.bf16.msrb.mxu1 %v8106_v25 }
 0xc06   :  { %v6486_v26 = vmul.f32 %v8463_v44, %v6485_v38  ;;  %v6492_v62 = vmul.f32 %v8465_v10, %v6474_v43  ;;  %vm6498_vm5 = vweird.f32 %v8465_v10 }
 0xc07   :  { %v6398_v28 = vpop.xlane.xlu1 %6397  ;;  %vm6499_vm7 = vmor %vm6497_vm6, %vm6498_vm5 }
 0xc08   :  { %v11532_v40 = vmul.f32 %v6398_v28, %v11930_v17  ;;  %v6490_v8 = vsel %vm6489_vm4, %v8463_v44, %v6486_v26  ;;  %v6493_v47 = vmul.f32 %v8465_v10, %v6492_v62 }
 0xc09   :  { %v6430_v5 = vpop.xlane.xlu0 %6429  ;;  %v6561_v54 = vmul.f32 %v6490_v8, %v6465_v9 }
 0xc0a   :  { %v6451_v11 = vmul.f32 %v11532_v40, %v11532_v40  ;;  %v6443_v56 = vmul.f32 %v6430_v5, %v11930_v17  ;;  %v6494_v39 = vmul.f32 0.5, %v6493_v47  ;;  %v6467_v45 = vsub.f32 %v11485_v35, %v11532_v40 }
 0xc0b   :  { %v6572_v19 = vmul.f32 %v11538_v15, %v6561_v54 }
 0xc0c   :  { %v6459_v7 = vsub.f32 %v6443_v56, %v6451_v11  ;;  %v6495_v60 = vsub.f32 1.5, %v6494_v39 }
 0xc0d   :  { %v11554_v2 = vadd.f32 %v11546_v50, %v6572_v19  ;;  %v8105_v19 = vld [vmem:[%s11722_s18] sm:$0xff] }
 0xc0e   :  { %v6475_v30 = vadd.f32 1e-05, %v6459_v7  ;;  %v6496_v41 = vmul.f32 %v8465_v10, %v6495_v60  ;;  %6742 = vmatpush.bf16.msrb.mxu1 %v8105_v19 }
 0xc0f   :  { %v6400_v31 = vpop.xlane.xlu2 %6399  ;;  %v6599_v48 = vmul.f32 0.044715, %v11554_v2 }
 0xc10   :  { %8466 = vrsqrt.f32 %v6475_v30  ;;  %v11544_v22 = vmul.f32 %v6400_v31, %v11930_v17  ;;  %v6500_v34 = vsel %vm6499_vm7, %v8465_v10, %v6496_v41  ;;  %vm6507_vm9 = vweird.f32 %v6475_v30 }
 0xc11   :  { %v6432_v37 = vpop.xlane.xlu1 %6431  ;;  %v6562_v18 = vmul.f32 %v6500_v34, %v6466_v27  ;;  %v6607_v55 = vmul.f32 %v6599_v48, %v11554_v2 }
 0xc12   :  { %v6452_v53 = vmul.f32 %v11544_v22, %v11544_v22  ;;  %v6444_v4 = vmul.f32 %v6432_v37, %v11930_v17  ;;  %v6468_v60 = vsub.f32 %v11490_v32, %v11544_v22 }
 0xc13   :  { %v6573_v33 = vmul.f32 %v11538_v15, %v6562_v18  ;;  %v6615_v36 = vmul.f32 %v6607_v55, %v11554_v2 }
 0xc14   :  { %v6460_v46 = vsub.f32 %v6444_v4, %v6452_v53 }
 0xc15   :  { %v11569_v61 = vadd.f32 %v11546_v50, %v6573_v33  ;;  %v6623_v5 = vadd.f32 %v6615_v36, %v11554_v2 }
 0xc16   :  { %v8467_v6 = vpop.eup %8466  ;;  %v6476_v12 = vadd.f32 1e-05, %v6460_v46 }
 0xc17   :  { %v6502_v1 = vmul.f32 %v8467_v6, %v6475_v30  ;;  %vm6508_vm8 = vweird.f32 %v8467_v6  ;;  %v6600_v35 = vmul.f32 0.044715, %v11569_v61  ;;  %v6631_v47 = vmul.f32 0.7978846, %v6623_v5 }
 0xc18   :  { %8468 = vrsqrt.f32 %v6476_v12  ;;  %vm6509_vm10 = vmor %vm6507_vm9, %vm6508_vm8  ;;  %vm6517_vm12 = vweird.f32 %v6476_v12 }
 0xc19   :  { %v6503_v49 = vmul.f32 %v8467_v6, %v6502_v1  ;;  %v6608_v7 = vmul.f32 %v6600_v35, %v11569_v61 }
 0xc1b   :  { %v6504_v51 = vmul.f32 0.5, %v6503_v49  ;;  %v6616_v3 = vmul.f32 %v6608_v7, %v11569_v61 }
 0xc1d   :  { %v6505_v59 = vsub.f32 1.5, %v6504_v51  ;;  %v6624_v41 = vadd.f32 %v6616_v3, %v11569_v61 }
 0xc1e   :  { %v6402_v14 = vpop.xlane.xlu2 %6401  ;;  %v8469_v13 = vpop.eup %8468 }
 0xc1f   :  { %v11560_v0 = vmul.f32 %v6402_v14, %v11930_v17  ;;  %v6506_v44 = vmul.f32 %v8467_v6, %v6505_v59  ;;  %v6512_v43 = vmul.f32 %v8469_v13, %v6476_v12  ;;  %vm6518_vm11 = vweird.f32 %v8469_v13 }
 0xc20   :  { %v6434_v42 = vpop.xlane.xlu1 %6433  ;;  %vm6519_vm13 = vmor %vm6517_vm12, %vm6518_vm11  ;;  %v6632_v1 = vmul.f32 0.7978846, %v6624_v41 }
 0xc21   :  { %v6453_v57 = vmul.f32 %v11560_v0, %v11560_v0  ;;  %v6445_v58 = vmul.f32 %v6434_v42, %v11930_v17  ;;  %v6510_v28 = vsel %vm6509_vm10, %v8467_v6, %v6506_v44  ;;  %v6513_v38 = vmul.f32 %v8469_v13, %v6512_v43 }
 0xc22   :  { %v6563_v10 = vmul.f32 %v6510_v28, %v6467_v45  ;;  %v6469_v44 = vsub.f32 %v11498_v16, %v11560_v0  ;;  %v6591_v45 = vmul.f32 0.5, %v11554_v2 }
 0xc23   :  { %v6461_v24 = vsub.f32 %v6445_v58, %v6453_v57  ;;  %v6514_v40 = vmul.f32 0.5, %v6513_v38 }
 0xc24   :  { %v6574_v62 = vmul.f32 %v11538_v15, %v6563_v10 }
 0xc25   :  { %v11572_v21 = vadd.f32 1e-05, %v6461_v24  ;;  %v6515_v8 = vsub.f32 1.5, %v6514_v40  ;;  %v6592_v40 = vmul.f32 0.5, %v11569_v61 }
 0xc26   :  { %v6404_v23 = vpop.xlane.xlu0 %6403  ;;  %v11591_v54 = vadd.f32 %v11546_v50, %v6574_v62 }
 0xc27   :  { %8470 = vrsqrt.f32 %v11572_v21  ;;  %v11582_v11 = vmul.f32 %v6404_v23, %v11930_v17  ;;  %v6516_v31 = vmul.f32 %v8469_v13, %v6515_v8  ;;  %vm6527_vm15 = vweird.f32 %v11572_v21 }
 0xc28   :  { %v6436_v56 = vpop.xlane.xlu2 %6435  ;;  %8472 = vtanh.f32 %v6631_v47  ;;  %v6601_v34 = vmul.f32 0.044715, %v11591_v54 }
 0xc29   :  { %v6446_v26 = vmul.f32 %v6436_v56, %v11930_v17  ;;  %v6454_v9 = vmul.f32 %v11582_v11, %v11582_v11  ;;  %v6520_v27 = vsel %vm6519_vm13, %v8469_v13, %v6516_v31  ;;  %v6470_v41 = vsub.f32 %v11503_v52, %v11582_v11 }
 0xc2a   :  { %v6564_v6 = vmul.f32 %v6520_v27, %v6468_v60  ;;  %v6609_v49 = vmul.f32 %v6601_v34, %v11591_v54 }
 0xc2b   :  { %v6462_v30 = vsub.f32 %v6446_v26, %v6454_v9 }
 0xc2c   :  { %v6575_v20 = vmul.f32 %v11538_v15, %v6564_v6  ;;  %v6617_v51 = vmul.f32 %v6609_v49, %v11591_v54 }
 0xc2d   :  { %v8471_v39 = vpop.eup %8470  ;;  %v11600_v53 = vadd.f32 1e-05, %v6462_v30 }
 0xc2e   :  { %v6522_v37 = vmul.f32 %v8471_v39, %v11572_v21  ;;  %v6406_v4 = vpop.xlane.xlu0 %6405  ;;  %v11614_v33 = vadd.f32 %v11546_v50, %v6575_v20  ;;  %vm6528_vm14 = vweird.f32 %v8471_v39  ;;  %v8473_v57 = vpop.eup %8472  ;;  %v6625_v36 = vadd.f32 %v6617_v51, %v11591_v54 }
 0xc2f   :  { %v11604_v46 = vmul.f32 %v6406_v4, %v11930_v17  ;;  %8474 = vrsqrt.f32 %v11600_v53  ;;  %vm6529_vm0 = vmor %vm6527_vm15, %vm6528_vm14  ;;  %v6647_v28 = vadd.f32 1.0, %v8473_v57  ;;  %vm6537_vm2 = vweird.f32 %v11600_v53 }
 0xc30   :  { %v6523_v18 = vmul.f32 %v8471_v39, %v6522_v37  ;;  %v6438_v32 = vpop.xlane.xlu2 %6437  ;;  %8476 = vtanh.f32 %v6632_v1  ;;  %v6602_v13 = vmul.f32 0.044715, %v11614_v33  ;;  %v6633_v0 = vmul.f32 0.7978846, %v6625_v36 }
 0xc31   :  { %v6455_v22 = vmul.f32 %v11604_v46, %v11604_v46  ;;  %v6447_v12 = vmul.f32 %v6438_v32, %v11930_v17  ;;  %v6655_v8 = vmul.f32 %v6647_v28, %v6591_v45  ;;  %v6593_v57 = vmul.f32 0.5, %v11591_v54 }
 0xc32   :  { %v6524_v14 = vmul.f32 0.5, %v6523_v18  ;;  %v6610_v38 = vmul.f32 %v6602_v13, %v11614_v33 }
 0xc33   :  { %v6463_v48 = vsub.f32 %v6447_v12, %v6455_v22 }
 0xc34   :  { %v6525_v42 = vsub.f32 1.5, %v6524_v14  ;;  %v6618_v26 = vmul.f32 %v6610_v38, %v11614_v33 }
 0xc35   :  { %v11617_v58 = vadd.f32 1e-05, %v6463_v48  ;;  %v8475_v55 = vpop.eup %8474 }
 0xc36   :  { %v6526_v59 = vmul.f32 %v8471_v39, %v6525_v42  ;;  %v6408_v24 = vpop.xlane.xlu1 %6407  ;;  %v6532_v43 = vmul.f32 %v8475_v55, %v11600_v53  ;;  %v8477_v5 = vpop.eup %8476  ;;  %v6626_v30 = vadd.f32 %v6618_v26, %v11614_v33  ;;  %vm6538_vm1 = vweird.f32 %v8475_v55 }
 0xc37   :  { %8478 = vrsqrt.f32 %v11617_v58  ;;  %v11628_v25 = vmul.f32 %v6408_v24, %v11930_v17  ;;  %v6648_v2 = vadd.f32 1.0, %v8477_v5  ;;  %vm6539_vm3 = vmor %vm6537_vm2, %vm6538_vm1  ;;  %vm6547_vm5 = vweird.f32 %v11617_v58 }
 0xc38   :  { %v6530_v23 = vsel %vm6529_vm0, %v8471_v39, %v6526_v59  ;;  %v6440_v21 = vpop.xlane.xlu0 %6439  ;;  %v6533_v56 = vmul.f32 %v8475_v55, %v6532_v43  ;;  %8480 = vtanh.f32 %v6633_v0  ;;  %v6634_v37 = vmul.f32 0.7978846, %v6626_v30 }
 0xc39   :  { %v6565_v10 = vmul.f32 %v6530_v23, %v6469_v44  ;;  %v6448_v16 = vmul.f32 %v6440_v21, %v11930_v17  ;;  %v6456_v35 = vmul.f32 %v11628_v25, %v11628_v25  ;;  %v6656_v47 = vmul.f32 %v6648_v2, %v6592_v40 }
 0xc3a   :  { %v6534_v9 = vmul.f32 0.5, %v6533_v56  ;;  %v6471_v42 = vsub.f32 %v11508_v63, %v11604_v46  ;;  %v6594_v59 = vmul.f32 0.5, %v11614_v33  ;;  %v6472_v56 = vsub.f32 %v11513_v29, %v11628_v25 }
 0xc3b   :  { %v6576_v62 = vmul.f32 %v11538_v15, %v6565_v10  ;;  %v6464_v7 = vsub.f32 %v6448_v16, %v6456_v35  ;;  %v6663_v19 = vpack.c.bf16 %v6656_v47, %v6655_v8 }
 0xc3c   :  { %v6535_v39 = vsub.f32 1.5, %v6534_v9 }
 0xc3d   :  { %v8479_v3 = vpop.eup %8478  ;;  %v11639_v17 = vadd.f32 %v11546_v50, %v6576_v62  ;;  %v6480_v31 = vadd.f32 1e-05, %v6464_v7  ;;  %6743 = vmatmul.bf16.vlgmr.msrb.gmra.mxu1 %v6663_v19 }
 0xc3e   :  { %v6542_v61 = vmul.f32 %v8479_v3, %v11617_v58  ;;  %v6536_v60 = vmul.f32 %v8475_v55, %v6535_v39  ;;  %v8481_v22 = vpop.eup %8480  ;;  %vm6548_vm4 = vweird.f32 %v8479_v3 }
 0xc3f   :  { %v6603_v4 = vmul.f32 0.044715, %v11639_v17  ;;  %8482 = vrsqrt.f32 %v6480_v31  ;;  %v6649_v14 = vadd.f32 1.0, %v8481_v22  ;;  %vm6549_vm6 = vmor %vm6547_vm5, %vm6548_vm4  ;;  %vm6557_vm8 = vweird.f32 %v6480_v31 }
 0xc40   :  { %v6543_v27 = vmul.f32 %v8479_v3, %v6542_v61  ;;  %v6540_v34 = vsel %vm6539_vm3, %v8475_v55, %v6536_v60  ;;  %8484 = vtanh.f32 %v6634_v37 }
 0xc41   :  { %v6611_v6 = vmul.f32 %v6603_v4, %v11639_v17  ;;  %v6566_v18 = vmul.f32 %v6540_v34, %v6470_v41  ;;  %v6657_v44 = vmul.f32 %v6649_v14, %v6593_v57 }
 0xc42   :  { %v6544_v32 = vmul.f32 0.5, %v6543_v27 }
 0xc43   :  { %v6619_v12 = vmul.f32 %v6611_v6, %v11639_v17  ;;  %v6577_v53 = vmul.f32 %v11538_v15, %v6566_v18 }
 0xc44   :  { %v6545_v1 = vsub.f32 1.5, %v6544_v32 }
 0xc45   :  { %v8483_v52 = vpop.eup %8482  ;;  %v6588_v11 = vadd.f32 %v11546_v50, %v6577_v53  ;;  %v6627_v49 = vadd.f32 %v6619_v12, %v11639_v17  ;;  %v8171_v12 = vld [vmem:[%s11723_s19] ss:$0 sm:$0xff]  ;;  %s8960_s19 = smov [#allocation28]  }
 0xc46   :  { %v6546_v20 = vmul.f32 %v8479_v3, %v6545_v1  ;;  %v8485_v48 = vpop.eup %8484  ;;  %v6552_v51 = vmul.f32 %v8483_v52, %v6480_v31  ;;  %vm6558_vm7 = vweird.f32 %v8483_v52  ;;  %s6896_s17 = sshll.u32 %s8960_s19, 4  ;;  %s6897_s17 = int_to_ptr.vmem [resolvable:$true] %s6896_s17 }
 0xc47   :  { %v6650_v24 = vadd.f32 1.0, %v8485_v48  ;;  %v6604_v58 = vmul.f32 0.044715, %v6588_v11  ;;  %v6635_v23 = vmul.f32 0.7978846, %v6627_v49  ;;  %vm6559_vm9 = vmor %vm6557_vm8, %vm6558_vm7  ;;  %v6596_v29 = vmul.f32 0.5, %v6588_v11 }
 0xc48   :  { %v6550_v55 = vsel %vm6549_vm6, %v8479_v3, %v6546_v20  ;;  %v6553_v36 = vmul.f32 %v8483_v52, %v6552_v51  ;;  %v6595_v3 = vmul.f32 0.5, %v11639_v17 }
 0xc49   :  { %v6567_v13 = vmul.f32 %v6550_v55, %v6471_v42  ;;  %v6658_v43 = vmul.f32 %v6650_v24, %v6594_v59  ;;  %v6612_v45 = vmul.f32 %v6604_v58, %v6588_v11  ;;  %8486 = vtanh.f32 %v6635_v23 }
 0xc4a   :  { %v6554_v28 = vmul.f32 0.5, %v6553_v36 }
 0xc4b   :  { %v6578_v21 = vmul.f32 %v11538_v15, %v6567_v13  ;;  %v6664_v38 = vpack.c.bf16 %v6658_v43, %v6657_v44  ;;  %v6620_v63 = vmul.f32 %v6612_v45, %v6588_v11 }
 0xc4c   :  { %v6555_v5 = vsub.f32 1.5, %v6554_v28 }
 0xc4d   :  { %v6589_v46 = vadd.f32 %v11546_v50, %v6578_v21  ;;  %v6628_v54 = vadd.f32 %v6620_v63, %v6588_v11  ;;  %6748 = vmatmul.bf16.gmra.mxu1 %v6664_v38 }
 0xc4e   :  { %v6556_v33 = vmul.f32 %v8483_v52, %v6555_v5 }
 0xc4f   :  { %v6605_v10 = vmul.f32 0.044715, %v6589_v46  ;;  %v6636_v16 = vmul.f32 0.7978846, %v6628_v54  ;;  %v8487_v26 = vpop.eup %8486  ;;  %v6597_v34 = vmul.f32 0.5, %v6589_v46 }
 0xc50   :  { %v6560_v0 = vsel %vm6559_vm9, %v8483_v52, %v6556_v33  ;;  %v6651_v8 = vadd.f32 1.0, %v8487_v26 }
 0xc51   :  { %v6613_v35 = vmul.f32 %v6605_v10, %v6589_v46  ;;  %v6568_v40 = vmul.f32 %v6560_v0, %v6472_v56  ;;  %8488 = vtanh.f32 %v6636_v16 }
 0xc52   :  { %v6659_v31 = vmul.f32 %v6651_v8, %v6595_v3 }
 0xc53   :  { %v6621_v2 = vmul.f32 %v6613_v35, %v6589_v46  ;;  %v6579_v62 = vmul.f32 %v11538_v15, %v6568_v40 }
 0xc55   :  { %v6590_v9 = vadd.f32 %v11546_v50, %v6579_v62  ;;  %v6629_v7 = vadd.f32 %v6621_v2, %v6589_v46 }
 0xc57   :  { %v8489_v47 = vpop.eup %8488  ;;  %v6606_v30 = vmul.f32 0.044715, %v6590_v9  ;;  %v6637_v61 = vmul.f32 0.7978846, %v6629_v7  ;;  %v6598_v6 = vmul.f32 0.5, %v6590_v9 }
 0xc58   :  { %v6652_v25 = vadd.f32 1.0, %v8489_v47 }
 0xc59   :  { %v6614_v39 = vmul.f32 %v6606_v30, %v6590_v9  ;;  %8490 = vtanh.f32 %v6637_v61 }
 0xc5a   :  { %v6660_v19 = vmul.f32 %v6652_v25, %v6596_v29 }
 0xc5b   :  { %v6622_v60 = vmul.f32 %v6614_v39, %v6590_v9 }
 0xc5c   :  { %v6665_v37 = vpack.c.bf16 %v6660_v19, %v6659_v31 }
 0xc5d   :  { %v6630_v4 = vadd.f32 %v6622_v60, %v6590_v9 }
 0xc5e   :  { %6753 = vmatmul.bf16.gmra.mxu1 %v6665_v37 }
 0xc5f   :  { %v6638_v15 = vmul.f32 0.7978846, %v6630_v4  ;;  %v8491_v50 = vpop.eup %8490 }
 0xc60   :  { %v6653_v41 = vadd.f32 1.0, %v8491_v50 }
 0xc61   :  { %8492 = vtanh.f32 %v6638_v15 }
 0xc62   :  { %v6661_v17 = vmul.f32 %v6653_v41, %v6597_v34 }
 0xc67   :  { %v8493_v27 = vpop.eup %8492 }
 0xc68   :  { %v6654_v18 = vadd.f32 1.0, %v8493_v27 }
 0xc6a   :  { %v6662_v32 = vmul.f32 %v6654_v18, %v6598_v6 }
 0xc6c   :  { %v6666_v22 = vpack.c.bf16 %v6662_v32, %v6661_v17 }
 0xc6e   :  { %6758 = vmatmul.bf16.gmra.mxu1 %v6666_v22 }
 0xcba   :  { %v6744_v53 = vpop.f32.mrf.mxu1 }
 0xcbb   :  { %v6745_v1 = vadd.f32 %v8171_v12, %v6744_v53 }
 0xcbd   :  { %v6764_v52 = vmul.f32 %v6745_v1, %v6745_v1 }
 0xcbf   :  { %6772 = vadd.xlane.f32.xlu1 %v6764_v52 }
 0xcc2   :  { %v6746_v11 = vpop.f32.mrf.mxu1 }
 0xcc3   :  { %v11666_v20 = vadd.f32 %v8171_v12, %v6746_v11 }
 0xcc5   :  { %v6765_v14 = vmul.f32 %v11666_v20, %v11666_v20 }
 0xcc7   :  { %6774 = vadd.xlane.f32.xlu2 %v6765_v14 }
 0xcca   :  { %v6749_v49 = vpop.f32.mrf.mxu1 }
 0xccb   :  { %v11670_v48 = vadd.f32 %v8171_v12, %v6749_v49 }
 0xccd   :  { %v6766_v42 = vmul.f32 %v11670_v48, %v11670_v48 }
 0xccf   :  { %6776 = vadd.xlane.f32.xlu0 %v6766_v42 }
 0xcd2   :  { %v6751_v51 = vpop.f32.mrf.mxu1 }
 0xcd3   :  { %v11674_v57 = vadd.f32 %v8171_v12, %v6751_v51 }
 0xcd5   :  { %v6767_v55 = vmul.f32 %v11674_v57, %v11674_v57 }
 0xcd7   :  { %6778 = vadd.xlane.f32.xlu1 %v6767_v55 }
 0xcdb   :  { %v6754_v59 = vpop.f32.mrf.mxu1 }
 0xcdc   :  { %v11678_v24 = vadd.f32 %v8171_v12, %v6754_v59 }
 0xcde   :  { %v6768_v58 = vmul.f32 %v11678_v24, %v11678_v24 }
 0xce0   :  { %6780 = vadd.xlane.f32.xlu2 %v6768_v58 }
 0xce3   :  { %v6756_v13 = vpop.f32.mrf.mxu1 }
 0xce4   :  { %v11682_v36 = vadd.f32 %v8171_v12, %v6756_v13 }
 0xce6   :  { %v6769_v44 = vmul.f32 %v11682_v36, %v11682_v36 }
 0xce8   :  { %6782 = vadd.xlane.f32.xlu0 %v6769_v44 }
 0xceb   :  { %v6759_v43 = vpop.f32.mrf.mxu1 }
 0xcec   :  { %v11686_v45 = vadd.f32 %v8171_v12, %v6759_v43 }
 0xcee   :  { %v6770_v23 = vmul.f32 %v11686_v45, %v11686_v45 }
 0xcf0   :  { %6784 = vadd.xlane.f32.xlu1 %v6770_v23 }
 0xcf3   :  { %v6761_v21 = vpop.f32.mrf.mxu1 }
 0xcf4   :  { %v11690_v28 = vadd.f32 %v8171_v12, %v6761_v21 }
 0xcf6   :  { %v6771_v38 = vmul.f32 %v11690_v28, %v11690_v28 }
 0xcf8   :  { %6786 = vadd.xlane.f32.xlu2 %v6771_v38 }
 0xd32   :  { %v6773_v63 = vpop.xlane.xlu1 %6772 }
 0xd33   :  { %v6788_v46 = vmax.f32 %v6773_v63, 1e-24 }
 0xd35   :  { %8494 = vrsqrt.f32 %v6788_v46  ;;  %vm6802_vm11 = vweird.f32 %v6788_v46 }
 0xd3a   :  { %v6775_v5 = vpop.xlane.xlu2 %6774 }
 0xd3b   :  { %v8495_v54 = vpop.eup %8494  ;;  %v6789_v33 = vmax.f32 %v6775_v5, 1e-24 }
 0xd3c   :  { %v6797_v10 = vmul.f32 %v8495_v54, %v6788_v46  ;;  %vm6803_vm10 = vweird.f32 %v8495_v54 }
 0xd3d   :  { %8496 = vrsqrt.f32 %v6789_v33  ;;  %vm6804_vm12 = vmor %vm6802_vm11, %vm6803_vm10  ;;  %vm6812_vm14 = vweird.f32 %v6789_v33 }
 0xd3e   :  { %v6798_v56 = vmul.f32 %v8495_v54, %v6797_v10 }
 0xd40   :  { %v6799_v16 = vmul.f32 0.5, %v6798_v56 }
 0xd42   :  { %v6800_v0 = vsub.f32 1.5, %v6799_v16  ;;  %v6777_v35 = vpop.xlane.xlu0 %6776 }
 0xd43   :  { %v8497_v40 = vpop.eup %8496  ;;  %v6790_v2 = vmax.f32 %v6777_v35, 1e-24 }
 0xd44   :  { %v6801_v26 = vmul.f32 %v8495_v54, %v6800_v0  ;;  %v6807_v62 = vmul.f32 %v8497_v40, %v6789_v33  ;;  %vm6813_vm13 = vweird.f32 %v8497_v40 }
 0xd45   :  { %8498 = vrsqrt.f32 %v6790_v2  ;;  %vm6814_vm15 = vmor %vm6812_vm14, %vm6813_vm13  ;;  %vm6822_vm1 = vweird.f32 %v6790_v2 }
 0xd46   :  { %v6805_v9 = vsel %vm6804_vm12, %v8495_v54, %v6801_v26  ;;  %v6808_v7 = vmul.f32 %v8497_v40, %v6807_v62 }
 0xd47   :  { %v6876_v8 = vmul.f32 %v6805_v9, %v6745_v1 }
 0xd48   :  { %v6809_v47 = vmul.f32 0.5, %v6808_v7 }
 0xd49   :  { %6884 = vst [vmem:[#allocation28] sm:$0xff] %v6876_v8 }
 0xd4a   :  { %v6810_v30 = vsub.f32 1.5, %v6809_v47  ;;  %v6779_v3 = vpop.xlane.xlu1 %6778 }
 0xd4b   :  { %v8499_v29 = vpop.eup %8498  ;;  %v6791_v25 = vmax.f32 %v6779_v3, 1e-24 }
 0xd4c   :  { %v6811_v39 = vmul.f32 %v8497_v40, %v6810_v30  ;;  %v6817_v61 = vmul.f32 %v8499_v29, %v6790_v2  ;;  %vm6823_vm0 = vweird.f32 %v8499_v29 }
 0xd4d   :  { %8500 = vrsqrt.f32 %v6791_v25  ;;  %vm6824_vm2 = vmor %vm6822_vm1, %vm6823_vm0  ;;  %vm6832_vm4 = vweird.f32 %v6791_v25 }
 0xd4e   :  { %v6815_v31 = vsel %vm6814_vm15, %v8497_v40, %v6811_v39  ;;  %v6818_v19 = vmul.f32 %v8499_v29, %v6817_v61 }
 0xd4f   :  { %v6877_v60 = vmul.f32 %v6815_v31, %v11666_v20 }
 0xd50   :  { %v6819_v37 = vmul.f32 0.5, %v6818_v19 }
 0xd51   :  { %6885 = vst [vmem:[#allocation28 + $0x8] sm:$0xff] %v6877_v60 }
 0xd52   :  { %v6820_v4 = vsub.f32 1.5, %v6819_v37 }
 0xd53   :  { %v6781_v15 = vpop.xlane.xlu2 %6780  ;;  %v8501_v50 = vpop.eup %8500 }
 0xd54   :  { %v6792_v41 = vmax.f32 %v6781_v15, 1e-24  ;;  %v6821_v27 = vmul.f32 %v8499_v29, %v6820_v4  ;;  %v6827_v34 = vmul.f32 %v8501_v50, %v6791_v25  ;;  %vm6833_vm3 = vweird.f32 %v8501_v50 }
 0xd55   :  { %vm6834_vm5 = vmor %vm6832_vm4, %vm6833_vm3 }
 0xd56   :  { %8502 = vrsqrt.f32 %v6792_v41  ;;  %v6825_v6 = vsel %vm6824_vm2, %v8499_v29, %v6821_v27  ;;  %v6828_v18 = vmul.f32 %v8501_v50, %v6827_v34  ;;  %vm6842_vm7 = vweird.f32 %v6792_v41 }
 0xd57   :  { %v6878_v17 = vmul.f32 %v6825_v6, %v11670_v48 }
 0xd58   :  { %v6829_v32 = vmul.f32 0.5, %v6828_v18 }
 0xd59   :  { %6886 = vst [vmem:[#allocation28 + $0x10] sm:$0xff] %v6878_v17 }
 0xd5a   :  { %v6830_v22 = vsub.f32 1.5, %v6829_v32 }
 0xd5b   :  { %v6783_v12 = vpop.xlane.xlu0 %6782 }
 0xd5c   :  { %v8503_v53 = vpop.eup %8502  ;;  %v6793_v1 = vmax.f32 %v6783_v12, 1e-24  ;;  %v6831_v52 = vmul.f32 %v8501_v50, %v6830_v22 }
 0xd5d   :  { %v6837_v11 = vmul.f32 %v8503_v53, %v6792_v41  ;;  %vm6843_vm6 = vweird.f32 %v8503_v53 }
 0xd5e   :  { %8504 = vrsqrt.f32 %v6793_v1  ;;  %v6835_v20 = vsel %vm6834_vm5, %v8501_v50, %v6831_v52  ;;  %vm6844_vm8 = vmor %vm6842_vm7, %vm6843_vm6  ;;  %vm6852_vm10 = vweird.f32 %v6793_v1 }
 0xd5f   :  { %v6838_v14 = vmul.f32 %v8503_v53, %v6837_v11  ;;  %v6879_v49 = vmul.f32 %v6835_v20, %v11674_v57 }
 0xd61   :  { %v6839_v42 = vmul.f32 0.5, %v6838_v14  ;;  %6887 = vst [vmem:[#allocation28 + $0x18] sm:$0xff] %v6879_v49 }
 0xd63   :  { %v6840_v51 = vsub.f32 1.5, %v6839_v42  ;;  %v6785_v48 = vpop.xlane.xlu1 %6784 }
 0xd64   :  { %v8505_v55 = vpop.eup %8504  ;;  %v6794_v59 = vmax.f32 %v6785_v48, 1e-24 }
 0xd65   :  { %v6841_v58 = vmul.f32 %v8503_v53, %v6840_v51  ;;  %v6847_v13 = vmul.f32 %v8505_v55, %v6793_v1  ;;  %vm6853_vm9 = vweird.f32 %v8505_v55 }
 0xd66   :  { %8506 = vrsqrt.f32 %v6794_v59  ;;  %vm6854_vm11 = vmor %vm6852_vm10, %vm6853_vm9  ;;  %vm6862_vm13 = vweird.f32 %v6794_v59 }
 0xd67   :  { %v6845_v44 = vsel %vm6844_vm8, %v8503_v53, %v6841_v58  ;;  %v6848_v43 = vmul.f32 %v8505_v55, %v6847_v13 }
 0xd68   :  { %v6880_v23 = vmul.f32 %v6845_v44, %v11678_v24 }
 0xd69   :  { %v6849_v21 = vmul.f32 0.5, %v6848_v43 }
 0xd6a   :  { %6888 = vst [vmem:[#allocation28 + $0x20] sm:$0xff] %v6880_v23 }
 0xd6b   :  { %v6850_v38 = vsub.f32 1.5, %v6849_v21  ;;  %v6787_v57 = vpop.xlane.xlu2 %6786 }
 0xd6c   :  { %v8507_v63 = vpop.eup %8506  ;;  %v6795_v46 = vmax.f32 %v6787_v57, 1e-24 }
 0xd6d   :  { %v6851_v5 = vmul.f32 %v8505_v55, %v6850_v38  ;;  %v6857_v54 = vmul.f32 %v8507_v63, %v6794_v59  ;;  %vm6863_vm12 = vweird.f32 %v8507_v63 }
 0xd6e   :  { %8508 = vrsqrt.f32 %v6795_v46  ;;  %vm6864_vm14 = vmor %vm6862_vm13, %vm6863_vm12  ;;  %vm6872_vm0 = vweird.f32 %v6795_v46 }
 0xd6f   :  { %v6855_v33 = vsel %vm6854_vm11, %v8505_v55, %v6851_v5  ;;  %v6858_v10 = vmul.f32 %v8507_v63, %v6857_v54 }
 0xd70   :  { %v6881_v56 = vmul.f32 %v6855_v33, %v11682_v36 }
 0xd71   :  { %v6859_v16 = vmul.f32 0.5, %v6858_v10 }
 0xd72   :  { %6889 = vst [vmem:[#allocation28 + $0x28] sm:$0xff] %v6881_v56 }
 0xd73   :  { %v6860_v0 = vsub.f32 1.5, %v6859_v16 }
 0xd74   :  { %v8509_v24 = vpop.eup %8508 }
 0xd75   :  { %v6861_v35 = vmul.f32 %v8507_v63, %v6860_v0  ;;  %v6867_v40 = vmul.f32 %v8509_v24, %v6795_v46  ;;  %vm6873_vm15 = vweird.f32 %v8509_v24 }
 0xd76   :  { %vm6874_vm1 = vmor %vm6872_vm0, %vm6873_vm15 }
 0xd77   :  { %v6865_v2 = vsel %vm6864_vm14, %v8507_v63, %v6861_v35  ;;  %v6868_v26 = vmul.f32 %v8509_v24, %v6867_v40 }
 0xd78   :  { %v6882_v62 = vmul.f32 %v6865_v2, %v11686_v45 }
 0xd79   :  { %v6869_v9 = vmul.f32 0.5, %v6868_v26 }
 0xd7a   :  { %6890 = vst [vmem:[#allocation28 + $0x30] sm:$0xff] %v6882_v62 }
 0xd7b   :  { %v6870_v7 = vsub.f32 1.5, %v6869_v9 }
 0xd7d   :  { %v6871_v36 = vmul.f32 %v8509_v24, %v6870_v7 }
 0xd7f   :  { %v6875_v8 = vsel %vm6874_vm1, %v8509_v24, %v6871_v36 }
 0xd80   :  { %v6883_v47 = vmul.f32 %v6875_v8, %v11690_v28 }
 0xd82   :  { %6891 = vst [vmem:[#allocation28 + $0x38] sm:$0xff] %v6883_v47 }
 0xd83   :  { %6904 = dma.vmem_to_hbm [thread:$0]  %s6897_s17, 1024, %s6899_s22, [#allocation4], %s8961_s5, %s8961_s5, %s8962_s15  }
 0xd84   :  { %8936 = dma.done.wait [#allocation4], 1024  }
 0xd85   :  { %8937 = vsyncadd [#allocation4], 4294966272 }
 0xd86   :  { %6909 = vsyncpa [#allocation3], 1 }
 0xd87   :  { %6910 = vsyncpa [#allocation6], 1 }
 0xd88   :  { %6911 = vsyncpa [#allocation9], 1 }
 0xd89   :  { %6912 = vsyncpa [#allocation12], 1 }
 0xd8a   :  { %6913 = vsyncpa [#allocation15], 1 }
 0xd8b   :  { %6914 = vsyncpa [#allocation18], 1 }
 0xd8c   :  { %6915 = vsyncpa [#allocation21], 1 }
 0xd8d   :  { %6916 = vsyncpa [#allocation24], 1 }
 0xd8e   :  { %6917 = vsyncpa [#allocation27], 1 }
 0xd8f   :  { %6918 = vsyncpa [#allocation4], 1 }

</bundles_post_ra>
